<compile_context>
chip_gen: v5e
topology: v5e:2x2
jax: 0.10.0
libtpu: 0.0.40
codegen_flags: <defaults>
</compile_context>

<pallas_src>
import functools
import math

import jax
import jax.numpy as jnp
from jax.experimental import pallas as pl
from jax.experimental.pallas import tpu as pltpu


def _round_up(n, m):
    return ((n + m - 1) // m) * m


_RESIDENT_W_BYTES = 8 * 1024 * 1024      # keep W fully resident below this
_VMEM_TILE_BUDGET = 40 * 1024 * 1024     # conservative vs. v7x's 64 MiB/core


# --------------------------------------------------------------------------- #
# Kernel
# --------------------------------------------------------------------------- #
def sine_layer_kernel(x_ref, w_ref, b_ref, o_ref, *, omega_0, compute_dtype):
    # x_ref: (tm, K)   input dtype (f32) — cast on-chip, hides under DMA/MXU
    # w_ref: (K, tn)   compute dtype (bf16 by default)
    # b_ref: (1, tn)   f32
    # o_ref: (tm, tn)  output dtype
    x = x_ref[...].astype(compute_dtype)
    z = jnp.dot(x, w_ref[...], preferred_element_type=jnp.float32)
    z = z + b_ref[...]
    o_ref[...] = jnp.sin(jnp.float32(omega_0) * z).astype(o_ref.dtype)


# --------------------------------------------------------------------------- #
# Single-buffering (pl.Buffered(1)) support probe — cached, falls back cleanly.
# --------------------------------------------------------------------------- #
_SINGLE_BUFFER_OK = None


def _single_buffer_supported():
    """Does this backend accept pipeline_mode=pl.Buffered(1) on a constant-index
    block?  Probed once eagerly so the decision is made outside any jit trace."""
    global _SINGLE_BUFFER_OK
    if _SINGLE_BUFFER_OK is None:
        try:
            def _k(a_ref, c_ref, o_ref):
                o_ref[...] = a_ref[...] + c_ref[...]

            f = pl.pallas_call(
                _k,
                out_shape=jax.ShapeDtypeStruct((32, 128), jnp.float32),
                grid=(2,),
                in_specs=[
                    pl.BlockSpec((16, 128), lambda i: (i, 0)),
                    pl.BlockSpec((16, 128), lambda i: (0, 0),
                                 pipeline_mode=pl.Buffered(1)),
                ],
                out_specs=pl.BlockSpec((16, 128), lambda i: (i, 0)),
            )
            jax.block_until_ready(
                f(jnp.ones((32, 128), jnp.float32),
                  jnp.ones((16, 128), jnp.float32)))
            _SINGLE_BUFFER_OK = True
        except Exception:
            _SINGLE_BUFFER_OK = False
    return _SINGLE_BUFFER_OK


# --------------------------------------------------------------------------- #
# Tiling helpers
# --------------------------------------------------------------------------- #
def _pick_row_tile(n_rows, tm_max):
    tm_max = max(16, min(int(tm_max), 1024))
    if n_rows <= tm_max:
        # single row tile (bf16 sublane packing -> multiples of 16)
        return max(16, _round_up(n_rows, 16))
    best_t, best_cost = 16, None
    for t in (1024, 512, 256, 128, 64, 32, 16):
        if t > tm_max:
            continue
        pad = (-n_rows) % t
        steps = (n_rows + pad) // t
        # wasted padded/ragged rows + ~0.35us/grid-step overhead (~tens of rows of HBM)
        cost = pad + 48 * steps
        if best_cost is None or cost < best_cost:
            best_t, best_cost = t, cost
    # v7x has 2 TensorCores: keep >= 4 row tiles when the problem allows so the
    # "parallel" axis shards with some slack.
    while best_t > 64 and pl.cdiv(n_rows, best_t) < 4:
        best_t //= 2
    return best_t


# --------------------------------------------------------------------------- #
# Forward
# --------------------------------------------------------------------------- #
@functools.partial(
    jax.jit,
    static_argnames=("omega_0", "tm", "tn", "compute_dtype", "out_dtype",
                     "single_buffer_w"))
def _sine_layer_forward(x, w, b, *, omega_0, tm, tn, compute_dtype, out_dtype,
                        single_buffer_w):
    orig_dtype = x.dtype
    out_dtype = orig_dtype if out_dtype is None else out_dtype
    in_feat = x.shape[-1]
    out_feat = w.shape[1]
    lead = x.shape[:-1]

    xf = x.reshape(-1, in_feat)          # no pad, no cast — streamed as-is
    n_rows = xf.shape[0]

    # ---- weight / bias: small; pad lane dim to 128 & cast once in the wrapper
    out_pad = _round_up(out_feat, 128)
    wp, bp = w, b
    if out_pad != out_feat:
        wp = jnp.pad(wp, ((0, 0), (0, out_pad - out_feat)))
        bp = jnp.pad(bp, (0, out_pad - out_feat))
    wp = wp.astype(compute_dtype)
    bp = bp.reshape(1, out_pad).astype(jnp.float32)

    # ---- tile selection -----------------------------------------------------
    tm_eff = _pick_row_tile(n_rows, tm)
    c_bytes = jnp.dtype(compute_dtype).itemsize
    x_bytes = jnp.dtype(orig_dtype).itemsize
    o_bytes = jnp.dtype(out_dtype).itemsize

    w_total = in_feat * out_pad * c_bytes
    resident_w = w_total <= _RESIDENT_W_BYTES
    if resident_w:
        tn_eff = out_pad                                   # single N tile, constant index
    else:
        tn_eff = min(_round_up(min(int(tn), out_pad), 128), out_pad)

    use_single_buffer = resident_w and single_buffer_w
    w_bufs = 1 if use_single_buffer else 2

    def footprint(tm_):
        return (2 * tm_ * in_feat * x_bytes                # x tile (double-buffered)
                + w_bufs * in_feat * tn_eff * c_bytes      # weight tile(s)
                + w_bufs * tn_eff * 4                      # bias tile(s)
                + 2 * tm_ * tn_eff * o_bytes)              # out tile (double-buffered)

    while tm_eff > 16 and footprint(tm_eff) > _VMEM_TILE_BUDGET:
        tm_eff = max(16, tm_eff // 2)

    # footprint-derived limit (>= 32 MiB), never the whole physical VMEM of a core
    vmem_limit = int(min(100 * 1024 * 1024,
                         max(32 * 1024 * 1024, (footprint(tm_eff) * 3) // 2)))

    # ---- grid / specs -------------------------------------------------------
    n_i = pl.cdiv(n_rows, tm_eff)
    w_pipe = {"pipeline_mode": pl.Buffered(1)} if use_single_buffer else {}

    if resident_w:
        grid = (n_i,)
        x_spec = pl.BlockSpec((tm_eff, in_feat), lambda i: (i, 0))
        w_spec = pl.BlockSpec((in_feat, tn_eff), lambda i: (0, 0), **w_pipe)
        b_spec = pl.BlockSpec((1, tn_eff), lambda i: (0, 0), **w_pipe)
        o_spec = pl.BlockSpec((tm_eff, tn_eff), lambda i: (i, 0))
        dims = ("parallel",)
    else:
        n_j = pl.cdiv(out_feat, tn_eff)
        x_total = n_rows * in_feat * x_bytes
        if w_total <= x_total:
            # re-stream the cheaper operand (W): N tiles innermost, x tile reused
            grid = (n_i, n_j)
            x_spec = pl.BlockSpec((tm_eff, in_feat), lambda i, j: (i, 0))
            w_spec = pl.BlockSpec((in_feat, tn_eff), lambda i, j: (0, j))
            b_spec = pl.BlockSpec((1, tn_eff), lambda i, j: (0, j))
            o_spec = pl.BlockSpec((tm_eff, tn_eff), lambda i, j: (i, j))
        else:
            # re-stream the cheaper operand (x): row tiles innermost, W tile reused
            grid = (n_j, n_i)
            x_spec = pl.BlockSpec((tm_eff, in_feat), lambda j, i: (i, 0))
            w_spec = pl.BlockSpec((in_feat, tn_eff), lambda j, i: (0, j))
            b_spec = pl.BlockSpec((1, tn_eff), lambda j, i: (0, j))
            o_spec = pl.BlockSpec((tm_eff, tn_eff), lambda j, i: (i, j))
        dims = ("parallel", "parallel")

    out = pl.pallas_call(
        functools.partial(sine_layer_kernel, omega_0=float(omega_0),
                          compute_dtype=compute_dtype),
        out_shape=jax.ShapeDtypeStruct((n_rows, out_feat), out_dtype),
        grid=grid,
        in_specs=[x_spec, w_spec, b_spec],
        out_specs=o_spec,
        compiler_params=pltpu.CompilerParams(
            dimension_semantics=dims,
            vmem_limit_bytes=vmem_limit,
        ),
    )(xf, wp, bp)

    return out.reshape(*lead, out_feat)


def sine_layer_forward(x, w, b, *, omega_0=30.0, tm=512, tn=512,
                       compute_dtype=jnp.bfloat16, out_dtype=None):
    """SIREN SineLayer: sin(omega_0 * (x @ w + b)).

    x: (..., in_feat); w: (in_feat, out_feat) (transposed vs. torch); b: (out_feat,).
    compute_dtype: MXU feed dtype (bf16 default; jnp.float32 for max accuracy).
    out_dtype:     output dtype (None -> x.dtype; bf16 halves write-back in stacks).
    """
    return _sine_layer_forward(
        x, w, b, omega_0=float(omega_0), tm=int(tm), tn=int(tn),
        compute_dtype=compute_dtype, out_dtype=out_dtype,
        single_buffer_w=_single_buffer_supported())


def init_sine_layer_params(key, in_features, out_features, *, is_first=False,
                           omega_0=30.0):
    """Mirrors SineLayer.init_weights (+ torch.nn.Linear default bias init)."""
    kw, kb = jax.random.split(key)
    if is_first:
        w_bound = 1.0 / in_features
    else:
        w_bound = math.sqrt(6.0 / in_features) / omega_0
    b_bound = 1.0 / math.sqrt(in_features)
    # stored transposed relative to torch: (in, out) so the kernel does x @ W
    w = jax.random.uniform(kw, (in_features, out_features), jnp.float32,
                           -w_bound, w_bound)
    b = jax.random.uniform(kb, (out_features,), jnp.float32, -b_bound, b_bound)
    return w, b


if __name__ == "__main__":
    key = jax.random.PRNGKey(0)
    kx, kp = jax.random.split(key)

    batch, n_points, in_feat, out_feat = 2, 512, 64, 128
    omega_0 = 30.0
    x = jax.random.normal(kx, (batch, n_points, in_feat), jnp.float32)
    w, b = init_sine_layer_params(kp, in_feat, out_feat, is_first=False,
                                  omega_0=omega_0)

    out = sine_layer_forward(x, w, b, omega_0=omega_0)
    out = jax.block_until_ready(out)
    assert out.shape == (batch, n_points, out_feat)
    assert out.dtype == x.dtype

    # reference with the same bf16-feed / f32-accumulate matmul contract
    z_ref = jnp.dot(x.reshape(-1, in_feat).astype(jnp.bfloat16),
                    w.astype(jnp.bfloat16),
                    preferred_element_type=jnp.float32) + b
    ref = jnp.sin(omega_0 * z_ref).reshape(batch, n_points, out_feat)
    assert jnp.allclose(out, ref, atol=2e-3), float(jnp.max(jnp.abs(out - ref)))

    # looser sanity vs. full-f32 reference (bf16 MXU feed, phase scaled by omega_0)
    ref_f32 = jnp.sin(omega_0 * (x @ w + b))
    assert jnp.allclose(out, ref_f32, atol=8e-2), float(jnp.max(jnp.abs(out - ref_f32)))

    print("KERNEL_OK")
</pallas_src>

<mosaic_0001>
module attributes {stable_mosaic.version = 11 : i64} {
  func.func @_k(%arg0: i32, %arg1: memref<16x128xf32, #tpu.memory_space<vmem>>, %arg2: memref<16x128xf32, #tpu.memory_space<vmem>>, %arg3: memref<16x128xf32, #tpu.memory_space<vmem>>) attributes {dimension_semantics = [#tpu.dimension_semantics<arbitrary>], iteration_bounds = array<i64: 2>, scalar_prefetch = 0 : i64, scratch_operands = 0 : i64, tpu.core_type = #tpu.core_type<tc>, window_params = [{transform_indices = @transform_0, window_bounds = array<i64: 16, 128>}, {pipeline_mode = #tpu.pipeline_mode<synchronous>, transform_indices = @transform_1, window_bounds = array<i64: 16, 128>}, {transform_indices = @transform_2, window_bounds = array<i64: 16, 128>}]} {
    %c0 = arith.constant 0 : index
    %c0_0 = arith.constant 0 : index
    %0 = vector.load %arg1[%c0, %c0_0] : memref<16x128xf32, #tpu.memory_space<vmem>>, vector<16x128xf32>
    %c0_1 = arith.constant 0 : index
    %c0_2 = arith.constant 0 : index
    %1 = vector.load %arg2[%c0_1, %c0_2] : memref<16x128xf32, #tpu.memory_space<vmem>>, vector<16x128xf32>
    %2 = arith.addf %0, %1 : vector<16x128xf32>
    %c0_3 = arith.constant 0 : index
    %c0_4 = arith.constant 0 : index
    %3 = vector.load %arg3[%c0_3, %c0_4] : memref<16x128xf32, #tpu.memory_space<vmem>>, vector<16x128xf32>
    tpu.vector_store %arg3[%c0_3, %c0_4], %2 {strides = array<i32>} : memref<16x128xf32, #tpu.memory_space<vmem>>, vector<16x128xf32>,
    return
  }
  func.func @transform_0(%arg0: i32) -> (i32, i32) {
    %c0_i32 = arith.constant 0 : i32
    %c0_i32_0 = arith.constant 0 : i32
    return %arg0, %c0_i32 : i32, i32
  }
  func.func @transform_1(%arg0: i32) -> (i32, i32) {
    %c0_i32 = arith.constant 0 : i32
    %c0_i32_0 = arith.constant 0 : i32
    %c0_i32_1 = arith.constant 0 : i32
    return %c0_i32, %c0_i32_0 : i32, i32
  }
  func.func @transform_2(%arg0: i32) -> (i32, i32) {
    %c0_i32 = arith.constant 0 : i32
    %c0_i32_0 = arith.constant 0 : i32
    return %arg0, %c0_i32 : i32, i32
  }
}

module attributes {stable_mosaic.version = 11 : i64} {
  func.func @sine_layer_kernel(%arg0: i32, %arg1: memref<256x64xf32, #tpu.memory_space<vmem>>, %arg2: memref<64x128xbf16, #tpu.memory_space<vmem>>, %arg3: memref<1x128xf32, #tpu.memory_space<vmem>>, %arg4: memref<256x128xf32, #tpu.memory_space<vmem>>) attributes {dimension_semantics = [#tpu.dimension_semantics<parallel>], iteration_bounds = array<i64: 4>, scalar_prefetch = 0 : i64, scratch_operands = 0 : i64, tpu.core_type = #tpu.core_type<tc>, window_params = [{transform_indices = @transform_0, window_bounds = array<i64: 256, 64>}, {pipeline_mode = #tpu.pipeline_mode<synchronous>, transform_indices = @transform_1, window_bounds = array<i64: 64, 128>}, {pipeline_mode = #tpu.pipeline_mode<synchronous>, transform_indices = @transform_2, window_bounds = array<i64: 1, 128>}, {transform_indices = @transform_3, window_bounds = array<i64: 256, 128>}]} {
    %c0 = arith.constant 0 : index
    %c0_0 = arith.constant 0 : index
    %0 = vector.load %arg1[%c0, %c0_0] : memref<256x64xf32, #tpu.memory_space<vmem>>, vector<256x64xf32>
    %1 = arith.truncf %0 : vector<256x64xf32> to vector<256x64xbf16>
    %c0_1 = arith.constant 0 : index
    %c0_2 = arith.constant 0 : index
    %2 = vector.load %arg2[%c0_1, %c0_2] : memref<64x128xbf16, #tpu.memory_space<vmem>>, vector<64x128xbf16>
    %cst = arith.constant dense<0.000000e+00> : vector<256x128xf32>
    %3 = tpu.matmul %1, %2, %cst {dimension_numbers = #tpu.dot_dimension_numbers<[1], [0], [0], [1], [0, 0, 1, 1], [], []>} : vector<256x64xbf16>, vector<64x128xbf16>, vector<256x128xf32> -> vector<256x128xf32>
    %c0_3 = arith.constant 0 : index
    %c0_4 = arith.constant 0 : index
    %4 = vector.load %arg3[%c0_3, %c0_4] : memref<1x128xf32, #tpu.memory_space<vmem>>, vector<1x128xf32>
    %5 = vector.broadcast %4 : vector<1x128xf32> to vector<256x128xf32>
    %6 = arith.addf %3, %5 : vector<256x128xf32>
    %cst_5 = arith.constant 3.000000e+01 : f32
    %7 = vector.broadcast %cst_5 : f32 to vector<256x128xf32>
    %8 = arith.mulf %7, %6 : vector<256x128xf32>
    %9 = math.sin %8 : vector<256x128xf32>
    %c0_6 = arith.constant 0 : index
    %c0_7 = arith.constant 0 : index
    %10 = vector.load %arg4[%c0_6, %c0_7] : memref<256x128xf32, #tpu.memory_space<vmem>>, vector<256x128xf32>
    tpu.vector_store %arg4[%c0_6, %c0_7], %9 {strides = array<i32>} : memref<256x128xf32, #tpu.memory_space<vmem>>, vector<256x128xf32>,
    return
  }
  func.func @transform_0(%arg0: i32) -> (i32, i32) {
    %c0_i32 = arith.constant 0 : i32
    %c0_i32_0 = arith.constant 0 : i32
    return %arg0, %c0_i32 : i32, i32
  }
  func.func @transform_1(%arg0: i32) -> (i32, i32) {
    %c0_i32 = arith.constant 0 : i32
    %c0_i32_0 = arith.constant 0 : i32
    %c0_i32_1 = arith.constant 0 : i32
    return %c0_i32, %c0_i32_0 : i32, i32
  }
  func.func @transform_2(%arg0: i32) -> (i32, i32) {
    %c0_i32 = arith.constant 0 : i32
    %c0_i32_0 = arith.constant 0 : i32
    %c0_i32_1 = arith.constant 0 : i32
    return %c0_i32, %c0_i32_0 : i32, i32
  }
  func.func @transform_3(%arg0: i32) -> (i32, i32) {
    %c0_i32 = arith.constant 0 : i32
    %c0_i32_0 = arith.constant 0 : i32
    return %arg0, %c0_i32 : i32, i32
  }
}

</mosaic_0001>

<bundles_post_ra>
// kernel: tpu_custom_call.1
= control target key start
LH: loop header
LB: loop body
LE: loop exit
PB: predicated region body
PF: predicated region fallthrough
CT: control target
= control target key end

     0   :  { %7 = vsyncpa [#allocation3], 0  ;;  %s665_s0 = inlined_call_operand.hbm [shape: f32[32,128], index: 0, kind: input, shape index: {}]   ;;  %s666_s1 = inlined_call_operand.hbm [shape: f32[16,128], index: 1, kind: input, shape index: {}]   ;;  %s667_s2 = inlined_call_operand.hbm [shape: f32[32,128], index: 2, kind: output, shape index: {}]  }
   0x1   :  { %9 = vsyncpa [#allocation3 + $0x1], 0 }
   0x2   :  { %10 = vsyncpa [#allocation6], 0 }
   0x3   :  { %11 = vsyncpa [#allocation4], 0 }
   0x4   :  { %13 = vsyncpa [#allocation4 + $0x1], 0  ;;  %s521_s9 = smov 0   ;;  %s523_s10 = smov 0  }
   0x5   :  { %s525_s11 = smov 0   ;;  %s527_s12 = smov 0  }
   0x6 LB: > { %s542_s13 = sadd.s32 4294967295, %s499_s12   ;;  %s290_s14 = sadd.s32 4294967294, %s499_s12   ;;  %s499_s12 = sphi %s527_s12, %s677_s12   ;;  %s495_s11 = sphi %s525_s11, %s676_s11   ;;  %s491_s10 = sphi %s523_s10, %s675_s10   ;;  %s487_s9 = sphi %s521_s9, %s674_s9  }
   0x7   : > { %p39_p0 = scmp.ne.s32.totalorder %s491_s10, %s487_s9  ;;  %p40_p1 = scmp.eq.s32.totalorder %s542_s13, 0 }
   0x8   : > { %p84_p2 = scmp.eq.s32.totalorder %s542_s13, 1  ;;  %p90_p3 = scmp.eq.s32.totalorder %s290_s14, 1 }
   0x9   : > { %p551_p4 = por %p40_p1, %p39_p0  ;;  %p291_p5 = scmp.ge.s32.totalorder %s499_s12, 1 }
   0xa   : > { %p556_p6 = por %p90_p3, %p39_p0  ;;  %p97_p7 = scmp.lt.s32.totalorder %s499_s12, 3 }
   0xb   : > { %s108_s19 = sshll.u32 %s666_s1, 4  ;;  %s501_s21 = smov [#allocation5]   ;;  %s109_s19 = int_to_ptr.hbm [resolvable:$true] %s108_s19 }
   0xc   : > { %p564_p8 = pnand %p291_p5, %p97_p7  ;;  %s110_s22 = sshll.u32 %s501_s21, 4  ;;  %s111_s22 = int_to_ptr.vmem [resolvable:$true] %s110_s22 }
   0xd   : > { %s574_s23 = sadd.s32 1, %s499_s12   ;;  %s502_s24 = smov 128  }
   0xe   : > { %p316_p9 = pneg %p564_p8  ;;  %s503_s25 = smov 8  }
   0xf   : > { %s23_s26 = ssub.s32 %s499_s12, %s574_s23  ;;  %s26_s27 = sadd.s32 1, %s495_s11 }
  0x10   : > { %p317_p10 = pnand %p316_p9, %p40_p1  ;;  %p24_p12 = scmp.eq.s32.totalorder %s23_s26, 0 }
  0x11   : > { %p33_p13 = scmp.ne.s32.totalorder %s495_s11, %s491_s10  ;;  %p34_p0 = scmp.eq.s32.totalorder %s499_s12, 0 }
  0x12   : > { %319 = dma.hbm_to_vmem [thread:$0]  (!%p317_p10), %s109_s19, 256, %s111_s22, [#allocation6], %s502_s24, %s502_s24, %s503_s25  }
  0x13   : > { %s586_s28 = scalar_select %p24_p12, %s495_s11, %s26_s27  }
  0x14   : > { %p590_p3 = por %p84_p2, %p33_p13  ;;  %p329_p5 = scmp.lt.s32.totalorder %s499_s12, 2 }
  0x15   : > { %s124_s30 = sand.u32 1, %s495_s11   ;;  %s306_s3 = sshll.u32 %s499_s12, 4 }
  0x16   : > { %p35_p7 = por %p34_p0, %p33_p13  ;;  %s294_s4 = sshll.u32 %s124_s30, 4 }
  0x17   : > { %s133_s7 = scalar_lea.hbm %s665_s0, %s306_s3  ;;  %s128_s14 = scalar_lea.vmem [#allocation2], %s294_s4 }
  0x18   : > { %s134_s8 = sshll.u32 %s133_s7, 4  ;;  %s136_s17 = sshll.u32 %s128_s14, 4  ;;  %s135_s8 = int_to_ptr.hbm [resolvable:$true] %s134_s8  ;;  %s137_s17 = int_to_ptr.vmem [resolvable:$true] %s136_s17 }
  0x19   : > { %p600_p9 = pnand %p329_p5, %p35_p7  ;;  %s125_s19 = scalar_lea.sflag [#allocation3], %s124_s30 }
  0x1a   : > { %s399_s21 = sshra.s32 %s135_s8, 4  ;;  %s406_s3 = scalar_lea.hbm %s665_s0, 32  ;;  %s400_s21 = int_to_ptr.hbm [resolvable:$true] %s399_s21 }
  0x1b   : > { %s401_s22 = scalar_lea.hbm %s400_s21, 16  ;;  %p403_p10 = pneg %p600_p9 }
  0x1c   : > { %p402_p2 = scmp.ne.s32.totalorder %s400_s21, %s401_s22  ;;  %p407_p0 = scmp.lt.s32.totalorder %s400_s21, %s665_s0 }
  0x1d   : > { %p408_p5 = scmp.lt.s32.totalorder %s406_s3, %s401_s22 }
  0x1e   : > { %p404_p12 = pnand %p403_p10, %p402_p2 }
  0x1f   : > { %p409_p7 = por %p408_p5, %p407_p0 }
  0x20   : > { %p405_p13 = pneg %p404_p12 }
  0x22   : > { %p410_p11 = pnand %p409_p7, %p405_p13 }
  0x24   : > { %413 = shalt.err (!%p410_p11)
}
  0x25   : > { %323 = dma.hbm_to_vmem [thread:$0]  (!%p600_p9), %s135_s8, 256, %s137_s17, %s125_s19, %s502_s24, %s502_s24, %s503_s25  }
  0x26   : > { %148 = sbr.rel (%p564_p8) target bundleno = 62 (0x3e), region = 28  ;;  %s620_s30 = sand.u32 (!%p564_p8), 1, %s491_s10  }
  0x27   : > { %s298_s6 = sshll.u32 (!%p564_p8), %s620_s30, 4  ;;  %s151_s7 = scalar_lea.sflag (!%p564_p8), [#allocation3], %s620_s30 }
  0x28   : > { %s154_s14 = scalar_lea.vmem (!%p564_p8), [#allocation2], %s298_s6 }
  0x2b   : > { %474 = dma.done.wait (%p551_p4), %s151_s7, 256  }
  0x2c   : > { %476 = vsyncadd (%p551_p4), %s151_s7, 4294967040 }
  0x2d   : > { %478 = dma.done.wait (%p40_p1), [#allocation6], 256  }
  0x2e   : > { %480 = vsyncadd (%p40_p1), [#allocation6], 4294967040  ;;  %s307_s20 = sshll.u32 %s542_s13, 4  ;;  %s180_s17 = scalar_lea.vmem [#allocation7], %s298_s6  ;;  %v183_v0 = vld [vmem:[%s154_s14] sm:$0xff]  ;;  %v184_v2 = vld [vmem:[%s154_s14 + $0x8] sm:$0xff] }
  0x2f   : > { %s203_s8 = scalar_lea.hbm %s667_s2, %s307_s20  ;;  %s204_s18 = sshll.u32 %s180_s17, 4  ;;  %v185_v1 = vld [vmem:[#allocation5] sm:$0xff]  ;;  %v186_v4 = vld [vmem:[#allocation5 + $0x8] sm:$0xff]  ;;  %s205_s18 = int_to_ptr.vmem [resolvable:$true] %s204_s18 }
  0x30   : > { %s206_s19 = sshll.u32 %s203_s8, 4  ;;  %v187_v3 = vadd.f32 %v185_v1, %v183_v0  ;;  %v188_v5 = vadd.f32 %v186_v4, %v184_v2  ;;  %s192_s15 = scalar_lea.sflag [#allocation4], %s620_s30  ;;  %s207_s19 = int_to_ptr.hbm [resolvable:$true] %s206_s19 }
  0x31   : > { %s443_s13 = sshra.s32 %s207_s19, 4  ;;  %s449_s27 = scalar_lea.hbm %s667_s2, 32  ;;  %s444_s13 = int_to_ptr.hbm [resolvable:$true] %s443_s13 }
  0x32   : > { %189 = vst [vmem:[%s180_s17] sm:$0xff] %v187_v3  ;;  %s445_s21 = scalar_lea.hbm %s444_s13, 16  ;;  %p450_p11 = scmp.lt.s32.totalorder %s444_s13, %s667_s2 }
  0x33   : > { %190 = vst [vmem:[%s180_s17 + $0x8] sm:$0xff] %v188_v5  ;;  %p446_p1 = scmp.ne.s32.totalorder %s444_s13, %s445_s21  ;;  %p451_p9 = scmp.lt.s32.totalorder %s449_s27, %s445_s21 }
  0x35   : > { %p447_p4 = pnand %p446_p1, %p590_p3  ;;  %p452_p2 = por %p451_p9, %p450_p11 }
  0x37   : > { %p448_p8 = pneg %p447_p4 }
  0x39   : > { %p453_p10 = pnand %p452_p2, %p448_p8 }
  0x3b   : > { %456 = shalt.err (!%p453_p10)
}
  0x3c   : > { %s504_s5 = smov 128   ;;  %s505_s30 = smov 8  }
  0x3d   : > { %314 = dma.vmem_to_hbm [thread:$0]  (%p590_p3), %s205_s18, 256, %s207_s19, %s192_s15, %s504_s5, %s504_s5, %s505_s30  }
  0x3e PF: > { %s221_s6 = sand.u32 1, %s487_s9   ;;  %p673_p12 = scmp.ge.s32.totalorder %s499_s12, 2 }
  0x3f   : > { %s222_s7 = scalar_lea.sflag [#allocation4], %s221_s6 }
  0x40   : > { %p325_p13 = pnand %p673_p12, %p556_p6 }
  0x42   : > { %p326_p0 = pneg %p325_p13 }
  0x44   : > { %482 = dma.done.wait (%p326_p0), %s222_s7, 256  }
  0x45   : > { %484 = vsyncadd (%p326_p0), %s222_s7, 4294967040  ;;  %p16_p5 = scmp.ge.s32.totalorder %s574_s23, 4   ;;  %s674_s9 = smov %s491_s10 }
  0x46   : > { %s675_s10 = smov %s495_s11  ;;  %s676_s11 = smov %s586_s28 }
  0x47   : > { %s677_s12 = smov %s574_s23  ;;  %18 = sbr.rel (!%p16_p5) target bundleno = 6 (0x6), region = 77 }
  0x4c   :  { %228 = vsyncpa [#allocation3], 1 }
  0x4d   :  { %230 = vsyncpa [#allocation3 + $0x1], 1 }
  0x4e   :  { %231 = vsyncpa [#allocation6], 1 }
  0x4f   :  { %232 = vsyncpa [#allocation4], 1 }
  0x50   :  { %234 = vsyncpa [#allocation4 + $0x1], 1 }

// kernel: _sine_layer_forward.1
= control target key start
LH: loop header
LB: loop body
LE: loop exit
PB: predicated region body
PF: predicated region fallthrough
CT: control target
= control target key end

     0   :  { %8 = vsyncpa [#allocation3], 0  ;;  %s9380_s0 = inlined_call_operand.vmem [shape: f32[1024,64], index: 0, kind: input, shape index: {}]   ;;  %s9381_s1 = inlined_call_operand.vmem [shape: bf16[64,128], index: 1, kind: input, shape index: {}]   ;;  %s9382_s2 = inlined_call_operand.vmem [shape: f32[1,128], index: 2, kind: input, shape index: {}]   ;;  %s9383_s3 = inlined_call_operand.hbm [shape: f32[1024,128], index: 3, kind: output, shape index: {}]  }
   0x1   :  { %10 = vsyncpa [#allocation3 + $0x1], 0  ;;  %s5803_s12 = smov 0   ;;  %s5805_s13 = smov 0  }
   0x2   :  { %s5807_s14 = smov 0   ;;  %s5809_s15 = smov 0  }
   0x3 LB: > { %s5824_s16 = sadd.s32 4294967295, %s5772_s15   ;;  %s5497_s17 = sadd.s32 4294967294, %s5772_s15   ;;  %s5772_s15 = sphi %s5809_s15, %s9451_s15   ;;  %s5768_s14 = sphi %s5807_s14, %s9450_s14   ;;  %s5764_s13 = sphi %s5805_s13, %s9449_s13   ;;  %s5760_s12 = sphi %s5803_s12, %s9448_s12  }
   0x4   : > { %s5828_s18 = sadd.s32 1, %s5772_s15   ;;  %s91_s19 = sadd.s32 1, %s5768_s14 }
   0x5   : > { %s88_s20 = ssub.s32 %s5772_s15, %s5828_s18  ;;  %p101_p0 = scmp.ne.s32.totalorder %s5768_s14, %s5764_s13 }
   0x6   : > { %p89_p1 = scmp.eq.s32.totalorder %s88_s20, 0  ;;  %p102_p2 = scmp.eq.s32.totalorder %s5824_s16, 3 }
   0x7   : > { %p107_p3 = scmp.ne.s32.totalorder %s5764_s13, %s5760_s12  ;;  %p108_p4 = scmp.eq.s32.totalorder %s5497_s17, 3 }
   0x8   : > { %s5839_s21 = scalar_select %p89_p1, %s5768_s14, %s91_s19  }
   0x9   : > { %p5841_p5 = por %p102_p2, %p101_p0  ;;  %p5845_p6 = por %p108_p4, %p107_p3 }
   0xa   : > { %p5500_p7 = scmp.ge.s32.totalorder %s5772_s15, 1  ;;  %p141_p8 = scmp.lt.s32.totalorder %s5772_s15, 5 }
   0xc   : > { %p142_p9 = pnand %p5500_p7, %p141_p8 }
   0xd   : > { %s5502_s24 = sshll.u32 (!%p142_p9), %s5824_s16, 5  ;;  %s162_s17 = sand.u32 (!%p142_p9), 1, %s5764_s13  }
   0xe   : > { %145 = sbr.rel (%p142_p9) target bundleno = 1418 (0x58a), region = 32  ;;  %p166_p10 = scmp.lt.s32.totalorder (!%p142_p9), %s5502_s24, 127 }
   0xf   : > { %s5501_s19 = sshll.u32 (!%p142_p9), %s162_s17, 8  ;;  %s5641_s11 = sshll.u32 (!%p142_p9), %s5824_s16, 8 }
  0x10   : > { %s6179_s20 = scalar_lea.vmem (!%p142_p9), [#allocation2], %s5501_s19  ;;  %s5431_s25 = scalar_lea.hbm (!%p142_p9), %s9383_s3, %s5641_s11 }
  0x11   : > { %s5432_s26 = sshll.u32 (!%p142_p9), %s6179_s20, 4  ;;  %s5434_s27 = sshll.u32 (!%p142_p9), %s5431_s25, 4  ;;  %s5433_s26 = int_to_ptr.vmem [resolvable:$true] %s5432_s26  ;;  %s5435_s27 = int_to_ptr.hbm [resolvable:$true] %s5434_s27 }
  0x12   : > { %s5420_s16 = scalar_lea.sflag (!%p142_p9), [#allocation3], %s162_s17  ;;  %s5724_s28 = sshra.s32 (!%p142_p9), %s5435_s27, 4  ;;  %s5725_s28 = int_to_ptr.hbm [resolvable:$true] %s5724_s28 }
  0x13   : > { %v5640_v0 = vld [vmem:[%s9381_s1 + $0x18] sm:$0xff]  ;;  %s9453_s24 = smov (!%p166_p10, %s5502_s24), 127  ;;  %v5639_v1 = vld [vmem:[%s9381_s1 + $0x10] sm:$0xff]  ;;  %v5638_v2 = vld [vmem:[%s9381_s1 + $0x8] sm:$0xff]  ;;  %vm257_vm0 = vcmask 523264   ;;  %p5731_p0 = scmp.lt.s32.totalorder %s5725_s28, %s9383_s3 }
  0x14   : > { %310 = vmatpush.bf16.msra.mxu0 %v5640_v0  ;;  %5642 = vmatpush.bf16.msra.mxu1 %v5640_v0  ;;  %s5503_s29 = sshll.u32 %s9453_s24, 3  ;;  %v5637_v4 = vld [vmem:[%s9381_s1] sm:$0xff] }
  0x15   : > { %5643 = vmatpush.bf16.msra.mxu2 %v5640_v0  ;;  %5644 = vmatpush.bf16.msra.mxu3 %v5640_v0  ;;  %s5861_s5 = scalar_lea.vmem %s9380_s0, %s5503_s29  ;;  %v5920_v52 = vld [vmem:[%s9382_s2] ss:$0 sm:$0xff]  ;;  %s5726_s29 = scalar_lea.hbm %s5725_s28, 256 }
  0x16   : > { %v173_v3 = vld [vmem:[%s5861_s5] sm:$0xff]  ;;  %v174_v5 = vld [vmem:[%s5861_s5 + $0x8] sm:$0xff]  ;;  %v175_v16 = vld [vmem:[%s5861_s5 + $0x10] sm:$0xff]  ;;  %p5727_p11 = scmp.ne.s32.totalorder %s5725_s28, %s5726_s29 }
  0x17   : > { %v181_v6 = vld [vmem:[%s5861_s5 + $0x40] sm:$0xff]  ;;  %v182_v7 = vld [vmem:[%s5861_s5 + $0x48] sm:$0xff]  ;;  %v205_v10 = vpack.c.bf16 %v174_v5, %v173_v3  ;;  %v176_v17 = vld [vmem:[%s5861_s5 + $0x18] sm:$0xff] }
  0x18   : > { %311 = vmatpush.bf16.msra.mxu0 %v5639_v1  ;;  %5645 = vmatpush.bf16.msra.mxu1 %v5639_v1  ;;  %v189_v8 = vld [vmem:[%s5861_s5 + $0x80] sm:$0xff]  ;;  %v190_v9 = vld [vmem:[%s5861_s5 + $0x88] sm:$0xff]  ;;  %v209_v11 = vpack.c.bf16 %v182_v7, %v181_v6  ;;  %v183_v18 = vld [vmem:[%s5861_s5 + $0x50] sm:$0xff]  ;;  %v206_v24 = vpack.c.bf16 %v176_v17, %v175_v16  ;;  %v5775_v7 = vmov 2475754826   ;;  %p5728_p12 = pnand %p5727_p11, %p5841_p5 }
  0x19   : > { %5646 = vmatpush.bf16.msra.mxu2 %v5639_v1  ;;  %5647 = vmatpush.bf16.msra.mxu3 %v5639_v1  ;;  %v197_v12 = vld [vmem:[%s5861_s5 + $0xc0] sm:$0xff]  ;;  %v198_v13 = vld [vmem:[%s5861_s5 + $0xc8] sm:$0xff]  ;;  %v213_v14 = vpack.c.bf16 %v190_v9, %v189_v8  ;;  %v184_v19 = vld [vmem:[%s5861_s5 + $0x58] sm:$0xff]  ;;  %v5776_v9 = vmov 2131351028  }
  0x1a   : > { %v217_v15 = vpack.c.bf16 %v198_v13, %v197_v12  ;;  %v191_v20 = vld [vmem:[%s5861_s5 + $0x90] sm:$0xff]  ;;  %v192_v21 = vld [vmem:[%s5861_s5 + $0x98] sm:$0xff]  ;;  %v210_v25 = vpack.c.bf16 %v184_v19, %v183_v18  ;;  %v177_v28 = vld [vmem:[%s5861_s5 + $0x20] sm:$0xff]  ;;  %v5778_v17 = vmov 920167782   ;;  %p5729_p13 = pneg %p5728_p12 }
  0x1b   : > { %v199_v22 = vld [vmem:[%s5861_s5 + $0xd0] sm:$0xff]  ;;  %v200_v23 = vld [vmem:[%s5861_s5 + $0xd8] sm:$0xff]  ;;  %v214_v26 = vpack.c.bf16 %v192_v21, %v191_v20  ;;  %v178_v29 = vld [vmem:[%s5861_s5 + $0x28] sm:$0xff]  ;;  %v5779_v21 = vmov 1326507024  }
  0x1c   : > { %312 = vmatpush.bf16.msra.mxu0 %v5638_v2  ;;  %5648 = vmatpush.bf16.msra.mxu1 %v5638_v2  ;;  %v218_v27 = vpack.c.bf16 %v200_v23, %v199_v22  ;;  %v185_v30 = vld [vmem:[%s5861_s5 + $0x60] sm:$0xff]  ;;  %v186_v31 = vld [vmem:[%s5861_s5 + $0x68] sm:$0xff]  ;;  %v207_v36 = vpack.c.bf16 %v178_v29, %v177_v28  ;;  %v179_v40 = vld [vmem:[%s5861_s5 + $0x30] sm:$0xff] }
  0x1d   : > { %5649 = vmatpush.bf16.msra.mxu2 %v5638_v2  ;;  %5650 = vmatpush.bf16.msra.mxu3 %v5638_v2  ;;  %v193_v32 = vld [vmem:[%s5861_s5 + $0xa0] sm:$0xff]  ;;  %v194_v33 = vld [vmem:[%s5861_s5 + $0xa8] sm:$0xff]  ;;  %v211_v37 = vpack.c.bf16 %v186_v31, %v185_v30  ;;  %v180_v41 = vld [vmem:[%s5861_s5 + $0x38] sm:$0xff] }
  0x1e   : > { %v201_v34 = vld [vmem:[%s5861_s5 + $0xe0] sm:$0xff]  ;;  %v202_v35 = vld [vmem:[%s5861_s5 + $0xe8] sm:$0xff]  ;;  %v215_v38 = vpack.c.bf16 %v194_v33, %v193_v32  ;;  %v187_v42 = vld [vmem:[%s5861_s5 + $0x70] sm:$0xff]  ;;  %v208_v48 = vpack.c.bf16 %v180_v41, %v179_v40 }
  0x1f   : > { %v219_v39 = vpack.c.bf16 %v202_v35, %v201_v34  ;;  %v188_v43 = vld [vmem:[%s5861_s5 + $0x78] sm:$0xff]  ;;  %v195_v44 = vld [vmem:[%s5861_s5 + $0xb0] sm:$0xff] }
  0x20   : > { %313 = vmatpush.bf16.msra.mxu0 %v5637_v4  ;;  %5651 = vmatpush.bf16.msra.mxu1 %v5637_v4  ;;  %v196_v45 = vld [vmem:[%s5861_s5 + $0xb8] sm:$0xff]  ;;  %v203_v46 = vld [vmem:[%s5861_s5 + $0xf0] sm:$0xff]  ;;  %v212_v49 = vpack.c.bf16 %v188_v43, %v187_v42 }
  0x21   : > { %5652 = vmatpush.bf16.msra.mxu2 %v5637_v4  ;;  %5653 = vmatpush.bf16.msra.mxu3 %v5637_v4  ;;  %v204_v47 = vld [vmem:[%s5861_s5 + $0xf8] sm:$0xff]  ;;  %v216_v50 = vpack.c.bf16 %v196_v45, %v195_v44  ;;  %v5774_v4 = vmov 683565275   ;;  %s5730_s5 = scalar_lea.hbm %s9383_s3, 1024 }
  0x22   : > { %v220_v51 = vpack.c.bf16 %v204_v47, %v203_v46  ;;  %p5732_p1 = scmp.lt.s32.totalorder %s5730_s5, %s5726_s29 }
  0x23   : > { %5520 = vmatmul.msk.bf16.vlgmr.msra.gmra.mxu0 %vm257_vm0, %v205_v10  ;;  %5524 = vmatmul.msk.bf16.vlgmr.msra.gmra.mxu1 %vm257_vm0, %v209_v11 }
  0x24   : > { %5528 = vmatmul.msk.bf16.vlgmr.msra.gmra.mxu2 %vm257_vm0, %v213_v14  ;;  %5532 = vmatmul.msk.bf16.vlgmr.msra.gmra.mxu3 %vm257_vm0, %v217_v15  ;;  %v5777_v14 = vmov 2102212464   ;;  %p5733_p2 = por %p5732_p1, %p5731_p0 }
  0x26   : > { %p5734_p3 = pnand %p5733_p2, %p5729_p13 }
  0x33   : > { %5521 = vmatmul.msk.bf16.gmra.mxu0 %vm257_vm0, %v206_v24  ;;  %5525 = vmatmul.msk.bf16.gmra.mxu1 %vm257_vm0, %v210_v25 }
  0x34   : > { %5529 = vmatmul.msk.bf16.gmra.mxu2 %vm257_vm0, %v214_v26  ;;  %5533 = vmatmul.msk.bf16.gmra.mxu3 %vm257_vm0, %v218_v27 }
  0x43   : > { %5522 = vmatmul.msk.bf16.gmra.mxu0 %vm257_vm0, %v207_v36  ;;  %5526 = vmatmul.msk.bf16.gmra.mxu1 %vm257_vm0, %v211_v37 }
  0x44   : > { %5530 = vmatmul.msk.bf16.gmra.mxu2 %vm257_vm0, %v215_v38  ;;  %5534 = vmatmul.msk.bf16.gmra.mxu3 %vm257_vm0, %v219_v39 }
  0x53   : > { %5523 = vmatmul.msk.bf16.gmra.mxu0 %vm257_vm0, %v208_v48  ;;  %5527 = vmatmul.msk.bf16.gmra.mxu1 %vm257_vm0, %v212_v49 }
  0x54   : > { %5531 = vmatmul.msk.bf16.gmra.mxu2 %vm257_vm0, %v216_v50  ;;  %5535 = vmatmul.msk.bf16.gmra.mxu3 %vm257_vm0, %v220_v51 }
  0xa0   : > { %v315_v53 = vpop.f32.mrf.mxu0 }
  0xa1   : > { %v316_v54 = vadd.f32 %v5920_v52, %v315_v53 }
  0xa3   : > { %v5923_v55 = vmul.f32 30.0, %v316_v54 }
  0xa5   : > { %v430_v56 = vand.u32 2139095040, %v5923_v55  ;;  %v427_v60 = vand.u32 2147483647, %v5923_v55 }
  0xa7   : > { %v431_v57 = vshrl.u32 %v430_v56, 23  ;;  %v434_v0 = vand.u32 8388607, %v427_v60 }
  0xa8   : > { %v317_v59 = vpop.f32.mrf.mxu0 }
  0xa9   : > { %v5536_v58 = vadd.s32 4294967169, %v431_v57  ;;  %v318_v62 = vadd.f32 %v5920_v52, %v317_v59  ;;  %v435_v11 = vor.u32 8388608, %v434_v0  ;;  %v5780_v0 = vmov 0  }
  0xab   : > { %v437_v61 = vadd.s32 1, %v5536_v58  ;;  %v5935_v6 = vmul.f32 30.0, %v318_v62  ;;  %v5960_v29 = vshll.u32 %v435_v11, 8 }
  0xad   : > { %vm438_vm1 = vcmp.gt.s32.totalorder %v437_v61, 0  ;;  %v585_v26 = vand.u32 2139095040, %v5935_v6  ;;  %v476_v36 = vand.u32 65535, %v5960_v29  ;;  %v477_v41 = vshrl.u32 %v5960_v29, 16 }
  0xae   : > { %v439_v63 = vsel %vm438_vm1, %v437_v61, 0 }
  0xaf   : > { %v441_v1 = vand.u32 31, %v439_v63  ;;  %v5930_v2 = vshrl.u32 %v439_v63, 5  ;;  %v586_v32 = vshrl.u32 %v585_v26, 23 }
  0xb1   : > { %v5932_v3 = vsub.s32 32, %v441_v1  ;;  %v444_v5 = vshll.u32 %v5774_v4, %v441_v1  ;;  %v447_v8 = vshll.u32 %v5775_v7, %v441_v1  ;;  %v450_v10 = vshll.u32 %v5776_v9, %v441_v1 }
  0xb2   : > { %v453_v16 = vshll.u32 %v5777_v14, %v441_v1  ;;  %v456_v20 = vshll.u32 %v5778_v17, %v441_v1  ;;  %vm459_vm2 = vcmp.lt.s32.totalorder %v5930_v2, 1  ;;  %vm461_vm3 = vcmp.lt.s32.totalorder %v5930_v2, 3 }
  0xb3   : > { %v445_v12 = vshrl.u32 %v5775_v7, %v5932_v3  ;;  %v448_v13 = vshrl.u32 %v5776_v9, %v5932_v3  ;;  %v451_v15 = vshrl.u32 %v5777_v14, %v5932_v3  ;;  %v454_v18 = vshrl.u32 %v5778_v17, %v5932_v3 }
  0xb4   : > { %v457_v22 = vshrl.u32 %v5779_v21, %v5932_v3  ;;  %vm462_vm4 = vcmp.lt.s32.totalorder %v5930_v2, 4  ;;  %vm460_vm5 = vcmp.lt.s32.totalorder %v5930_v2, 2  ;;  %v5539_v43 = vadd.s32 4294967169, %v586_v32 }
  0xb5   : > { %v5948_v19 = vor.u32 %v445_v12, %v444_v5  ;;  %v449_v23 = vor.u32 %v448_v13, %v447_v8  ;;  %v452_v24 = vor.u32 %v451_v15, %v450_v10  ;;  %v455_v25 = vor.u32 %v454_v18, %v453_v16 }
  0xb6   : > { %v458_v27 = vor.u32 %v457_v22, %v456_v20  ;;  %v592_v50 = vadd.s32 1, %v5539_v43  ;;  %v443_v63 = vshrl.u32 %v5774_v4, %v5932_v3 }
  0xb7   : > { %v467_v28 = vsel %vm459_vm2, %v5948_v19, %v449_v23  ;;  %v468_v30 = vsel %vm462_vm4, %v455_v25, 920167782  ;;  %v471_v34 = vsel %vm459_vm2, %v449_v23, %v452_v24  ;;  %v464_v11 = vsel %vm462_vm4, %v452_v24, 2102212464 }
  0xb8   : > { %v469_v31 = vsel %vm461_vm3, %v452_v24, %v468_v30  ;;  %v472_v35 = vsel %vm462_vm4, %v458_v27, 1326507024  ;;  %vm593_vm8 = vcmp.gt.s32.totalorder %v592_v50, 0  ;;  %v463_v22 = vsel %vm459_vm2, %v443_v63, %v5948_v19 }
  0xb9   : > { %v470_v33 = vsel %vm460_vm5, %v467_v28, %v469_v31  ;;  %v473_v39 = vsel %vm461_vm3, %v455_v25, %v472_v35  ;;  %v594_v20 = vsel %vm593_vm8, %v592_v50, 0  ;;  %v465_v25 = vsel %vm461_vm3, %v449_v23, %v464_v11  ;;  %v320_v50 = vpop.f32.mrf.mxu0 }
  0xba   : > { %v500_v37 = vand.u32 65535, %v470_v33  ;;  %v501_v38 = vshrl.u32 %v470_v33, 16  ;;  %v474_v40 = vsel %vm460_vm5, %v471_v34, %v473_v39  ;;  %v596_v30 = vand.u32 31, %v594_v20 }
  0xbb   : > { %v478_v44 = vand.u32 65535, %v474_v40  ;;  %v479_v45 = vshrl.u32 %v474_v40, 16  ;;  %v466_v33 = vsel %vm460_vm5, %v463_v22, %v465_v25  ;;  %vm429_vm5 = vcmp.lt.s32.totalorder %v5923_v55, 0 }
  0xbc   : > { %v503_v42 = vmul.u32 %v501_v38, %v476_v36  ;;  %v504_v46 = vmul.u32 %v500_v37, %v477_v41  ;;  %v502_v54 = vmul.u32 %v500_v37, %v476_v36  ;;  %v505_v58 = vmul.u32 %v501_v38, %v477_v41 }
  0xbd   : > { %v481_v47 = vmul.u32 %v479_v45, %v476_v36  ;;  %v482_v49 = vmul.u32 %v478_v44, %v477_v41  ;;  %v480_v51 = vmul.u32 %v478_v44, %v476_v36  ;;  %v483_v56 = vmul.u32 %v479_v45, %v477_v41 }
  0xbe   : > { %v506_v48 = vshll.u32 %v503_v42, 16  ;;  %v508_v59 = vshll.u32 %v504_v46, 16  ;;  %v507_v3 = vshrl.u32 %v503_v42, 16  ;;  %v509_v28 = vshrl.u32 %v504_v46, 16 }
  0xbf   : > { %v484_v53 = vshll.u32 %v481_v47, 16  ;;  %v486_v57 = vshll.u32 %v482_v49, 16  ;;  %v485_v15 = vshrl.u32 %v481_v47, 16  ;;  %v487_v26 = vshrl.u32 %v482_v49, 16 }
  0xc0   : > { %vm510_vm7 = vc.u32 %v502_v54, %v506_v48  ;;  %v512_v62 = vadd.s32 %v506_v48, %v502_v54  ;;  %v597_v35 = vsub.s32 32, %v596_v30  ;;  %v582_v36 = vand.u32 2147483647, %v5935_v6 }
  0xc1   : > { %vm488_vm6 = vc.u32 %v480_v51, %v484_v53  ;;  %v490_v61 = vadd.s32 %v484_v53, %v480_v51  ;;  %v511_v5 = vsel %vm510_vm7, 1, %v5780_v0  ;;  %v520_v19 = vmul.u32 %v5960_v29, %v466_v33 }
  0xc2   : > { %v489_v1 = vsel %vm488_vm6, 1, %v5780_v0  ;;  %v513_v10 = vadd.s32 %v511_v5, %v505_v58  ;;  %vm514_vm10 = vc.u32 %v512_v62, %v508_v59  ;;  %v516_v32 = vadd.s32 %v512_v62, %v508_v59 }
  0xc3   : > { %v491_v8 = vadd.s32 %v489_v1, %v483_v56  ;;  %vm492_vm9 = vc.u32 %v490_v61, %v486_v57  ;;  %v515_v13 = vsel %vm514_vm10, 1, %v5780_v0  ;;  %v600_v23 = vshrl.u32 %v5775_v7, %v597_v35 }
  0xc4   : > { %v493_v12 = vsel %vm492_vm9, 1, %v5780_v0  ;;  %v517_v18 = vadd.s32 %v515_v13, %v513_v10  ;;  %v603_v39 = vshrl.u32 %v5776_v9, %v597_v35  ;;  %v606_v40 = vshrl.u32 %v5777_v14, %v597_v35 }
  0xc5   : > { %v495_v16 = vadd.s32 %v493_v12, %v491_v8  ;;  %v589_v2 = vand.u32 8388607, %v582_v36  ;;  %v6001_v42 = vshrl.u32 %v594_v20, 5  ;;  %v599_v43 = vshll.u32 %v5774_v4, %v596_v30 }
  0xc6   : > { %v518_v24 = vadd.s32 %v517_v18, %v507_v3  ;;  %v602_v44 = vshll.u32 %v5775_v7, %v596_v30  ;;  %v605_v45 = vshll.u32 %v5776_v9, %v596_v30  ;;  %v608_v29 = vshll.u32 %v5777_v14, %v596_v30 }
  0xc7   : > { %v496_v27 = vadd.s32 %v495_v16, %v485_v15  ;;  %v609_v46 = vshrl.u32 %v5778_v17, %v597_v35  ;;  %v611_v48 = vshll.u32 %v5778_v17, %v596_v30  ;;  %v612_v49 = vshrl.u32 %v5779_v21, %v597_v35 }
  0xc8   : > { %v519_v34 = vadd.s32 %v518_v24, %v509_v28  ;;  %v6010_v51 = vor.u32 %v600_v23, %v599_v43  ;;  %v6012_v53 = vor.u32 %v603_v39, %v602_v44  ;;  %v607_v54 = vor.u32 %v606_v40, %v605_v45 }
  0xc9   : > { %v497_v31 = vadd.s32 %v496_v27, %v487_v26  ;;  %v610_v56 = vor.u32 %v609_v46, %v608_v29  ;;  %v590_v58 = vor.u32 8388608, %v589_v2  ;;  %v613_v59 = vor.u32 %v612_v49, %v611_v48 }
  0xca   : > { %v523_v37 = vadd.s32 1, %v519_v34  ;;  %vm617_vm12 = vcmp.lt.s32.totalorder %v6001_v42, 4  ;;  %v321_v62 = vadd.f32 %v5920_v52, %v320_v50  ;;  %vm614_vm13 = vcmp.lt.s32.totalorder %v6001_v42, 1 }
  0xcb   : > { %vm522_vm11 = vc.u32 %v497_v31, %v516_v32  ;;  %v623_v61 = vsel %vm617_vm12, %v610_v56, 920167782  ;;  %vm616_vm14 = vcmp.lt.s32.totalorder %v6001_v42, 3  ;;  %v622_v1 = vsel %vm614_vm13, %v6010_v51, %v6012_v53 }
  0xcc   : > { %v524_v38 = vsel %vm522_vm11, %v523_v37, %v519_v34  ;;  %v624_v5 = vsel %vm616_vm14, %v607_v54, %v623_v61  ;;  %v626_v8 = vsel %vm614_vm13, %v6012_v53, %v607_v54  ;;  %v627_v10 = vsel %vm617_vm12, %v613_v59, 1326507024 }
  0xcd   : > { %v525_v41 = vadd.s32 %v524_v38, %v520_v19  ;;  %v6034_v12 = vshll.u32 %v590_v58, 8  ;;  %vm615_vm15 = vcmp.lt.s32.totalorder %v6001_v42, 2  ;;  %v628_v13 = vsel %vm616_vm14, %v610_v56, %v627_v10 }
  0xce   : > { %v625_v16 = vsel %vm615_vm15, %v622_v1, %v624_v5  ;;  %v629_v3 = vsel %vm615_vm15, %v626_v8, %v628_v13  ;;  %v6043_v18 = vmul.f32 30.0, %v321_v62  ;;  %v521_v34 = vadd.s32 %v516_v32, %v497_v31 }
  0xcf   : > { %v526_v47 = vadd.s32 536870912, %v525_v41  ;;  %v633_v20 = vand.u32 65535, %v629_v3  ;;  %v634_v22 = vshrl.u32 %v629_v3, 16  ;;  %v631_v26 = vand.u32 65535, %v6034_v12 }
  0xd0   : > { %v632_v28 = vshrl.u32 %v6034_v12, 16  ;;  %v656_v24 = vshrl.u32 %v625_v16, 16  ;;  %v655_v33 = vand.u32 65535, %v625_v16  ;;  %v740_v38 = vand.u32 2139095040, %v6043_v18 }
  0xd1   : > { %v6014_v57 = vshrl.u32 %v526_v47, 30  ;;  %v636_v30 = vmul.u32 %v634_v22, %v631_v26  ;;  %v598_v23 = vshrl.u32 %v5774_v4, %v597_v35  ;;  %v619_v39 = vsel %vm617_vm12, %v607_v54, 2102212464 }
  0xd2   : > { %v637_v19 = vmul.u32 %v633_v20, %v632_v28  ;;  %v635_v40 = vmul.u32 %v633_v20, %v631_v26  ;;  %v638_v2 = vmul.u32 %v634_v22, %v632_v28  ;;  %v658_v44 = vmul.u32 %v656_v24, %v631_v26 }
  0xd3   : > { %v528_v63 = vshll.u32 %v6014_v57, 30  ;;  %v659_v46 = vmul.u32 %v655_v33, %v632_v28  ;;  %v640_v47 = vshrl.u32 %v636_v30, 16  ;;  %v657_v35 = vmul.u32 %v655_v33, %v631_v26 }
  0xd4   : > { %v641_v43 = vshll.u32 %v637_v19, 16  ;;  %v661_v50 = vshll.u32 %v658_v44, 16  ;;  %v660_v62 = vmul.u32 %v656_v24, %v632_v28  ;;  %v551_v13 = vsub.s32 4, %v6014_v57 }
  0xd5   : > { %v529_v11 = vsub.s32 %v525_v41, %v528_v63  ;;  %v639_v41 = vshll.u32 %v636_v30, 16  ;;  %v663_v63 = vshll.u32 %v659_v46, 16  ;;  %v741_v3 = vshrl.u32 %v740_v38, 23 }
  0xd6   : > { %vm665_vm4 = vc.u32 %v657_v35, %v661_v50  ;;  %v667_v10 = vadd.s32 %v661_v50, %v657_v35  ;;  %v618_v20 = vsel %vm614_vm13, %v598_v23, %v6010_v51  ;;  %v620_v22 = vsel %vm616_vm14, %v6012_v53, %v619_v39  ;;  %v322_v39 = vpop.f32.mrf.mxu0 }
  0xd7   : > { %vm530_vm0 = vcmp.lt.s32.totalorder %v529_v11, 0  ;;  %v531_v15 = vsub.s32 0, %v529_v11  ;;  %vm643_vm2 = vc.u32 %v635_v40, %v639_v41  ;;  %v645_v29 = vadd.s32 %v639_v41, %v635_v40 }
  0xd8   : > { %v644_v48 = vsel %vm643_vm2, 1, %v5780_v0  ;;  %v666_v8 = vsel %vm665_vm4, 1, %v5780_v0  ;;  %vm669_vm6 = vc.u32 %v667_v10, %v663_v63  ;;  %v662_v30 = vshrl.u32 %v658_v44, 16 }
  0xd9   : > { %v532_v25 = vsel %vm530_vm0, %v531_v15, %v529_v11  ;;  %v646_v49 = vadd.s32 %v644_v48, %v638_v2  ;;  %vm647_vm3 = vc.u32 %v645_v29, %v641_v43  ;;  %v668_v16 = vadd.s32 %v666_v8, %v660_v62 }
  0xda   : > { %v533_v27 = vclz %v532_v25  ;;  %v648_v59 = vsel %vm647_vm3, 1, %v5780_v0  ;;  %v642_v25 = vshrl.u32 %v637_v19, 16  ;;  %v670_v26 = vsel %vm669_vm6, 1, %v5780_v0 }
  0xdb   : > { %v650_v61 = vadd.s32 %v648_v59, %v646_v49  ;;  %v672_v33 = vadd.s32 %v670_v26, %v668_v16  ;;  %vm6070_vm7 = vcmp.le.f32.partialorder %v427_v60, 0.7853982  ;;  %v664_v19 = vshrl.u32 %v659_v46, 16 }
  0xdc   : > { %v5537_v37 = vadd.s32 4294967294, %v533_v27  ;;  %v5542_v27 = vadd.s32 4294967169, %v741_v3  ;;  %v621_v40 = vsel %vm615_vm15, %v618_v20, %v620_v22  ;;  %v6076_v41 = vadd.s32 %v667_v10, %v663_v63 }
  0xdd   : > { %v651_v15 = vadd.s32 %v650_v61, %v640_v47  ;;  %v673_v23 = vadd.s32 %v672_v33, %v662_v30  ;;  %v323_v29 = vadd.f32 %v5920_v52, %v322_v39  ;;  %v675_v46 = vmul.u32 %v6034_v12, %v621_v40 }
  0xde   : > { %vm5538_vm1 = vcmp.lt.s32.totalorder %v5537_v37, 0  ;;  %v747_v51 = vadd.s32 1, %v5542_v27  ;;  %v325_v22 = vpop.f32.mrf.mxu0  ;;  %vm570_vm0 = vweird.f32 %v5923_v55  ;;  %vm584_vm4 = vcmp.lt.s32.totalorder %v5935_v6, 0 }
  0xdf   : > { %v536_v45 = vsel %vm5538_vm1, 0, %v5537_v37  ;;  %v6066_v37 = vadd.s32 %v651_v15, %v642_v25  ;;  %v674_v60 = vadd.s32 %v673_v23, %v664_v19 }
  0xe0   : > { %v537_v31 = vsub.s32 32, %v536_v45  ;;  %v541_v32 = vsub.s32 4294967266, %v536_v45  ;;  %v538_v54 = vshll.u32 %v529_v11, %v536_v45  ;;  %vm748_vm8 = vcmp.gt.s32.totalorder %v747_v51, 0 }
  0xe1   : > { %v749_v44 = vsel %vm748_vm8, %v747_v51, 0  ;;  %vm677_vm9 = vc.u32 %v6066_v37, %v6076_v41 }
  0xe2   : > { %v539_v56 = vshrl.u32 %v521_v34, %v537_v31  ;;  %v542_v58 = vadd.s32 127, %v541_v32  ;;  %v552_v34 = vsel %vm429_vm5, %v551_v13, %v6014_v57  ;;  %v737_v57 = vand.u32 2147483647, %v6043_v18 }
  0xe3   : > { %v554_v43 = vsel %vm6070_vm7, 0, %v552_v34  ;;  %v751_v45 = vand.u32 31, %v749_v44  ;;  %v678_v31 = vadd.s32 1, %v674_v60  ;;  %v6115_v34 = vmul.f32 30.0, %v323_v29 }
  0xe4   : > { %v540_v1 = vor.u32 %v539_v56, %v538_v54  ;;  %v543_v5 = vshll.u32 %v542_v58, 23  ;;  %v571_v47 = vadd.s32 3, %v554_v43  ;;  %v744_v48 = vand.u32 8388607, %v737_v57 }
  0xe5   : > { %v752_v49 = vsub.s32 32, %v751_v45  ;;  %v679_v50 = vsel %vm677_vm9, %v678_v31, %v674_v60  ;;  %v6096_v54 = vshrl.u32 %v749_v44, 5  ;;  %v754_v56 = vshll.u32 %v5774_v4, %v751_v45 }
  0xe6   : > { %v544_v11 = vor.u32 4788187, %v543_v5  ;;  %v547_v24 = vcvt.s32.f32 %v540_v1  ;;  %v680_v12 = vadd.s32 %v679_v50, %v675_v46  ;;  %v757_v59 = vshll.u32 %v5775_v7, %v751_v45 }
  0xe7   : > { %v755_v58 = vshrl.u32 %v5775_v7, %v752_v49  ;;  %v763_v61 = vshll.u32 %v5777_v14, %v751_v45  ;;  %v758_v1 = vshrl.u32 %v5776_v9, %v752_v49  ;;  %v764_v5 = vshrl.u32 %v5778_v17, %v752_v49 }
  0xe8   : > { %v545_v28 = vand.u32 2147483647, %v544_v11  ;;  %v6104_v8 = vand.u32 3, %v571_v47  ;;  %v681_v10 = vadd.s32 536870912, %v680_v12  ;;  %v760_v13 = vshll.u32 %v5776_v9, %v751_v45 }
  0xe9   : > { %v761_v15 = vshrl.u32 %v5777_v14, %v752_v49  ;;  %v745_v11 = vor.u32 8388608, %v744_v48  ;;  %v756_v20 = vor.u32 %v755_v58, %v754_v56  ;;  %v765_v26 = vor.u32 %v764_v5, %v763_v61 }
  0xea   : > { %v548_v53 = vmul.f32 %v547_v24, %v545_v28  ;;  %v6108_v25 = vshrl.u32 %v681_v10, 30  ;;  %v766_v27 = vshll.u32 %v5778_v17, %v751_v45  ;;  %v767_v28 = vshrl.u32 %v5779_v21, %v752_v49 }
  0xeb   : > { %v6112_v33 = vor.u32 %v758_v1, %v757_v59  ;;  %vm772_vm10 = vcmp.lt.s32.totalorder %v6096_v54, 4  ;;  %v762_v38 = vor.u32 %v761_v15, %v760_v13  ;;  %vm769_vm11 = vcmp.lt.s32.totalorder %v6096_v54, 1 }
  0xec   : > { %v549_v2 = vxor.u32 2147483648, %v548_v53  ;;  %v683_v51 = vshll.u32 %v6108_v25, 30  ;;  %vm771_vm12 = vcmp.lt.s32.totalorder %v6096_v54, 3  ;;  %vm574_vm13 = vcmp.eq.s32.totalorder %v6104_v8, 0 }
  0xed   : > { %vm577_vm14 = vcmp.eq.s32.totalorder %v6104_v8, 2  ;;  %v768_v40 = vor.u32 %v767_v28, %v766_v27  ;;  %vm573_vm15 = vcmp.lt.s32.totalorder %v6104_v8, 2  ;;  %v777_v44 = vsel %vm769_vm11, %v756_v20, %v6112_v33 }
  0xee   : > { %v550_v42 = vsel %vm429_vm5, %v549_v2, %v548_v53  ;;  %v6120_v53 = vadd.f32 %v5920_v52, %v325_v22  ;;  %v6125_v39 = vsub.s32 %v680_v12, %v683_v51  ;;  %v778_v2 = vsel %vm772_vm10, %v765_v26, 920167782 }
  0xef   : > { %v6090_v32 = vsel %vm6070_vm7, %v5923_v55, %v550_v42  ;;  %v6133_v45 = vshll.u32 %v745_v11, 8  ;;  %v779_v42 = vsel %vm771_vm12, %v762_v38, %v778_v2  ;;  %v895_v46 = vand.u32 2139095040, %v6115_v34 }
  0xf0   : > { %v555_v35 = vmul.f32 %v6090_v32, %v6090_v32  ;;  %vm685_vm1 = vcmp.lt.s32.totalorder %v6125_v39, 0  ;;  %v686_v29 = vsub.s32 0, %v6125_v39  ;;  %vm770_vm2 = vcmp.lt.s32.totalorder %v6096_v54, 2 }
  0xf1   : > { %v781_v48 = vsel %vm769_vm11, %v6112_v33, %v762_v38  ;;  %v753_v50 = vshrl.u32 %v5774_v4, %v752_v49  ;;  %v780_v56 = vsel %vm770_vm2, %v777_v44, %v779_v42  ;;  %v782_v12 = vsel %vm772_vm10, %v768_v40, 1326507024 }
  0xf2   : > { %v556_v62 = vmul.f32 -0.001358992, %v555_v35  ;;  %v563_v63 = vmul.f32 -0.00019511016, %v555_v35  ;;  %v786_v1 = vand.u32 65535, %v6133_v45  ;;  %v787_v5 = vshrl.u32 %v6133_v45, 16 }
  0xf3   : > { %v896_v15 = vshrl.u32 %v895_v46, 23  ;;  %v810_v22 = vand.u32 65535, %v780_v56  ;;  %vm6184_vm5 = vcmp.le.f32.partialorder %v582_v36, 0.7853982 }
  0xf4   : > { %v557_v16 = vadd.f32 0.041655596, %v556_v62  ;;  %v564_v3 = vadd.f32 0.008332121, %v563_v63  ;;  %v783_v62 = vsel %vm771_vm12, %v765_v26, %v782_v12  ;;  %v676_v63 = vadd.s32 %v6076_v41, %v6066_v37 }
  0xf5   : > { %v784_v49 = vsel %vm770_vm2, %v781_v48, %v783_v62  ;;  %v811_v26 = vshrl.u32 %v780_v56, 16 }
  0xf6   : > { %v558_v24 = vmul.f32 %v557_v16, %v555_v35  ;;  %v565_v30 = vmul.f32 %v564_v3, %v555_v35  ;;  %v706_v16 = vsub.s32 4, %v6108_v25  ;;  %v6166_v3 = vsel %vm769_vm11, %v753_v50, %v756_v20 }
  0xf7   : > { %v789_v11 = vshrl.u32 %v784_v49, 16  ;;  %v813_v42 = vmul.u32 %v811_v26, %v786_v1  ;;  %v815_v36 = vmul.u32 %v811_v26, %v787_v5 }
  0xf8   : > { %v559_v19 = vadd.f32 -0.4999988, %v558_v24  ;;  %v566_v23 = vadd.f32 -0.16666654, %v565_v30 }
  0xf9   : > { %v791_v24 = vmul.u32 %v789_v11, %v786_v1  ;;  %v816_v50 = vshll.u32 %v813_v42, 16 }
  0xfa   : > { %v560_v43 = vmul.f32 %v559_v19, %v555_v35  ;;  %v567_v60 = vmul.f32 %v566_v23, %v555_v35  ;;  %v687_v35 = vsel %vm685_vm1, %v686_v29, %v6125_v39  ;;  %v774_v23 = vsel %vm772_vm10, %v762_v38, 2102212464 }
  0xfb   : > { %v688_v61 = vclz %v687_v35  ;;  %v794_v2 = vshll.u32 %v791_v24, 16  ;;  %v793_v38 = vmul.u32 %v789_v11, %v787_v5  ;;  %v795_v56 = vshrl.u32 %v791_v24, 16 }
  0xfc   : > { %v561_v31 = vadd.f32 1.0, %v560_v43  ;;  %v568_v47 = vadd.f32 1.0, %v567_v60  ;;  %v812_v43 = vmul.u32 %v810_v22, %v786_v1  ;;  %v814_v60 = vmul.u32 %v810_v22, %v787_v5 }
  0xfd   : > { %v5540_v13 = vadd.s32 4294967294, %v688_v61 }
  0xfe   : > { %v569_v58 = vmul.f32 %v568_v47, %v6090_v32  ;;  %v578_v59 = vxor.u32 2147483648, %v561_v31  ;;  %v788_v32 = vand.u32 65535, %v784_v49  ;;  %vm820_vm8 = vc.u32 %v812_v43, %v816_v50 }
  0xff   : > { %vm5541_vm3 = vcmp.lt.s32.totalorder %v5540_v13, 0  ;;  %v821_v62 = vsel %vm820_vm8, 1, %v5780_v0  ;;  %v5545_v49 = vadd.s32 4294967169, %v896_v15  ;;  %v892_v15 = vand.u32 2147483647, %v6115_v34 }
 0x100   : > { %v575_v10 = vxor.u32 2147483648, %v569_v58  ;;  %v579_v41 = vsel %vm577_vm14, %v578_v59, %v569_v58  ;;  %v691_v28 = vsel %vm5541_vm3, 0, %v5540_v13  ;;  %v792_v30 = vmul.u32 %v788_v32, %v787_v5 }
 0x101   : > { %v692_v51 = vsub.s32 32, %v691_v28  ;;  %v696_v19 = vsub.s32 4294967266, %v691_v28  ;;  %v790_v40 = vmul.u32 %v788_v32, %v786_v1  ;;  %v693_v55 = vshll.u32 %v6125_v39, %v691_v28 }
 0x102   : > { %v576_v37 = vsel %vm574_vm13, %v561_v31, %v575_v10  ;;  %v796_v46 = vshll.u32 %v792_v30, 16  ;;  %v818_v39 = vshll.u32 %v814_v60, 16  ;;  %v707_v13 = vsel %vm584_vm4, %v706_v16, %v6108_v25 }
 0x103   : > { %v580_v27 = vsel %vm573_vm15, %v576_v37, %v579_v41  ;;  %v694_v44 = vshrl.u32 %v676_v63, %v692_v51  ;;  %v697_v29 = vadd.s32 127, %v696_v19  ;;  %vm798_vm6 = vc.u32 %v790_v40, %v794_v2 }
 0x104   : > { %v581_v20 = vsel %vm570_vm0, nan, %v580_v27  ;;  %v800_v31 = vadd.s32 %v794_v2, %v790_v40  ;;  %v799_v35 = vsel %vm798_vm6, 1, %v5780_v0  ;;  %v822_v63 = vadd.s32 %v816_v50, %v812_v43 }
 0x105   : > { %5387 = vst [vmem:[%s6179_s20] sm:$0xff] %v581_v20  ;;  %v695_v47 = vor.u32 %v694_v44, %v693_v55  ;;  %v698_v48 = vshll.u32 %v697_v29, 23  ;;  %v801_v12 = vadd.s32 %v799_v35, %v793_v38  ;;  %v823_v32 = vadd.s32 %v821_v62, %v815_v36 }
 0x106   : > { %vm802_vm7 = vc.u32 %v800_v31, %v796_v46  ;;  %v775_v5 = vsel %vm771_vm12, %v6112_v33, %v774_v23  ;;  %vm824_vm9 = vc.u32 %v822_v63, %v818_v39  ;;  %v902_v22 = vadd.s32 1, %v5545_v49 }
 0x107   : > { %v699_v58 = vor.u32 4788187, %v698_v48  ;;  %v803_v59 = vsel %vm802_vm7, 1, %v5780_v0  ;;  %v702_v10 = vcvt.s32.f32 %v695_v47  ;;  %v797_v41 = vshrl.u32 %v792_v30, 16 }
 0x108   : > { %v805_v61 = vadd.s32 %v803_v59, %v801_v12  ;;  %v825_v26 = vsel %vm824_vm9, 1, %v5780_v0  ;;  %v709_v27 = vsel %vm6184_vm5, 0, %v707_v13  ;;  %v817_v28 = vshrl.u32 %v813_v42, 16 }
 0x109   : > { %v700_v1 = vand.u32 2147483647, %v699_v58  ;;  %v827_v24 = vadd.s32 %v825_v26, %v823_v32  ;;  %vm903_vm10 = vcmp.gt.s32.totalorder %v902_v22, 0  ;;  %v776_v33 = vsel %vm770_vm2, %v6166_v3, %v775_v5 }
 0x10a   : > { %v806_v11 = vadd.s32 %v805_v61, %v795_v56  ;;  %v904_v20 = vsel %vm903_vm10, %v902_v22, 0  ;;  %v6208_v30 = vmul.f32 30.0, %v6120_v53  ;;  %v819_v51 = vshrl.u32 %v814_v60, 16 }
 0x10b   : > { %v703_v37 = vmul.f32 %v702_v10, %v700_v1  ;;  %v828_v19 = vadd.s32 %v827_v24, %v817_v28  ;;  %v6212_v40 = vadd.s32 %v822_v63, %v818_v39  ;;  %v899_v2 = vand.u32 8388607, %v892_v15 }
 0x10c   : > { %v6205_v16 = vadd.s32 %v806_v11, %v797_v41  ;;  %v906_v43 = vand.u32 31, %v904_v20  ;;  %v726_v3 = vadd.s32 3, %v709_v27  ;;  %v830_v53 = vmul.u32 %v6133_v45, %v776_v33 }
 0x10d   : > { %v704_v25 = vxor.u32 2147483648, %v703_v37  ;;  %v829_v55 = vadd.s32 %v828_v19, %v819_v51  ;;  %v6222_v60 = vshrl.u32 %v904_v20, 5  ;;  %v900_v11 = vor.u32 8388608, %v899_v2 }
 0x10e   : > { %vm832_vm11 = vc.u32 %v6205_v16, %v6212_v40  ;;  %v6224_v29 = vsub.s32 32, %v906_v43  ;;  %v909_v38 = vshll.u32 %v5774_v4, %v906_v43  ;;  %v912_v46 = vshll.u32 %v5775_v7, %v906_v43 }
 0x10f   : > { %v705_v23 = vsel %vm584_vm4, %v704_v25, %v703_v37  ;;  %v833_v42 = vadd.s32 1, %v829_v55  ;;  %v915_v8 = vshll.u32 %v5776_v9, %v906_v43  ;;  %v918_v48 = vshll.u32 %v5777_v14, %v906_v43 }
 0x110   : > { %v708_v54 = vsel %vm6184_vm5, %v5935_v6, %v705_v23  ;;  %v910_v45 = vshrl.u32 %v5775_v7, %v6224_v29  ;;  %v913_v50 = vshrl.u32 %v5776_v9, %v6224_v29  ;;  %v916_v56 = vshrl.u32 %v5777_v14, %v6224_v29 }
 0x111   : > { %v710_v44 = vmul.f32 %v708_v54, %v708_v54  ;;  %v834_v35 = vsel %vm832_vm11, %v833_v42, %v829_v55  ;;  %v919_v12 = vshrl.u32 %v5778_v17, %v6224_v29  ;;  %v921_v39 = vshll.u32 %v5778_v17, %v906_v43 }
 0x112   : > { %v835_v59 = vadd.s32 %v834_v35, %v830_v53  ;;  %v6239_v61 = vor.u32 %v910_v45, %v909_v38  ;;  %v6241_v62 = vor.u32 %v913_v50, %v912_v46  ;;  %v922_v49 = vshrl.u32 %v5779_v21, %v6224_v29 }
 0x113   : > { %v711_v31 = vmul.f32 -0.001358992, %v710_v44  ;;  %v718_v47 = vmul.f32 -0.00019511016, %v710_v44  ;;  %v920_v63 = vor.u32 %v919_v12, %v918_v48  ;;  %v917_v32 = vor.u32 %v916_v56, %v915_v8 }
 0x114   : > { %v836_v13 = vadd.s32 536870912, %v835_v59  ;;  %v727_v5 = vand.u32 3, %v726_v3  ;;  %v923_v22 = vor.u32 %v922_v49, %v921_v39  ;;  %vm924_vm12 = vcmp.lt.s32.totalorder %v6222_v60, 1 }
 0x115   : > { %v712_v36 = vadd.f32 0.041655596, %v711_v31  ;;  %v719_v58 = vadd.f32 0.008332121, %v718_v47  ;;  %vm927_vm13 = vcmp.lt.s32.totalorder %v6222_v60, 4  ;;  %vm926_vm14 = vcmp.lt.s32.totalorder %v6222_v60, 3 }
 0x116   : > { %v6246_v26 = vshrl.u32 %v836_v13, 30  ;;  %v932_v27 = vsel %vm924_vm12, %v6239_v61, %v6241_v62  ;;  %v933_v28 = vsel %vm927_vm13, %v920_v63, 920167782  ;;  %v937_v24 = vsel %vm927_vm13, %v923_v22, 1326507024 }
 0x117   : > { %v713_v1 = vmul.f32 %v712_v36, %v710_v44  ;;  %v720_v10 = vmul.f32 %v719_v58, %v710_v44  ;;  %v936_v51 = vsel %vm924_vm12, %v6241_v62, %v917_v32  ;;  %vm725_vm15 = vweird.f32 %v5935_v6 }
 0x118   : > { %v838_v20 = vshll.u32 %v6246_v26, 30  ;;  %v934_v19 = vsel %vm926_vm14, %v917_v32, %v933_v28  ;;  %v938_v23 = vsel %vm926_vm14, %v920_v63, %v937_v24  ;;  %v6267_v2 = vshll.u32 %v900_v11, 8 }
 0x119   : > { %v714_v37 = vadd.f32 -0.4999988, %v713_v1  ;;  %v721_v41 = vadd.f32 -0.16666654, %v720_v10  ;;  %v1050_v43 = vand.u32 2139095040, %v6208_v30  ;;  %vm925_vm0 = vcmp.lt.s32.totalorder %v6222_v60, 2 }
 0x11a   : > { %v839_v53 = vsub.s32 %v835_v59, %v838_v20  ;;  %vm728_vm1 = vcmp.lt.s32.totalorder %v727_v5, 2  ;;  %vm729_vm2 = vcmp.eq.s32.totalorder %v727_v5, 0  ;;  %v939_v42 = vsel %vm925_vm0, %v936_v51, %v938_v23  ;;  %v327_v23 = vpop.f32.mrf.mxu0 }
 0x11b   : > { %v715_v25 = vmul.f32 %v714_v37, %v710_v44  ;;  %v722_v33 = vmul.f32 %v721_v41, %v710_v44  ;;  %v935_v44 = vsel %vm925_vm0, %v932_v27, %v934_v19  ;;  %vm732_vm4 = vcmp.eq.s32.totalorder %v727_v5, 2 }
 0x11c   : > { %vm840_vm3 = vcmp.lt.s32.totalorder %v839_v53, 0  ;;  %v841_v8 = vsub.s32 0, %v839_v53  ;;  %v941_v31 = vand.u32 65535, %v6267_v2  ;;  %v943_v47 = vand.u32 65535, %v939_v42 }
 0x11d   : > { %v716_v3 = vadd.f32 1.0, %v715_v25  ;;  %v723_v55 = vadd.f32 1.0, %v722_v33  ;;  %v944_v45 = vshrl.u32 %v939_v42, 16  ;;  %v942_v50 = vshrl.u32 %v6267_v2, 16 }
 0x11e   : > { %v842_v35 = vsel %vm840_vm3, %v841_v8, %v839_v53  ;;  %v1051_v56 = vshrl.u32 %v1050_v43, 23  ;;  %v831_v12 = vadd.s32 %v6212_v40, %v6205_v16  ;;  %v966_v59 = vshrl.u32 %v935_v44, 16 }
 0x11f   : > { %v724_v38 = vmul.f32 %v723_v55, %v708_v54  ;;  %v733_v46 = vxor.u32 2147483648, %v716_v3  ;;  %v843_v36 = vclz %v842_v35  ;;  %v946_v58 = vmul.u32 %v944_v45, %v941_v31 }
 0x120   : > { %v947_v63 = vmul.u32 %v943_v47, %v942_v50  ;;  %v965_v49 = vand.u32 65535, %v935_v44  ;;  %v908_v13 = vshrl.u32 %v5774_v4, %v6224_v29  ;;  %v929_v11 = vsel %vm927_vm13, %v917_v32, 2102212464 }
 0x121   : > { %v730_v48 = vxor.u32 2147483648, %v724_v38  ;;  %v734_v39 = vsel %vm732_vm4, %v733_v46, %v724_v38  ;;  %v5543_v10 = vadd.s32 4294967294, %v843_v36  ;;  %v945_v40 = vmul.u32 %v943_v47, %v941_v31 }
 0x122   : > { %v949_v22 = vshll.u32 %v946_v58, 16  ;;  %v5548_v37 = vadd.s32 4294967169, %v1051_v56  ;;  %v948_v41 = vmul.u32 %v944_v45, %v942_v50  ;;  %v951_v27 = vshll.u32 %v947_v63, 16 }
 0x123   : > { %v731_v54 = vsel %vm729_vm2, %v716_v3, %v730_v48  ;;  %vm5544_vm5 = vcmp.lt.s32.totalorder %v5543_v10, 0  ;;  %v968_v28 = vmul.u32 %v966_v59, %v941_v31  ;;  %v969_v25 = vmul.u32 %v965_v49, %v942_v50 }
 0x124   : > { %v735_v1 = vsel %vm728_vm1, %v731_v54, %v734_v39  ;;  %v846_v5 = vsel %vm5544_vm5, 0, %v5543_v10  ;;  %vm953_vm6 = vc.u32 %v945_v40, %v949_v22  ;;  %v955_v24 = vadd.s32 %v949_v22, %v945_v40 }
 0x125   : > { %v736_v16 = vsel %vm725_vm15, nan, %v735_v1  ;;  %v847_v33 = vsub.s32 32, %v846_v5  ;;  %v851_v29 = vsub.s32 4294967266, %v846_v5  ;;  %v954_v20 = vsel %vm953_vm6, 1, %v5780_v0 }
 0x126   : > { %5388 = vst [vmem:[%s6179_s20 + $0x8] sm:$0xff] %v736_v16  ;;  %v967_v32 = vmul.u32 %v965_v49, %v941_v31  ;;  %v950_v51 = vshrl.u32 %v946_v58, 16  ;;  %v956_v6 = vadd.s32 %v954_v20, %v948_v41  ;;  %vm957_vm7 = vc.u32 %v955_v24, %v951_v27 }
 0x127   : > { %v971_v19 = vshll.u32 %v968_v28, 16  ;;  %v848_v43 = vshll.u32 %v839_v53, %v846_v5  ;;  %v849_v3 = vshrl.u32 %v831_v12, %v847_v33  ;;  %v852_v55 = vadd.s32 127, %v851_v29 }
 0x128   : > { %v958_v44 = vsel %vm957_vm7, 1, %v5780_v0  ;;  %v970_v38 = vmul.u32 %v966_v59, %v942_v50  ;;  %v973_v46 = vshll.u32 %v969_v25, 16  ;;  %v6292_v31 = vadd.f32 %v5920_v52, %v327_v23 }
 0x129   : > { %v960_v42 = vadd.s32 %v958_v44, %v956_v6  ;;  %vm975_vm8 = vc.u32 %v967_v32, %v971_v19  ;;  %v850_v8 = vor.u32 %v849_v3, %v848_v43  ;;  %v853_v47 = vshll.u32 %v852_v55, 23 }
 0x12a   : > { %v976_v45 = vsel %vm975_vm8, 1, %v5780_v0  ;;  %v977_v48 = vadd.s32 %v971_v19, %v967_v32  ;;  %v861_v35 = vsub.s32 4, %v6246_v26  ;;  %v928_v36 = vsel %vm924_vm12, %v908_v13, %v6239_v61 }
 0x12b   : > { %v961_v56 = vadd.s32 %v960_v42, %v950_v51  ;;  %v978_v53 = vadd.s32 %v976_v45, %v970_v38  ;;  %v854_v12 = vor.u32 4788187, %v853_v47  ;;  %v930_v50 = vsel %vm926_vm14, %v6241_v62, %v929_v11 }
 0x12c   : > { %vm979_vm9 = vc.u32 %v977_v48, %v973_v46  ;;  %vm739_vm10 = vcmp.lt.s32.totalorder %v6043_v18, 0  ;;  %v952_v58 = vshrl.u32 %v947_v63, 16  ;;  %v1057_v59 = vadd.s32 1, %v5548_v37 }
 0x12d   : > { %v980_v52 = vsel %vm979_vm9, 1, %v5780_v0  ;;  %v855_v54 = vand.u32 2147483647, %v854_v12  ;;  %v857_v39 = vcvt.s32.f32 %v850_v8  ;;  %v972_v49 = vshrl.u32 %v968_v28, 16 }
 0x12e   : > { %v982_v1 = vadd.s32 %v980_v52, %v978_v53  ;;  %v862_v10 = vsel %vm739_vm10, %v861_v35, %v6246_v26  ;;  %v931_v61 = vsel %vm925_vm0, %v928_v36, %v930_v50  ;;  %v6308_v13 = vadd.s32 %v961_v56, %v952_v58 }
 0x12f   : > { %vm1058_vm11 = vcmp.gt.s32.totalorder %v1057_v59, 0  ;;  %v858_v62 = vmul.f32 %v857_v39, %v855_v54  ;;  %v974_v11 = vshrl.u32 %v969_v25, 16  ;;  %vm6312_vm12 = vcmp.le.f32.partialorder %v737_v57, 0.7853982 }
 0x130   : > { %v983_v63 = vadd.s32 %v982_v1, %v972_v49  ;;  %v1059_v16 = vsel %vm1058_vm11, %v1057_v59, 0  ;;  %v6316_v22 = vadd.s32 %v977_v48, %v973_v46  ;;  %v1047_v26 = vand.u32 2147483647, %v6208_v30  ;;  %v330_v59 = vpop.f32.mrf.mxu0 }
 0x131   : > { %v1061_v37 = vand.u32 31, %v1059_v16  ;;  %v859_v60 = vxor.u32 2147483648, %v858_v62  ;;  %v864_v41 = vsel %vm6312_vm12, 0, %v862_v10  ;;  %v985_v28 = vmul.u32 %v6267_v2, %v931_v61 }
 0x132   : > { %v984_v27 = vadd.s32 %v983_v63, %v974_v11  ;;  %vm987_vm13 = vc.u32 %v6308_v13, %v6316_v22  ;;  %v6324_v5 = vshrl.u32 %v1059_v16, 5  ;;  %v1054_v44 = vand.u32 8388607, %v1047_v26 }
 0x133   : > { %v6326_v57 = vsub.s32 32, %v1061_v37  ;;  %v1064_v24 = vshll.u32 %v5774_v4, %v1061_v37  ;;  %v860_v25 = vsel %vm739_vm10, %v859_v60, %v858_v62  ;;  %v1067_v29 = vshll.u32 %v5775_v7, %v1061_v37 }
 0x134   : > { %v988_v33 = vadd.s32 1, %v984_v27  ;;  %v1073_v20 = vshll.u32 %v5777_v14, %v1061_v37  ;;  %v6336_v2 = vsel %vm6312_vm12, %v6043_v18, %v860_v25  ;;  %v1070_v6 = vshll.u32 %v5776_v9, %v1061_v37 }
 0x135   : > { %v1065_v32 = vshrl.u32 %v5775_v7, %v6326_v57  ;;  %v1068_v51 = vshrl.u32 %v5776_v9, %v6326_v57  ;;  %v865_v19 = vmul.f32 %v6336_v2, %v6336_v2  ;;  %v1071_v43 = vshrl.u32 %v5777_v14, %v6326_v57 }
 0x136   : > { %v989_v23 = vsel %vm987_vm13, %v988_v33, %v984_v27  ;;  %v1074_v3 = vshrl.u32 %v5778_v17, %v6326_v57  ;;  %v1076_v42 = vshll.u32 %v5778_v17, %v1061_v37  ;;  %v1077_v38 = vshrl.u32 %v5779_v21, %v6326_v57 }
 0x137   : > { %v990_v55 = vadd.s32 %v989_v23, %v985_v28  ;;  %v866_v46 = vmul.f32 -0.001358992, %v865_v19  ;;  %v873_v8 = vmul.f32 -0.00019511016, %v865_v19  ;;  %v881_v47 = vadd.s32 3, %v864_v41 }
 0x138   : > { %v1075_v45 = vor.u32 %v1074_v3, %v1073_v20  ;;  %v6354_v35 = vor.u32 %v1065_v32, %v1064_v24  ;;  %v6356_v56 = vor.u32 %v1068_v51, %v1067_v29  ;;  %v6358_v53 = vor.u32 %v1071_v43, %v1070_v6 }
 0x139   : > { %v991_v48 = vadd.s32 536870912, %v990_v55  ;;  %v867_v12 = vadd.f32 0.041655596, %v866_v46  ;;  %v874_v36 = vadd.f32 0.008332121, %v873_v8  ;;  %vm1079_vm14 = vcmp.lt.s32.totalorder %v6324_v5, 1 }
 0x13a   : > { %vm1082_vm15 = vcmp.lt.s32.totalorder %v6324_v5, 4  ;;  %v1055_v58 = vor.u32 8388608, %v1054_v44  ;;  %v1078_v52 = vor.u32 %v1077_v38, %v1076_v42  ;;  %vm1081_vm0 = vcmp.lt.s32.totalorder %v6324_v5, 3 }
 0x13b   : > { %v6362_v50 = vshrl.u32 %v991_v48, 30  ;;  %v868_v54 = vmul.f32 %v867_v12, %v865_v19  ;;  %v875_v39 = vmul.f32 %v874_v36, %v865_v19  ;;  %v882_v49 = vand.u32 3, %v881_v47 }
 0x13c   : > { %v1088_v1 = vsel %vm1082_vm15, %v1075_v45, 920167782  ;;  %v6368_v10 = vmul.f32 30.0, %v6292_v31  ;;  %v1087_v62 = vsel %vm1079_vm14, %v6354_v35, %v6356_v56  ;;  %v1091_v40 = vsel %vm1079_vm14, %v6356_v56, %v6358_v53  ;;  %v6385_v31 = vld [vmem:[%s9382_s2] ss:$0 sm:$0xff] }
 0x13d   : > { %v993_v61 = vshll.u32 %v6362_v50, 30  ;;  %v869_v11 = vadd.f32 -0.4999988, %v868_v54  ;;  %v876_v63 = vadd.f32 -0.16666654, %v875_v39  ;;  %v1089_v16 = vsel %vm1081_vm0, %v6358_v53, %v1088_v1 }
 0x13e   : > { %v6388_v37 = vadd.f32 %v6385_v31, %v330_v59  ;;  %v1092_v41 = vsel %vm1082_vm15, %v1078_v52, 1326507024  ;;  %v6394_v27 = vshll.u32 %v1055_v58, 8  ;;  %vm883_vm1 = vcmp.lt.s32.totalorder %v882_v49, 2 }
 0x13f   : > { %v6390_v60 = vsub.s32 %v990_v55, %v993_v61  ;;  %v870_v28 = vmul.f32 %v869_v11, %v865_v19  ;;  %v877_v24 = vmul.f32 %v876_v63, %v865_v19  ;;  %vm1080_vm2 = vcmp.lt.s32.totalorder %v6324_v5, 2 }
 0x140   : > { %v1093_v25 = vsel %vm1081_vm0, %v1075_v45, %v1092_v41  ;;  %vm880_vm3 = vweird.f32 %v6043_v18  ;;  %v1090_v29 = vsel %vm1080_vm2, %v1087_v62, %v1089_v16  ;;  %vm884_vm5 = vcmp.eq.s32.totalorder %v882_v49, 0 }
 0x141   : > { %vm995_vm4 = vcmp.lt.s32.totalorder %v6390_v60, 0  ;;  %v996_v33 = vsub.s32 0, %v6390_v60  ;;  %v1094_v20 = vsel %vm1080_vm2, %v1091_v40, %v1093_v25  ;;  %v871_v32 = vadd.f32 1.0, %v870_v28 }
 0x142   : > { %v878_v51 = vadd.f32 1.0, %v877_v24  ;;  %v1098_v6 = vand.u32 65535, %v1094_v20  ;;  %v1099_v19 = vshrl.u32 %v1094_v20, 16  ;;  %v1096_v43 = vand.u32 65535, %v6394_v27 }
 0x143   : > { %v997_v23 = vsel %vm995_vm4, %v996_v33, %v6390_v60  ;;  %v1097_v3 = vshrl.u32 %v6394_v27, 16  ;;  %v888_v44 = vxor.u32 2147483648, %v871_v32  ;;  %v1121_v38 = vshrl.u32 %v1090_v29, 16 }
 0x144   : > { %v879_v55 = vmul.f32 %v878_v51, %v6336_v2  ;;  %v998_v42 = vclz %v997_v23  ;;  %vm887_vm6 = vcmp.eq.s32.totalorder %v882_v49, 2  ;;  %v986_v46 = vadd.s32 %v6316_v22, %v6308_v13 }
 0x145   : > { %v1101_v8 = vmul.u32 %v1099_v19, %v1096_v43  ;;  %v1202_v47 = vand.u32 2147483647, %v6368_v10  ;;  %v1102_v12 = vmul.u32 %v1098_v6, %v1097_v3  ;;  %v1205_v36 = vand.u32 2139095040, %v6368_v10 }
 0x146   : > { %v885_v45 = vxor.u32 2147483648, %v879_v55  ;;  %v5546_v48 = vadd.s32 4294967294, %v998_v42  ;;  %v889_v58 = vsel %vm887_vm6, %v888_v44, %v879_v55  ;;  %v1100_v52 = vmul.u32 %v1098_v6, %v1096_v43 }
 0x147   : > { %v1104_v59 = vshll.u32 %v1101_v8, 16  ;;  %v1120_v54 = vand.u32 65535, %v1090_v29  ;;  %v1106_v39 = vshll.u32 %v1102_v12, 16  ;;  %v1123_v1 = vmul.u32 %v1121_v38, %v1096_v43 }
 0x148   : > { %v886_v2 = vsel %vm884_vm5, %v871_v32, %v885_v45  ;;  %vm5547_vm7 = vcmp.lt.s32.totalorder %v5546_v48, 0  ;;  %v1103_v16 = vmul.u32 %v1099_v19, %v1097_v3  ;;  %vm894_vm9 = vcmp.lt.s32.totalorder %v6115_v34, 0 }
 0x149   : > { %v890_v13 = vsel %vm883_vm1, %v886_v2, %v889_v58  ;;  %v1001_v22 = vsel %vm5547_vm7, 0, %v5546_v48  ;;  %vm1108_vm8 = vc.u32 %v1100_v52, %v1104_v59  ;;  %v1110_v61 = vadd.s32 %v1104_v59, %v1100_v52 }
 0x14a   : > { %v891_v62 = vsel %vm880_vm3, nan, %v890_v13  ;;  %v1002_v11 = vsub.s32 32, %v1001_v22  ;;  %v1006_v63 = vsub.s32 4294967266, %v1001_v22  ;;  %v1003_v40 = vshll.u32 %v6390_v60, %v1001_v22 }
 0x14b   : > { %v1109_v41 = vsel %vm1108_vm8, 1, %v5780_v0  ;;  %vm1112_vm10 = vc.u32 %v1110_v61, %v1106_v39  ;;  %v1124_v28 = vmul.u32 %v1120_v54, %v1097_v3  ;;  %5389 = vst [vmem:[%s6179_s20 + $0x10] sm:$0xff] %v891_v62  ;;  %v1063_v18 = vshrl.u32 %v5774_v4, %v6326_v57  ;;  %v332_v61 = vpop.f32.mrf.mxu0 }
 0x14c   : > { %v1004_v49 = vshrl.u32 %v986_v46, %v1002_v11  ;;  %v1007_v24 = vadd.s32 127, %v1006_v63  ;;  %v1111_v25 = vadd.s32 %v1109_v41, %v1103_v16  ;;  %v1113_v33 = vsel %vm1112_vm10, 1, %v5780_v0 }
 0x14d   : > { %v1105_v29 = vshrl.u32 %v1101_v8, 16  ;;  %v1122_v20 = vmul.u32 %v1120_v54, %v1096_v43  ;;  %v1126_v32 = vshll.u32 %v1123_v1, 16  ;;  %v1125_v60 = vmul.u32 %v1121_v38, %v1097_v3 }
 0x14e   : > { %v1005_v51 = vor.u32 %v1004_v49, %v1003_v40  ;;  %v1008_v6 = vshll.u32 %v1007_v24, 23  ;;  %v1115_v19 = vadd.s32 %v1113_v33, %v1111_v25  ;;  %v1128_v23 = vshll.u32 %v1124_v28, 16 }
 0x14f   : > { %vm1130_vm11 = vc.u32 %v1122_v20, %v1126_v32  ;;  %v1132_v55 = vadd.s32 %v1126_v32, %v1122_v20  ;;  %v1206_v44 = vshrl.u32 %v1205_v36, 23  ;;  %v1016_v46 = vsub.s32 4, %v6362_v50 }
 0x150   : > { %v1009_v42 = vor.u32 4788187, %v1008_v6  ;;  %v1116_v45 = vadd.s32 %v1115_v19, %v1105_v29  ;;  %v1131_v48 = vsel %vm1130_vm11, 1, %v5780_v0  ;;  %v1084_v57 = vsel %vm1082_vm15, %v6358_v53, 2102212464 }
 0x151   : > { %v1133_v43 = vadd.s32 %v1131_v48, %v1125_v60  ;;  %vm1134_vm12 = vc.u32 %v1132_v55, %v1128_v23  ;;  %v5551_v8 = vadd.s32 4294967169, %v1206_v44  ;;  %v1012_v52 = vcvt.s32.f32 %v1005_v51 }
 0x152   : > { %v1010_v58 = vand.u32 2147483647, %v1009_v42  ;;  %v1107_v3 = vshrl.u32 %v1102_v12, 16  ;;  %v1135_v38 = vsel %vm1134_vm12, 1, %v5780_v0  ;;  %v1083_v36 = vsel %vm1079_vm14, %v1063_v18, %v6354_v35 }
 0x153   : > { %v1127_v59 = vshrl.u32 %v1123_v1, 16  ;;  %v1137_v54 = vadd.s32 %v1135_v38, %v1133_v43  ;;  %v1212_v2 = vadd.s32 1, %v5551_v8  ;;  %v1017_v53 = vsel %vm894_vm9, %v1016_v46, %v6362_v50 }
 0x154   : > { %v1013_v39 = vmul.f32 %v1012_v52, %v1010_v58  ;;  %v1085_v13 = vsel %vm1081_vm0, %v6356_v56, %v1084_v57  ;;  %v6440_v22 = vadd.s32 %v1116_v45, %v1107_v3  ;;  %vm6444_vm13 = vcmp.le.f32.partialorder %v892_v15, 0.7853982 }
 0x155   : > { %v1129_v35 = vshrl.u32 %v1124_v28, 16  ;;  %v1138_v1 = vadd.s32 %v1137_v54, %v1127_v59  ;;  %vm1213_vm14 = vcmp.gt.s32.totalorder %v1212_v2, 0  ;;  %v6448_v11 = vadd.s32 %v1132_v55, %v1128_v23 }
 0x156   : > { %v1014_v62 = vxor.u32 2147483648, %v1013_v39  ;;  %v1209_v50 = vand.u32 8388607, %v1202_v47  ;;  %v1214_v63 = vsel %vm1213_vm14, %v1212_v2, 0  ;;  %v1019_v56 = vsel %vm6444_vm13, 0, %v1017_v53 }
 0x157   : > { %v1086_v15 = vsel %vm1080_vm2, %v1083_v36, %v1085_v13  ;;  %v1139_v16 = vadd.s32 %v1138_v1, %v1129_v35  ;;  %v1216_v40 = vand.u32 31, %v1214_v63  ;;  %v6457_v41 = vmul.f32 30.0, %v6388_v37 }
 0x158   : > { %v1015_v28 = vsel %vm894_vm9, %v1014_v62, %v1013_v39  ;;  %vm1142_vm15 = vc.u32 %v6440_v22, %v6448_v11  ;;  %v6464_v49 = vadd.f32 %v6385_v31, %v332_v61  ;;  %v1036_v18 = vadd.s32 3, %v1019_v56 }
 0x159   : > { %v1018_v24 = vsel %vm6444_vm13, %v6115_v34, %v1015_v28  ;;  %v1143_v5 = vadd.s32 1, %v1139_v16  ;;  %v6469_v25 = vsub.s32 32, %v1216_v40  ;;  %v1140_v37 = vmul.u32 %v6394_v27, %v1086_v15 }
 0x15a   : > { %v1020_v33 = vmul.f32 %v1018_v24, %v1018_v24  ;;  %v1210_v29 = vor.u32 8388608, %v1209_v50  ;;  %v6472_v32 = vshrl.u32 %v1214_v63, 5  ;;  %v1219_v51 = vshll.u32 %v5774_v4, %v1216_v40 }
 0x15b   : > { %v1144_v20 = vsel %vm1142_vm15, %v1143_v5, %v1139_v16  ;;  %v1223_v6 = vshrl.u32 %v5776_v9, %v6469_v25  ;;  %v1226_v55 = vshrl.u32 %v5777_v14, %v6469_v25  ;;  %v1220_v44 = vshrl.u32 %v5775_v7, %v6469_v25 }
 0x15c   : > { %v1021_v19 = vmul.f32 -0.001358992, %v1020_v33  ;;  %v1028_v60 = vmul.f32 -0.00019511016, %v1020_v33  ;;  %v1145_v23 = vadd.s32 %v1144_v20, %v1140_v37  ;;  %v1222_v27 = vshll.u32 %v5775_v7, %v1216_v40 }
 0x15d   : > { %v1228_v42 = vshll.u32 %v5777_v14, %v1216_v40  ;;  %v1229_v46 = vshrl.u32 %v5778_v17, %v6469_v25  ;;  %v1225_v43 = vshll.u32 %v5776_v9, %v1216_v40  ;;  %v1231_v52 = vshll.u32 %v5778_v17, %v1216_v40 }
 0x15e   : > { %v1022_v45 = vadd.f32 0.041655596, %v1021_v19  ;;  %v1029_v48 = vadd.f32 0.008332121, %v1028_v60  ;;  %v1146_v57 = vadd.s32 536870912, %v1145_v23  ;;  %v6486_v8 = vor.u32 %v1223_v6, %v1222_v27 }
 0x15f   : > { %v1230_v58 = vor.u32 %v1229_v46, %v1228_v42  ;;  %v1232_v3 = vshrl.u32 %v5779_v21, %v6469_v25  ;;  %v6493_v54 = vor.u32 %v1226_v55, %v1225_v43  ;;  %v1037_v2 = vand.u32 3, %v1036_v18 }
 0x160   : > { %v1023_v38 = vmul.f32 %v1022_v45, %v1020_v33  ;;  %v1030_v36 = vmul.f32 %v1029_v48, %v1020_v33  ;;  %v6491_v59 = vshrl.u32 %v1146_v57, 30  ;;  %v6495_v39 = vor.u32 %v1220_v44, %v1219_v51 }
 0x161   : > { %v1233_v53 = vor.u32 %v1232_v3, %v1231_v52  ;;  %v6497_v13 = vshll.u32 %v1210_v29, 8  ;;  %vm1237_vm0 = vcmp.lt.s32.totalorder %v6472_v32, 4  ;;  %vm1234_vm1 = vcmp.lt.s32.totalorder %v6472_v32, 1 }
 0x162   : > { %v1024_v12 = vadd.f32 -0.4999988, %v1023_v38  ;;  %v1031_v35 = vadd.f32 -0.16666654, %v1030_v36  ;;  %v1148_v1 = vshll.u32 %v6491_v59, 30  ;;  %vm1236_vm2 = vcmp.lt.s32.totalorder %v6472_v32, 3 }
 0x163   : > { %v1243_v61 = vsel %vm1237_vm0, %v1230_v58, 920167782  ;;  %v1247_v62 = vsel %vm1237_vm0, %v1233_v53, 1326507024  ;;  %v1246_v15 = vsel %vm1234_vm1, %v6486_v8, %v6493_v54  ;;  %vm1035_vm3 = vweird.f32 %v6115_v34 }
 0x164   : > { %v1025_v50 = vmul.f32 %v1024_v12, %v1020_v33  ;;  %v1032_v63 = vmul.f32 %v1031_v35, %v1020_v33  ;;  %v1149_v56 = vsub.s32 %v1145_v23, %v1148_v1  ;;  %vm1235_vm4 = vcmp.lt.s32.totalorder %v6472_v32, 2 }
 0x165   : > { %v1242_v16 = vsel %vm1234_vm1, %v6495_v39, %v6486_v8  ;;  %v1244_v40 = vsel %vm1236_vm2, %v6493_v54, %v1243_v61  ;;  %v1248_v28 = vsel %vm1236_vm2, %v1230_v58, %v1247_v62  ;;  %vm1038_vm6 = vcmp.lt.s32.totalorder %v1037_v2, 2 }
 0x166   : > { %v1026_v5 = vadd.f32 1.0, %v1025_v50  ;;  %v1033_v33 = vadd.f32 1.0, %v1032_v63  ;;  %vm1150_vm5 = vcmp.lt.s32.totalorder %v1149_v56, 0  ;;  %v1151_v18 = vsub.s32 0, %v1149_v56 }
 0x167   : > { %vm1039_vm7 = vcmp.eq.s32.totalorder %v1037_v2, 0  ;;  %vm1042_vm8 = vcmp.eq.s32.totalorder %v1037_v2, 2  ;;  %v1249_v37 = vsel %vm1235_vm4, %v1246_v15, %v1248_v28  ;;  %v1245_v60 = vsel %vm1235_vm4, %v1242_v16, %v1244_v40 }
 0x168   : > { %v1034_v29 = vmul.f32 %v1033_v33, %v1018_v24  ;;  %v1043_v20 = vxor.u32 2147483648, %v1026_v5  ;;  %v1152_v51 = vsel %vm1150_vm5, %v1151_v18, %v1149_v56  ;;  %v1253_v6 = vand.u32 65535, %v1249_v37 }
 0x169   : > { %v1153_v19 = vclz %v1152_v51  ;;  %v1252_v23 = vshrl.u32 %v6497_v13, 16  ;;  %v1254_v55 = vshrl.u32 %v1249_v37, 16  ;;  %v1141_v27 = vadd.s32 %v6448_v11, %v6440_v22 }
 0x16a   : > { %v1040_v44 = vxor.u32 2147483648, %v1034_v29  ;;  %v1251_v42 = vand.u32 65535, %v6497_v13  ;;  %v1360_v46 = vand.u32 2139095040, %v6457_v41  ;;  %v1171_v24 = vsub.s32 4, %v6491_v59 }
 0x16b   : > { %v5549_v45 = vadd.s32 4294967294, %v1153_v19  ;;  %v1218_v48 = vshrl.u32 %v5774_v4, %v6469_v25  ;;  %v1257_v57 = vmul.u32 %v1253_v6, %v1252_v23  ;;  %v1044_v58 = vsel %vm1042_vm8, %v1043_v20, %v1034_v29 }
 0x16c   : > { %v1041_v43 = vsel %vm1039_vm7, %v1026_v5, %v1040_v44  ;;  %vm1049_vm9 = vcmp.lt.s32.totalorder %v6208_v30, 0  ;;  %v1256_v52 = vmul.u32 %v1254_v55, %v1251_v42  ;;  %v1275_v22 = vand.u32 65535, %v1245_v60 }
 0x16d   : > { %v1045_v11 = vsel %vm1038_vm6, %v1041_v43, %v1044_v58  ;;  %vm5550_vm10 = vcmp.lt.s32.totalorder %v5549_v45, 0  ;;  %v1255_v3 = vmul.u32 %v1253_v6, %v1251_v42  ;;  %v1276_v38 = vshrl.u32 %v1245_v60, 16 }
 0x16e   : > { %v1046_v36 = vsel %vm1035_vm3, nan, %v1045_v11  ;;  %v1156_v53 = vsel %vm5550_vm10, 0, %v5549_v45  ;;  %v1258_v25 = vmul.u32 %v1254_v55, %v1252_v23  ;;  %v1259_v12 = vshll.u32 %v1256_v52, 16 }
 0x16f   : > { %v1157_v35 = vsub.s32 32, %v1156_v53  ;;  %v1161_v1 = vsub.s32 4294967266, %v1156_v53  ;;  %v1260_v61 = vshrl.u32 %v1256_v52, 16  ;;  %v1261_v62 = vshll.u32 %v1257_v57, 16  ;;  %5390 = vst [vmem:[%s6179_s20 + $0x18] sm:$0xff] %v1046_v36 }
 0x170   : > { %vm1263_vm11 = vc.u32 %v1255_v3, %v1259_v12  ;;  %v1265_v50 = vadd.s32 %v1259_v12, %v1255_v3  ;;  %v1278_v63 = vmul.u32 %v1276_v38, %v1251_v42  ;;  %v1279_v15 = vmul.u32 %v1275_v22, %v1252_v23 }
 0x171   : > { %v1158_v2 = vshll.u32 %v1149_v56, %v1156_v53  ;;  %v1159_v16 = vshrl.u32 %v1141_v27, %v1157_v35  ;;  %v1162_v40 = vadd.s32 127, %v1161_v1  ;;  %v1264_v28 = vsel %vm1263_vm11, 1, %v5780_v0 }
 0x172   : > { %v1266_v5 = vadd.s32 %v1264_v28, %v1258_v25  ;;  %vm1267_vm12 = vc.u32 %v1265_v50, %v1261_v62  ;;  %v1277_v34 = vmul.u32 %v1275_v22, %v1251_v42  ;;  %v1281_v33 = vshll.u32 %v1278_v63, 16 }
 0x173   : > { %v1160_v18 = vor.u32 %v1159_v16, %v1158_v2  ;;  %v1163_v37 = vshll.u32 %v1162_v40, 23  ;;  %v1268_v29 = vsel %vm1267_vm12, 1, %v5780_v0  ;;  %v1280_v20 = vmul.u32 %v1276_v38, %v1252_v23 }
 0x174   : > { %v1270_v51 = vadd.s32 %v1268_v29, %v1266_v5  ;;  %v1283_v6 = vshll.u32 %v1279_v15, 16  ;;  %vm1285_vm13 = vc.u32 %v1277_v34, %v1281_v33  ;;  %v1287_v19 = vadd.s32 %v1281_v33, %v1277_v34 }
 0x175   : > { %v1164_v60 = vor.u32 4788187, %v1163_v37  ;;  %v1172_v56 = vsel %vm1049_vm9, %v1171_v24, %v6491_v59  ;;  %v1239_v55 = vsel %vm1237_vm0, %v6493_v54, 2102212464  ;;  %v1286_v44 = vsel %vm1285_vm13, 1, %v5780_v0 }
 0x176   : > { %v1262_v27 = vshrl.u32 %v1257_v57, 16  ;;  %v1271_v42 = vadd.s32 %v1270_v51, %v1260_v61  ;;  %v1288_v45 = vadd.s32 %v1286_v44, %v1280_v20  ;;  %vm1289_vm14 = vc.u32 %v1287_v19, %v1283_v6  ;;  %v335_v57 = vpop.f32.mrf.mxu1 }
 0x177   : > { %v1165_v23 = vand.u32 2147483647, %v1164_v60  ;;  %v1167_v43 = vcvt.s32.f32 %v1160_v18  ;;  %v1290_v58 = vsel %vm1289_vm14, 1, %v5780_v0  ;;  %v1361_v52 = vshrl.u32 %v1360_v46, 23 }
 0x178   : > { %vm6553_vm15 = vcmp.le.f32.partialorder %v1047_v26, 0.7853982  ;;  %v1238_v59 = vsel %vm1234_vm1, %v1218_v48, %v6495_v39  ;;  %v1282_v54 = vshrl.u32 %v1278_v63, 16  ;;  %v1292_v24 = vadd.s32 %v1290_v58, %v1288_v45 }
 0x179   : > { %v1168_v11 = vmul.f32 %v1167_v43, %v1165_v23  ;;  %v1240_v3 = vsel %vm1236_vm2, %v6486_v8, %v1239_v55  ;;  %v1272_v38 = vadd.s32 %v1271_v42, %v1262_v27  ;;  %v5554_v46 = vadd.s32 4294967169, %v1361_v52 }
 0x17a   : > { %v1174_v26 = vsel %vm6553_vm15, 0, %v1172_v56  ;;  %v1284_v36 = vshrl.u32 %v1279_v15, 16  ;;  %v1293_v53 = vadd.s32 %v1292_v24, %v1282_v54  ;;  %v1357_v25 = vand.u32 2147483647, %v6457_v41 }
 0x17b   : > { %v1169_v12 = vxor.u32 2147483648, %v1168_v11  ;;  %v1291_v35 = vadd.s32 %v1287_v19, %v1283_v6  ;;  %v1367_v39 = vadd.s32 1, %v5554_v46  ;;  %v336_v48 = vadd.f32 %v6385_v31, %v335_v57 }
 0x17c   : > { %v6568_v1 = vmul.f32 30.0, %v6464_v49  ;;  %v1241_v8 = vsel %vm1235_vm4, %v1238_v59, %v1240_v3  ;;  %v1294_v61 = vadd.s32 %v1293_v53, %v1284_v36  ;;  %v1191_v50 = vadd.s32 3, %v1174_v26 }
 0x17d   : > { %v1170_v62 = vsel %vm1049_vm9, %v1169_v12, %v1168_v11  ;;  %vm1297_vm0 = vc.u32 %v1272_v38, %v1291_v35  ;;  %vm1368_vm1 = vcmp.gt.s32.totalorder %v1367_v39, 0  ;;  %v1364_v31 = vand.u32 8388607, %v1357_v25 }
 0x17e   : > { %v6577_v63 = vsel %vm6553_vm15, %v6208_v30, %v1170_v62  ;;  %v1298_v15 = vadd.s32 1, %v1294_v61  ;;  %v1369_v49 = vsel %vm1368_vm1, %v1367_v39, 0  ;;  %v1295_v2 = vmul.u32 %v6497_v13, %v1241_v8 }
 0x17f   : > { %v1175_v32 = vmul.f32 %v6577_v63, %v6577_v63  ;;  %v1371_v16 = vand.u32 31, %v1369_v49  ;;  %v6584_v40 = vmul.f32 30.0, %v336_v48  ;;  %v6586_v37 = vand.u32 3, %v1191_v50 }
 0x180   : > { %v1299_v28 = vsel %vm1297_vm0, %v1298_v15, %v1294_v61  ;;  %v1365_v29 = vor.u32 8388608, %v1364_v31  ;;  %v1512_v51 = vand.u32 2147483647, %v6568_v1  ;;  %v6595_v43 = vshrl.u32 %v1369_v49, 5 }
 0x181   : > { %v1176_v5 = vmul.f32 -0.001358992, %v1175_v32  ;;  %v1183_v34 = vmul.f32 -0.00019511016, %v1175_v32  ;;  %v1300_v33 = vadd.s32 %v1299_v28, %v1295_v2  ;;  %v1372_v18 = vsub.s32 32, %v1371_v16 }
 0x182   : > { %v1374_v20 = vshll.u32 %v5774_v4, %v1371_v16  ;;  %v1377_v13 = vshll.u32 %v5775_v7, %v1371_v16  ;;  %v1383_v44 = vshll.u32 %v5777_v14, %v1371_v16  ;;  %v6597_v58 = vadd.s32 %v1291_v35, %v1272_v38 }
 0x183   : > { %v1177_v6 = vadd.f32 0.041655596, %v1176_v5  ;;  %v1184_v19 = vadd.f32 0.008332121, %v1183_v34  ;;  %v1301_v60 = vadd.s32 536870912, %v1300_v33  ;;  %v1375_v56 = vshrl.u32 %v5775_v7, %v1372_v18 }
 0x184   : > { %v1378_v55 = vshrl.u32 %v5776_v9, %v1372_v18  ;;  %v1384_v27 = vshrl.u32 %v5778_v17, %v1372_v18  ;;  %v1380_v52 = vshll.u32 %v5776_v9, %v1371_v16  ;;  %v1381_v22 = vshrl.u32 %v5777_v14, %v1372_v18 }
 0x185   : > { %v1178_v42 = vmul.f32 %v1177_v6, %v1175_v32  ;;  %v1185_v45 = vmul.f32 %v1184_v19, %v1175_v32  ;;  %v1302_v23 = vshrl.u32 %v1301_v60, 30  ;;  %v6601_v59 = vshll.u32 %v1365_v29, 8 }
 0x186   : > { %vm1197_vm2 = vcmp.eq.s32.totalorder %v6586_v37, 2  ;;  %vm1204_vm3 = vcmp.lt.s32.totalorder %v6368_v10, 0  ;;  %v1386_v11 = vshll.u32 %v5778_v17, %v1371_v16  ;;  %vm1194_vm4 = vcmp.eq.s32.totalorder %v6586_v37, 0 }
 0x187   : > { %v1179_v54 = vadd.f32 -0.4999988, %v1178_v42  ;;  %v1186_v24 = vadd.f32 -0.16666654, %v1185_v45  ;;  %v1303_v57 = vshll.u32 %v1302_v23, 30  ;;  %v1376_v3 = vor.u32 %v1375_v56, %v1374_v20 }
 0x188   : > { %v6607_v38 = vor.u32 %v1378_v55, %v1377_v13  ;;  %v1385_v46 = vor.u32 %v1384_v27, %v1383_v44  ;;  %v1387_v26 = vshrl.u32 %v5779_v21, %v1372_v18  ;;  %vm1193_vm5 = vcmp.lt.s32.totalorder %v6586_v37, 2 }
 0x189   : > { %v1180_v36 = vmul.f32 %v1179_v54, %v1175_v32  ;;  %v1187_v53 = vmul.f32 %v1186_v24, %v1175_v32  ;;  %v1304_v12 = vsub.s32 %v1300_v33, %v1303_v57  ;;  %vm1389_vm6 = vcmp.lt.s32.totalorder %v6595_v43, 1 }
 0x18a   : > { %vm1190_vm7 = vweird.f32 %v6208_v30  ;;  %vm6615_vm8 = vcmp.le.f32.partialorder %v1202_v47, 0.7853982  ;;  %v1382_v39 = vor.u32 %v1381_v22, %v1380_v52  ;;  %vm1391_vm9 = vcmp.lt.s32.totalorder %v6595_v43, 3 }
 0x18b   : > { %vm1392_vm10 = vcmp.lt.s32.totalorder %v6595_v43, 4  ;;  %v1515_v48 = vand.u32 2139095040, %v6568_v1  ;;  %v1181_v8 = vadd.f32 1.0, %v1180_v36  ;;  %v1188_v61 = vadd.f32 1.0, %v1187_v53 }
 0x18c   : > { %vm1305_vm11 = vcmp.lt.s32.totalorder %v1304_v12, 0  ;;  %v1306_v62 = vsub.s32 0, %v1304_v12  ;;  %v1326_v50 = vsub.s32 4, %v1302_v23  ;;  %v1397_v15 = vsel %vm1389_vm6, %v1376_v3, %v6607_v38 }
 0x18d   : > { %v1398_v47 = vsel %vm1392_vm10, %v1385_v46, 920167782  ;;  %v1406_v31 = vand.u32 65535, %v6601_v59  ;;  %v1189_v49 = vmul.f32 %v1188_v61, %v6577_v63  ;;  %v1198_v32 = vxor.u32 2147483648, %v1181_v8 }
 0x18e   : > { %v1307_v2 = vsel %vm1305_vm11, %v1306_v62, %v1304_v12  ;;  %v1388_v16 = vor.u32 %v1387_v26, %v1386_v11  ;;  %vm1390_vm12 = vcmp.lt.s32.totalorder %v6595_v43, 2  ;;  %v1399_v5 = vsel %vm1391_vm9, %v1382_v39, %v1398_v47 }
 0x18f   : > { %v1308_v28 = vclz %v1307_v2  ;;  %v1516_v34 = vshrl.u32 %v1515_v48, 23  ;;  %v1195_v33 = vxor.u32 2147483648, %v1189_v49  ;;  %v1373_v29 = vshrl.u32 %v5774_v4, %v1372_v18 }
 0x190   : > { %v1400_v20 = vsel %vm1390_vm12, %v1397_v15, %v1399_v5  ;;  %v1407_v6 = vshrl.u32 %v6601_v59, 16  ;;  %v1199_v63 = vsel %vm1197_vm2, %v1198_v32, %v1189_v49  ;;  %v1327_v60 = vsel %vm1204_vm3, %v1326_v50, %v1302_v23 }
 0x191   : > { %v5552_v19 = vadd.s32 4294967294, %v1308_v28  ;;  %v1401_v13 = vsel %vm1389_vm6, %v6607_v38, %v1382_v39  ;;  %v1196_v56 = vsel %vm1194_vm4, %v1181_v8, %v1195_v33  ;;  %v1402_v18 = vsel %vm1392_vm10, %v1388_v16, 1326507024 }
 0x192   : > { %v1430_v55 = vand.u32 65535, %v1400_v20  ;;  %v1431_v44 = vshrl.u32 %v1400_v20, 16  ;;  %v1200_v27 = vsel %vm1193_vm5, %v1196_v56, %v1199_v63  ;;  %v1403_v42 = vsel %vm1391_vm9, %v1385_v46, %v1402_v18 }
 0x193   : > { %vm5553_vm13 = vcmp.lt.s32.totalorder %v5552_v19, 0  ;;  %v5557_v45 = vadd.s32 4294967169, %v1516_v34  ;;  %v1201_v23 = vsel %vm1190_vm7, nan, %v1200_v27  ;;  %v1329_v22 = vsel %vm6615_vm8, 0, %v1327_v60 }
 0x194   : > { %v1311_v52 = vsel %vm5553_vm13, 0, %v5552_v19  ;;  %v1404_v54 = vsel %vm1390_vm12, %v1401_v13, %v1403_v42  ;;  %v1394_v37 = vsel %vm1392_vm10, %v1382_v39, 2102212464  ;;  %5391 = vst [vmem:[%s6179_s20 + $0x20] sm:$0xff] %v1201_v23  ;;  %v1393_v46 = vsel %vm1389_vm6, %v1373_v29, %v1376_v3 }
 0x195   : > { %v1312_v24 = vsub.s32 32, %v1311_v52  ;;  %v1316_v57 = vsub.s32 4294967266, %v1311_v52  ;;  %v1408_v11 = vand.u32 65535, %v1404_v54  ;;  %v1409_v26 = vshrl.u32 %v1404_v54, 16 }
 0x196   : > { %v1433_v30 = vmul.u32 %v1431_v44, %v1406_v31  ;;  %v1434_v36 = vmul.u32 %v1430_v55, %v1407_v6  ;;  %v1313_v53 = vshll.u32 %v1304_v12, %v1311_v52  ;;  %v1395_v62 = vsel %vm1391_vm9, %v6607_v38, %v1394_v37 }
 0x197   : > { %v1314_v48 = vshrl.u32 %v6597_v58, %v1312_v24  ;;  %v1317_v8 = vadd.s32 127, %v1316_v57  ;;  %v1412_v61 = vmul.u32 %v1408_v11, %v1407_v6  ;;  %v1411_v50 = vmul.u32 %v1409_v26, %v1406_v31 }
 0x198   : > { %v1432_v15 = vmul.u32 %v1430_v55, %v1406_v31  ;;  %v1436_v39 = vshll.u32 %v1433_v30, 16  ;;  %v1410_v32 = vmul.u32 %v1408_v11, %v1406_v31  ;;  %v1435_v2 = vmul.u32 %v1431_v44, %v1407_v6 }
 0x199   : > { %v1315_v47 = vor.u32 %v1314_v48, %v1313_v53  ;;  %v1318_v49 = vshll.u32 %v1317_v8, 23  ;;  %v1413_v3 = vmul.u32 %v1409_v26, %v1407_v6  ;;  %v1414_v16 = vshll.u32 %v1411_v50, 16 }
 0x19a   : > { %v1416_v28 = vshll.u32 %v1412_v61, 16  ;;  %v1438_v5 = vshll.u32 %v1434_v36, 16  ;;  %vm1440_vm14 = vc.u32 %v1432_v15, %v1436_v39  ;;  %v1442_v58 = vadd.s32 %v1436_v39, %v1432_v15 }
 0x19b   : > { %v1319_v12 = vor.u32 4788187, %v1318_v49  ;;  %v1322_v34 = vcvt.s32.f32 %v1315_v47  ;;  %vm1418_vm15 = vc.u32 %v1410_v32, %v1414_v16  ;;  %v1420_v33 = vadd.s32 %v1414_v16, %v1410_v32 }
 0x19c   : > { %v1441_v29 = vsel %vm1440_vm14, 1, %v5780_v0  ;;  %v1522_v38 = vadd.s32 1, %v5557_v45  ;;  %v1419_v63 = vsel %vm1418_vm15, 1, %v5780_v0  ;;  %vm1444_vm0 = vc.u32 %v1442_v58, %v1438_v5 }
 0x19d   : > { %v1320_v20 = vand.u32 2147483647, %v1319_v12  ;;  %v1443_v19 = vadd.s32 %v1441_v29, %v1435_v2  ;;  %v1421_v31 = vadd.s32 %v1419_v63, %v1413_v3  ;;  %vm1422_vm1 = vc.u32 %v1420_v33, %v1416_v28 }
 0x19e   : > { %v1437_v6 = vshrl.u32 %v1433_v30, 16  ;;  %v1445_v60 = vsel %vm1444_vm0, 1, %v5780_v0  ;;  %v1423_v56 = vsel %vm1422_vm1, 1, %v5780_v0  ;;  %vm1523_vm2 = vcmp.gt.s32.totalorder %v1522_v38, 0 }
 0x19f   : > { %v1323_v13 = vmul.f32 %v1322_v34, %v1320_v20  ;;  %v1447_v18 = vadd.s32 %v1445_v60, %v1443_v19  ;;  %v1346_v55 = vadd.s32 3, %v1329_v22  ;;  %v1415_v44 = vshrl.u32 %v1411_v50, 16 }
 0x1a0   : > { %v1425_v27 = vadd.s32 %v1423_v56, %v1421_v31  ;;  %v1524_v42 = vsel %vm1523_vm2, %v1522_v38, 0  ;;  %v1439_v23 = vshrl.u32 %v1434_v36, 16  ;;  %v1396_v24 = vsel %vm1390_vm12, %v1393_v46, %v1395_v62 }
 0x1a1   : > { %v1324_v45 = vxor.u32 2147483648, %v1323_v13  ;;  %v1448_v52 = vadd.s32 %v1447_v18, %v1437_v6  ;;  %v1526_v54 = vand.u32 31, %v1524_v42  ;;  %v1417_v57 = vshrl.u32 %v1412_v61, 16 }
 0x1a2   : > { %v1426_v37 = vadd.s32 %v1425_v27, %v1415_v44  ;;  %v1670_v11 = vand.u32 2139095040, %v6584_v40  ;;  %v1519_v22 = vand.u32 8388607, %v1512_v51  ;;  %v6684_v43 = vand.u32 3, %v1346_v55 }
 0x1a3   : > { %v1325_v26 = vsel %vm1204_vm3, %v1324_v45, %v1323_v13  ;;  %v1449_v30 = vadd.s32 %v1448_v52, %v1439_v23  ;;  %v6677_v53 = vsub.s32 32, %v1526_v54  ;;  %v6688_v48 = vadd.s32 %v1442_v58, %v1438_v5 }
 0x1a4   : > { %v6682_v36 = vsel %vm6615_vm8, %v6368_v10, %v1325_v26  ;;  %v6686_v46 = vadd.s32 %v1426_v37, %v1417_v57  ;;  %v1450_v61 = vmul.u32 %v6601_v59, %v1396_v24  ;;  %v1529_v35 = vshll.u32 %v5774_v4, %v1526_v54 }
 0x1a5   : > { %v1330_v8 = vmul.f32 %v6682_v36, %v6682_v36  ;;  %v1453_v62 = vadd.s32 1, %v1449_v30  ;;  %v1530_v50 = vshrl.u32 %v5775_v7, %v6677_v53  ;;  %v1533_v15 = vshrl.u32 %v5776_v9, %v6677_v53 }
 0x1a6   : > { %vm1452_vm3 = vc.u32 %v6686_v46, %v6688_v48  ;;  %v1536_v39 = vshrl.u32 %v5777_v14, %v6677_v53  ;;  %v6702_v2 = vshrl.u32 %v1524_v42, 5  ;;  %v1532_v16 = vshll.u32 %v5775_v7, %v1526_v54 }
 0x1a7   : > { %v1331_v47 = vmul.f32 -0.001358992, %v1330_v8  ;;  %v1338_v49 = vmul.f32 -0.00019511016, %v1330_v8  ;;  %v1454_v32 = vsel %vm1452_vm3, %v1453_v62, %v1449_v30  ;;  %v6704_v3 = vor.u32 %v1530_v50, %v1529_v35 }
 0x1a8   : > { %v1455_v59 = vadd.s32 %v1454_v32, %v1450_v61  ;;  %v1535_v28 = vshll.u32 %v5776_v9, %v1526_v54  ;;  %v1538_v34 = vshll.u32 %v5777_v14, %v1526_v54  ;;  %v1539_v58 = vshrl.u32 %v5778_v17, %v6677_v53 }
 0x1a9   : > { %v1332_v5 = vadd.f32 0.041655596, %v1331_v47  ;;  %v1339_v12 = vadd.f32 0.008332121, %v1338_v49  ;;  %v6711_v29 = vor.u32 %v1533_v15, %v1532_v16  ;;  %v1542_v20 = vshrl.u32 %v5779_v21, %v6677_v53 }
 0x1aa   : > { %v1456_v33 = vadd.s32 536870912, %v1455_v59  ;;  %v1537_v38 = vor.u32 %v1536_v39, %v1535_v28  ;;  %v1540_v31 = vor.u32 %v1539_v58, %v1538_v34  ;;  %v1541_v6 = vshll.u32 %v5778_v17, %v1526_v54 }
 0x1ab   : > { %v1333_v63 = vmul.f32 %v1332_v5, %v1330_v8  ;;  %v1340_v19 = vmul.f32 %v1339_v12, %v1330_v8  ;;  %v1520_v13 = vor.u32 8388608, %v1519_v22  ;;  %v1667_v56 = vand.u32 2147483647, %v6584_v40 }
 0x1ac   : > { %v6716_v60 = vshrl.u32 %v1456_v33, 30  ;;  %v1671_v18 = vshrl.u32 %v1670_v11, 23  ;;  %v1543_v27 = vor.u32 %v1542_v20, %v1541_v6  ;;  %vm1547_vm4 = vcmp.lt.s32.totalorder %v6702_v2, 4 }
 0x1ad   : > { %v1334_v55 = vadd.f32 -0.4999988, %v1333_v63  ;;  %v1341_v44 = vadd.f32 -0.16666654, %v1340_v19  ;;  %vm1544_vm5 = vcmp.lt.s32.totalorder %v6702_v2, 1  ;;  %vm1546_vm6 = vcmp.lt.s32.totalorder %v6702_v2, 3 }
 0x1ae   : > { %v1458_v42 = vshll.u32 %v6716_v60, 30  ;;  %v1553_v45 = vsel %vm1547_vm4, %v1540_v31, 920167782  ;;  %vm1348_vm7 = vcmp.lt.s32.totalorder %v6684_v43, 2  ;;  %v1552_v54 = vsel %vm1544_vm5, %v6704_v3, %v6711_v29 }
 0x1af   : > { %v1335_v23 = vmul.f32 %v1334_v55, %v1330_v8  ;;  %v1342_v52 = vmul.f32 %v1341_v44, %v1330_v8  ;;  %v1554_v24 = vsel %vm1546_vm6, %v1537_v38, %v1553_v45  ;;  %vm1345_vm8 = vweird.f32 %v6368_v10 }
 0x1b0   : > { %vm1349_vm9 = vcmp.eq.s32.totalorder %v6684_v43, 0  ;;  %v1459_v57 = vsub.s32 %v1455_v59, %v1458_v42  ;;  %v1556_v37 = vsel %vm1544_vm5, %v6711_v29, %v1537_v38  ;;  %v6737_v11 = vshll.u32 %v1520_v13, 8 }
 0x1b1   : > { %v1336_v26 = vadd.f32 1.0, %v1335_v23  ;;  %v1343_v30 = vadd.f32 1.0, %v1342_v52  ;;  %vm1545_vm10 = vcmp.lt.s32.totalorder %v6702_v2, 2  ;;  %v1557_v22 = vsel %vm1547_vm4, %v1543_v27, 1326507024 }
 0x1b2   : > { %vm1460_vm11 = vcmp.lt.s32.totalorder %v1459_v57, 0  ;;  %v1461_v8 = vsub.s32 0, %v1459_v57  ;;  %v1555_v61 = vsel %vm1545_vm10, %v1552_v54, %v1554_v24  ;;  %v1558_v62 = vsel %vm1546_vm6, %v1540_v31, %v1557_v22 }
 0x1b3   : > { %v1344_v50 = vmul.f32 %v1343_v30, %v6682_v36  ;;  %vm1352_vm12 = vcmp.eq.s32.totalorder %v6684_v43, 2  ;;  %v1353_v35 = vxor.u32 2147483648, %v1336_v26  ;;  %v1559_v15 = vsel %vm1545_vm10, %v1556_v37, %v1558_v62 }
 0x1b4   : > { %v1462_v39 = vsel %vm1460_vm11, %v1461_v8, %v1459_v57  ;;  %v1561_v47 = vand.u32 65535, %v6737_v11  ;;  %v1563_v49 = vand.u32 65535, %v1559_v15  ;;  %v1564_v32 = vshrl.u32 %v1559_v15, 16 }
 0x1b5   : > { %v1350_v59 = vxor.u32 2147483648, %v1344_v50  ;;  %v1463_v16 = vclz %v1462_v39  ;;  %v1562_v28 = vshrl.u32 %v6737_v11, 16  ;;  %v1586_v5 = vshrl.u32 %v1555_v61, 16 }
 0x1b6   : > { %v1354_v12 = vsel %vm1352_vm12, %v1353_v35, %v1344_v50  ;;  %v1528_v36 = vshrl.u32 %v5774_v4, %v6677_v53  ;;  %v1585_v34 = vand.u32 65535, %v1555_v61  ;;  %v5560_v58 = vadd.s32 4294967169, %v1671_v18 }
 0x1b7   : > { %v1351_v33 = vsel %vm1349_vm9, %v1336_v26, %v1350_v59  ;;  %v5555_v20 = vadd.s32 4294967294, %v1463_v16  ;;  %v1566_v63 = vmul.u32 %v1564_v32, %v1561_v47  ;;  %v1567_v19 = vmul.u32 %v1563_v49, %v1562_v28 }
 0x1b8   : > { %v1355_v31 = vsel %vm1348_vm7, %v1351_v33, %v1354_v12  ;;  %v1451_v6 = vadd.s32 %v6688_v48, %v6686_v46  ;;  %v1549_v13 = vsel %vm1547_vm4, %v1537_v38, 2102212464  ;;  %v1588_v55 = vmul.u32 %v1586_v5, %v1561_v47 }
 0x1b9   : > { %v1356_v53 = vsel %vm1345_vm8, nan, %v1355_v31  ;;  %vm1359_vm13 = vcmp.lt.s32.totalorder %v6457_v41, 0  ;;  %vm5556_vm14 = vcmp.lt.s32.totalorder %v5555_v20, 0  ;;  %v1565_v18 = vmul.u32 %v1563_v49, %v1561_v47 }
 0x1ba   : > { %v1569_v44 = vshll.u32 %v1566_v63, 16  ;;  %v1466_v27 = vsel %vm5556_vm14, 0, %v5555_v20  ;;  %v1481_v42 = vsub.s32 4, %v6716_v60  ;;  %v1568_v43 = vmul.u32 %v1564_v32, %v1562_v28  ;;  %5392 = vst [vmem:[%s6179_s20 + $0x28] sm:$0xff] %v1356_v53 }
 0x1bb   : > { %v1587_v45 = vmul.u32 %v1585_v34, %v1561_v47  ;;  %v1467_v23 = vsub.s32 32, %v1466_v27  ;;  %v1471_v46 = vsub.s32 4294967266, %v1466_v27  ;;  %v1571_v48 = vshll.u32 %v1567_v19, 16 }
 0x1bc   : > { %vm1573_vm15 = vc.u32 %v1565_v18, %v1569_v44  ;;  %v1575_v52 = vadd.s32 %v1569_v44, %v1565_v18  ;;  %v1589_v10 = vmul.u32 %v1585_v34, %v1562_v28  ;;  %v1591_v54 = vshll.u32 %v1588_v55, 16 }
 0x1bd   : > { %v1574_v38 = vsel %vm1573_vm15, 1, %v5780_v0  ;;  %v1468_v24 = vshll.u32 %v1459_v57, %v1466_v27  ;;  %v1469_v37 = vshrl.u32 %v1451_v6, %v1467_v23  ;;  %v1472_v26 = vadd.s32 127, %v1471_v46 }
 0x1be   : > { %v1576_v30 = vadd.s32 %v1574_v38, %v1568_v43  ;;  %v1570_v22 = vshrl.u32 %v1566_v63, 16  ;;  %vm1577_vm0 = vc.u32 %v1575_v52, %v1571_v48  ;;  %v1590_v8 = vmul.u32 %v1586_v5, %v1562_v28 }
 0x1bf   : > { %vm1595_vm1 = vc.u32 %v1587_v45, %v1591_v54  ;;  %v1470_v61 = vor.u32 %v1469_v37, %v1468_v24  ;;  %v1473_v62 = vshll.u32 %v1472_v26, 23  ;;  %v1578_v50 = vsel %vm1577_vm0, 1, %v5780_v0 }
 0x1c0   : > { %v1596_v35 = vsel %vm1595_vm1, 1, %v5780_v0  ;;  %v1580_v15 = vadd.s32 %v1578_v50, %v1576_v30  ;;  %v1593_v39 = vshll.u32 %v1589_v10, 16  ;;  %v1597_v47 = vadd.s32 %v1591_v54, %v1587_v45  ;;  %v337_v50 = vpop.f32.mrf.mxu1 }
 0x1c1   : > { %v1598_v49 = vadd.s32 %v1596_v35, %v1590_v8  ;;  %v1474_v32 = vor.u32 4788187, %v1473_v62  ;;  %v1548_v57 = vsel %vm1544_vm5, %v1528_v36, %v6704_v3  ;;  %v1550_v59 = vsel %vm1546_vm6, %v6711_v29, %v1549_v13 }
 0x1c2   : > { %v1677_v16 = vadd.s32 1, %v5560_v58  ;;  %v1482_v28 = vsel %vm1359_vm13, %v1481_v42, %v6716_v60  ;;  %v1572_v5 = vshrl.u32 %v1567_v19, 16  ;;  %v1581_v12 = vadd.s32 %v1580_v15, %v1570_v22 }
 0x1c3   : > { %vm1599_vm2 = vc.u32 %v1597_v47, %v1593_v39  ;;  %v1475_v34 = vand.u32 2147483647, %v1474_v32  ;;  %v1477_v33 = vcvt.s32.f32 %v1470_v61  ;;  %v1592_v3 = vshrl.u32 %v1588_v55, 16 }
 0x1c4   : > { %v1600_v20 = vsel %vm1599_vm2, 1, %v5780_v0  ;;  %vm1678_vm3 = vcmp.gt.s32.totalorder %v1677_v16, 0  ;;  %v6780_v63 = vadd.s32 %v1581_v12, %v1572_v5  ;;  %vm6784_vm4 = vcmp.le.f32.partialorder %v1357_v25, 0.7853982 }
 0x1c5   : > { %v1602_v36 = vadd.s32 %v1600_v20, %v1598_v49  ;;  %v1679_v31 = vsel %vm1678_vm3, %v1677_v16, 0  ;;  %v1478_v60 = vmul.f32 %v1477_v33, %v1475_v34  ;;  %v1551_v58 = vsel %vm1545_vm10, %v1548_v57, %v1550_v59  ;;  %v6833_v16 = vld [vmem:[%s9382_s2] ss:$0 sm:$0xff] }
 0x1c6   : > { %v1681_v19 = vand.u32 31, %v1679_v31  ;;  %v1484_v6 = vsel %vm6784_vm4, 0, %v1482_v28  ;;  %v1594_v13 = vshrl.u32 %v1589_v10, 16  ;;  %v6792_v53 = vadd.s32 %v1597_v47, %v1593_v39 }
 0x1c7   : > { %v1603_v55 = vadd.s32 %v1602_v36, %v1592_v3  ;;  %v1479_v18 = vxor.u32 2147483648, %v1478_v60  ;;  %v1674_v44 = vand.u32 8388607, %v1667_v56  ;;  %v6796_v25 = vshrl.u32 %v1679_v31, 5 }
 0x1c8   : > { %v6798_v27 = vsub.s32 32, %v1681_v19  ;;  %vm1607_vm5 = vc.u32 %v6780_v63, %v6792_v53  ;;  %v1687_v2 = vshll.u32 %v5775_v7, %v1681_v19  ;;  %v1690_v43 = vshll.u32 %v5776_v9, %v1681_v19 }
 0x1c9   : > { %v1604_v42 = vadd.s32 %v1603_v55, %v1594_v13  ;;  %v1480_v45 = vsel %vm1359_vm13, %v1479_v18, %v1478_v60  ;;  %v1693_v46 = vshll.u32 %v5777_v14, %v1681_v19  ;;  %v1696_v48 = vshll.u32 %v5778_v17, %v1681_v19 }
 0x1ca   : > { %v1688_v23 = vshrl.u32 %v5776_v9, %v6798_v27  ;;  %v1483_v38 = vsel %vm6784_vm4, %v6457_v41, %v1480_v45  ;;  %v1691_v10 = vshrl.u32 %v5777_v14, %v6798_v27  ;;  %v1694_v54 = vshrl.u32 %v5778_v17, %v6798_v27 }
 0x1cb   : > { %v1608_v52 = vadd.s32 1, %v1604_v42  ;;  %v1485_v24 = vmul.f32 %v1483_v38, %v1483_v38  ;;  %v1605_v37 = vmul.u32 %v6737_v11, %v1551_v58  ;;  %v1684_v26 = vshll.u32 %v5774_v4, %v1681_v19 }
 0x1cc   : > { %v1697_v30 = vshrl.u32 %v5779_v21, %v6798_v27  ;;  %v1685_v8 = vshrl.u32 %v5775_v7, %v6798_v27  ;;  %v6823_v61 = vor.u32 %v1688_v23, %v1687_v2  ;;  %v6825_v62 = vor.u32 %v1691_v10, %v1690_v43 }
 0x1cd   : > { %v1609_v22 = vsel %vm1607_vm5, %v1608_v52, %v1604_v42  ;;  %v1486_v35 = vmul.f32 -0.001358992, %v1485_v24  ;;  %v1493_v15 = vmul.f32 -0.00019511016, %v1485_v24  ;;  %v1675_v49 = vor.u32 8388608, %v1674_v44 }
 0x1ce   : > { %v1610_v39 = vadd.s32 %v1609_v22, %v1605_v37  ;;  %v1698_v47 = vor.u32 %v1697_v30, %v1696_v48  ;;  %v1695_v11 = vor.u32 %v1694_v54, %v1693_v46  ;;  %vm1699_vm6 = vcmp.lt.s32.totalorder %v6796_v25, 1 }
 0x1cf   : > { %vm1702_vm7 = vcmp.lt.s32.totalorder %v6796_v25, 4  ;;  %v1487_v32 = vadd.f32 0.041655596, %v1486_v35  ;;  %v1494_v57 = vadd.f32 0.008332121, %v1493_v15  ;;  %vm1701_vm8 = vcmp.lt.s32.totalorder %v6796_v25, 3 }
 0x1d0   : > { %v1611_v59 = vadd.s32 536870912, %v1610_v39  ;;  %v338_v28 = vadd.f32 %v6833_v16, %v337_v50  ;;  %v1501_v5 = vadd.s32 3, %v1484_v6  ;;  %v6836_v12 = vor.u32 %v1685_v8, %v1684_v26 }
 0x1d1   : > { %v1712_v34 = vsel %vm1702_vm7, %v1698_v47, 1326507024  ;;  %v1488_v33 = vmul.f32 %v1487_v32, %v1485_v24  ;;  %v1495_v20 = vmul.f32 %v1494_v57, %v1485_v24  ;;  %v1711_v36 = vsel %vm1699_vm6, %v6823_v61, %v6825_v62 }
 0x1d2   : > { %v6840_v3 = vshrl.u32 %v1611_v59, 30  ;;  %v1708_v31 = vsel %vm1702_vm7, %v1695_v11, 920167782  ;;  %v1713_v29 = vsel %vm1701_vm8, %v1695_v11, %v1712_v34  ;;  %v6850_v60 = vshll.u32 %v1675_v49, 8 }
 0x1d3   : > { %v1489_v58 = vadd.f32 -0.4999988, %v1488_v33  ;;  %v1496_v19 = vadd.f32 -0.16666654, %v1495_v20  ;;  %vm1700_vm9 = vcmp.lt.s32.totalorder %v6796_v25, 2  ;;  %v6854_v13 = vmul.f32 30.0, %v338_v28 }
 0x1d4   : > { %v1613_v6 = vshll.u32 %v6840_v3, 30  ;;  %v1502_v55 = vand.u32 3, %v1501_v5  ;;  %v1707_v18 = vsel %vm1699_vm6, %v6836_v12, %v6823_v61  ;;  %v1714_v44 = vsel %vm1700_vm9, %v1711_v36, %v1713_v29 }
 0x1d5   : > { %v1490_v42 = vmul.f32 %v1489_v58, %v1485_v24  ;;  %v1497_v2 = vmul.f32 %v1496_v19, %v1485_v24  ;;  %v1709_v45 = vsel %vm1701_vm8, %v6825_v62, %v1708_v31  ;;  %v1716_v23 = vand.u32 65535, %v6850_v60 }
 0x1d6   : > { %v1614_v43 = vsub.s32 %v1610_v39, %v1613_v6  ;;  %v1717_v46 = vshrl.u32 %v6850_v60, 16  ;;  %v1718_v48 = vand.u32 65535, %v1714_v44  ;;  %v1719_v52 = vshrl.u32 %v1714_v44, 16 }
 0x1d7   : > { %v1491_v10 = vadd.f32 1.0, %v1490_v42  ;;  %v1498_v54 = vadd.f32 1.0, %v1497_v2  ;;  %vm1500_vm11 = vweird.f32 %v6457_v41  ;;  %v1710_v24 = vsel %vm1700_vm9, %v1707_v18, %v1709_v45 }
 0x1d8   : > { %vm1615_vm10 = vcmp.lt.s32.totalorder %v1614_v43, 0  ;;  %v1616_v37 = vsub.s32 0, %v1614_v43  ;;  %v1721_v26 = vmul.u32 %v1719_v52, %v1716_v23  ;;  %v6870_v30 = vmul.u32 %v1718_v48, %v1717_v46 }
 0x1d9   : > { %v1499_v22 = vmul.f32 %v1498_v54, %v1483_v38  ;;  %vm1503_vm12 = vcmp.lt.s32.totalorder %v1502_v55, 2  ;;  %v1508_v8 = vxor.u32 2147483648, %v1491_v10  ;;  %vm1504_vm13 = vcmp.eq.s32.totalorder %v1502_v55, 0 }
 0x1da   : > { %v1617_v50 = vsel %vm1615_vm10, %v1616_v37, %v1614_v43  ;;  %vm1507_vm14 = vcmp.eq.s32.totalorder %v1502_v55, 2  ;;  %v1724_v15 = vshll.u32 %v1721_v26, 16  ;;  %v1683_v47 = vshrl.u32 %v5774_v4, %v6798_v27 }
 0x1db   : > { %v1618_v35 = vclz %v1617_v50  ;;  %v1505_v39 = vxor.u32 2147483648, %v1499_v22  ;;  %v1720_v49 = vmul.u32 %v1718_v48, %v1716_v23  ;;  %v1740_v11 = vand.u32 65535, %v1710_v24 }
 0x1dc   : > { %v1509_v32 = vsel %vm1507_vm14, %v1508_v8, %v1499_v22  ;;  %v1723_v59 = vmul.u32 %v1719_v52, %v1717_v46  ;;  %v1726_v28 = vshll.u32 %v6870_v30, 16  ;;  %v1741_v34 = vshrl.u32 %v1710_v24, 16 }
 0x1dd   : > { %v5558_v57 = vadd.s32 4294967294, %v1618_v35  ;;  %v1506_v5 = vsel %vm1504_vm13, %v1491_v10, %v1505_v39  ;;  %vm1728_vm15 = vc.u32 %v1720_v49, %v1724_v15  ;;  %v1730_v38 = vadd.s32 %v1724_v15, %v1720_v49 }
 0x1de   : > { %v1510_v33 = vsel %vm1503_vm12, %v1506_v5, %v1509_v32  ;;  %vm1514_vm0 = vcmp.lt.s32.totalorder %v6568_v1, 0  ;;  %v1606_v20 = vadd.s32 %v6792_v53, %v6780_v63  ;;  %v1729_v27 = vsel %vm1728_vm15, 1, %v5780_v0  ;;  %v340_v5 = vpop.f32.mrf.mxu1 }
 0x1df   : > { %vm5559_vm1 = vcmp.lt.s32.totalorder %v5558_v57, 0  ;;  %v1511_v36 = vsel %vm1500_vm11, nan, %v1510_v33  ;;  %v1731_v29 = vadd.s32 %v1729_v27, %v1723_v59  ;;  %vm1732_vm2 = vc.u32 %v1730_v38, %v1726_v28 }
 0x1e0   : > { %v1621_v31 = vsel %vm5559_vm1, 0, %v5558_v57  ;;  %v1704_v6 = vsel %vm1702_vm7, %v6825_v62, 2102212464  ;;  %v1733_v55 = vsel %vm1732_vm2, 1, %v5780_v0  ;;  %5393 = vst [vmem:[%s6179_s20 + $0x30] sm:$0xff] %v1511_v36  ;;  %v1703_v53 = vsel %vm1699_vm6, %v1683_v47, %v6836_v12 }
 0x1e1   : > { %v1622_v58 = vsub.s32 32, %v1621_v31  ;;  %v1626_v19 = vsub.s32 4294967266, %v1621_v31  ;;  %vm6889_vm3 = vcmp.le.f32.partialorder %v1512_v51, 0.7853982  ;;  %v1623_v41 = vshll.u32 %v1614_v43, %v1621_v31 }
 0x1e2   : > { %v1743_v18 = vmul.u32 %v1741_v34, %v1716_v23  ;;  %v1744_v44 = vmul.u32 %v1740_v11, %v1717_v46  ;;  %v1735_v45 = vadd.s32 %v1733_v55, %v1731_v29  ;;  %v1825_v62 = vand.u32 2139095040, %v6854_v13 }
 0x1e3   : > { %v1624_v42 = vshrl.u32 %v1606_v20, %v1622_v58  ;;  %v1627_v2 = vadd.s32 127, %v1626_v19  ;;  %v1636_v48 = vsub.s32 4, %v6840_v3  ;;  %v1705_v51 = vsel %vm1701_vm8, %v6823_v61, %v1704_v6 }
 0x1e4   : > { %v1742_v52 = vmul.u32 %v1740_v11, %v1716_v23  ;;  %v1746_v10 = vshll.u32 %v1743_v18, 16  ;;  %v1725_v37 = vshrl.u32 %v1721_v26, 16  ;;  %v1826_v24 = vshrl.u32 %v1825_v62, 23 }
 0x1e5   : > { %v1625_v43 = vor.u32 %v1624_v42, %v1623_v41  ;;  %v1628_v54 = vshll.u32 %v1627_v2, 23  ;;  %v1745_v12 = vmul.u32 %v1741_v34, %v1717_v46  ;;  %v1748_v22 = vshll.u32 %v1744_v44, 16 }
 0x1e6   : > { %vm1750_vm4 = vc.u32 %v1742_v52, %v1746_v10  ;;  %v1752_v8 = vadd.s32 %v1746_v10, %v1742_v52  ;;  %v1736_v35 = vadd.s32 %v1735_v45, %v1725_v37  ;;  %v5563_v39 = vadd.s32 4294967169, %v1826_v24 }
 0x1e7   : > { %v1629_v50 = vor.u32 4788187, %v1628_v54  ;;  %v1751_v15 = vsel %vm1750_vm4, 1, %v5780_v0  ;;  %v1637_v47 = vsel %vm1514_vm0, %v1636_v48, %v6840_v3  ;;  %v1727_v61 = vshrl.u32 %v6870_v30, 16 }
 0x1e8   : > { %v1753_v23 = vadd.s32 %v1751_v15, %v1745_v12  ;;  %vm1754_vm5 = vc.u32 %v1752_v8, %v1748_v22  ;;  %v1632_v26 = vcvt.s32.f32 %v1625_v43  ;;  %v1832_v11 = vadd.s32 1, %v5563_v39 }
 0x1e9   : > { %v1630_v49 = vand.u32 2147483647, %v1629_v50  ;;  %v1755_v46 = vsel %vm1754_vm5, 1, %v5780_v0  ;;  %v1706_v32 = vsel %vm1700_vm9, %v1703_v53, %v1705_v51  ;;  %v1747_v57 = vshrl.u32 %v1743_v18, 16 }
 0x1ea   : > { %v1757_v59 = vadd.s32 %v1755_v46, %v1753_v23  ;;  %v1822_v28 = vand.u32 2147483647, %v6854_v13  ;;  %v1639_v3 = vsel %vm6889_vm3, 0, %v1637_v47  ;;  %v6912_v30 = vadd.s32 %v1736_v35, %v1727_v61 }
 0x1eb   : > { %v1633_v38 = vmul.f32 %v1632_v26, %v1630_v49  ;;  %vm1833_vm6 = vcmp.gt.s32.totalorder %v1832_v11, 0  ;;  %v1749_v34 = vshrl.u32 %v1744_v44, 16  ;;  %v6914_v36 = vadd.s32 %v1752_v8, %v1748_v22 }
 0x1ec   : > { %v1758_v33 = vadd.s32 %v1757_v59, %v1747_v57  ;;  %v1834_v20 = vsel %vm1833_vm6, %v1832_v11, 0  ;;  %v341_v31 = vadd.f32 %v6833_v16, %v340_v5  ;;  %v1656_v29 = vadd.s32 3, %v1639_v3 }
 0x1ed   : > { %v1634_v27 = vxor.u32 2147483648, %v1633_v38  ;;  %v1836_v25 = vand.u32 31, %v1834_v20  ;;  %v1760_v19 = vmul.u32 %v6850_v60, %v1706_v32  ;;  %vm1762_vm7 = vc.u32 %v6912_v30, %v6914_v36 }
 0x1ee   : > { %v1759_v58 = vadd.s32 %v1758_v33, %v1749_v34  ;;  %v1829_v55 = vand.u32 8388607, %v1822_v28  ;;  %v6927_v44 = vshrl.u32 %v1834_v20, 5  ;;  %v1657_v47 = vand.u32 3, %v1656_v29 }
 0x1ef   : > { %v1635_v6 = vsel %vm1514_vm0, %v1634_v27, %v1633_v38  ;;  %v1837_v41 = vsub.s32 32, %v1836_v25  ;;  %v1839_v42 = vshll.u32 %v5774_v4, %v1836_v25  ;;  %v1842_v45 = vshll.u32 %v5775_v7, %v1836_v25 }
 0x1f0   : > { %v1638_v53 = vsel %vm6889_vm3, %v6568_v1, %v1635_v6  ;;  %v1763_v18 = vadd.s32 1, %v1759_v58  ;;  %v1848_v52 = vshll.u32 %v5777_v14, %v1836_v25  ;;  %v1845_v37 = vshll.u32 %v5776_v9, %v1836_v25 }
 0x1f1   : > { %v1640_v60 = vmul.f32 %v1638_v53, %v1638_v53  ;;  %v1840_v2 = vshrl.u32 %v5775_v7, %v1837_v41  ;;  %v1843_v62 = vshrl.u32 %v5776_v9, %v1837_v41  ;;  %v1846_v51 = vshrl.u32 %v5777_v14, %v1837_v41 }
 0x1f2   : > { %v1764_v48 = vsel %vm1762_vm7, %v1763_v18, %v1759_v58  ;;  %v1849_v63 = vshrl.u32 %v5778_v17, %v1837_v41  ;;  %v1851_v22 = vshll.u32 %v5778_v17, %v1836_v25  ;;  %v1852_v8 = vshrl.u32 %v5779_v21, %v1837_v41 }
 0x1f3   : > { %v1641_v10 = vmul.f32 -0.001358992, %v1640_v60  ;;  %v1648_v43 = vmul.f32 -0.00019511016, %v1640_v60  ;;  %v1765_v54 = vadd.s32 %v1764_v48, %v1760_v19  ;;  %v1841_v24 = vor.u32 %v1840_v2, %v1839_v42 }
 0x1f4   : > { %v1850_v12 = vor.u32 %v1849_v63, %v1848_v52  ;;  %v6939_v39 = vor.u32 %v1843_v62, %v1842_v45  ;;  %v1830_v61 = vor.u32 8388608, %v1829_v55  ;;  %v1847_v23 = vor.u32 %v1846_v51, %v1845_v37 }
 0x1f5   : > { %v1642_v50 = vadd.f32 0.041655596, %v1641_v10  ;;  %v1649_v35 = vadd.f32 0.008332121, %v1648_v43  ;;  %v1766_v15 = vadd.s32 536870912, %v1765_v54  ;;  %v1853_v49 = vor.u32 %v1852_v8, %v1851_v22 }
 0x1f6   : > { %vm1857_vm8 = vcmp.lt.s32.totalorder %v6927_v44, 4  ;;  %v6944_v32 = vmul.f32 30.0, %v341_v31  ;;  %vm1854_vm9 = vcmp.lt.s32.totalorder %v6927_v44, 1  ;;  %vm1856_vm10 = vcmp.lt.s32.totalorder %v6927_v44, 3 }
 0x1f7   : > { %v1643_v26 = vmul.f32 %v1642_v50, %v1640_v60  ;;  %v1650_v46 = vmul.f32 %v1649_v35, %v1640_v60  ;;  %v6941_v11 = vshrl.u32 %v1766_v15, 30  ;;  %v1863_v57 = vsel %vm1857_vm8, %v1850_v12, 920167782 }
 0x1f8   : > { %v1862_v3 = vsel %vm1854_vm9, %v1841_v24, %v6939_v39  ;;  %vm1855_vm11 = vcmp.lt.s32.totalorder %v6927_v44, 2  ;;  %v1864_v34 = vsel %vm1856_vm10, %v1847_v23, %v1863_v57  ;;  %v1867_v33 = vsel %vm1857_vm8, %v1853_v49, 1326507024 }
 0x1f9   : > { %v1644_v59 = vadd.f32 -0.4999988, %v1643_v26  ;;  %v1651_v5 = vadd.f32 -0.16666654, %v1650_v46  ;;  %v1768_v38 = vshll.u32 %v6941_v11, 30  ;;  %v6959_v20 = vshll.u32 %v1830_v61, 8 }
 0x1fa   : > { %vm1658_vm12 = vcmp.lt.s32.totalorder %v1657_v47, 2  ;;  %v1866_v29 = vsel %vm1854_vm9, %v6939_v39, %v1847_v23  ;;  %vm1655_vm13 = vweird.f32 %v6568_v1  ;;  %vm1659_vm14 = vcmp.eq.s32.totalorder %v1657_v47, 0 }
 0x1fb   : > { %v1645_v27 = vmul.f32 %v1644_v59, %v1640_v60  ;;  %v1652_v25 = vmul.f32 %v1651_v5, %v1640_v60  ;;  %v1769_v31 = vsub.s32 %v1765_v54, %v1768_v38  ;;  %vm1662_vm15 = vcmp.eq.s32.totalorder %v1657_v47, 2 }
 0x1fc   : > { %v1865_v58 = vsel %vm1855_vm11, %v1862_v3, %v1864_v34  ;;  %v1868_v19 = vsel %vm1856_vm10, %v1850_v12, %v1867_v33  ;;  %v1838_v42 = vshrl.u32 %v5774_v4, %v1837_v41  ;;  %v1872_v2 = vshrl.u32 %v6959_v20, 16 }
 0x1fd   : > { %v1646_v6 = vadd.f32 1.0, %v1645_v27  ;;  %v1653_v55 = vadd.f32 1.0, %v1652_v25  ;;  %vm1770_vm0 = vcmp.lt.s32.totalorder %v1769_v31, 0  ;;  %v1771_v18 = vsub.s32 0, %v1769_v31 }
 0x1fe   : > { %v1869_v60 = vsel %vm1855_vm11, %v1866_v29, %v1868_v19  ;;  %v1980_v45 = vand.u32 2139095040, %v6944_v32  ;;  %v1895_v43 = vand.u32 65535, %v1865_v58  ;;  %v1896_v54 = vshrl.u32 %v1865_v58, 16 }
 0x1ff   : > { %v1654_v62 = vmul.f32 %v1653_v55, %v1638_v53  ;;  %v1663_v48 = vxor.u32 2147483648, %v1646_v6  ;;  %v1772_v51 = vsel %vm1770_vm0, %v1771_v18, %v1769_v31  ;;  %v1873_v52 = vand.u32 65535, %v1869_v60 }
 0x200   : > { %v1773_v63 = vclz %v1772_v51  ;;  %v1874_v10 = vshrl.u32 %v1869_v60, 16  ;;  %v1761_v12 = vadd.s32 %v6914_v36, %v6912_v30  ;;  %v6978_v41 = vsel %vm1854_vm9, %v1838_v42, %v1841_v24 }
 0x201   : > { %v1660_v37 = vxor.u32 2147483648, %v1654_v62  ;;  %v1871_v22 = vand.u32 65535, %v6959_v20  ;;  %v1791_v53 = vsub.s32 4, %v6941_v11  ;;  %v1859_v50 = vsel %vm1857_vm8, %v1847_v23, 2102212464 }
 0x202   : > { %v5561_v8 = vadd.s32 4294967294, %v1773_v63  ;;  %v1877_v35 = vmul.u32 %v1873_v52, %v1872_v2  ;;  %v1664_v61 = vsel %vm1662_vm15, %v1663_v48, %v1654_v62  ;;  %v1981_v30 = vshrl.u32 %v1980_v45, 23 }
 0x203   : > { %v1661_v15 = vsel %vm1659_vm14, %v1646_v6, %v1660_v37  ;;  %v1876_v49 = vmul.u32 %v1874_v10, %v1871_v22  ;;  %vm1669_vm1 = vcmp.lt.s32.totalorder %v6584_v40, 0  ;;  %v1897_v24 = vmul.u32 %v1895_v43, %v1871_v22 }
 0x204   : > { %v1665_v36 = vsel %vm1658_vm12, %v1661_v15, %v1664_v61  ;;  %vm5562_vm2 = vcmp.lt.s32.totalorder %v5561_v8, 0  ;;  %v1898_v26 = vmul.u32 %v1896_v54, %v1871_v22  ;;  %v1875_v23 = vmul.u32 %v1873_v52, %v1871_v22  ;;  %v342_v15 = vpop.f32.mrf.mxu1 }
 0x205   : > { %v1666_v46 = vsel %vm1655_vm13, nan, %v1665_v36  ;;  %v1776_v57 = vsel %vm5562_vm2, 0, %v5561_v8  ;;  %v1879_v59 = vshll.u32 %v1876_v49, 16  ;;  %v1878_v3 = vmul.u32 %v1874_v10, %v1872_v2 }
 0x206   : > { %v1777_v5 = vsub.s32 32, %v1776_v57  ;;  %v1781_v38 = vsub.s32 4294967266, %v1776_v57  ;;  %v1881_v34 = vshll.u32 %v1877_v35, 16  ;;  %5394 = vst [vmem:[%s6179_s20 + $0x38] sm:$0xff] %v1666_v46  ;;  %v1899_v47 = vmul.u32 %v1895_v43, %v1872_v2 }
 0x207   : > { %vm1883_vm3 = vc.u32 %v1875_v23, %v1879_v59  ;;  %v1885_v33 = vadd.s32 %v1879_v59, %v1875_v23  ;;  %v1901_v27 = vshll.u32 %v1898_v26, 16  ;;  %v1778_v25 = vshll.u32 %v1769_v31, %v1776_v57 }
 0x208   : > { %v1779_v29 = vshrl.u32 %v1761_v12, %v1777_v5  ;;  %v1782_v58 = vadd.s32 127, %v1781_v38  ;;  %v1884_v19 = vsel %vm1883_vm3, 1, %v5780_v0  ;;  %v1880_v6 = vshrl.u32 %v1876_v49, 16 }
 0x209   : > { %v1886_v1 = vadd.s32 %v1884_v19, %v1878_v3  ;;  %vm1887_vm4 = vc.u32 %v1885_v33, %v1881_v34  ;;  %v1900_v55 = vmul.u32 %v1896_v54, %v1872_v2  ;;  %vm1905_vm5 = vc.u32 %v1897_v24, %v1901_v27 }
 0x20a   : > { %v1780_v18 = vor.u32 %v1779_v29, %v1778_v25  ;;  %v1783_v42 = vshll.u32 %v1782_v58, 23  ;;  %v1888_v60 = vsel %vm1887_vm4, 1, %v5780_v0  ;;  %v1903_v62 = vshll.u32 %v1899_v47, 16 }
 0x20b   : > { %v1890_v45 = vadd.s32 %v1888_v60, %v1886_v1  ;;  %v1906_v48 = vsel %vm1905_vm5, 1, %v5780_v0  ;;  %v1907_v51 = vadd.s32 %v1901_v27, %v1897_v24  ;;  %v1860_v31 = vsel %vm1856_vm10, %v6939_v39, %v1859_v50 }
 0x20c   : > { %v1784_v52 = vor.u32 4788187, %v1783_v42  ;;  %v1908_v63 = vadd.s32 %v1906_v48, %v1900_v55  ;;  %v5566_v10 = vadd.s32 4294967169, %v1981_v30  ;;  %v1792_v2 = vsel %vm1669_vm1, %v1791_v53, %v6941_v11 }
 0x20d   : > { %v1882_v43 = vshrl.u32 %v1877_v35, 16  ;;  %v1891_v54 = vadd.s32 %v1890_v45, %v1880_v6  ;;  %vm1909_vm6 = vc.u32 %v1907_v51, %v1903_v62  ;;  %v1787_v12 = vcvt.s32.f32 %v1780_v18 }
 0x20e   : > { %v1785_v37 = vand.u32 2147483647, %v1784_v52  ;;  %v1910_v22 = vsel %vm1909_vm6, 1, %v5780_v0  ;;  %v1987_v8 = vadd.s32 1, %v5566_v10  ;;  %vm7003_vm7 = vcmp.le.f32.partialorder %v1667_v56, 0.7853982 }
 0x20f   : > { %v7007_v39 = vadd.s32 %v1891_v54, %v1882_v43  ;;  %v1902_v50 = vshrl.u32 %v1898_v26, 16  ;;  %v1912_v49 = vadd.s32 %v1910_v22, %v1908_v63  ;;  %v1794_v53 = vsel %vm7003_vm7, 0, %v1792_v2 }
 0x210   : > { %v1788_v11 = vmul.f32 %v1787_v12, %v1785_v37  ;;  %v1861_v35 = vsel %vm1855_vm11, %v6978_v41, %v1860_v31  ;;  %vm1988_vm8 = vcmp.gt.s32.totalorder %v1987_v8, 0  ;;  %v1904_v30 = vshrl.u32 %v1899_v47, 16 }
 0x211   : > { %v7014_v36 = vadd.s32 %v1907_v51, %v1903_v62  ;;  %v1913_v56 = vadd.s32 %v1912_v49, %v1902_v50  ;;  %v1989_v24 = vsel %vm1988_vm8, %v1987_v8, 0  ;;  %v343_v46 = vadd.f32 %v6833_v16, %v342_v15 }
 0x212   : > { %v1789_v57 = vxor.u32 2147483648, %v1788_v11  ;;  %v1977_v26 = vand.u32 2147483647, %v6944_v32  ;;  %v1991_v23 = vand.u32 31, %v1989_v24  ;;  %v1811_v59 = vadd.s32 3, %v1794_v53 }
 0x213   : > { %v1914_v5 = vadd.s32 %v1913_v56, %v1904_v30  ;;  %v1915_v38 = vmul.u32 %v6959_v20, %v1861_v35  ;;  %vm1917_vm9 = vc.u32 %v7007_v39, %v7014_v36  ;;  %v7023_v41 = vshrl.u32 %v1989_v24, 5 }
 0x214   : > { %v1790_v44 = vsel %vm1669_vm1, %v1789_v57, %v1788_v11  ;;  %v1992_v3 = vsub.s32 32, %v1991_v23  ;;  %v1994_v34 = vshll.u32 %v5774_v4, %v1991_v23  ;;  %v1997_v27 = vshll.u32 %v5775_v7, %v1991_v23 }
 0x215   : > { %v1793_v33 = vsel %vm7003_vm7, %v6584_v40, %v1790_v44  ;;  %v1918_v47 = vadd.s32 1, %v1914_v5  ;;  %v2003_v20 = vshll.u32 %v5777_v14, %v1991_v23  ;;  %v2000_v19 = vshll.u32 %v5776_v9, %v1991_v23 }
 0x216   : > { %v1795_v25 = vmul.f32 %v1793_v33, %v1793_v33  ;;  %v1995_v29 = vshrl.u32 %v5775_v7, %v1992_v3  ;;  %v1998_v58 = vshrl.u32 %v5776_v9, %v1992_v3  ;;  %v2001_v1 = vshrl.u32 %v5777_v14, %v1992_v3 }
 0x217   : > { %v1919_v6 = vsel %vm1917_vm9, %v1918_v47, %v1914_v5  ;;  %v2004_v55 = vshrl.u32 %v5778_v17, %v1992_v3  ;;  %v2006_v18 = vshll.u32 %v5778_v17, %v1991_v23  ;;  %v7037_v42 = vmul.f32 30.0, %v343_v46 }
 0x218   : > { %v1796_v60 = vmul.f32 -0.001358992, %v1795_v25  ;;  %v1803_v45 = vmul.f32 -0.00019511016, %v1795_v25  ;;  %v1920_v62 = vadd.s32 %v1919_v6, %v1915_v38  ;;  %v7039_v48 = vand.u32 3, %v1811_v59 }
 0x219   : > { %v1984_v51 = vand.u32 8388607, %v1977_v26  ;;  %v2005_v52 = vor.u32 %v2004_v55, %v2003_v20  ;;  %v2007_v31 = vshrl.u32 %v5779_v21, %v1992_v3  ;;  %v1996_v43 = vor.u32 %v1995_v29, %v1994_v34 }
 0x21a   : > { %v1797_v63 = vadd.f32 0.041655596, %v1796_v60  ;;  %v1804_v10 = vadd.f32 0.008332121, %v1803_v45  ;;  %v1921_v2 = vadd.s32 536870912, %v1920_v62  ;;  %v1999_v54 = vor.u32 %v1998_v58, %v1997_v27 }
 0x21b   : > { %v2002_v37 = vor.u32 %v2001_v1, %v2000_v19  ;;  %v2008_v12 = vor.u32 %v2007_v31, %v2006_v18  ;;  %vm2012_vm10 = vcmp.lt.s32.totalorder %v7023_v41, 4  ;;  %vm2009_vm11 = vcmp.lt.s32.totalorder %v7023_v41, 1 }
 0x21c   : > { %v1798_v22 = vmul.f32 %v1797_v63, %v1795_v25  ;;  %v1805_v8 = vmul.f32 %v1804_v10, %v1795_v25  ;;  %v7045_v15 = vshrl.u32 %v1921_v2, 30  ;;  %v1985_v61 = vor.u32 8388608, %v1984_v51 }
 0x21d   : > { %vm2011_vm12 = vcmp.lt.s32.totalorder %v7023_v41, 3  ;;  %v2018_v50 = vsel %vm2012_vm10, %v2005_v52, 920167782  ;;  %vm1814_vm13 = vcmp.eq.s32.totalorder %v7039_v48, 0  ;;  %v2017_v35 = vsel %vm2009_vm11, %v1996_v43, %v1999_v54 }
 0x21e   : > { %v1799_v49 = vadd.f32 -0.4999988, %v1798_v22  ;;  %v1806_v11 = vadd.f32 -0.16666654, %v1805_v8  ;;  %v1923_v53 = vshll.u32 %v7045_v15, 30  ;;  %v2021_v30 = vsel %vm2009_vm11, %v1999_v54, %v2002_v37 }
 0x21f   : > { %v2022_v56 = vsel %vm2012_vm10, %v2008_v12, 1326507024  ;;  %v2135_v24 = vand.u32 2139095040, %v7037_v42  ;;  %vm1813_vm14 = vcmp.lt.s32.totalorder %v7039_v48, 2  ;;  %v2019_v59 = vsel %vm2011_vm12, %v2002_v37, %v2018_v50 }
 0x220   : > { %v1800_v46 = vmul.f32 %v1799_v49, %v1795_v25  ;;  %v1807_v57 = vmul.f32 %v1806_v11, %v1795_v25  ;;  %v1924_v23 = vsub.s32 %v1920_v62, %v1923_v53  ;;  %vm1810_vm15 = vweird.f32 %v6584_v40 }
 0x221   : > { %v1993_v5 = vshrl.u32 %v5774_v4, %v1992_v3  ;;  %vm2010_vm0 = vcmp.lt.s32.totalorder %v7023_v41, 2  ;;  %v2023_v38 = vsel %vm2011_vm12, %v2005_v52, %v2022_v56  ;;  %v7068_v44 = vshll.u32 %v1985_v61, 8 }
 0x222   : > { %v1801_v34 = vadd.f32 1.0, %v1800_v46  ;;  %v1808_v47 = vadd.f32 1.0, %v1807_v57  ;;  %vm1925_vm1 = vcmp.lt.s32.totalorder %v1924_v23, 0  ;;  %v1926_v27 = vsub.s32 0, %v1924_v23 }
 0x223   : > { %vm1817_vm2 = vcmp.eq.s32.totalorder %v7039_v48, 2  ;;  %v1916_v20 = vadd.s32 %v7014_v36, %v7007_v39  ;;  %v2020_v25 = vsel %vm2010_vm0, %v2017_v35, %v2019_v59  ;;  %v2024_v3 = vsel %vm2010_vm0, %v2021_v30, %v2023_v38 }
 0x224   : > { %v1809_v29 = vmul.f32 %v1808_v47, %v1793_v33  ;;  %v1818_v58 = vxor.u32 2147483648, %v1801_v34  ;;  %v1927_v19 = vsel %vm1925_vm1, %v1926_v27, %v1924_v23  ;;  %v2028_v6 = vand.u32 65535, %v2024_v3 }
 0x225   : > { %v1928_v1 = vclz %v1927_v19  ;;  %v2027_v55 = vshrl.u32 %v7068_v44, 16  ;;  %v2029_v18 = vshrl.u32 %v2024_v3, 16  ;;  %v2136_v60 = vshrl.u32 %v2135_v24, 23 }
 0x226   : > { %v1815_v45 = vxor.u32 2147483648, %v1809_v29  ;;  %v7080_v62 = vsel %vm2009_vm11, %v1993_v5, %v1996_v43  ;;  %v2014_v39 = vsel %vm2012_vm10, %v2002_v37, 2102212464  ;;  %v2026_v36 = vand.u32 65535, %v7068_v44 }
 0x227   : > { %v5564_v51 = vadd.s32 4294967294, %v1928_v1  ;;  %v1946_v33 = vsub.s32 4, %v7045_v15  ;;  %v2032_v52 = vmul.u32 %v2028_v6, %v2027_v55  ;;  %v2051_v31 = vshrl.u32 %v2020_v25, 16 }
 0x228   : > { %v1816_v63 = vsel %vm1814_vm13, %v1801_v34, %v1815_v45  ;;  %v1819_v10 = vsel %vm1817_vm2, %v1818_v58, %v1809_v29  ;;  %vm1824_vm3 = vcmp.lt.s32.totalorder %v6854_v13, 0  ;;  %v2031_v2 = vmul.u32 %v2029_v18, %v2026_v36 }
 0x229   : > { %v2050_v43 = vand.u32 65535, %v2020_v25  ;;  %v1820_v37 = vsel %vm1813_vm14, %v1816_v63, %v1819_v10  ;;  %vm5565_vm4 = vcmp.lt.s32.totalorder %v5564_v51, 0  ;;  %v2015_v12 = vsel %vm2011_vm12, %v1999_v54, %v2014_v39 }
 0x22a   : > { %v2030_v22 = vmul.u32 %v2028_v6, %v2026_v36  ;;  %v1821_v8 = vsel %vm1810_vm15, nan, %v1820_v37  ;;  %v1931_v61 = vsel %vm5565_vm4, 0, %v5564_v51  ;;  %v2033_v50 = vmul.u32 %v2029_v18, %v2027_v55 }
 0x22b   : > { %v2034_v49 = vshll.u32 %v2031_v2, 16  ;;  %v1932_v11 = vsub.s32 32, %v1931_v61  ;;  %v1936_v53 = vsub.s32 4294967266, %v1931_v61  ;;  %v2036_v35 = vshll.u32 %v2032_v52, 16  ;;  %5395 = vst [vmem:[%s6179_s20 + $0x40] sm:$0xff] %v1821_v8 }
 0x22c   : > { %v2053_v30 = vmul.u32 %v2051_v31, %v2026_v36  ;;  %v1933_v56 = vshll.u32 %v1924_v23, %v1931_v61  ;;  %v2054_v24 = vmul.u32 %v2050_v43, %v2027_v55  ;;  %v2035_v5 = vshrl.u32 %v2031_v2, 16 }
 0x22d   : > { %vm2038_vm5 = vc.u32 %v2030_v22, %v2034_v49  ;;  %v2040_v48 = vadd.s32 %v2034_v49, %v2030_v22  ;;  %v1934_v46 = vshrl.u32 %v1916_v20, %v1932_v11  ;;  %v1937_v57 = vadd.s32 127, %v1936_v53 }
 0x22e   : > { %v2039_v54 = vsel %vm2038_vm5, 1, %v5780_v0  ;;  %v2056_v59 = vshll.u32 %v2053_v30, 16  ;;  %v2052_v38 = vmul.u32 %v2050_v43, %v2026_v36  ;;  %v2055_v25 = vmul.u32 %v2051_v31, %v2027_v55 }
 0x22f   : > { %v2041_v40 = vadd.s32 %v2039_v54, %v2033_v50  ;;  %vm2042_vm6 = vc.u32 %v2040_v48, %v2036_v35  ;;  %v1935_v34 = vor.u32 %v1934_v46, %v1933_v56  ;;  %v1938_v47 = vshll.u32 %v1937_v57, 23 }
 0x230   : > { %v2043_v27 = vsel %vm2042_vm6, 1, %v5780_v0  ;;  %v2058_v29 = vshll.u32 %v2054_v24, 16  ;;  %vm2060_vm7 = vc.u32 %v2052_v38, %v2056_v59  ;;  %v2062_v23 = vadd.s32 %v2056_v59, %v2052_v38 }
 0x231   : > { %v2045_v3 = vadd.s32 %v2043_v27, %v2041_v40  ;;  %v1939_v58 = vor.u32 4788187, %v1938_v47  ;;  %v1947_v20 = vsel %vm1824_vm3, %v1946_v33, %v7045_v15  ;;  %v2061_v19 = vsel %vm2060_vm7, 1, %v5780_v0 }
 0x232   : > { %v5569_v6 = vadd.s32 4294967169, %v2136_v60  ;;  %v2037_v1 = vshrl.u32 %v2032_v52, 16  ;;  %v2063_v45 = vadd.s32 %v2061_v19, %v2055_v25  ;;  %vm2064_vm8 = vc.u32 %v2062_v23, %v2058_v29  ;;  %v345_v60 = vpop.f32.mrf.mxu1 }
 0x233   : > { %v2046_v18 = vadd.s32 %v2045_v3, %v2035_v5  ;;  %v1940_v39 = vand.u32 2147483647, %v1939_v58  ;;  %v1942_v36 = vcvt.s32.f32 %v1935_v34  ;;  %v2065_v55 = vsel %vm2064_vm8, 1, %v5780_v0 }
 0x234   : > { %v2142_v51 = vadd.s32 1, %v5569_v6  ;;  %vm7107_vm9 = vcmp.le.f32.partialorder %v1822_v28, 0.7853982  ;;  %v2057_v63 = vshrl.u32 %v2053_v30, 16  ;;  %v2067_v15 = vadd.s32 %v2065_v55, %v2063_v45 }
 0x235   : > { %v2132_v33 = vand.u32 2147483647, %v7037_v42  ;;  %v1943_v52 = vmul.f32 %v1942_v36, %v1940_v39  ;;  %v1949_v10 = vsel %vm7107_vm9, 0, %v1947_v20  ;;  %v7114_v2 = vadd.s32 %v2046_v18, %v2037_v1 }
 0x236   : > { %vm2143_vm10 = vcmp.gt.s32.totalorder %v2142_v51, 0  ;;  %v2016_v43 = vsel %vm2010_vm0, %v7080_v62, %v2015_v12  ;;  %v2059_v28 = vshrl.u32 %v2054_v24, 16  ;;  %v2068_v37 = vadd.s32 %v2067_v15, %v2057_v63 }
 0x237   : > { %v2144_v22 = vsel %vm2143_vm10, %v2142_v51, 0  ;;  %v1944_v8 = vxor.u32 2147483648, %v1943_v52  ;;  %v7119_v61 = vadd.s32 %v2062_v23, %v2058_v29  ;;  %v346_v49 = vadd.f32 %v6833_v16, %v345_v60 }
 0x238   : > { %v2146_v50 = vand.u32 31, %v2144_v22  ;;  %v1966_v11 = vadd.s32 3, %v1949_v10  ;;  %v2069_v53 = vadd.s32 %v2068_v37, %v2059_v28  ;;  %v2139_v35 = vand.u32 8388607, %v2132_v33 }
 0x239   : > { %v1945_v30 = vsel %vm1824_vm3, %v1944_v8, %v1943_v52  ;;  %v2070_v41 = vmul.u32 %v7068_v44, %v2016_v43  ;;  %vm2072_vm11 = vc.u32 %v7114_v2, %v7119_v61  ;;  %v7132_v16 = vshrl.u32 %v2144_v22, 5 }
 0x23a   : > { %v2147_v62 = vsub.s32 32, %v2146_v50  ;;  %v1948_v12 = vsel %vm7107_vm9, %v6854_v13, %v1945_v30  ;;  %v2073_v56 = vadd.s32 1, %v2069_v53  ;;  %v2149_v48 = vshll.u32 %v5774_v4, %v2146_v50 }
 0x23b   : > { %v1950_v24 = vmul.f32 %v1948_v12, %v1948_v12  ;;  %v2152_v57 = vshll.u32 %v5775_v7, %v2146_v50  ;;  %v2158_v5 = vshll.u32 %v5777_v14, %v2146_v50  ;;  %v2155_v27 = vshll.u32 %v5776_v9, %v2146_v50 }
 0x23c   : > { %v2150_v46 = vshrl.u32 %v5775_v7, %v2147_v62  ;;  %v2153_v44 = vshrl.u32 %v5776_v9, %v2147_v62  ;;  %v2074_v54 = vsel %vm2072_vm11, %v2073_v56, %v2069_v53  ;;  %v2156_v59 = vshrl.u32 %v5777_v14, %v2147_v62 }
 0x23d   : > { %v2159_v40 = vshrl.u32 %v5778_v17, %v2147_v62  ;;  %v1951_v38 = vmul.f32 -0.001358992, %v1950_v24  ;;  %v1958_v34 = vmul.f32 -0.00019511016, %v1950_v24  ;;  %v2075_v47 = vadd.s32 %v2074_v54, %v2070_v41 }
 0x23e   : > { %v2151_v25 = vor.u32 %v2150_v46, %v2149_v48  ;;  %v2161_v29 = vshll.u32 %v5778_v17, %v2146_v50  ;;  %v2162_v23 = vshrl.u32 %v5779_v21, %v2147_v62  ;;  %v7144_v6 = vor.u32 %v2153_v44, %v2152_v57 }
 0x23f   : > { %v2160_v3 = vor.u32 %v2159_v40, %v2158_v5  ;;  %v1952_v58 = vadd.f32 0.041655596, %v1951_v38  ;;  %v1959_v20 = vadd.f32 0.008332121, %v1958_v34  ;;  %v2076_v19 = vadd.s32 536870912, %v2075_v47 }
 0x240   : > { %v1967_v1 = vand.u32 3, %v1966_v11  ;;  %v2140_v18 = vor.u32 8388608, %v2139_v35  ;;  %v2157_v45 = vor.u32 %v2156_v59, %v2155_v27  ;;  %v2163_v39 = vor.u32 %v2162_v23, %v2161_v29 }
 0x241   : > { %v1953_v36 = vmul.f32 %v1952_v58, %v1950_v24  ;;  %v1960_v55 = vmul.f32 %v1959_v20, %v1950_v24  ;;  %v7146_v51 = vshrl.u32 %v2076_v19, 30  ;;  %vm2167_vm12 = vcmp.lt.s32.totalorder %v7132_v16, 4 }
 0x242   : > { %v7149_v31 = vmul.f32 30.0, %v346_v49  ;;  %vm2164_vm13 = vcmp.lt.s32.totalorder %v7132_v16, 1  ;;  %vm2166_vm14 = vcmp.lt.s32.totalorder %v7132_v16, 3  ;;  %v2173_v63 = vsel %vm2167_vm12, %v2160_v3, 920167782 }
 0x243   : > { %v1954_v15 = vadd.f32 -0.4999988, %v1953_v36  ;;  %v1961_v60 = vadd.f32 -0.16666654, %v1960_v55  ;;  %v2078_v52 = vshll.u32 %v7146_v51, 30  ;;  %v2172_v10 = vsel %vm2164_vm13, %v2151_v25, %v7144_v6 }
 0x244   : > { %vm2165_vm15 = vcmp.lt.s32.totalorder %v7132_v16, 2  ;;  %v2174_v43 = vsel %vm2166_vm14, %v2157_v45, %v2173_v63  ;;  %v2177_v28 = vsel %vm2167_vm12, %v2163_v39, 1326507024  ;;  %v7164_v37 = vshll.u32 %v2140_v18, 8 }
 0x245   : > { %v1955_v22 = vmul.f32 %v1954_v15, %v1950_v24  ;;  %v1962_v8 = vmul.f32 %v1961_v60, %v1950_v24  ;;  %vm1968_vm0 = vcmp.lt.s32.totalorder %v1967_v1, 2  ;;  %v2079_v50 = vsub.s32 %v2075_v47, %v2078_v52 }
 0x246   : > { %v2176_v49 = vsel %vm2164_vm13, %v7144_v6, %v2157_v45  ;;  %vm1965_vm1 = vweird.f32 %v6854_v13  ;;  %vm1969_vm2 = vcmp.eq.s32.totalorder %v1967_v1, 0  ;;  %vm1972_vm3 = vcmp.eq.s32.totalorder %v1967_v1, 2 }
 0x247   : > { %v2175_v11 = vsel %vm2165_vm15, %v2172_v10, %v2174_v43  ;;  %v2178_v53 = vsel %vm2166_vm14, %v2160_v3, %v2177_v28  ;;  %v1956_v35 = vadd.f32 1.0, %v1955_v22  ;;  %v1963_v30 = vadd.f32 1.0, %v1962_v8 }
 0x248   : > { %vm2080_vm4 = vcmp.lt.s32.totalorder %v2079_v50, 0  ;;  %v2081_v41 = vsub.s32 0, %v2079_v50  ;;  %v2148_v56 = vshrl.u32 %v5774_v4, %v2147_v62  ;;  %v2179_v48 = vsel %vm2165_vm15, %v2176_v49, %v2178_v53 }
 0x249   : > { %v2182_v24 = vshrl.u32 %v7164_v37, 16  ;;  %v2290_v46 = vand.u32 2139095040, %v7149_v31  ;;  %v1964_v57 = vmul.f32 %v1963_v30, %v1948_v12  ;;  %v1973_v44 = vxor.u32 2147483648, %v1956_v35 }
 0x24a   : > { %v2082_v54 = vsel %vm2080_vm4, %v2081_v41, %v2079_v50  ;;  %v2183_v59 = vand.u32 65535, %v2179_v48  ;;  %v2184_v40 = vshrl.u32 %v2179_v48, 16  ;;  %v2205_v38 = vand.u32 65535, %v2175_v11 }
 0x24b   : > { %v2083_v5 = vclz %v2082_v54  ;;  %v2206_v34 = vshrl.u32 %v2175_v11, 16  ;;  %v1970_v47 = vxor.u32 2147483648, %v1964_v57  ;;  %v2071_v27 = vadd.s32 %v7119_v61, %v7114_v2 }
 0x24c   : > { %v7183_v62 = vsel %vm2164_vm13, %v2148_v56, %v2151_v25  ;;  %v2181_v3 = vand.u32 65535, %v7164_v37  ;;  %v2101_v12 = vsub.s32 4, %v7146_v51  ;;  %v2169_v23 = vsel %vm2167_vm12, %v2157_v45, 2102212464 }
 0x24d   : > { %v5567_v29 = vadd.s32 4294967294, %v2083_v5  ;;  %v2187_v58 = vmul.u32 %v2183_v59, %v2182_v24  ;;  %v1971_v20 = vsel %vm1969_vm2, %v1956_v35, %v1970_v47  ;;  %v1974_v19 = vsel %vm1972_vm3, %v1973_v44, %v1964_v57 }
 0x24e   : > { %v2186_v18 = vmul.u32 %v2184_v40, %v2181_v3  ;;  %v2291_v2 = vshrl.u32 %v2290_v46, 23  ;;  %v1975_v61 = vsel %vm1968_vm0, %v1971_v20, %v1974_v19  ;;  %vm1979_vm5 = vcmp.lt.s32.totalorder %v6944_v32, 0 }
 0x24f   : > { %vm5568_vm6 = vcmp.lt.s32.totalorder %v5567_v29, 0  ;;  %v2207_v25 = vmul.u32 %v2205_v38, %v2181_v3  ;;  %v2208_v39 = vmul.u32 %v2206_v34, %v2181_v3  ;;  %v1976_v36 = vsel %vm1965_vm1, nan, %v1975_v61 }
 0x250   : > { %v2086_v55 = vsel %vm5568_vm6, 0, %v5567_v29  ;;  %v2185_v45 = vmul.u32 %v2183_v59, %v2181_v3  ;;  %v2189_v63 = vshll.u32 %v2186_v18, 16  ;;  %v2188_v52 = vmul.u32 %v2184_v40, %v2182_v24  ;;  %5396 = vst [vmem:[%s6179_s20 + $0x48] sm:$0xff] %v1976_v36  ;;  %v347_v29 = vpop.f32.mrf.mxu1 }
 0x251   : > { %v2087_v15 = vsub.s32 32, %v2086_v55  ;;  %v2091_v60 = vsub.s32 4294967266, %v2086_v55  ;;  %v2191_v10 = vshll.u32 %v2187_v58, 16  ;;  %v2209_v1 = vmul.u32 %v2205_v38, %v2182_v24 }
 0x252   : > { %vm2193_vm7 = vc.u32 %v2185_v45, %v2189_v63  ;;  %v2195_v43 = vadd.s32 %v2189_v63, %v2185_v45  ;;  %v2211_v28 = vshll.u32 %v2208_v39, 16  ;;  %v2088_v22 = vshll.u32 %v2079_v50, %v2086_v55 }
 0x253   : > { %v2089_v8 = vshrl.u32 %v2071_v27, %v2087_v15  ;;  %v2092_v49 = vadd.s32 127, %v2091_v60  ;;  %v2194_v11 = vsel %vm2193_vm7, 1, %v5780_v0  ;;  %v2190_v53 = vshrl.u32 %v2186_v18, 16 }
 0x254   : > { %v2196_v13 = vadd.s32 %v2194_v11, %v2188_v52  ;;  %vm2197_vm8 = vc.u32 %v2195_v43, %v2191_v10  ;;  %v2210_v35 = vmul.u32 %v2206_v34, %v2182_v24  ;;  %vm2215_vm9 = vc.u32 %v2207_v25, %v2211_v28 }
 0x255   : > { %v2090_v30 = vor.u32 %v2089_v8, %v2088_v22  ;;  %v2093_v41 = vshll.u32 %v2092_v49, 23  ;;  %v2198_v56 = vsel %vm2197_vm8, 1, %v5780_v0  ;;  %v2213_v46 = vshll.u32 %v2209_v1, 16 }
 0x256   : > { %v2200_v48 = vadd.s32 %v2198_v56, %v2196_v13  ;;  %v2216_v57 = vsel %vm2215_vm9, 1, %v5780_v0  ;;  %v2217_v44 = vadd.s32 %v2211_v28, %v2207_v25  ;;  %v2170_v50 = vsel %vm2166_vm14, %v7144_v6, %v2169_v23  ;;  %v7224_v25 = vld [vmem:[%s9382_s2] ss:$0 sm:$0xff] }
 0x257   : > { %v2094_v54 = vor.u32 4788187, %v2093_v41  ;;  %v2218_v59 = vadd.s32 %v2216_v57, %v2210_v35  ;;  %v5572_v5 = vadd.s32 4294967169, %v2291_v2  ;;  %v2102_v24 = vsel %vm1979_vm5, %v2101_v12, %v7146_v51 }
 0x258   : > { %v2192_v40 = vshrl.u32 %v2187_v58, 16  ;;  %v2201_v38 = vadd.s32 %v2200_v48, %v2190_v53  ;;  %vm2219_vm10 = vc.u32 %v2217_v44, %v2213_v46  ;;  %v2097_v47 = vcvt.s32.f32 %v2090_v30 }
 0x259   : > { %v2095_v34 = vand.u32 2147483647, %v2094_v54  ;;  %v2220_v27 = vsel %vm2219_vm10, 1, %v5780_v0  ;;  %v2297_v3 = vadd.s32 1, %v5572_v5  ;;  %vm7208_vm11 = vcmp.le.f32.partialorder %v1977_v26, 0.7853982 }
 0x25a   : > { %v7212_v6 = vadd.s32 %v2201_v38, %v2192_v40  ;;  %v2212_v23 = vshrl.u32 %v2208_v39, 16  ;;  %v2222_v19 = vadd.s32 %v2220_v27, %v2218_v59  ;;  %v2104_v12 = vsel %vm7208_vm11, 0, %v2102_v24 }
 0x25b   : > { %v2098_v51 = vmul.f32 %v2097_v47, %v2095_v34  ;;  %v2171_v58 = vsel %vm2165_vm15, %v7183_v62, %v2170_v50  ;;  %vm2298_vm12 = vcmp.gt.s32.totalorder %v2297_v3, 0  ;;  %v2214_v18 = vshrl.u32 %v2209_v1, 16 }
 0x25c   : > { %v7219_v2 = vadd.s32 %v2217_v44, %v2213_v46  ;;  %v2223_v26 = vadd.s32 %v2222_v19, %v2212_v23  ;;  %v2299_v61 = vsel %vm2298_vm12, %v2297_v3, 0  ;;  %v348_v39 = vadd.f32 %v7224_v25, %v347_v29 }
 0x25d   : > { %v2099_v36 = vxor.u32 2147483648, %v2098_v51  ;;  %v2287_v55 = vand.u32 2147483647, %v7149_v31  ;;  %v2301_v45 = vand.u32 31, %v2299_v61  ;;  %v2121_v63 = vadd.s32 3, %v2104_v12 }
 0x25e   : > { %v2224_v16 = vadd.s32 %v2223_v26, %v2214_v18  ;;  %v2225_v62 = vmul.u32 %v7164_v37, %v2171_v58  ;;  %vm2227_vm13 = vc.u32 %v7212_v6, %v7219_v2  ;;  %v7233_v60 = vshrl.u32 %v2299_v61, 5 }
 0x25f   : > { %v2100_v15 = vsel %vm1979_vm5, %v2099_v36, %v2098_v51  ;;  %v2302_v52 = vsub.s32 32, %v2301_v45  ;;  %v2304_v10 = vshll.u32 %v5774_v4, %v2301_v45  ;;  %v2307_v28 = vshll.u32 %v5775_v7, %v2301_v45 }
 0x260   : > { %v2103_v43 = vsel %vm7208_vm11, %v6944_v32, %v2100_v15  ;;  %v2228_v1 = vadd.s32 1, %v2224_v16  ;;  %v2313_v37 = vshll.u32 %v5777_v14, %v2301_v45  ;;  %v2310_v11 = vshll.u32 %v5776_v9, %v2301_v45 }
 0x261   : > { %v2105_v22 = vmul.f32 %v2103_v43, %v2103_v43  ;;  %v2305_v8 = vshrl.u32 %v5775_v7, %v2302_v52  ;;  %v2308_v49 = vshrl.u32 %v5776_v9, %v2302_v52  ;;  %v2311_v13 = vshrl.u32 %v5777_v14, %v2302_v52 }
 0x262   : > { %v2229_v53 = vsel %vm2227_vm13, %v2228_v1, %v2224_v16  ;;  %v2314_v35 = vshrl.u32 %v5778_v17, %v2302_v52  ;;  %v2316_v30 = vshll.u32 %v5778_v17, %v2301_v45  ;;  %v7247_v41 = vmul.f32 30.0, %v348_v39 }
 0x263   : > { %v2106_v56 = vmul.f32 -0.001358992, %v2105_v22  ;;  %v2113_v48 = vmul.f32 -0.00019511016, %v2105_v22  ;;  %v2230_v46 = vadd.s32 %v2229_v53, %v2225_v62  ;;  %v7249_v57 = vand.u32 3, %v2121_v63 }
 0x264   : > { %v2294_v44 = vand.u32 8388607, %v2287_v55  ;;  %v2315_v54 = vor.u32 %v2314_v35, %v2313_v37  ;;  %v2317_v50 = vshrl.u32 %v5779_v21, %v2302_v52  ;;  %v2306_v40 = vor.u32 %v2305_v8, %v2304_v10 }
 0x265   : > { %v2107_v59 = vadd.f32 0.041655596, %v2106_v56  ;;  %v2114_v5 = vadd.f32 0.008332121, %v2113_v48  ;;  %v2231_v24 = vadd.s32 536870912, %v2230_v46  ;;  %v2309_v38 = vor.u32 %v2308_v49, %v2307_v28 }
 0x266   : > { %v2312_v34 = vor.u32 %v2311_v13, %v2310_v11  ;;  %v2318_v47 = vor.u32 %v2317_v50, %v2316_v30  ;;  %vm2322_vm14 = vcmp.lt.s32.totalorder %v7233_v60, 4  ;;  %vm2319_vm15 = vcmp.lt.s32.totalorder %v7233_v60, 1 }
 0x267   : > { %v2108_v27 = vmul.f32 %v2107_v59, %v2105_v22  ;;  %v2115_v3 = vmul.f32 %v2114_v5, %v2105_v22  ;;  %v7255_v29 = vshrl.u32 %v2231_v24, 30  ;;  %v2295_v20 = vor.u32 8388608, %v2294_v44 }
 0x268   : > { %vm2321_vm0 = vcmp.lt.s32.totalorder %v7233_v60, 3  ;;  %v2328_v23 = vsel %vm2322_vm14, %v2315_v54, 920167782  ;;  %vm2124_vm1 = vcmp.eq.s32.totalorder %v7249_v57, 0  ;;  %v2327_v58 = vsel %vm2319_vm15, %v2306_v40, %v2309_v38 }
 0x269   : > { %v2109_v19 = vadd.f32 -0.4999988, %v2108_v27  ;;  %v2116_v51 = vadd.f32 -0.16666654, %v2115_v3  ;;  %v2233_v12 = vshll.u32 %v7255_v29, 30  ;;  %v2331_v18 = vsel %vm2319_vm15, %v2309_v38, %v2312_v34 }
 0x26a   : > { %v2332_v26 = vsel %vm2322_vm14, %v2318_v47, 1326507024  ;;  %v2445_v61 = vand.u32 2139095040, %v7247_v41  ;;  %vm2123_vm2 = vcmp.lt.s32.totalorder %v7249_v57, 2  ;;  %v2329_v63 = vsel %vm2321_vm0, %v2312_v34, %v2328_v23 }
 0x26b   : > { %v2110_v39 = vmul.f32 %v2109_v19, %v2105_v22  ;;  %v2117_v36 = vmul.f32 %v2116_v51, %v2105_v22  ;;  %v2234_v45 = vsub.s32 %v2230_v46, %v2233_v12  ;;  %vm2120_vm3 = vweird.f32 %v6944_v32 }
 0x26c   : > { %v2303_v16 = vshrl.u32 %v5774_v4, %v2302_v52  ;;  %vm2320_vm4 = vcmp.lt.s32.totalorder %v7233_v60, 2  ;;  %v2333_v62 = vsel %vm2321_vm0, %v2315_v54, %v2332_v26  ;;  %v7278_v15 = vshll.u32 %v2295_v20, 8 }
 0x26d   : > { %v2111_v10 = vadd.f32 1.0, %v2110_v39  ;;  %v2118_v1 = vadd.f32 1.0, %v2117_v36  ;;  %vm2235_vm5 = vcmp.lt.s32.totalorder %v2234_v45, 0  ;;  %v2236_v28 = vsub.s32 0, %v2234_v45 }
 0x26e   : > { %vm2127_vm6 = vcmp.eq.s32.totalorder %v7249_v57, 2  ;;  %v2226_v37 = vadd.s32 %v7219_v2, %v7212_v6  ;;  %v2330_v22 = vsel %vm2320_vm4, %v2327_v58, %v2329_v63  ;;  %v2334_v52 = vsel %vm2320_vm4, %v2331_v18, %v2333_v62 }
 0x26f   : > { %v2119_v8 = vmul.f32 %v2118_v1, %v2103_v43  ;;  %v2128_v49 = vxor.u32 2147483648, %v2111_v10  ;;  %v2237_v11 = vsel %vm2235_vm5, %v2236_v28, %v2234_v45  ;;  %v2338_v53 = vand.u32 65535, %v2334_v52 }
 0x270   : > { %v2238_v13 = vclz %v2237_v11  ;;  %v2337_v35 = vshrl.u32 %v7278_v15, 16  ;;  %v2339_v30 = vshrl.u32 %v2334_v52, 16  ;;  %v2446_v56 = vshrl.u32 %v2445_v61, 23 }
 0x271   : > { %v2125_v48 = vxor.u32 2147483648, %v2119_v8  ;;  %v7290_v46 = vsel %vm2319_vm15, %v2303_v16, %v2306_v40  ;;  %v2324_v6 = vsel %vm2322_vm14, %v2312_v34, 2102212464  ;;  %v2336_v2 = vand.u32 65535, %v7278_v15 }
 0x272   : > { %v5570_v44 = vadd.s32 4294967294, %v2238_v13  ;;  %v2256_v43 = vsub.s32 4, %v7255_v29  ;;  %v2342_v54 = vmul.u32 %v2338_v53, %v2337_v35  ;;  %v2361_v50 = vshrl.u32 %v2330_v22, 16 }
 0x273   : > { %v2126_v59 = vsel %vm2124_vm1, %v2111_v10, %v2125_v48  ;;  %v2129_v5 = vsel %vm2127_vm6, %v2128_v49, %v2119_v8  ;;  %vm2134_vm7 = vcmp.lt.s32.totalorder %v7037_v42, 0  ;;  %v2341_v24 = vmul.u32 %v2339_v30, %v2336_v2 }
 0x274   : > { %v2360_v40 = vand.u32 65535, %v2330_v22  ;;  %v2130_v34 = vsel %vm2123_vm2, %v2126_v59, %v2129_v5  ;;  %vm5571_vm8 = vcmp.lt.s32.totalorder %v5570_v44, 0  ;;  %v2325_v47 = vsel %vm2321_vm0, %v2309_v38, %v2324_v6 }
 0x275   : > { %v2340_v27 = vmul.u32 %v2338_v53, %v2336_v2  ;;  %v2131_v3 = vsel %vm2120_vm3, nan, %v2130_v34  ;;  %v2241_v20 = vsel %vm5571_vm8, 0, %v5570_v44  ;;  %v2343_v23 = vmul.u32 %v2339_v30, %v2337_v35 }
 0x276   : > { %v2344_v19 = vshll.u32 %v2341_v24, 16  ;;  %v2242_v51 = vsub.s32 32, %v2241_v20  ;;  %v2246_v12 = vsub.s32 4294967266, %v2241_v20  ;;  %v2346_v58 = vshll.u32 %v2342_v54, 16  ;;  %5397 = vst [vmem:[%s6179_s20 + $0x50] sm:$0xff] %v2131_v3 }
 0x277   : > { %v2363_v18 = vmul.u32 %v2361_v50, %v2336_v2  ;;  %v2243_v26 = vshll.u32 %v2234_v45, %v2241_v20  ;;  %v2364_v61 = vmul.u32 %v2360_v40, %v2337_v35  ;;  %v2345_v16 = vshrl.u32 %v2341_v24, 16 }
 0x278   : > { %vm2348_vm9 = vc.u32 %v2340_v27, %v2344_v19  ;;  %v2350_v57 = vadd.s32 %v2344_v19, %v2340_v27  ;;  %v2244_v39 = vshrl.u32 %v2226_v37, %v2242_v51  ;;  %v2247_v36 = vadd.s32 127, %v2246_v12 }
 0x279   : > { %v2349_v38 = vsel %vm2348_vm9, 1, %v5780_v0  ;;  %v2366_v63 = vshll.u32 %v2363_v18, 16  ;;  %v2362_v62 = vmul.u32 %v2360_v40, %v2336_v2  ;;  %v2365_v22 = vmul.u32 %v2361_v50, %v2337_v35 }
 0x27a   : > { %v2351_v32 = vadd.s32 %v2349_v38, %v2343_v23  ;;  %vm2352_vm10 = vc.u32 %v2350_v57, %v2346_v58  ;;  %v2245_v10 = vor.u32 %v2244_v39, %v2243_v26  ;;  %v2248_v1 = vshll.u32 %v2247_v36, 23 }
 0x27b   : > { %v2353_v28 = vsel %vm2352_vm10, 1, %v5780_v0  ;;  %v2368_v8 = vshll.u32 %v2364_v61, 16  ;;  %vm2370_vm11 = vc.u32 %v2362_v62, %v2366_v63  ;;  %v2372_v45 = vadd.s32 %v2366_v63, %v2362_v62 }
 0x27c   : > { %v2355_v52 = vadd.s32 %v2353_v28, %v2351_v32  ;;  %v2249_v49 = vor.u32 4788187, %v2248_v1  ;;  %v2257_v37 = vsel %vm2134_vm7, %v2256_v43, %v7255_v29  ;;  %v2371_v11 = vsel %vm2370_vm11, 1, %v5780_v0 }
 0x27d   : > { %v5575_v53 = vadd.s32 4294967169, %v2446_v56  ;;  %v2347_v13 = vshrl.u32 %v2342_v54, 16  ;;  %v2373_v48 = vadd.s32 %v2371_v11, %v2365_v22  ;;  %vm2374_vm12 = vc.u32 %v2372_v45, %v2368_v8  ;;  %v350_v56 = vpop.f32.mrf.mxu1 }
 0x27e   : > { %v2356_v30 = vadd.s32 %v2355_v52, %v2345_v16  ;;  %v2250_v6 = vand.u32 2147483647, %v2249_v49  ;;  %v2252_v2 = vcvt.s32.f32 %v2245_v10  ;;  %v2375_v35 = vsel %vm2374_vm12, 1, %v5780_v0 }
 0x27f   : > { %v2452_v44 = vadd.s32 1, %v5575_v53  ;;  %vm7317_vm13 = vcmp.le.f32.partialorder %v2132_v33, 0.7853982  ;;  %v2367_v59 = vshrl.u32 %v2363_v18, 16  ;;  %v2377_v29 = vadd.s32 %v2375_v35, %v2373_v48 }
 0x280   : > { %v2442_v43 = vand.u32 2147483647, %v7247_v41  ;;  %v2253_v54 = vmul.f32 %v2252_v2, %v2250_v6  ;;  %v2259_v5 = vsel %vm7317_vm13, 0, %v2257_v37  ;;  %v7324_v24 = vadd.s32 %v2356_v30, %v2347_v13 }
 0x281   : > { %vm2453_vm14 = vcmp.gt.s32.totalorder %v2452_v44, 0  ;;  %v2326_v40 = vsel %vm2320_vm4, %v7290_v46, %v2325_v47  ;;  %v2369_v33 = vshrl.u32 %v2364_v61, 16  ;;  %v2378_v34 = vadd.s32 %v2377_v29, %v2367_v59 }
 0x282   : > { %v2454_v27 = vsel %vm2453_vm14, %v2452_v44, 0  ;;  %v2254_v3 = vxor.u32 2147483648, %v2253_v54  ;;  %v7329_v20 = vadd.s32 %v2372_v45, %v2368_v8  ;;  %v351_v19 = vadd.f32 %v7224_v25, %v350_v56 }
 0x283   : > { %v2456_v23 = vand.u32 31, %v2454_v27  ;;  %v2276_v51 = vadd.s32 3, %v2259_v5  ;;  %v2379_v12 = vadd.s32 %v2378_v34, %v2369_v33  ;;  %v2449_v58 = vand.u32 8388607, %v2442_v43 }
 0x284   : > { %v2255_v18 = vsel %vm2134_vm7, %v2254_v3, %v2253_v54  ;;  %v2380_v60 = vmul.u32 %v7278_v15, %v2326_v40  ;;  %vm2382_vm15 = vc.u32 %v7324_v24, %v7329_v20  ;;  %v7342_v57 = vshrl.u32 %v2454_v27, 5 }
 0x285   : > { %v2457_v46 = vsub.s32 32, %v2456_v23  ;;  %v2258_v47 = vsel %vm7317_vm13, %v7037_v42, %v2255_v18  ;;  %v2383_v26 = vadd.s32 1, %v2379_v12  ;;  %v2459_v61 = vshll.u32 %v5774_v4, %v2456_v23 }
 0x286   : > { %v2260_v39 = vmul.f32 %v2258_v47, %v2258_v47  ;;  %v2462_v38 = vshll.u32 %v5775_v7, %v2456_v23  ;;  %v2468_v32 = vshll.u32 %v5777_v14, %v2456_v23  ;;  %v2465_v22 = vshll.u32 %v5776_v9, %v2456_v23 }
 0x287   : > { %v2460_v36 = vshrl.u32 %v5775_v7, %v2457_v46  ;;  %v2463_v15 = vshrl.u32 %v5776_v9, %v2457_v46  ;;  %v2384_v63 = vsel %vm2382_vm15, %v2383_v26, %v2379_v12  ;;  %v2466_v16 = vshrl.u32 %v5777_v14, %v2457_v46 }
 0x288   : > { %v2469_v62 = vshrl.u32 %v5778_v17, %v2457_v46  ;;  %v2261_v10 = vmul.f32 -0.001358992, %v2260_v39  ;;  %v2268_v1 = vmul.f32 -0.00019511016, %v2260_v39  ;;  %v2385_v28 = vadd.s32 %v2384_v63, %v2380_v60 }
 0x289   : > { %v2461_v52 = vor.u32 %v2460_v36, %v2459_v61  ;;  %v2471_v45 = vshll.u32 %v5778_v17, %v2456_v23  ;;  %v2472_v49 = vshrl.u32 %v5779_v21, %v2457_v46  ;;  %v7354_v13 = vor.u32 %v2463_v15, %v2462_v38 }
 0x28a   : > { %v2470_v8 = vor.u32 %v2469_v62, %v2468_v32  ;;  %v2262_v37 = vadd.f32 0.041655596, %v2261_v10  ;;  %v2269_v11 = vadd.f32 0.008332121, %v2268_v1  ;;  %v2386_v53 = vadd.s32 536870912, %v2385_v28 }
 0x28b   : > { %v2277_v30 = vand.u32 3, %v2276_v51  ;;  %v2450_v48 = vor.u32 8388608, %v2449_v58  ;;  %v2467_v6 = vor.u32 %v2466_v16, %v2465_v22  ;;  %v2473_v2 = vor.u32 %v2472_v49, %v2471_v45 }
 0x28c   : > { %v2263_v35 = vmul.f32 %v2262_v37, %v2260_v39  ;;  %v2270_v44 = vmul.f32 %v2269_v11, %v2260_v39  ;;  %v7356_v50 = vshrl.u32 %v2386_v53, 30  ;;  %vm2477_vm0 = vcmp.lt.s32.totalorder %v7342_v57, 4 }
 0x28d   : > { %v7359_v59 = vmul.f32 30.0, %v351_v19  ;;  %vm2474_vm1 = vcmp.lt.s32.totalorder %v7342_v57, 1  ;;  %vm2476_vm2 = vcmp.lt.s32.totalorder %v7342_v57, 3  ;;  %v2483_v29 = vsel %vm2477_vm0, %v2470_v8, 920167782 }
 0x28e   : > { %v2264_v56 = vadd.f32 -0.4999988, %v2263_v35  ;;  %v2271_v54 = vadd.f32 -0.16666654, %v2270_v44  ;;  %v2388_v5 = vshll.u32 %v7356_v50, 30  ;;  %v2482_v40 = vsel %vm2474_vm1, %v2461_v52, %v7354_v13 }
 0x28f   : > { %vm2475_vm3 = vcmp.lt.s32.totalorder %v7342_v57, 2  ;;  %v2484_v33 = vsel %vm2476_vm2, %v2467_v6, %v2483_v29  ;;  %v2487_v34 = vsel %vm2477_vm0, %v2473_v2, 1326507024  ;;  %v7374_v27 = vshll.u32 %v2450_v48, 8 }
 0x290   : > { %v2265_v3 = vmul.f32 %v2264_v56, %v2260_v39  ;;  %v2272_v23 = vmul.f32 %v2271_v54, %v2260_v39  ;;  %vm2278_vm4 = vcmp.lt.s32.totalorder %v2277_v30, 2  ;;  %v2389_v19 = vsub.s32 %v2385_v28, %v2388_v5 }
 0x291   : > { %v2486_v51 = vsel %vm2474_vm1, %v7354_v13, %v2467_v6  ;;  %vm2275_vm5 = vweird.f32 %v7037_v42  ;;  %vm2279_vm6 = vcmp.eq.s32.totalorder %v2277_v30, 0  ;;  %vm2282_vm7 = vcmp.eq.s32.totalorder %v2277_v30, 2 }
 0x292   : > { %v2485_v12 = vsel %vm2475_vm3, %v2482_v40, %v2484_v33  ;;  %v2488_v58 = vsel %vm2476_vm2, %v2470_v8, %v2487_v34  ;;  %v2266_v18 = vadd.f32 1.0, %v2265_v3  ;;  %v2273_v60 = vadd.f32 1.0, %v2272_v23 }
 0x293   : > { %vm2390_vm8 = vcmp.lt.s32.totalorder %v2389_v19, 0  ;;  %v2391_v26 = vsub.s32 0, %v2389_v19  ;;  %v2458_v61 = vshrl.u32 %v5774_v4, %v2457_v46  ;;  %v2489_v39 = vsel %vm2475_vm3, %v2486_v51, %v2488_v58 }
 0x294   : > { %v2492_v36 = vshrl.u32 %v7374_v27, 16  ;;  %v2600_v38 = vand.u32 2139095040, %v7359_v59  ;;  %v2274_v15 = vmul.f32 %v2273_v60, %v2258_v47  ;;  %v2283_v63 = vxor.u32 2147483648, %v2266_v18 }
 0x295   : > { %v2392_v16 = vsel %vm2390_vm8, %v2391_v26, %v2389_v19  ;;  %v2493_v32 = vand.u32 65535, %v2489_v39  ;;  %v2494_v10 = vshrl.u32 %v2489_v39, 16  ;;  %v2515_v1 = vand.u32 65535, %v2485_v12 }
 0x296   : > { %v2393_v62 = vclz %v2392_v16  ;;  %v2516_v28 = vshrl.u32 %v2485_v12, 16  ;;  %v2280_v22 = vxor.u32 2147483648, %v2274_v15  ;;  %v2381_v8 = vadd.s32 %v7329_v20, %v7324_v24 }
 0x297   : > { %v7393_v46 = vsel %vm2474_vm1, %v2458_v61, %v2461_v52  ;;  %v2491_v45 = vand.u32 65535, %v7374_v27  ;;  %v2411_v47 = vsub.s32 4, %v7356_v50  ;;  %v2479_v37 = vsel %vm2477_vm0, %v2467_v6, 2102212464 }
 0x298   : > { %v5573_v49 = vadd.s32 4294967294, %v2393_v62  ;;  %v2497_v11 = vmul.u32 %v2493_v32, %v2492_v36  ;;  %v2281_v53 = vsel %vm2279_vm6, %v2266_v18, %v2280_v22  ;;  %v2284_v48 = vsel %vm2282_vm7, %v2283_v63, %v2274_v15 }
 0x299   : > { %v2496_v2 = vmul.u32 %v2494_v10, %v2491_v45  ;;  %v2601_v24 = vshrl.u32 %v2600_v38, 23  ;;  %v2285_v20 = vsel %vm2278_vm4, %v2281_v53, %v2284_v48  ;;  %vm2289_vm9 = vcmp.lt.s32.totalorder %v7149_v31, 0  ;;  %v352_v53 = vpop.f32.mrf.mxu1 }
 0x29a   : > { %vm5574_vm10 = vcmp.lt.s32.totalorder %v5573_v49, 0  ;;  %v2517_v52 = vmul.u32 %v2515_v1, %v2491_v45  ;;  %v2518_v35 = vmul.u32 %v2516_v28, %v2491_v45  ;;  %v2286_v44 = vsel %vm2275_vm5, nan, %v2285_v20 }
 0x29b   : > { %v2396_v29 = vsel %vm5574_vm10, 0, %v5573_v49  ;;  %v2495_v6 = vmul.u32 %v2493_v32, %v2491_v45  ;;  %v2499_v56 = vshll.u32 %v2496_v2, 16  ;;  %v2498_v40 = vmul.u32 %v2494_v10, %v2492_v36  ;;  %5398 = vst [vmem:[%s6179_s20 + $0x58] sm:$0xff] %v2286_v44 }
 0x29c   : > { %v2397_v54 = vsub.s32 32, %v2396_v29  ;;  %v2401_v5 = vsub.s32 4294967266, %v2396_v29  ;;  %v2501_v33 = vshll.u32 %v2497_v11, 16  ;;  %v2519_v30 = vmul.u32 %v2515_v1, %v2492_v36 }
 0x29d   : > { %vm2503_vm11 = vc.u32 %v2495_v6, %v2499_v56  ;;  %v2505_v34 = vadd.s32 %v2499_v56, %v2495_v6  ;;  %v2521_v3 = vshll.u32 %v2518_v35, 16  ;;  %v2398_v23 = vshll.u32 %v2389_v19, %v2396_v29 }
 0x29e   : > { %v2399_v51 = vshrl.u32 %v2381_v8, %v2397_v54  ;;  %v2402_v12 = vadd.s32 127, %v2401_v5  ;;  %v2504_v58 = vsel %vm2503_vm11, 1, %v5780_v0  ;;  %v2500_v18 = vshrl.u32 %v2496_v2, 16 }
 0x29f   : > { %v2506_v42 = vadd.s32 %v2504_v58, %v2498_v40  ;;  %vm2507_vm12 = vc.u32 %v2505_v34, %v2501_v33  ;;  %v2520_v60 = vmul.u32 %v2516_v28, %v2492_v36  ;;  %vm2525_vm13 = vc.u32 %v2517_v52, %v2521_v3 }
 0x2a0   : > { %v2400_v26 = vor.u32 %v2399_v51, %v2398_v23  ;;  %v2403_v61 = vshll.u32 %v2402_v12, 23  ;;  %v2508_v39 = vsel %vm2507_vm12, 1, %v5780_v0  ;;  %v2523_v15 = vshll.u32 %v2519_v30, 16 }
 0x2a1   : > { %v2510_v38 = vadd.s32 %v2508_v39, %v2506_v42  ;;  %v2526_v63 = vsel %vm2525_vm13, 1, %v5780_v0  ;;  %v2527_v16 = vadd.s32 %v2521_v3, %v2517_v52  ;;  %v2480_v19 = vsel %vm2476_vm2, %v7354_v13, %v2479_v37 }
 0x2a2   : > { %v2404_v32 = vor.u32 4788187, %v2403_v61  ;;  %v2528_v62 = vadd.s32 %v2526_v63, %v2520_v60  ;;  %v5578_v10 = vadd.s32 4294967169, %v2601_v24  ;;  %v2412_v36 = vsel %vm2289_vm9, %v2411_v47, %v7356_v50 }
 0x2a3   : > { %v2502_v1 = vshrl.u32 %v2497_v11, 16  ;;  %v2511_v28 = vadd.s32 %v2510_v38, %v2500_v18  ;;  %vm2529_vm14 = vc.u32 %v2527_v16, %v2523_v15  ;;  %v2407_v8 = vcvt.s32.f32 %v2400_v26 }
 0x2a4   : > { %v2405_v22 = vand.u32 2147483647, %v2404_v32  ;;  %v2530_v45 = vsel %vm2529_vm14, 1, %v5780_v0  ;;  %v2607_v49 = vadd.s32 1, %v5578_v10  ;;  %vm7418_vm15 = vcmp.le.f32.partialorder %v2287_v55, 0.7853982 }
 0x2a5   : > { %v7422_v13 = vadd.s32 %v2511_v28, %v2502_v1  ;;  %v2522_v37 = vshrl.u32 %v2518_v35, 16  ;;  %v2532_v2 = vadd.s32 %v2530_v45, %v2528_v62  ;;  %v2414_v47 = vsel %vm7418_vm15, 0, %v2412_v36 }
 0x2a6   : > { %v2408_v50 = vmul.f32 %v2407_v8, %v2405_v22  ;;  %v2481_v11 = vsel %vm2475_vm3, %v7393_v46, %v2480_v19  ;;  %vm2608_vm0 = vcmp.gt.s32.totalorder %v2607_v49, 0  ;;  %v2524_v24 = vshrl.u32 %v2519_v30, 16 }
 0x2a7   : > { %v7429_v20 = vadd.s32 %v2527_v16, %v2523_v15  ;;  %v2533_v55 = vadd.s32 %v2532_v2, %v2522_v37  ;;  %v2609_v52 = vsel %vm2608_vm0, %v2607_v49, 0  ;;  %v353_v44 = vadd.f32 %v7224_v25, %v352_v53 }
 0x2a8   : > { %v2409_v29 = vxor.u32 2147483648, %v2408_v50  ;;  %v2597_v35 = vand.u32 2147483647, %v7359_v59  ;;  %v2611_v6 = vand.u32 31, %v2609_v52  ;;  %v2431_v56 = vadd.s32 3, %v2414_v47 }
 0x2a9   : > { %v2534_v54 = vadd.s32 %v2533_v55, %v2524_v24  ;;  %v2535_v5 = vmul.u32 %v7374_v27, %v2481_v11  ;;  %vm2537_vm1 = vc.u32 %v7422_v13, %v7429_v20  ;;  %v7438_v46 = vshrl.u32 %v2609_v52, 5 }
 0x2aa   : > { %v2410_v57 = vsel %vm2289_vm9, %v2409_v29, %v2408_v50  ;;  %v2612_v40 = vsub.s32 32, %v2611_v6  ;;  %v2614_v33 = vshll.u32 %v5774_v4, %v2611_v6  ;;  %v2617_v3 = vshll.u32 %v5775_v7, %v2611_v6 }
 0x2ab   : > { %v2413_v34 = vsel %vm7418_vm15, %v7149_v31, %v2410_v57  ;;  %v2538_v30 = vadd.s32 1, %v2534_v54  ;;  %v2623_v27 = vshll.u32 %v5777_v14, %v2611_v6  ;;  %v2620_v58 = vshll.u32 %v5776_v9, %v2611_v6 }
 0x2ac   : > { %v2415_v23 = vmul.f32 %v2413_v34, %v2413_v34  ;;  %v2615_v51 = vshrl.u32 %v5775_v7, %v2612_v40  ;;  %v2618_v12 = vshrl.u32 %v5776_v9, %v2612_v40  ;;  %v2621_v42 = vshrl.u32 %v5777_v14, %v2612_v40 }
 0x2ad   : > { %v2539_v18 = vsel %vm2537_vm1, %v2538_v30, %v2534_v54  ;;  %v2624_v60 = vshrl.u32 %v5778_v17, %v2612_v40  ;;  %v2626_v26 = vshll.u32 %v5778_v17, %v2611_v6  ;;  %v7452_v61 = vmul.f32 30.0, %v353_v44 }
 0x2ae   : > { %v2416_v39 = vmul.f32 -0.001358992, %v2415_v23  ;;  %v2423_v38 = vmul.f32 -0.00019511016, %v2415_v23  ;;  %v2540_v15 = vadd.s32 %v2539_v18, %v2535_v5  ;;  %v7454_v63 = vand.u32 3, %v2431_v56 }
 0x2af   : > { %v2604_v16 = vand.u32 8388607, %v2597_v35  ;;  %v2625_v32 = vor.u32 %v2624_v60, %v2623_v27  ;;  %v2627_v19 = vshrl.u32 %v5779_v21, %v2612_v40  ;;  %v2616_v1 = vor.u32 %v2615_v51, %v2614_v33 }
 0x2b0   : > { %v2417_v62 = vadd.f32 0.041655596, %v2416_v39  ;;  %v2424_v10 = vadd.f32 0.008332121, %v2423_v38  ;;  %v2541_v36 = vadd.s32 536870912, %v2540_v15  ;;  %v2619_v28 = vor.u32 %v2618_v12, %v2617_v3 }
 0x2b1   : > { %v2622_v22 = vor.u32 %v2621_v42, %v2620_v58  ;;  %v2628_v8 = vor.u32 %v2627_v19, %v2626_v26  ;;  %vm2632_vm2 = vcmp.lt.s32.totalorder %v7438_v46, 4  ;;  %vm2629_vm3 = vcmp.lt.s32.totalorder %v7438_v46, 1 }
 0x2b2   : > { %v2418_v45 = vmul.f32 %v2417_v62, %v2415_v23  ;;  %v2425_v49 = vmul.f32 %v2424_v10, %v2415_v23  ;;  %v7460_v53 = vshrl.u32 %v2541_v36, 30  ;;  %v2605_v48 = vor.u32 8388608, %v2604_v16 }
 0x2b3   : > { %vm2631_vm4 = vcmp.lt.s32.totalorder %v7438_v46, 3  ;;  %v2638_v37 = vsel %vm2632_vm2, %v2625_v32, 920167782  ;;  %vm2434_vm5 = vcmp.eq.s32.totalorder %v7454_v63, 0  ;;  %v2637_v11 = vsel %vm2629_vm3, %v2616_v1, %v2619_v28 }
 0x2b4   : > { %v2419_v2 = vadd.f32 -0.4999988, %v2418_v45  ;;  %v2426_v50 = vadd.f32 -0.16666654, %v2425_v49  ;;  %v2543_v47 = vshll.u32 %v7460_v53, 30  ;;  %v2641_v24 = vsel %vm2629_vm3, %v2619_v28, %v2622_v22 }
 0x2b5   : > { %v2642_v55 = vsel %vm2632_vm2, %v2628_v8, 1326507024  ;;  %v2755_v52 = vand.u32 2139095040, %v7452_v61  ;;  %vm2433_vm6 = vcmp.lt.s32.totalorder %v7454_v63, 2  ;;  %v2639_v56 = vsel %vm2631_vm4, %v2622_v22, %v2638_v37 }
 0x2b6   : > { %v2420_v44 = vmul.f32 %v2419_v2, %v2415_v23  ;;  %v2427_v29 = vmul.f32 %v2426_v50, %v2415_v23  ;;  %v2544_v6 = vsub.s32 %v2540_v15, %v2543_v47  ;;  %vm2430_vm7 = vweird.f32 %v7149_v31 }
 0x2b7   : > { %v2613_v54 = vshrl.u32 %v5774_v4, %v2612_v40  ;;  %vm2630_vm8 = vcmp.lt.s32.totalorder %v7438_v46, 2  ;;  %v2643_v5 = vsel %vm2631_vm4, %v2625_v32, %v2642_v55  ;;  %v7483_v57 = vshll.u32 %v2605_v48, 8 }
 0x2b8   : > { %v2421_v33 = vadd.f32 1.0, %v2420_v44  ;;  %v2428_v30 = vadd.f32 1.0, %v2427_v29  ;;  %vm2545_vm9 = vcmp.lt.s32.totalorder %v2544_v6, 0  ;;  %v2546_v3 = vsub.s32 0, %v2544_v6 }
 0x2b9   : > { %vm2437_vm10 = vcmp.eq.s32.totalorder %v7454_v63, 2  ;;  %v2536_v27 = vadd.s32 %v7429_v20, %v7422_v13  ;;  %v2640_v23 = vsel %vm2630_vm8, %v2637_v11, %v2639_v56  ;;  %v2644_v40 = vsel %vm2630_vm8, %v2641_v24, %v2643_v5 }
 0x2ba   : > { %v2429_v51 = vmul.f32 %v2428_v30, %v2413_v34  ;;  %v2438_v12 = vxor.u32 2147483648, %v2421_v33  ;;  %v2547_v58 = vsel %vm2545_vm9, %v2546_v3, %v2544_v6  ;;  %v2648_v18 = vand.u32 65535, %v2644_v40 }
 0x2bb   : > { %v2548_v42 = vclz %v2547_v58  ;;  %v2647_v60 = vshrl.u32 %v7483_v57, 16  ;;  %v2649_v26 = vshrl.u32 %v2644_v40, 16  ;;  %v2756_v39 = vshrl.u32 %v2755_v52, 23 }
 0x2bc   : > { %v2435_v38 = vxor.u32 2147483648, %v2429_v51  ;;  %v7495_v15 = vsel %vm2629_vm3, %v2613_v54, %v2616_v1  ;;  %v2634_v13 = vsel %vm2632_vm2, %v2622_v22, 2102212464  ;;  %v2646_v20 = vand.u32 65535, %v7483_v57 }
 0x2bd   : > { %v5576_v16 = vadd.s32 4294967294, %v2548_v42  ;;  %v2566_v34 = vsub.s32 4, %v7460_v53  ;;  %v2652_v32 = vmul.u32 %v2648_v18, %v2647_v60  ;;  %v2671_v19 = vshrl.u32 %v2640_v23, 16 }
 0x2be   : > { %v2436_v62 = vsel %vm2434_vm5, %v2421_v33, %v2435_v38  ;;  %v2439_v10 = vsel %vm2437_vm10, %v2438_v12, %v2429_v51  ;;  %vm2444_vm11 = vcmp.lt.s32.totalorder %v7247_v41, 0  ;;  %v2651_v36 = vmul.u32 %v2649_v26, %v2646_v20 }
 0x2bf   : > { %v2670_v1 = vand.u32 65535, %v2640_v23  ;;  %v2440_v22 = vsel %vm2433_vm6, %v2436_v62, %v2439_v10  ;;  %vm5577_vm12 = vcmp.lt.s32.totalorder %v5576_v16, 0  ;;  %v2635_v8 = vsel %vm2631_vm4, %v2619_v28, %v2634_v13 }
 0x2c0   : > { %v2650_v45 = vmul.u32 %v2648_v18, %v2646_v20  ;;  %v2441_v49 = vsel %vm2430_vm7, nan, %v2440_v22  ;;  %v2551_v48 = vsel %vm5577_vm12, 0, %v5576_v16  ;;  %v2653_v37 = vmul.u32 %v2649_v26, %v2647_v60 }
 0x2c1   : > { %v2654_v2 = vshll.u32 %v2651_v36, 16  ;;  %v2552_v50 = vsub.s32 32, %v2551_v48  ;;  %v2556_v47 = vsub.s32 4294967266, %v2551_v48  ;;  %v2656_v11 = vshll.u32 %v2652_v32, 16  ;;  %5399 = vst [vmem:[%s6179_s20 + $0x60] sm:$0xff] %v2441_v49 }
 0x2c2   : > { %v2673_v24 = vmul.u32 %v2671_v19, %v2646_v20  ;;  %v2553_v55 = vshll.u32 %v2544_v6, %v2551_v48  ;;  %v2674_v52 = vmul.u32 %v2670_v1, %v2647_v60  ;;  %v2655_v54 = vshrl.u32 %v2651_v36, 16 }
 0x2c3   : > { %vm2658_vm13 = vc.u32 %v2650_v45, %v2654_v2  ;;  %v2660_v63 = vadd.s32 %v2654_v2, %v2650_v45  ;;  %v2554_v44 = vshrl.u32 %v2536_v27, %v2552_v50  ;;  %v2557_v29 = vadd.s32 127, %v2556_v47 }
 0x2c4   : > { %v2659_v28 = vsel %vm2658_vm13, 1, %v5780_v0  ;;  %v2676_v56 = vshll.u32 %v2673_v24, 16  ;;  %v2672_v5 = vmul.u32 %v2670_v1, %v2646_v20  ;;  %v2675_v23 = vmul.u32 %v2671_v19, %v2647_v60 }
 0x2c5   : > { %v2661_v31 = vadd.s32 %v2659_v28, %v2653_v37  ;;  %vm2662_vm14 = vc.u32 %v2660_v63, %v2656_v11  ;;  %v2555_v33 = vor.u32 %v2554_v44, %v2553_v55  ;;  %v2558_v30 = vshll.u32 %v2557_v29, 23 }
 0x2c6   : > { %v2663_v3 = vsel %vm2662_vm14, 1, %v5780_v0  ;;  %v2678_v51 = vshll.u32 %v2674_v52, 16  ;;  %vm2680_vm15 = vc.u32 %v2672_v5, %v2676_v56  ;;  %v2682_v6 = vadd.s32 %v2676_v56, %v2672_v5 }
 0x2c7   : > { %v2665_v40 = vadd.s32 %v2663_v3, %v2661_v31  ;;  %v2559_v12 = vor.u32 4788187, %v2558_v30  ;;  %v2567_v27 = vsel %vm2444_vm11, %v2566_v34, %v7460_v53  ;;  %v2681_v58 = vsel %vm2680_vm15, 1, %v5780_v0 }
 0x2c8   : > { %v5581_v18 = vadd.s32 4294967169, %v2756_v39  ;;  %v2657_v42 = vshrl.u32 %v2652_v32, 16  ;;  %v2683_v38 = vadd.s32 %v2681_v58, %v2675_v23  ;;  %vm2684_vm0 = vc.u32 %v2682_v6, %v2678_v51  ;;  %v355_v39 = vpop.f32.mrf.mxu2 }
 0x2c9   : > { %v2666_v26 = vadd.s32 %v2665_v40, %v2655_v54  ;;  %v2560_v13 = vand.u32 2147483647, %v2559_v12  ;;  %v2562_v20 = vcvt.s32.f32 %v2555_v33  ;;  %v2685_v60 = vsel %vm2684_vm0, 1, %v5780_v0 }
 0x2ca   : > { %v2762_v16 = vadd.s32 1, %v5581_v18  ;;  %vm7522_vm1 = vcmp.le.f32.partialorder %v2442_v43, 0.7853982  ;;  %v2677_v62 = vshrl.u32 %v2673_v24, 16  ;;  %v2687_v53 = vadd.s32 %v2685_v60, %v2683_v38 }
 0x2cb   : > { %v2752_v34 = vand.u32 2147483647, %v7452_v61  ;;  %v2563_v32 = vmul.f32 %v2562_v20, %v2560_v13  ;;  %v2569_v10 = vsel %vm7522_vm1, 0, %v2567_v27  ;;  %v7529_v36 = vadd.s32 %v2666_v26, %v2657_v42 }
 0x2cc   : > { %vm2763_vm2 = vcmp.gt.s32.totalorder %v2762_v16, 0  ;;  %v2636_v1 = vsel %vm2630_vm8, %v7495_v15, %v2635_v8  ;;  %v2679_v43 = vshrl.u32 %v2674_v52, 16  ;;  %v2688_v22 = vadd.s32 %v2687_v53, %v2677_v62 }
 0x2cd   : > { %v2764_v45 = vsel %vm2763_vm2, %v2762_v16, 0  ;;  %v2564_v49 = vxor.u32 2147483648, %v2563_v32  ;;  %v7534_v48 = vadd.s32 %v2682_v6, %v2678_v51  ;;  %v356_v2 = vadd.f32 %v7224_v25, %v355_v39 }
 0x2ce   : > { %v2766_v37 = vand.u32 31, %v2764_v45  ;;  %v2586_v50 = vadd.s32 3, %v2569_v10  ;;  %v2689_v47 = vadd.s32 %v2688_v22, %v2679_v43  ;;  %v2759_v11 = vand.u32 8388607, %v2752_v34 }
 0x2cf   : > { %v2565_v24 = vsel %vm2444_vm11, %v2564_v49, %v2563_v32  ;;  %v2690_v46 = vmul.u32 %v7483_v57, %v2636_v1  ;;  %vm2692_vm3 = vc.u32 %v7529_v36, %v7534_v48  ;;  %v7547_v25 = vshrl.u32 %v2764_v45, 5 }
 0x2d0   : > { %v2767_v15 = vsub.s32 32, %v2766_v37  ;;  %v2568_v8 = vsel %vm7522_vm1, %v7247_v41, %v2565_v24  ;;  %v2693_v55 = vadd.s32 1, %v2689_v47  ;;  %v2769_v63 = vshll.u32 %v5774_v4, %v2766_v37 }
 0x2d1   : > { %v2570_v52 = vmul.f32 %v2568_v8, %v2568_v8  ;;  %v2772_v29 = vshll.u32 %v5775_v7, %v2766_v37  ;;  %v2778_v54 = vshll.u32 %v5777_v14, %v2766_v37  ;;  %v2775_v3 = vshll.u32 %v5776_v9, %v2766_v37 }
 0x2d2   : > { %v2770_v44 = vshrl.u32 %v5775_v7, %v2767_v15  ;;  %v2773_v57 = vshrl.u32 %v5776_v9, %v2767_v15  ;;  %v2694_v28 = vsel %vm2692_vm3, %v2693_v55, %v2689_v47  ;;  %v2776_v56 = vshrl.u32 %v5777_v14, %v2767_v15 }
 0x2d3   : > { %v2779_v31 = vshrl.u32 %v5778_v17, %v2767_v15  ;;  %v2571_v5 = vmul.f32 -0.001358992, %v2570_v52  ;;  %v2578_v33 = vmul.f32 -0.00019511016, %v2570_v52  ;;  %v2695_v30 = vadd.s32 %v2694_v28, %v2690_v46 }
 0x2d4   : > { %v2771_v23 = vor.u32 %v2770_v44, %v2769_v63  ;;  %v2781_v51 = vshll.u32 %v5778_v17, %v2766_v37  ;;  %v2782_v6 = vshrl.u32 %v5779_v21, %v2767_v15  ;;  %v7559_v18 = vor.u32 %v2773_v57, %v2772_v29 }
 0x2d5   : > { %v2780_v40 = vor.u32 %v2779_v31, %v2778_v54  ;;  %v2572_v12 = vadd.f32 0.041655596, %v2571_v5  ;;  %v2579_v27 = vadd.f32 0.008332121, %v2578_v33  ;;  %v2696_v58 = vadd.s32 536870912, %v2695_v30 }
 0x2d6   : > { %v2587_v42 = vand.u32 3, %v2586_v50  ;;  %v2760_v26 = vor.u32 8388608, %v2759_v11  ;;  %v2777_v38 = vor.u32 %v2776_v56, %v2775_v3  ;;  %v2783_v13 = vor.u32 %v2782_v6, %v2781_v51 }
 0x2d7   : > { %v2573_v20 = vmul.f32 %v2572_v12, %v2570_v52  ;;  %v2580_v60 = vmul.f32 %v2579_v27, %v2570_v52  ;;  %v7561_v16 = vshrl.u32 %v2696_v58, 30  ;;  %vm2787_vm4 = vcmp.lt.s32.totalorder %v7547_v25, 4 }
 0x2d8   : > { %v7564_v19 = vmul.f32 30.0, %v356_v2  ;;  %vm2784_vm5 = vcmp.lt.s32.totalorder %v7547_v25, 1  ;;  %vm2786_vm6 = vcmp.lt.s32.totalorder %v7547_v25, 3  ;;  %v2793_v62 = vsel %vm2787_vm4, %v2780_v40, 920167782 }
 0x2d9   : > { %v2574_v53 = vadd.f32 -0.4999988, %v2573_v20  ;;  %v2581_v39 = vadd.f32 -0.16666654, %v2580_v60  ;;  %v2698_v32 = vshll.u32 %v7561_v16, 30  ;;  %v2792_v10 = vsel %vm2784_vm5, %v2771_v23, %v7559_v18 }
 0x2da   : > { %vm2785_vm7 = vcmp.lt.s32.totalorder %v7547_v25, 2  ;;  %v2794_v1 = vsel %vm2786_vm6, %v2777_v38, %v2793_v62  ;;  %v2797_v43 = vsel %vm2787_vm4, %v2783_v13, 1326507024  ;;  %v7579_v22 = vshll.u32 %v2760_v26, 8 }
 0x2db   : > { %v2575_v45 = vmul.f32 %v2574_v53, %v2570_v52  ;;  %v2582_v49 = vmul.f32 %v2581_v39, %v2570_v52  ;;  %vm2588_vm8 = vcmp.lt.s32.totalorder %v2587_v42, 2  ;;  %v2699_v37 = vsub.s32 %v2695_v30, %v2698_v32 }
 0x2dc   : > { %v2796_v2 = vsel %vm2784_vm5, %v7559_v18, %v2777_v38  ;;  %vm2585_vm9 = vweird.f32 %v7247_v41  ;;  %vm2589_vm10 = vcmp.eq.s32.totalorder %v2587_v42, 0  ;;  %vm2592_vm11 = vcmp.eq.s32.totalorder %v2587_v42, 2 }
 0x2dd   : > { %v2795_v50 = vsel %vm2785_vm7, %v2792_v10, %v2794_v1  ;;  %v2798_v47 = vsel %vm2786_vm6, %v2780_v40, %v2797_v43  ;;  %v2576_v11 = vadd.f32 1.0, %v2575_v45  ;;  %v2583_v24 = vadd.f32 1.0, %v2582_v49 }
 0x2de   : > { %vm2700_vm12 = vcmp.lt.s32.totalorder %v2699_v37, 0  ;;  %v2701_v46 = vsub.s32 0, %v2699_v37  ;;  %v2768_v55 = vshrl.u32 %v5774_v4, %v2767_v15  ;;  %v2799_v63 = vsel %vm2785_vm7, %v2796_v2, %v2798_v47 }
 0x2df   : > { %v2802_v52 = vshrl.u32 %v7579_v22, 16  ;;  %v2910_v44 = vand.u32 2139095040, %v7564_v19  ;;  %v2584_v29 = vmul.f32 %v2583_v24, %v2568_v8  ;;  %v2593_v57 = vxor.u32 2147483648, %v2576_v11 }
 0x2e0   : > { %v2702_v28 = vsel %vm2700_vm12, %v2701_v46, %v2699_v37  ;;  %v2803_v56 = vand.u32 65535, %v2799_v63  ;;  %v2804_v31 = vshrl.u32 %v2799_v63, 16  ;;  %v2825_v5 = vand.u32 65535, %v2795_v50 }
 0x2e1   : > { %v2703_v54 = vclz %v2702_v28  ;;  %v2826_v33 = vshrl.u32 %v2795_v50, 16  ;;  %v2590_v30 = vxor.u32 2147483648, %v2584_v29  ;;  %v2691_v3 = vadd.s32 %v7534_v48, %v7529_v36 }
 0x2e2   : > { %v7598_v15 = vsel %vm2784_vm5, %v2768_v55, %v2771_v23  ;;  %v2801_v40 = vand.u32 65535, %v7579_v22  ;;  %v2721_v8 = vsub.s32 4, %v7561_v16  ;;  %v2789_v6 = vsel %vm2787_vm4, %v2777_v38, 2102212464 }
 0x2e3   : > { %v5579_v51 = vadd.s32 4294967294, %v2703_v54  ;;  %v2807_v12 = vmul.u32 %v2803_v56, %v2802_v52  ;;  %v2591_v27 = vsel %vm2589_vm10, %v2576_v11, %v2590_v30  ;;  %v2594_v58 = vsel %vm2592_vm11, %v2593_v57, %v2584_v29 }
 0x2e4   : > { %v2806_v26 = vmul.u32 %v2804_v31, %v2801_v40  ;;  %v2911_v36 = vshrl.u32 %v2910_v44, 23  ;;  %v2595_v48 = vsel %vm2588_vm8, %v2591_v27, %v2594_v58  ;;  %vm2599_vm13 = vcmp.lt.s32.totalorder %v7359_v59, 0  ;;  %v357_v58 = vpop.f32.mrf.mxu2 }
 0x2e5   : > { %vm5580_vm14 = vcmp.lt.s32.totalorder %v5579_v51, 0  ;;  %v2827_v23 = vmul.u32 %v2825_v5, %v2801_v40  ;;  %v2828_v13 = vmul.u32 %v2826_v33, %v2801_v40  ;;  %v2596_v20 = vsel %vm2585_vm9, nan, %v2595_v48 }
 0x2e6   : > { %v2706_v60 = vsel %vm5580_vm14, 0, %v5579_v51  ;;  %v2805_v38 = vmul.u32 %v2803_v56, %v2801_v40  ;;  %v2809_v62 = vshll.u32 %v2806_v26, 16  ;;  %v2808_v32 = vmul.u32 %v2804_v31, %v2802_v52  ;;  %5400 = vst [vmem:[%s6179_s20 + $0x68] sm:$0xff] %v2596_v20 }
 0x2e7   : > { %v2707_v53 = vsub.s32 32, %v2706_v60  ;;  %v2711_v39 = vsub.s32 4294967266, %v2706_v60  ;;  %v2811_v10 = vshll.u32 %v2807_v12, 16  ;;  %v2829_v42 = vmul.u32 %v2825_v5, %v2802_v52 }
 0x2e8   : > { %vm2813_vm15 = vc.u32 %v2805_v38, %v2809_v62  ;;  %v2815_v1 = vadd.s32 %v2809_v62, %v2805_v38  ;;  %v2831_v43 = vshll.u32 %v2828_v13, 16  ;;  %v2708_v45 = vshll.u32 %v2699_v37, %v2706_v60  ;;  %v7640_v60 = vld [vmem:[%s9382_s2] ss:$0 sm:$0xff] }
 0x2e9   : > { %v2709_v49 = vshrl.u32 %v2691_v3, %v2707_v53  ;;  %v2712_v2 = vadd.s32 127, %v2711_v39  ;;  %v2814_v50 = vsel %vm2813_vm15, 1, %v5780_v0  ;;  %v2810_v47 = vshrl.u32 %v2806_v26, 16 }
 0x2ea   : > { %v2816_v41 = vadd.s32 %v2814_v50, %v2808_v32  ;;  %vm2817_vm0 = vc.u32 %v2815_v1, %v2811_v10  ;;  %v2830_v11 = vmul.u32 %v2826_v33, %v2802_v52  ;;  %vm2835_vm1 = vc.u32 %v2827_v23, %v2831_v43 }
 0x2eb   : > { %v2710_v24 = vor.u32 %v2709_v49, %v2708_v45  ;;  %v2713_v46 = vshll.u32 %v2712_v2, 23  ;;  %v2818_v55 = vsel %vm2817_vm0, 1, %v5780_v0  ;;  %v2833_v44 = vshll.u32 %v2829_v42, 16 }
 0x2ec   : > { %v2820_v63 = vadd.s32 %v2818_v55, %v2816_v41  ;;  %v2836_v29 = vsel %vm2835_vm1, 1, %v5780_v0  ;;  %v2837_v57 = vadd.s32 %v2831_v43, %v2827_v23  ;;  %v2790_v37 = vsel %vm2786_vm6, %v7559_v18, %v2789_v6 }
 0x2ed   : > { %v2714_v28 = vor.u32 4788187, %v2713_v46  ;;  %v2838_v56 = vadd.s32 %v2836_v29, %v2830_v11  ;;  %v5584_v54 = vadd.s32 4294967169, %v2911_v36  ;;  %v2722_v52 = vsel %vm2599_vm13, %v2721_v8, %v7561_v16 }
 0x2ee   : > { %v2812_v31 = vshrl.u32 %v2807_v12, 16  ;;  %v2821_v5 = vadd.s32 %v2820_v63, %v2810_v47  ;;  %vm2839_vm2 = vc.u32 %v2837_v57, %v2833_v44  ;;  %v2717_v30 = vcvt.s32.f32 %v2710_v24 }
 0x2ef   : > { %v2715_v33 = vand.u32 2147483647, %v2714_v28  ;;  %v2840_v3 = vsel %vm2839_vm2, 1, %v5780_v0  ;;  %v2917_v40 = vadd.s32 1, %v5584_v54  ;;  %vm7623_vm3 = vcmp.le.f32.partialorder %v2597_v35, 0.7853982 }
 0x2f0   : > { %v2832_v18 = vshrl.u32 %v2828_v13, 16  ;;  %v2842_v6 = vadd.s32 %v2840_v3, %v2838_v56  ;;  %v2907_v27 = vand.u32 2147483647, %v7564_v19  ;;  %v2724_v8 = vsel %vm7623_vm3, 0, %v2722_v52 }
 0x2f1   : > { %v2718_v16 = vmul.f32 %v2717_v30, %v2715_v33  ;;  %v7630_v12 = vadd.s32 %v2821_v5, %v2812_v31  ;;  %vm2918_vm4 = vcmp.gt.s32.totalorder %v2917_v40, 0  ;;  %v2791_v26 = vsel %vm2785_vm7, %v7598_v15, %v2790_v37 }
 0x2f2   : > { %v2834_v35 = vshrl.u32 %v2829_v42, 16  ;;  %v2843_v36 = vadd.s32 %v2842_v6, %v2832_v18  ;;  %v2919_v48 = vsel %vm2918_vm4, %v2917_v40, 0  ;;  %v7635_v13 = vadd.s32 %v2837_v57, %v2833_v44 }
 0x2f3   : > { %v2719_v23 = vxor.u32 2147483648, %v2718_v16  ;;  %v2921_v20 = vand.u32 31, %v2919_v48  ;;  %v358_v38 = vadd.f32 %v7640_v60, %v357_v58  ;;  %v2741_v62 = vadd.s32 3, %v2724_v8 }
 0x2f4   : > { %v2844_v53 = vadd.s32 %v2843_v36, %v2834_v35  ;;  %v2845_v15 = vmul.u32 %v7579_v22, %v2791_v26  ;;  %vm2847_vm5 = vc.u32 %v7630_v12, %v7635_v13  ;;  %v2914_v1 = vand.u32 8388607, %v2907_v27 }
 0x2f5   : > { %v2720_v25 = vsel %vm2599_vm13, %v2719_v23, %v2718_v16  ;;  %v2922_v39 = vsub.s32 32, %v2921_v20  ;;  %v7655_v42 = vshrl.u32 %v2919_v48, 5  ;;  %v2924_v22 = vshll.u32 %v5774_v4, %v2921_v20 }
 0x2f6   : > { %v7651_v32 = vsel %vm7623_vm3, %v7359_v59, %v2720_v25  ;;  %v2848_v10 = vadd.s32 1, %v2844_v53  ;;  %v2933_v49 = vshll.u32 %v5777_v14, %v2921_v20  ;;  %v2927_v55 = vshll.u32 %v5775_v7, %v2921_v20 }
 0x2f7   : > { %v2725_v43 = vmul.f32 %v7651_v32, %v7651_v32  ;;  %v2925_v45 = vshrl.u32 %v5775_v7, %v2922_v39  ;;  %v2928_v50 = vshrl.u32 %v5776_v9, %v2922_v39  ;;  %v2931_v47 = vshrl.u32 %v5777_v14, %v2922_v39 }
 0x2f8   : > { %v2849_v2 = vsel %vm2847_vm5, %v2848_v10, %v2844_v53  ;;  %v2934_v41 = vshrl.u32 %v5778_v17, %v2922_v39  ;;  %v2930_v63 = vshll.u32 %v5776_v9, %v2921_v20  ;;  %v2936_v29 = vshll.u32 %v5778_v17, %v2921_v20 }
 0x2f9   : > { %v2726_v11 = vmul.f32 -0.001358992, %v2725_v43  ;;  %v2733_v24 = vmul.f32 -0.00019511016, %v2725_v43  ;;  %v2850_v46 = vadd.s32 %v2849_v2, %v2845_v15  ;;  %v2937_v57 = vshrl.u32 %v5779_v21, %v2922_v39 }
 0x2fa   : > { %v2935_v44 = vor.u32 %v2934_v41, %v2933_v49  ;;  %v7669_v56 = vand.u32 3, %v2741_v62  ;;  %v2926_v52 = vor.u32 %v2925_v45, %v2924_v22  ;;  %v2929_v31 = vor.u32 %v2928_v50, %v2927_v55 }
 0x2fb   : > { %v2727_v28 = vadd.f32 0.041655596, %v2726_v11  ;;  %v2734_v37 = vadd.f32 0.008332121, %v2733_v24  ;;  %v2851_v54 = vadd.s32 536870912, %v2850_v46  ;;  %v2932_v5 = vor.u32 %v2931_v47, %v2930_v63 }
 0x2fc   : > { %v2938_v33 = vor.u32 %v2937_v57, %v2936_v29  ;;  %vm2942_vm6 = vcmp.lt.s32.totalorder %v7655_v42, 4  ;;  %v7674_v51 = vmul.f32 30.0, %v358_v38  ;;  %v2915_v18 = vor.u32 8388608, %v2914_v1 }
 0x2fd   : > { %v2728_v30 = vmul.f32 %v2727_v28, %v2725_v43  ;;  %v2735_v3 = vmul.f32 %v2734_v37, %v2725_v43  ;;  %v7671_v40 = vshrl.u32 %v2851_v54, 30  ;;  %v2948_v6 = vsel %vm2942_vm6, %v2935_v44, 920167782 }
 0x2fe   : > { %vm2939_vm7 = vcmp.lt.s32.totalorder %v7655_v42, 1  ;;  %vm2744_vm8 = vcmp.eq.s32.totalorder %v7669_v56, 0  ;;  %vm2747_vm9 = vcmp.eq.s32.totalorder %v7669_v56, 2  ;;  %vm2941_vm10 = vcmp.lt.s32.totalorder %v7655_v42, 3 }
 0x2ff   : > { %v2729_v58 = vadd.f32 -0.4999988, %v2728_v30  ;;  %v2736_v16 = vadd.f32 -0.16666654, %v2735_v3  ;;  %v2853_v8 = vshll.u32 %v7671_v40, 30  ;;  %v2947_v26 = vsel %vm2939_vm7, %v2926_v52, %v2929_v31 }
 0x300   : > { %v2951_v35 = vsel %vm2939_vm7, %v2929_v31, %v2932_v5  ;;  %v2952_v36 = vsel %vm2942_vm6, %v2938_v33, 1326507024  ;;  %vm2743_vm11 = vcmp.lt.s32.totalorder %v7669_v56, 2  ;;  %v2949_v38 = vsel %vm2941_vm10, %v2932_v5, %v2948_v6 }
 0x301   : > { %v2730_v48 = vmul.f32 %v2729_v58, %v2725_v43  ;;  %v2737_v23 = vmul.f32 %v2736_v16, %v2725_v43  ;;  %v2854_v20 = vsub.s32 %v2850_v46, %v2853_v8  ;;  %vm2740_vm12 = vweird.f32 %v7359_v59 }
 0x302   : > { %vm2940_vm13 = vcmp.lt.s32.totalorder %v7655_v42, 2  ;;  %v2953_v62 = vsel %vm2941_vm10, %v2935_v44, %v2952_v36  ;;  %v7696_v53 = vshll.u32 %v2915_v18, 8  ;;  %v3065_v25 = vand.u32 2139095040, %v7674_v51 }
 0x303   : > { %v2731_v15 = vadd.f32 1.0, %v2730_v48  ;;  %v2738_v10 = vadd.f32 1.0, %v2737_v23  ;;  %vm2855_vm14 = vcmp.lt.s32.totalorder %v2854_v20, 0  ;;  %v2856_v1 = vsub.s32 0, %v2854_v20 }
 0x304   : > { %v2846_v43 = vadd.s32 %v7635_v13, %v7630_v12  ;;  %v2923_v22 = vshrl.u32 %v5774_v4, %v2922_v39  ;;  %v2950_v45 = vsel %vm2940_vm13, %v2947_v26, %v2949_v38  ;;  %v2954_v49 = vsel %vm2940_vm13, %v2951_v35, %v2953_v62 }
 0x305   : > { %v2739_v2 = vmul.f32 %v2738_v10, %v7651_v32  ;;  %v2748_v50 = vxor.u32 2147483648, %v2731_v15  ;;  %v2857_v47 = vsel %vm2855_vm14, %v2856_v1, %v2854_v20  ;;  %v2958_v41 = vand.u32 65535, %v2954_v49 }
 0x306   : > { %v2858_v11 = vclz %v2857_v47  ;;  %v2957_v24 = vshrl.u32 %v7696_v53, 16  ;;  %v2959_v46 = vshrl.u32 %v2954_v49, 16  ;;  %v3066_v55 = vshrl.u32 %v3065_v25, 23 }
 0x307   : > { %v2745_v63 = vxor.u32 2147483648, %v2739_v2  ;;  %v7710_v12 = vsel %vm2939_vm7, %v2923_v22, %v2926_v52  ;;  %v2944_v13 = vsel %vm2942_vm6, %v2932_v5, 2102212464  ;;  %v2956_v39 = vand.u32 65535, %v7696_v53 }
 0x308   : > { %v5582_v44 = vadd.s32 4294967294, %v2858_v11  ;;  %v2876_v32 = vsub.s32 4, %v7671_v40  ;;  %v2962_v29 = vmul.u32 %v2958_v41, %v2957_v24  ;;  %v2981_v57 = vshrl.u32 %v2950_v45, 16 }
 0x309   : > { %v2746_v28 = vsel %vm2744_vm8, %v2731_v15, %v2745_v63  ;;  %v2749_v37 = vsel %vm2747_vm9, %v2748_v50, %v2739_v2  ;;  %vm2754_vm15 = vcmp.lt.s32.totalorder %v7452_v61, 0  ;;  %v2961_v54 = vmul.u32 %v2959_v46, %v2956_v39 }
 0x30a   : > { %v2980_v52 = vand.u32 65535, %v2950_v45  ;;  %v2750_v5 = vsel %vm2743_vm11, %v2746_v28, %v2749_v37  ;;  %vm5583_vm0 = vcmp.lt.s32.totalorder %v5582_v44, 0  ;;  %v2945_v33 = vsel %vm2941_vm10, %v2929_v31, %v2944_v13 }
 0x30b   : > { %v2960_v30 = vmul.u32 %v2958_v41, %v2956_v39  ;;  %v2751_v3 = vsel %vm2740_vm12, nan, %v2750_v5  ;;  %v2861_v18 = vsel %vm5583_vm0, 0, %v5582_v44  ;;  %v2963_v6 = vmul.u32 %v2959_v46, %v2957_v24 }
 0x30c   : > { %v2964_v58 = vshll.u32 %v2961_v54, 16  ;;  %v2862_v16 = vsub.s32 32, %v2861_v18  ;;  %v2866_v8 = vsub.s32 4294967266, %v2861_v18  ;;  %v2966_v26 = vshll.u32 %v2962_v29, 16  ;;  %5401 = vst [vmem:[%s6179_s20 + $0x70] sm:$0xff] %v2751_v3 }
 0x30d   : > { %v2983_v35 = vmul.u32 %v2981_v57, %v2956_v39  ;;  %v2863_v36 = vshll.u32 %v2854_v20, %v2861_v18  ;;  %v2984_v48 = vmul.u32 %v2980_v52, %v2957_v24  ;;  %v2965_v25 = vshrl.u32 %v2961_v54, 16 }
 0x30e   : > { %vm2968_vm1 = vc.u32 %v2960_v30, %v2964_v58  ;;  %v2970_v56 = vadd.s32 %v2964_v58, %v2960_v30  ;;  %v2864_v23 = vshrl.u32 %v2846_v43, %v2862_v16  ;;  %v2867_v38 = vadd.s32 127, %v2866_v8 }
 0x30f   : > { %v2969_v31 = vsel %vm2968_vm1, 1, %v5780_v0  ;;  %v2986_v62 = vshll.u32 %v2983_v35, 16  ;;  %v2982_v15 = vmul.u32 %v2980_v52, %v2956_v39  ;;  %v2985_v45 = vmul.u32 %v2981_v57, %v2957_v24 }
 0x310   : > { %v2971_v59 = vadd.s32 %v2969_v31, %v2963_v6  ;;  %vm2972_vm2 = vc.u32 %v2970_v56, %v2966_v26  ;;  %v2865_v10 = vor.u32 %v2864_v23, %v2863_v36  ;;  %v2868_v1 = vshll.u32 %v2867_v38, 23 }
 0x311   : > { %v2973_v22 = vsel %vm2972_vm2, 1, %v5780_v0  ;;  %v2988_v2 = vshll.u32 %v2984_v48, 16  ;;  %vm2990_vm3 = vc.u32 %v2982_v15, %v2986_v62  ;;  %v2992_v20 = vadd.s32 %v2986_v62, %v2982_v15 }
 0x312   : > { %v2975_v49 = vadd.s32 %v2973_v22, %v2971_v59  ;;  %v2869_v50 = vor.u32 4788187, %v2868_v1  ;;  %v2877_v43 = vsel %vm2754_vm15, %v2876_v32, %v7671_v40  ;;  %v2991_v47 = vsel %vm2990_vm3, 1, %v5780_v0 }
 0x313   : > { %v5587_v41 = vadd.s32 4294967169, %v3066_v55  ;;  %v2967_v11 = vshrl.u32 %v2962_v29, 16  ;;  %v2993_v63 = vadd.s32 %v2991_v47, %v2985_v45  ;;  %vm2994_vm4 = vc.u32 %v2992_v20, %v2988_v2  ;;  %v360_v55 = vpop.f32.mrf.mxu2 }
 0x314   : > { %v2976_v46 = vadd.s32 %v2975_v49, %v2965_v25  ;;  %v2870_v13 = vand.u32 2147483647, %v2869_v50  ;;  %v2872_v39 = vcvt.s32.f32 %v2865_v10  ;;  %v2995_v24 = vsel %vm2994_vm4, 1, %v5780_v0 }
 0x315   : > { %v3072_v44 = vadd.s32 1, %v5587_v41  ;;  %vm7737_vm5 = vcmp.le.f32.partialorder %v2752_v34, 0.7853982  ;;  %v2987_v28 = vshrl.u32 %v2983_v35, 16  ;;  %v2997_v40 = vadd.s32 %v2995_v24, %v2993_v63 }
 0x316   : > { %v3062_v32 = vand.u32 2147483647, %v7674_v51  ;;  %v2873_v29 = vmul.f32 %v2872_v39, %v2870_v13  ;;  %v2879_v37 = vsel %vm7737_vm5, 0, %v2877_v43  ;;  %v7744_v54 = vadd.s32 %v2976_v46, %v2967_v11 }
 0x317   : > { %vm3073_vm6 = vcmp.gt.s32.totalorder %v3072_v44, 0  ;;  %v2946_v52 = vsel %vm2940_vm13, %v7710_v12, %v2945_v33  ;;  %v2989_v34 = vshrl.u32 %v2984_v48, 16  ;;  %v2998_v5 = vadd.s32 %v2997_v40, %v2987_v28 }
 0x318   : > { %v3074_v30 = vsel %vm3073_vm6, %v3072_v44, 0  ;;  %v2874_v3 = vxor.u32 2147483648, %v2873_v29  ;;  %v7749_v18 = vadd.s32 %v2992_v20, %v2988_v2  ;;  %v361_v58 = vadd.f32 %v7640_v60, %v360_v55 }
 0x319   : > { %v3076_v6 = vand.u32 31, %v3074_v30  ;;  %v2896_v16 = vadd.s32 3, %v2879_v37  ;;  %v2999_v8 = vadd.s32 %v2998_v5, %v2989_v34  ;;  %v3069_v26 = vand.u32 8388607, %v3062_v32 }
 0x31a   : > { %v2875_v35 = vsel %vm2754_vm15, %v2874_v3, %v2873_v29  ;;  %v3000_v42 = vmul.u32 %v7696_v53, %v2946_v52  ;;  %vm3002_vm7 = vc.u32 %v7744_v54, %v7749_v18  ;;  %v7762_v56 = vshrl.u32 %v3074_v30, 5 }
 0x31b   : > { %v3077_v12 = vsub.s32 32, %v3076_v6  ;;  %v2878_v33 = vsel %vm7737_vm5, %v7452_v61, %v2875_v35  ;;  %v3003_v36 = vadd.s32 1, %v2999_v8  ;;  %v3079_v48 = vshll.u32 %v5774_v4, %v3076_v6 }
 0x31c   : > { %v2880_v23 = vmul.f32 %v2878_v33, %v2878_v33  ;;  %v3082_v31 = vshll.u32 %v5775_v7, %v3076_v6  ;;  %v3088_v59 = vshll.u32 %v5777_v14, %v3076_v6  ;;  %v3085_v45 = vshll.u32 %v5776_v9, %v3076_v6 }
 0x31d   : > { %v3080_v38 = vshrl.u32 %v5775_v7, %v3077_v12  ;;  %v3083_v53 = vshrl.u32 %v5776_v9, %v3077_v12  ;;  %v3004_v62 = vsel %vm3002_vm7, %v3003_v36, %v2999_v8  ;;  %v3086_v25 = vshrl.u32 %v5777_v14, %v3077_v12 }
 0x31e   : > { %v3089_v15 = vshrl.u32 %v5778_v17, %v3077_v12  ;;  %v2881_v10 = vmul.f32 -0.001358992, %v2880_v23  ;;  %v2888_v1 = vmul.f32 -0.00019511016, %v2880_v23  ;;  %v3005_v22 = vadd.s32 %v3004_v62, %v3000_v42 }
 0x31f   : > { %v3081_v49 = vor.u32 %v3080_v38, %v3079_v48  ;;  %v3091_v20 = vshll.u32 %v5778_v17, %v3076_v6  ;;  %v3092_v50 = vshrl.u32 %v5779_v21, %v3077_v12  ;;  %v7774_v11 = vor.u32 %v3083_v53, %v3082_v31 }
 0x320   : > { %v3090_v2 = vor.u32 %v3089_v15, %v3088_v59  ;;  %v2882_v43 = vadd.f32 0.041655596, %v2881_v10  ;;  %v2889_v47 = vadd.f32 0.008332121, %v2888_v1  ;;  %v3006_v41 = vadd.s32 536870912, %v3005_v22 }
 0x321   : > { %v2897_v46 = vand.u32 3, %v2896_v16  ;;  %v3070_v63 = vor.u32 8388608, %v3069_v26  ;;  %v3087_v13 = vor.u32 %v3086_v25, %v3085_v45  ;;  %v3093_v39 = vor.u32 %v3092_v50, %v3091_v20 }
 0x322   : > { %v2883_v24 = vmul.f32 %v2882_v43, %v2880_v23  ;;  %v2890_v44 = vmul.f32 %v2889_v47, %v2880_v23  ;;  %v7776_v57 = vshrl.u32 %v3006_v41, 30  ;;  %vm3097_vm8 = vcmp.lt.s32.totalorder %v7762_v56, 4 }
 0x323   : > { %v7779_v28 = vmul.f32 30.0, %v361_v58  ;;  %vm3094_vm9 = vcmp.lt.s32.totalorder %v7762_v56, 1  ;;  %vm3096_vm10 = vcmp.lt.s32.totalorder %v7762_v56, 3  ;;  %v3103_v40 = vsel %vm3097_vm8, %v3090_v2, 920167782 }
 0x324   : > { %v2884_v55 = vadd.f32 -0.4999988, %v2883_v24  ;;  %v2891_v29 = vadd.f32 -0.16666654, %v2890_v44  ;;  %v3008_v37 = vshll.u32 %v7776_v57, 30  ;;  %v3102_v52 = vsel %vm3094_vm9, %v3081_v49, %v7774_v11 }
 0x325   : > { %vm3095_vm11 = vcmp.lt.s32.totalorder %v7762_v56, 2  ;;  %v3104_v34 = vsel %vm3096_vm10, %v3087_v13, %v3103_v40  ;;  %v3107_v5 = vsel %vm3097_vm8, %v3093_v39, 1326507024  ;;  %v7794_v30 = vshll.u32 %v3070_v63, 8 }
 0x326   : > { %v2885_v3 = vmul.f32 %v2884_v55, %v2880_v23  ;;  %v2892_v6 = vmul.f32 %v2891_v29, %v2880_v23  ;;  %vm2898_vm12 = vcmp.lt.s32.totalorder %v2897_v46, 2  ;;  %v3009_v58 = vsub.s32 %v3005_v22, %v3008_v37 }
 0x327   : > { %v3106_v16 = vsel %vm3094_vm9, %v7774_v11, %v3087_v13  ;;  %vm2895_vm13 = vweird.f32 %v7452_v61  ;;  %vm2899_vm14 = vcmp.eq.s32.totalorder %v2897_v46, 0  ;;  %vm2902_vm15 = vcmp.eq.s32.totalorder %v2897_v46, 2 }
 0x328   : > { %v3105_v8 = vsel %vm3095_vm11, %v3102_v52, %v3104_v34  ;;  %v3108_v26 = vsel %vm3096_vm10, %v3090_v2, %v3107_v5  ;;  %v2886_v35 = vadd.f32 1.0, %v2885_v3  ;;  %v2893_v42 = vadd.f32 1.0, %v2892_v6 }
 0x329   : > { %vm3010_vm0 = vcmp.lt.s32.totalorder %v3009_v58, 0  ;;  %v3011_v36 = vsub.s32 0, %v3009_v58  ;;  %v3078_v48 = vshrl.u32 %v5774_v4, %v3077_v12  ;;  %v3109_v23 = vsel %vm3095_vm11, %v3106_v16, %v3108_v26 }
 0x32a   : > { %v3112_v38 = vshrl.u32 %v7794_v30, 16  ;;  %v3220_v31 = vand.u32 2139095040, %v7779_v28  ;;  %v2894_v53 = vmul.f32 %v2893_v42, %v2878_v33  ;;  %v2903_v62 = vxor.u32 2147483648, %v2886_v35 }
 0x32b   : > { %v3012_v25 = vsel %vm3010_vm0, %v3011_v36, %v3009_v58  ;;  %v3113_v59 = vand.u32 65535, %v3109_v23  ;;  %v3114_v10 = vshrl.u32 %v3109_v23, 16  ;;  %v3135_v1 = vand.u32 65535, %v3105_v8 }
 0x32c   : > { %v3013_v15 = vclz %v3012_v25  ;;  %v3136_v22 = vshrl.u32 %v3105_v8, 16  ;;  %v2900_v45 = vxor.u32 2147483648, %v2894_v53  ;;  %v3001_v2 = vadd.s32 %v7749_v18, %v7744_v54 }
 0x32d   : > { %v7813_v12 = vsel %vm3094_vm9, %v3078_v48, %v3081_v49  ;;  %v3111_v20 = vand.u32 65535, %v7794_v30  ;;  %v3031_v33 = vsub.s32 4, %v7776_v57  ;;  %v3099_v43 = vsel %vm3097_vm8, %v3087_v13, 2102212464 }
 0x32e   : > { %v5585_v50 = vadd.s32 4294967294, %v3013_v15  ;;  %v3117_v47 = vmul.u32 %v3113_v59, %v3112_v38  ;;  %v2901_v41 = vsel %vm2899_vm14, %v2886_v35, %v2900_v45  ;;  %v2904_v63 = vsel %vm2902_vm15, %v2903_v62, %v2894_v53 }
 0x32f   : > { %v3116_v39 = vmul.u32 %v3114_v10, %v3111_v20  ;;  %v3221_v54 = vshrl.u32 %v3220_v31, 23  ;;  %v2905_v18 = vsel %vm2898_vm12, %v2901_v41, %v2904_v63  ;;  %vm2909_vm1 = vcmp.lt.s32.totalorder %v7564_v19, 0 }
 0x330   : > { %vm5586_vm2 = vcmp.lt.s32.totalorder %v5585_v50, 0  ;;  %v3137_v49 = vmul.u32 %v3135_v1, %v3111_v20  ;;  %v3138_v24 = vmul.u32 %v3136_v22, %v3111_v20  ;;  %v2906_v44 = vsel %vm2895_vm13, nan, %v2905_v18 }
 0x331   : > { %v3016_v40 = vsel %vm5586_vm2, 0, %v5585_v50  ;;  %v3115_v13 = vmul.u32 %v3113_v59, %v3111_v20  ;;  %v3119_v55 = vshll.u32 %v3116_v39, 16  ;;  %v3118_v52 = vmul.u32 %v3114_v10, %v3112_v38  ;;  %5402 = vst [vmem:[%s6179_s20 + $0x78] sm:$0xff] %v2906_v44 }
 0x332   : > { %v3017_v29 = vsub.s32 32, %v3016_v40  ;;  %v3021_v37 = vsub.s32 4294967266, %v3016_v40  ;;  %v3121_v34 = vshll.u32 %v3117_v47, 16  ;;  %v3139_v46 = vmul.u32 %v3135_v1, %v3112_v38 }
 0x333   : > { %vm3123_vm3 = vc.u32 %v3115_v13, %v3119_v55  ;;  %v3125_v5 = vadd.s32 %v3119_v55, %v3115_v13  ;;  %v3141_v3 = vshll.u32 %v3138_v24, 16  ;;  %v3018_v6 = vshll.u32 %v3009_v58, %v3016_v40 }
 0x334   : > { %v3019_v16 = vshrl.u32 %v3001_v2, %v3017_v29  ;;  %v3022_v8 = vadd.s32 127, %v3021_v37  ;;  %v3124_v26 = vsel %vm3123_vm3, 1, %v5780_v0  ;;  %v3120_v35 = vshrl.u32 %v3116_v39, 16  ;;  %v362_v39 = vpop.f32.mrf.mxu2 }
 0x335   : > { %v3126_v61 = vadd.s32 %v3124_v26, %v3118_v52  ;;  %vm3127_vm4 = vc.u32 %v3125_v5, %v3121_v34  ;;  %v3140_v42 = vmul.u32 %v3136_v22, %v3112_v38  ;;  %vm3145_vm5 = vc.u32 %v3137_v49, %v3141_v3 }
 0x336   : > { %v3020_v36 = vor.u32 %v3019_v16, %v3018_v6  ;;  %v3023_v48 = vshll.u32 %v3022_v8, 23  ;;  %v3128_v23 = vsel %vm3127_vm4, 1, %v5780_v0  ;;  %v3143_v53 = vshll.u32 %v3139_v46, 16 }
 0x337   : > { %v3130_v31 = vadd.s32 %v3128_v23, %v3126_v61  ;;  %v3146_v62 = vsel %vm3145_vm5, 1, %v5780_v0  ;;  %v3147_v25 = vadd.s32 %v3141_v3, %v3137_v49  ;;  %v3100_v58 = vsel %vm3096_vm10, %v7774_v11, %v3099_v43 }
 0x338   : > { %v3024_v59 = vor.u32 4788187, %v3023_v48  ;;  %v3148_v15 = vadd.s32 %v3146_v62, %v3140_v42  ;;  %v5590_v10 = vadd.s32 4294967169, %v3221_v54  ;;  %v3032_v38 = vsel %vm2909_vm1, %v3031_v33, %v7776_v57 }
 0x339   : > { %v3122_v1 = vshrl.u32 %v3117_v47, 16  ;;  %v3131_v22 = vadd.s32 %v3130_v31, %v3120_v35  ;;  %vm3149_vm6 = vc.u32 %v3147_v25, %v3143_v53  ;;  %v3027_v2 = vcvt.s32.f32 %v3020_v36 }
 0x33a   : > { %v3025_v45 = vand.u32 2147483647, %v3024_v59  ;;  %v3150_v20 = vsel %vm3149_vm6, 1, %v5780_v0  ;;  %v3227_v50 = vadd.s32 1, %v5590_v10  ;;  %vm7838_vm7 = vcmp.le.f32.partialorder %v2907_v27, 0.7853982 }
 0x33b   : > { %v3142_v11 = vshrl.u32 %v3138_v24, 16  ;;  %v3152_v43 = vadd.s32 %v3150_v20, %v3148_v15  ;;  %v3217_v63 = vand.u32 2147483647, %v7779_v28  ;;  %v3034_v33 = vsel %vm7838_vm7, 0, %v3032_v38 }
 0x33c   : > { %v3028_v57 = vmul.f32 %v3027_v2, %v3025_v45  ;;  %v7845_v47 = vadd.s32 %v3131_v22, %v3122_v1  ;;  %vm3228_vm8 = vcmp.gt.s32.totalorder %v3227_v50, 0  ;;  %v3101_v54 = vsel %vm3095_vm11, %v7813_v12, %v3100_v58 }
 0x33d   : > { %v3144_v27 = vshrl.u32 %v3139_v46, 16  ;;  %v3153_v18 = vadd.s32 %v3152_v43, %v3142_v11  ;;  %v3229_v49 = vsel %vm3228_vm8, %v3227_v50, 0  ;;  %v7850_v24 = vadd.s32 %v3147_v25, %v3143_v53 }
 0x33e   : > { %v3029_v44 = vxor.u32 2147483648, %v3028_v57  ;;  %v3231_v40 = vand.u32 31, %v3229_v49  ;;  %v363_v13 = vadd.f32 %v7640_v60, %v362_v39  ;;  %v3051_v55 = vadd.s32 3, %v3034_v33 }
 0x33f   : > { %v3154_v29 = vadd.s32 %v3153_v18, %v3144_v27  ;;  %v3155_v52 = vmul.u32 %v7794_v30, %v3101_v54  ;;  %vm3157_vm9 = vc.u32 %v7845_v47, %v7850_v24  ;;  %v3224_v5 = vand.u32 8388607, %v3217_v63 }
 0x340   : > { %v3030_v37 = vsel %vm2909_vm1, %v3029_v44, %v3028_v57  ;;  %v3232_v56 = vsub.s32 32, %v3231_v40  ;;  %v7865_v46 = vshrl.u32 %v3229_v49, 5  ;;  %v3234_v30 = vshll.u32 %v5774_v4, %v3231_v40 }
 0x341   : > { %v7861_v12 = vsel %vm7838_vm7, %v7564_v19, %v3030_v37  ;;  %v3158_v34 = vadd.s32 1, %v3154_v29  ;;  %v3243_v16 = vshll.u32 %v5777_v14, %v3231_v40  ;;  %v3237_v23 = vshll.u32 %v5775_v7, %v3231_v40 }
 0x342   : > { %v3035_v3 = vmul.f32 %v7861_v12, %v7861_v12  ;;  %v3235_v6 = vshrl.u32 %v5775_v7, %v3232_v56  ;;  %v3238_v26 = vshrl.u32 %v5776_v9, %v3232_v56  ;;  %v3241_v35 = vshrl.u32 %v5777_v14, %v3232_v56 }
 0x343   : > { %v3159_v8 = vsel %vm3157_vm9, %v3158_v34, %v3154_v29  ;;  %v3244_v61 = vshrl.u32 %v5778_v17, %v3232_v56  ;;  %v3240_v31 = vshll.u32 %v5776_v9, %v3231_v40  ;;  %v3246_v62 = vshll.u32 %v5778_v17, %v3231_v40 }
 0x344   : > { %v3036_v42 = vmul.f32 -0.001358992, %v3035_v3  ;;  %v3043_v36 = vmul.f32 -0.00019511016, %v3035_v3  ;;  %v3160_v48 = vadd.s32 %v3159_v8, %v3155_v52  ;;  %v3247_v25 = vshrl.u32 %v5779_v21, %v3232_v56 }
 0x345   : > { %v3245_v53 = vor.u32 %v3244_v61, %v3243_v16  ;;  %v7879_v15 = vand.u32 3, %v3051_v55  ;;  %v3236_v38 = vor.u32 %v3235_v6, %v3234_v30  ;;  %v3239_v1 = vor.u32 %v3238_v26, %v3237_v23 }
 0x346   : > { %v3037_v59 = vadd.f32 0.041655596, %v3036_v42  ;;  %v3044_v58 = vadd.f32 0.008332121, %v3043_v36  ;;  %v3161_v10 = vadd.s32 536870912, %v3160_v48  ;;  %v3242_v22 = vor.u32 %v3241_v35, %v3240_v31 }
 0x347   : > { %v3248_v45 = vor.u32 %v3247_v25, %v3246_v62  ;;  %vm3252_vm10 = vcmp.lt.s32.totalorder %v7865_v46, 4  ;;  %v7884_v41 = vmul.f32 30.0, %v363_v13  ;;  %v3225_v11 = vor.u32 8388608, %v3224_v5 }
 0x348   : > { %v3038_v2 = vmul.f32 %v3037_v59, %v3035_v3  ;;  %v3045_v20 = vmul.f32 %v3044_v58, %v3035_v3  ;;  %v7881_v50 = vshrl.u32 %v3161_v10, 30  ;;  %v3258_v43 = vsel %vm3252_vm10, %v3245_v53, 920167782 }
 0x349   : > { %vm3249_vm11 = vcmp.lt.s32.totalorder %v7865_v46, 1  ;;  %vm3054_vm12 = vcmp.eq.s32.totalorder %v7879_v15, 0  ;;  %vm3057_vm13 = vcmp.eq.s32.totalorder %v7879_v15, 2  ;;  %vm3251_vm14 = vcmp.lt.s32.totalorder %v7865_v46, 3 }
 0x34a   : > { %v3039_v39 = vadd.f32 -0.4999988, %v3038_v2  ;;  %v3046_v57 = vadd.f32 -0.16666654, %v3045_v20  ;;  %v3163_v33 = vshll.u32 %v7881_v50, 30  ;;  %v3257_v54 = vsel %vm3249_vm11, %v3236_v38, %v3239_v1 }
 0x34b   : > { %v3261_v27 = vsel %vm3249_vm11, %v3239_v1, %v3242_v22  ;;  %v3262_v18 = vsel %vm3252_vm10, %v3248_v45, 1326507024  ;;  %vm3053_vm15 = vcmp.lt.s32.totalorder %v7879_v15, 2  ;;  %v3259_v13 = vsel %vm3251_vm14, %v3242_v22, %v3258_v43 }
 0x34c   : > { %v3040_v49 = vmul.f32 %v3039_v39, %v3035_v3  ;;  %v3047_v44 = vmul.f32 %v3046_v57, %v3035_v3  ;;  %v3164_v40 = vsub.s32 %v3160_v48, %v3163_v33  ;;  %vm3050_vm0 = vweird.f32 %v7564_v19 }
 0x34d   : > { %vm3250_vm1 = vcmp.lt.s32.totalorder %v7865_v46, 2  ;;  %v3263_v55 = vsel %vm3251_vm14, %v3245_v53, %v3262_v18  ;;  %v7906_v29 = vshll.u32 %v3225_v11, 8  ;;  %v3375_v37 = vand.u32 2139095040, %v7884_v41 }
 0x34e   : > { %v3041_v52 = vadd.f32 1.0, %v3040_v49  ;;  %v3048_v34 = vadd.f32 1.0, %v3047_v44  ;;  %vm3165_vm2 = vcmp.lt.s32.totalorder %v3164_v40, 0  ;;  %v3166_v5 = vsub.s32 0, %v3164_v40 }
 0x34f   : > { %v3156_v3 = vadd.s32 %v7850_v24, %v7845_v47  ;;  %v3233_v30 = vshrl.u32 %v5774_v4, %v3232_v56  ;;  %v3260_v6 = vsel %vm3250_vm1, %v3257_v54, %v3259_v13  ;;  %v3264_v16 = vsel %vm3250_vm1, %v3261_v27, %v3263_v55 }
 0x350   : > { %v3049_v8 = vmul.f32 %v3048_v34, %v7861_v12  ;;  %v3058_v26 = vxor.u32 2147483648, %v3041_v52  ;;  %v3167_v35 = vsel %vm3165_vm2, %v3166_v5, %v3164_v40  ;;  %v3268_v61 = vand.u32 65535, %v3264_v16 }
 0x351   : > { %v3168_v42 = vclz %v3167_v35  ;;  %v3267_v36 = vshrl.u32 %v7906_v29, 16  ;;  %v3269_v48 = vshrl.u32 %v3264_v16, 16  ;;  %v3376_v23 = vshrl.u32 %v3375_v37, 23 }
 0x352   : > { %v3055_v31 = vxor.u32 2147483648, %v3049_v8  ;;  %v7920_v47 = vsel %vm3249_vm11, %v3233_v30, %v3236_v38  ;;  %v3254_v24 = vsel %vm3252_vm10, %v3242_v22, 2102212464  ;;  %v3266_v56 = vand.u32 65535, %v7906_v29 }
 0x353   : > { %v5588_v53 = vadd.s32 4294967294, %v3168_v42  ;;  %v3186_v12 = vsub.s32 4, %v7881_v50  ;;  %v3272_v62 = vmul.u32 %v3268_v61, %v3267_v36  ;;  %v3291_v25 = vshrl.u32 %v3260_v6, 16 }
 0x354   : > { %v3056_v59 = vsel %vm3054_vm12, %v3041_v52, %v3055_v31  ;;  %v3059_v58 = vsel %vm3057_vm13, %v3058_v26, %v3049_v8  ;;  %vm3064_vm3 = vcmp.lt.s32.totalorder %v7674_v51, 0  ;;  %v3271_v10 = vmul.u32 %v3269_v48, %v3266_v56 }
 0x355   : > { %v3290_v38 = vand.u32 65535, %v3260_v6  ;;  %v3060_v22 = vsel %vm3053_vm15, %v3056_v59, %v3059_v58  ;;  %vm5589_vm4 = vcmp.lt.s32.totalorder %v5588_v53, 0  ;;  %v3255_v45 = vsel %vm3251_vm14, %v3239_v1, %v3254_v24 }
 0x356   : > { %v3270_v2 = vmul.u32 %v3268_v61, %v3266_v56  ;;  %v3061_v20 = vsel %vm3050_vm0, nan, %v3060_v22  ;;  %v3171_v11 = vsel %vm5589_vm4, 0, %v5588_v53  ;;  %v3273_v43 = vmul.u32 %v3269_v48, %v3267_v36 }
 0x357   : > { %v3274_v39 = vshll.u32 %v3271_v10, 16  ;;  %v3172_v57 = vsub.s32 32, %v3171_v11  ;;  %v3176_v33 = vsub.s32 4294967266, %v3171_v11  ;;  %v3276_v54 = vshll.u32 %v3272_v62, 16  ;;  %5403 = vst [vmem:[%s6179_s20 + $0x80] sm:$0xff] %v3061_v20 }
 0x358   : > { %v3293_v27 = vmul.u32 %v3291_v25, %v3266_v56  ;;  %v3173_v18 = vshll.u32 %v3164_v40, %v3171_v11  ;;  %v3294_v49 = vmul.u32 %v3290_v38, %v3267_v36  ;;  %v3275_v37 = vshrl.u32 %v3271_v10, 16 }
 0x359   : > { %vm3278_vm5 = vc.u32 %v3270_v2, %v3274_v39  ;;  %v3280_v15 = vadd.s32 %v3274_v39, %v3270_v2  ;;  %v3174_v44 = vshrl.u32 %v3156_v3, %v3172_v57  ;;  %v3177_v13 = vadd.s32 127, %v3176_v33 }
 0x35a   : > { %v3279_v1 = vsel %vm3278_vm5, 1, %v5780_v0  ;;  %v3296_v55 = vshll.u32 %v3293_v27, 16  ;;  %v3292_v52 = vmul.u32 %v3290_v38, %v3266_v56  ;;  %v3295_v6 = vmul.u32 %v3291_v25, %v3267_v36 }
 0x35b   : > { %v3281_v19 = vadd.s32 %v3279_v1, %v3273_v43  ;;  %vm3282_vm6 = vc.u32 %v3280_v15, %v3276_v54  ;;  %v3175_v34 = vor.u32 %v3174_v44, %v3173_v18  ;;  %v3178_v5 = vshll.u32 %v3177_v13, 23 }
 0x35c   : > { %v3283_v30 = vsel %vm3282_vm6, 1, %v5780_v0  ;;  %v3298_v8 = vshll.u32 %v3294_v49, 16  ;;  %vm3300_vm7 = vc.u32 %v3292_v52, %v3296_v55  ;;  %v3302_v40 = vadd.s32 %v3296_v55, %v3292_v52 }
 0x35d   : > { %v3285_v16 = vadd.s32 %v3283_v30, %v3281_v19  ;;  %v3179_v26 = vor.u32 4788187, %v3178_v5  ;;  %v3187_v3 = vsel %vm3064_vm3, %v3186_v12, %v7881_v50  ;;  %v3301_v35 = vsel %vm3300_vm7, 1, %v5780_v0 }
 0x35e   : > { %v5593_v61 = vadd.s32 4294967169, %v3376_v23  ;;  %v3277_v42 = vshrl.u32 %v3272_v62, 16  ;;  %v3303_v31 = vadd.s32 %v3301_v35, %v3295_v6  ;;  %vm3304_vm8 = vc.u32 %v3302_v40, %v3298_v8  ;;  %v365_v23 = vpop.f32.mrf.mxu2 }
 0x35f   : > { %v3286_v48 = vadd.s32 %v3285_v16, %v3275_v37  ;;  %v3180_v24 = vand.u32 2147483647, %v3179_v26  ;;  %v3182_v56 = vcvt.s32.f32 %v3175_v34  ;;  %v3305_v36 = vsel %vm3304_vm8, 1, %v5780_v0 }
 0x360   : > { %v3382_v53 = vadd.s32 1, %v5593_v61  ;;  %vm7947_vm9 = vcmp.le.f32.partialorder %v3062_v32, 0.7853982  ;;  %v3297_v59 = vshrl.u32 %v3293_v27, 16  ;;  %v3307_v50 = vadd.s32 %v3305_v36, %v3303_v31 }
 0x361   : > { %v3372_v12 = vand.u32 2147483647, %v7884_v41  ;;  %v3183_v62 = vmul.f32 %v3182_v56, %v3180_v24  ;;  %v3189_v58 = vsel %vm7947_vm9, 0, %v3187_v3  ;;  %v7954_v10 = vadd.s32 %v3286_v48, %v3277_v42 }
 0x362   : > { %vm3383_vm10 = vcmp.gt.s32.totalorder %v3382_v53, 0  ;;  %v3256_v38 = vsel %vm3250_vm1, %v7920_v47, %v3255_v45  ;;  %v3299_v32 = vshrl.u32 %v3294_v49, 16  ;;  %v3308_v22 = vadd.s32 %v3307_v50, %v3297_v59 }
 0x363   : > { %v3384_v2 = vsel %vm3383_vm10, %v3382_v53, 0  ;;  %v3184_v20 = vxor.u32 2147483648, %v3183_v62  ;;  %v7959_v11 = vadd.s32 %v3302_v40, %v3298_v8  ;;  %v366_v39 = vadd.f32 %v7640_v60, %v365_v23 }
 0x364   : > { %v3386_v43 = vand.u32 31, %v3384_v2  ;;  %v3206_v57 = vadd.s32 3, %v3189_v58  ;;  %v3309_v33 = vadd.s32 %v3308_v22, %v3299_v32  ;;  %v3379_v54 = vand.u32 8388607, %v3372_v12 }
 0x365   : > { %v3185_v27 = vsel %vm3064_vm3, %v3184_v20, %v3183_v62  ;;  %v3310_v46 = vmul.u32 %v7906_v29, %v3256_v38  ;;  %vm3312_vm11 = vc.u32 %v7954_v10, %v7959_v11  ;;  %v7972_v60 = vshrl.u32 %v3384_v2, 5 }
 0x366   : > { %v3387_v47 = vsub.s32 32, %v3386_v43  ;;  %v3188_v45 = vsel %vm7947_vm9, %v7674_v51, %v3185_v27  ;;  %v3313_v18 = vadd.s32 1, %v3309_v33  ;;  %v3389_v15 = vshll.u32 %v5774_v4, %v3386_v43 }
 0x367   : > { %v3190_v49 = vmul.f32 %v3188_v45, %v3188_v45  ;;  %v3392_v13 = vshll.u32 %v5775_v7, %v3386_v43  ;;  %v3398_v37 = vshll.u32 %v5777_v14, %v3386_v43  ;;  %v3395_v30 = vshll.u32 %v5776_v9, %v3386_v43 }
 0x368   : > { %v3390_v44 = vshrl.u32 %v5775_v7, %v3387_v47  ;;  %v3393_v29 = vshrl.u32 %v5776_v9, %v3387_v47  ;;  %v3314_v1 = vsel %vm3312_vm11, %v3313_v18, %v3309_v33  ;;  %v3396_v55 = vshrl.u32 %v5777_v14, %v3387_v47 }
 0x369   : > { %v3399_v19 = vshrl.u32 %v5778_v17, %v3387_v47  ;;  %v3191_v52 = vmul.f32 -0.001358992, %v3190_v49  ;;  %v3198_v34 = vmul.f32 -0.00019511016, %v3190_v49  ;;  %v3315_v5 = vadd.s32 %v3314_v1, %v3310_v46 }
 0x36a   : > { %v3391_v6 = vor.u32 %v3390_v44, %v3389_v15  ;;  %v3401_v8 = vshll.u32 %v5778_v17, %v3386_v43  ;;  %v3402_v40 = vshrl.u32 %v5779_v21, %v3387_v47  ;;  %v7984_v61 = vor.u32 %v3393_v29, %v3392_v13 }
 0x36b   : > { %v3400_v16 = vor.u32 %v3399_v19, %v3398_v37  ;;  %v3192_v26 = vadd.f32 0.041655596, %v3191_v52  ;;  %v3199_v3 = vadd.f32 0.008332121, %v3198_v34  ;;  %v3316_v35 = vadd.s32 536870912, %v3315_v5 }
 0x36c   : > { %v3207_v42 = vand.u32 3, %v3206_v57  ;;  %v3380_v48 = vor.u32 8388608, %v3379_v54  ;;  %v3397_v31 = vor.u32 %v3396_v55, %v3395_v30  ;;  %v3403_v24 = vor.u32 %v3402_v40, %v3401_v8 }
 0x36d   : > { %v3193_v56 = vmul.f32 %v3192_v26, %v3190_v49  ;;  %v3200_v36 = vmul.f32 %v3199_v3, %v3190_v49  ;;  %v7986_v53 = vshrl.u32 %v3316_v35, 30  ;;  %vm3407_vm12 = vcmp.lt.s32.totalorder %v7972_v60, 4 }
 0x36e   : > { %v7989_v25 = vmul.f32 30.0, %v366_v39  ;;  %vm3404_vm13 = vcmp.lt.s32.totalorder %v7972_v60, 1  ;;  %vm3406_vm14 = vcmp.lt.s32.totalorder %v7972_v60, 3  ;;  %v3413_v59 = vsel %vm3407_vm12, %v3400_v16, 920167782 }
 0x36f   : > { %v3194_v50 = vadd.f32 -0.4999988, %v3193_v56  ;;  %v3201_v23 = vadd.f32 -0.16666654, %v3200_v36  ;;  %v3318_v62 = vshll.u32 %v7986_v53, 30  ;;  %v3412_v58 = vsel %vm3404_vm13, %v3391_v6, %v7984_v61 }
 0x370   : > { %vm3405_vm15 = vcmp.lt.s32.totalorder %v7972_v60, 2  ;;  %v3414_v38 = vsel %vm3406_vm14, %v3397_v31, %v3413_v59  ;;  %v3417_v32 = vsel %vm3407_vm12, %v3403_v24, 1326507024  ;;  %v8004_v22 = vshll.u32 %v3380_v48, 8 }
 0x371   : > { %v3195_v2 = vmul.f32 %v3194_v50, %v3190_v49  ;;  %v3202_v20 = vmul.f32 %v3201_v23, %v3190_v49  ;;  %vm3208_vm0 = vcmp.lt.s32.totalorder %v3207_v42, 2  ;;  %v3319_v43 = vsub.s32 %v3315_v5, %v3318_v62 }
 0x372   : > { %v3416_v39 = vsel %vm3404_vm13, %v7984_v61, %v3397_v31  ;;  %vm3205_vm1 = vweird.f32 %v7674_v51  ;;  %vm3209_vm2 = vcmp.eq.s32.totalorder %v3207_v42, 0  ;;  %vm3212_vm3 = vcmp.eq.s32.totalorder %v3207_v42, 2 }
 0x373   : > { %v3415_v57 = vsel %vm3405_vm15, %v3412_v58, %v3414_v38  ;;  %v3418_v33 = vsel %vm3406_vm14, %v3400_v16, %v3417_v32  ;;  %v3196_v54 = vadd.f32 1.0, %v3195_v2  ;;  %v3203_v27 = vadd.f32 1.0, %v3202_v20 }
 0x374   : > { %vm3320_vm4 = vcmp.lt.s32.totalorder %v3319_v43, 0  ;;  %v3321_v46 = vsub.s32 0, %v3319_v43  ;;  %v3388_v18 = vshrl.u32 %v5774_v4, %v3387_v47  ;;  %v3419_v15 = vsel %vm3405_vm15, %v3416_v39, %v3418_v33 }
 0x375   : > { %v3422_v49 = vshrl.u32 %v8004_v22, 16  ;;  %v3530_v44 = vand.u32 2139095040, %v7989_v25  ;;  %v3204_v13 = vmul.f32 %v3203_v27, %v3188_v45  ;;  %v3213_v29 = vxor.u32 2147483648, %v3196_v54 }
 0x376   : > { %v3322_v1 = vsel %vm3320_vm4, %v3321_v46, %v3319_v43  ;;  %v3423_v55 = vand.u32 65535, %v3419_v15  ;;  %v3424_v19 = vshrl.u32 %v3419_v15, 16  ;;  %v3445_v52 = vand.u32 65535, %v3415_v57 }
 0x377   : > { %v3323_v37 = vclz %v3322_v1  ;;  %v3446_v34 = vshrl.u32 %v3415_v57, 16  ;;  %v3210_v5 = vxor.u32 2147483648, %v3204_v13  ;;  %v3311_v30 = vadd.s32 %v7959_v11, %v7954_v10 }
 0x378   : > { %v8023_v47 = vsel %vm3404_vm13, %v3388_v18, %v3391_v6  ;;  %v3421_v16 = vand.u32 65535, %v8004_v22  ;;  %v3341_v45 = vsub.s32 4, %v7986_v53  ;;  %v3409_v40 = vsel %vm3407_vm12, %v3397_v31, 2102212464 }
 0x379   : > { %v5591_v8 = vadd.s32 4294967294, %v3323_v37  ;;  %v3427_v26 = vmul.u32 %v3423_v55, %v3422_v49  ;;  %v3211_v3 = vsel %vm3209_vm2, %v3196_v54, %v3210_v5  ;;  %v3214_v35 = vsel %vm3212_vm3, %v3213_v29, %v3204_v13 }
 0x37a   : > { %v3426_v48 = vmul.u32 %v3424_v19, %v3421_v16  ;;  %v3531_v10 = vshrl.u32 %v3530_v44, 23  ;;  %v3215_v11 = vsel %vm3208_vm0, %v3211_v3, %v3214_v35  ;;  %vm3219_vm5 = vcmp.lt.s32.totalorder %v7779_v28, 0  ;;  %v367_v35 = vpop.f32.mrf.mxu2 }
 0x37b   : > { %vm5592_vm6 = vcmp.lt.s32.totalorder %v5591_v8, 0  ;;  %v3447_v6 = vmul.u32 %v3445_v52, %v3421_v16  ;;  %v3448_v24 = vmul.u32 %v3446_v34, %v3421_v16  ;;  %v3216_v56 = vsel %vm3205_vm1, nan, %v3215_v11 }
 0x37c   : > { %v3326_v36 = vsel %vm5592_vm6, 0, %v5591_v8  ;;  %v3425_v31 = vmul.u32 %v3423_v55, %v3421_v16  ;;  %v3429_v59 = vshll.u32 %v3426_v48, 16  ;;  %v3428_v62 = vmul.u32 %v3424_v19, %v3422_v49  ;;  %5404 = vst [vmem:[%s6179_s20 + $0x88] sm:$0xff] %v3216_v56 }
 0x37d   : > { %v3327_v50 = vsub.s32 32, %v3326_v36  ;;  %v3331_v23 = vsub.s32 4294967266, %v3326_v36  ;;  %v3431_v58 = vshll.u32 %v3427_v26, 16  ;;  %v3449_v42 = vmul.u32 %v3445_v52, %v3422_v49 }
 0x37e   : > { %vm3433_vm7 = vc.u32 %v3425_v31, %v3429_v59  ;;  %v3435_v38 = vadd.s32 %v3429_v59, %v3425_v31  ;;  %v3451_v32 = vshll.u32 %v3448_v24, 16  ;;  %v3328_v2 = vshll.u32 %v3319_v43, %v3326_v36  ;;  %v8065_v36 = vld [vmem:[%s9382_s2] ss:$0 sm:$0xff] }
 0x37f   : > { %v3329_v20 = vshrl.u32 %v3311_v30, %v3327_v50  ;;  %v3332_v39 = vadd.s32 127, %v3331_v23  ;;  %v3434_v57 = vsel %vm3433_vm7, 1, %v5780_v0  ;;  %v3430_v33 = vshrl.u32 %v3426_v48, 16 }
 0x380   : > { %v3436_v51 = vadd.s32 %v3434_v57, %v3428_v62  ;;  %vm3437_vm8 = vc.u32 %v3435_v38, %v3431_v58  ;;  %v3450_v54 = vmul.u32 %v3446_v34, %v3422_v49  ;;  %vm3455_vm9 = vc.u32 %v3447_v6, %v3451_v32 }
 0x381   : > { %v3330_v27 = vor.u32 %v3329_v20, %v3328_v2  ;;  %v3333_v46 = vshll.u32 %v3332_v39, 23  ;;  %v3438_v18 = vsel %vm3437_vm8, 1, %v5780_v0  ;;  %v3453_v44 = vshll.u32 %v3449_v42, 16 }
 0x382   : > { %v3440_v15 = vadd.s32 %v3438_v18, %v3436_v51  ;;  %v3456_v13 = vsel %vm3455_vm9, 1, %v5780_v0  ;;  %v3457_v29 = vadd.s32 %v3451_v32, %v3447_v6  ;;  %v3410_v43 = vsel %vm3406_vm14, %v7984_v61, %v3409_v40 }
 0x383   : > { %v3334_v1 = vor.u32 4788187, %v3333_v46  ;;  %v3458_v55 = vadd.s32 %v3456_v13, %v3450_v54  ;;  %v5596_v37 = vadd.s32 4294967169, %v3531_v10  ;;  %v3342_v49 = vsel %vm3219_vm5, %v3341_v45, %v7986_v53 }
 0x384   : > { %v3432_v19 = vshrl.u32 %v3427_v26, 16  ;;  %v3441_v52 = vadd.s32 %v3440_v15, %v3430_v33  ;;  %vm3459_vm10 = vc.u32 %v3457_v29, %v3453_v44  ;;  %v3337_v5 = vcvt.s32.f32 %v3330_v27 }
 0x385   : > { %v3335_v34 = vand.u32 2147483647, %v3334_v1  ;;  %v3460_v30 = vsel %vm3459_vm10, 1, %v5780_v0  ;;  %v3537_v16 = vadd.s32 1, %v5596_v37  ;;  %vm8048_vm11 = vcmp.le.f32.partialorder %v3217_v63, 0.7853982 }
 0x386   : > { %v3452_v61 = vshrl.u32 %v3448_v24, 16  ;;  %v3462_v40 = vadd.s32 %v3460_v30, %v3458_v55  ;;  %v3527_v3 = vand.u32 2147483647, %v7989_v25  ;;  %v3344_v45 = vsel %vm8048_vm11, 0, %v3342_v49 }
 0x387   : > { %v3338_v53 = vmul.f32 %v3337_v5, %v3335_v34  ;;  %v8055_v26 = vadd.s32 %v3441_v52, %v3432_v19  ;;  %vm3538_vm12 = vcmp.gt.s32.totalorder %v3537_v16, 0  ;;  %v3411_v48 = vsel %vm3405_vm15, %v8023_v47, %v3410_v43 }
 0x388   : > { %v3454_v63 = vshrl.u32 %v3449_v42, 16  ;;  %v3463_v10 = vadd.s32 %v3462_v40, %v3452_v61  ;;  %v3539_v11 = vsel %vm3538_vm12, %v3537_v16, 0  ;;  %v8060_v24 = vadd.s32 %v3457_v29, %v3453_v44 }
 0x389   : > { %v3339_v6 = vxor.u32 2147483648, %v3338_v53  ;;  %v3541_v56 = vand.u32 31, %v3539_v11  ;;  %v368_v31 = vadd.f32 %v8065_v36, %v367_v35  ;;  %v3361_v59 = vadd.s32 3, %v3344_v45 }
 0x38a   : > { %v3464_v50 = vadd.s32 %v3463_v10, %v3454_v63  ;;  %v3465_v47 = vmul.u32 %v8004_v22, %v3411_v48  ;;  %vm3467_vm13 = vc.u32 %v8055_v26, %v8060_v24  ;;  %v3534_v38 = vand.u32 8388607, %v3527_v3 }
 0x38b   : > { %v3340_v60 = vsel %vm3219_vm5, %v3339_v6, %v3338_v53  ;;  %v3542_v23 = vsub.s32 32, %v3541_v56  ;;  %v8080_v42 = vshrl.u32 %v3539_v11, 5  ;;  %v3544_v22 = vshll.u32 %v5774_v4, %v3541_v56 }
 0x38c   : > { %v8076_v62 = vsel %vm8048_vm11, %v7779_v28, %v3340_v60  ;;  %v3468_v58 = vadd.s32 1, %v3464_v50  ;;  %v3553_v20 = vshll.u32 %v5777_v14, %v3541_v56  ;;  %v3547_v18 = vshll.u32 %v5775_v7, %v3541_v56 }
 0x38d   : > { %v3345_v32 = vmul.f32 %v8076_v62, %v8076_v62  ;;  %v3545_v2 = vshrl.u32 %v5775_v7, %v3542_v23  ;;  %v3548_v57 = vshrl.u32 %v5776_v9, %v3542_v23  ;;  %v3551_v33 = vshrl.u32 %v5777_v14, %v3542_v23 }
 0x38e   : > { %v3469_v39 = vsel %vm3467_vm13, %v3468_v58, %v3464_v50  ;;  %v3554_v51 = vshrl.u32 %v5778_v17, %v3542_v23  ;;  %v3550_v15 = vshll.u32 %v5776_v9, %v3541_v56  ;;  %v3556_v13 = vshll.u32 %v5778_v17, %v3541_v56 }
 0x38f   : > { %v3346_v54 = vmul.f32 -0.001358992, %v3345_v32  ;;  %v3353_v27 = vmul.f32 -0.00019511016, %v3345_v32  ;;  %v3470_v46 = vadd.s32 %v3469_v39, %v3465_v47  ;;  %v3557_v29 = vshrl.u32 %v5779_v21, %v3542_v23 }
 0x390   : > { %v3555_v44 = vor.u32 %v3554_v51, %v3553_v20  ;;  %v8094_v55 = vand.u32 3, %v3361_v59  ;;  %v3546_v49 = vor.u32 %v3545_v2, %v3544_v22  ;;  %v3549_v19 = vor.u32 %v3548_v57, %v3547_v18 }
 0x391   : > { %v3347_v1 = vadd.f32 0.041655596, %v3346_v54  ;;  %v3354_v43 = vadd.f32 0.008332121, %v3353_v27  ;;  %v3471_v37 = vadd.s32 536870912, %v3470_v46  ;;  %v3552_v52 = vor.u32 %v3551_v33, %v3550_v15 }
 0x392   : > { %v3558_v34 = vor.u32 %v3557_v29, %v3556_v13  ;;  %vm3562_vm14 = vcmp.lt.s32.totalorder %v8080_v42, 4  ;;  %v8099_v8 = vmul.f32 30.0, %v368_v31  ;;  %v3535_v61 = vor.u32 8388608, %v3534_v38 }
 0x393   : > { %v3348_v5 = vmul.f32 %v3347_v1, %v3345_v32  ;;  %v3355_v30 = vmul.f32 %v3354_v43, %v3345_v32  ;;  %v8096_v16 = vshrl.u32 %v3471_v37, 30  ;;  %v3568_v40 = vsel %vm3562_vm14, %v3555_v44, 920167782 }
 0x394   : > { %vm3559_vm15 = vcmp.lt.s32.totalorder %v8080_v42, 1  ;;  %vm3364_vm0 = vcmp.eq.s32.totalorder %v8094_v55, 0  ;;  %vm3367_vm1 = vcmp.eq.s32.totalorder %v8094_v55, 2  ;;  %vm3561_vm2 = vcmp.lt.s32.totalorder %v8080_v42, 3 }
 0x395   : > { %v3349_v35 = vadd.f32 -0.4999988, %v3348_v5  ;;  %v3356_v53 = vadd.f32 -0.16666654, %v3355_v30  ;;  %v3473_v45 = vshll.u32 %v8096_v16, 30  ;;  %v3567_v48 = vsel %vm3559_vm15, %v3546_v49, %v3549_v19 }
 0x396   : > { %v3571_v63 = vsel %vm3559_vm15, %v3549_v19, %v3552_v52  ;;  %v3572_v10 = vsel %vm3562_vm14, %v3558_v34, 1326507024  ;;  %vm3363_vm3 = vcmp.lt.s32.totalorder %v8094_v55, 2  ;;  %v3569_v31 = vsel %vm3561_vm2, %v3552_v52, %v3568_v40 }
 0x397   : > { %v3350_v11 = vmul.f32 %v3349_v35, %v3345_v32  ;;  %v3357_v6 = vmul.f32 %v3356_v53, %v3345_v32  ;;  %v3474_v56 = vsub.s32 %v3470_v46, %v3473_v45  ;;  %vm3360_vm4 = vweird.f32 %v7779_v28 }
 0x398   : > { %vm3560_vm5 = vcmp.lt.s32.totalorder %v8080_v42, 2  ;;  %v3573_v59 = vsel %vm3561_vm2, %v3555_v44, %v3572_v10  ;;  %v8121_v50 = vshll.u32 %v3535_v61, 8  ;;  %v3685_v60 = vand.u32 2139095040, %v8099_v8 }
 0x399   : > { %v3351_v47 = vadd.f32 1.0, %v3350_v11  ;;  %v3358_v58 = vadd.f32 1.0, %v3357_v6  ;;  %vm3475_vm6 = vcmp.lt.s32.totalorder %v3474_v56, 0  ;;  %v3476_v38 = vsub.s32 0, %v3474_v56 }
 0x39a   : > { %v3466_v32 = vadd.s32 %v8060_v24, %v8055_v26  ;;  %v3543_v22 = vshrl.u32 %v5774_v4, %v3542_v23  ;;  %v3570_v2 = vsel %vm3560_vm5, %v3567_v48, %v3569_v31  ;;  %v3574_v20 = vsel %vm3560_vm5, %v3571_v63, %v3573_v59 }
 0x39b   : > { %v3359_v39 = vmul.f32 %v3358_v58, %v8076_v62  ;;  %v3368_v57 = vxor.u32 2147483648, %v3351_v47  ;;  %v3477_v33 = vsel %vm3475_vm6, %v3476_v38, %v3474_v56  ;;  %v3578_v51 = vand.u32 65535, %v3574_v20 }
 0x39c   : > { %v3478_v54 = vclz %v3477_v33  ;;  %v3577_v27 = vshrl.u32 %v8121_v50, 16  ;;  %v3579_v46 = vshrl.u32 %v3574_v20, 16  ;;  %v3686_v18 = vshrl.u32 %v3685_v60, 23 }
 0x39d   : > { %v3365_v15 = vxor.u32 2147483648, %v3359_v39  ;;  %v8135_v26 = vsel %vm3559_vm15, %v3543_v22, %v3546_v49  ;;  %v3564_v24 = vsel %vm3562_vm14, %v3552_v52, 2102212464  ;;  %v3576_v23 = vand.u32 65535, %v8121_v50 }
 0x39e   : > { %v5594_v44 = vadd.s32 4294967294, %v3478_v54  ;;  %v3496_v62 = vsub.s32 4, %v8096_v16  ;;  %v3582_v13 = vmul.u32 %v3578_v51, %v3577_v27  ;;  %v3601_v29 = vshrl.u32 %v3570_v2, 16 }
 0x39f   : > { %v3366_v1 = vsel %vm3364_vm0, %v3351_v47, %v3365_v15  ;;  %v3369_v43 = vsel %vm3367_vm1, %v3368_v57, %v3359_v39  ;;  %vm3374_vm7 = vcmp.lt.s32.totalorder %v7884_v41, 0  ;;  %v3581_v37 = vmul.u32 %v3579_v46, %v3576_v23 }
 0x3a0   : > { %v3600_v49 = vand.u32 65535, %v3570_v2  ;;  %v3370_v52 = vsel %vm3363_vm3, %v3366_v1, %v3369_v43  ;;  %vm5595_vm8 = vcmp.lt.s32.totalorder %v5594_v44, 0  ;;  %v3565_v34 = vsel %vm3561_vm2, %v3549_v19, %v3564_v24 }
 0x3a1   : > { %v3580_v5 = vmul.u32 %v3578_v51, %v3576_v23  ;;  %v3371_v30 = vsel %vm3360_vm4, nan, %v3370_v52  ;;  %v3481_v61 = vsel %vm5595_vm8, 0, %v5594_v44  ;;  %v3583_v40 = vmul.u32 %v3579_v46, %v3577_v27 }
 0x3a2   : > { %v3584_v35 = vshll.u32 %v3581_v37, 16  ;;  %v3482_v53 = vsub.s32 32, %v3481_v61  ;;  %v3486_v45 = vsub.s32 4294967266, %v3481_v61  ;;  %v3586_v48 = vshll.u32 %v3582_v13, 16  ;;  %5405 = vst [vmem:[%s6179_s20 + $0x90] sm:$0xff] %v3371_v30 }
 0x3a3   : > { %v3603_v63 = vmul.u32 %v3601_v29, %v3576_v23  ;;  %v3483_v10 = vshll.u32 %v3474_v56, %v3481_v61  ;;  %v3604_v11 = vmul.u32 %v3600_v49, %v3577_v27  ;;  %v3585_v60 = vshrl.u32 %v3581_v37, 16 }
 0x3a4   : > { %vm3588_vm9 = vc.u32 %v3580_v5, %v3584_v35  ;;  %v3590_v55 = vadd.s32 %v3584_v35, %v3580_v5  ;;  %v3484_v6 = vshrl.u32 %v3466_v32, %v3482_v53  ;;  %v3487_v31 = vadd.s32 127, %v3486_v45 }
 0x3a5   : > { %v3589_v19 = vsel %vm3588_vm9, 1, %v5780_v0  ;;  %v3606_v59 = vshll.u32 %v3603_v63, 16  ;;  %v3602_v47 = vmul.u32 %v3600_v49, %v3576_v23  ;;  %v3605_v2 = vmul.u32 %v3601_v29, %v3577_v27 }
 0x3a6   : > { %v3591_v28 = vadd.s32 %v3589_v19, %v3583_v40  ;;  %vm3592_vm10 = vc.u32 %v3590_v55, %v3586_v48  ;;  %v3485_v58 = vor.u32 %v3484_v6, %v3483_v10  ;;  %v3488_v38 = vshll.u32 %v3487_v31, 23 }
 0x3a7   : > { %v3593_v22 = vsel %vm3592_vm10, 1, %v5780_v0  ;;  %v3608_v39 = vshll.u32 %v3604_v11, 16  ;;  %vm3610_vm11 = vc.u32 %v3602_v47, %v3606_v59  ;;  %v3612_v56 = vadd.s32 %v3606_v59, %v3602_v47 }
 0x3a8   : > { %v3595_v20 = vadd.s32 %v3593_v22, %v3591_v28  ;;  %v3489_v57 = vor.u32 4788187, %v3488_v38  ;;  %v3497_v32 = vsel %vm3374_vm7, %v3496_v62, %v8096_v16  ;;  %v3611_v33 = vsel %vm3610_vm11, 1, %v5780_v0 }
 0x3a9   : > { %v5599_v51 = vadd.s32 4294967169, %v3686_v18  ;;  %v3587_v54 = vshrl.u32 %v3582_v13, 16  ;;  %v3613_v15 = vadd.s32 %v3611_v33, %v3605_v2  ;;  %vm3614_vm12 = vc.u32 %v3612_v56, %v3608_v39  ;;  %v370_v18 = vpop.f32.mrf.mxu2 }
 0x3aa   : > { %v3596_v46 = vadd.s32 %v3595_v20, %v3585_v60  ;;  %v3490_v24 = vand.u32 2147483647, %v3489_v57  ;;  %v3492_v23 = vcvt.s32.f32 %v3485_v58  ;;  %v3615_v27 = vsel %vm3614_vm12, 1, %v5780_v0 }
 0x3ab   : > { %v3692_v44 = vadd.s32 1, %v5599_v51  ;;  %vm8162_vm13 = vcmp.le.f32.partialorder %v3372_v12, 0.7853982  ;;  %v3607_v1 = vshrl.u32 %v3603_v63, 16  ;;  %v3617_v16 = vadd.s32 %v3615_v27, %v3613_v15 }
 0x3ac   : > { %v3682_v62 = vand.u32 2147483647, %v8099_v8  ;;  %v3493_v13 = vmul.f32 %v3492_v23, %v3490_v24  ;;  %v3499_v43 = vsel %vm8162_vm13, 0, %v3497_v32  ;;  %v8169_v37 = vadd.s32 %v3596_v46, %v3587_v54 }
 0x3ad   : > { %vm3693_vm14 = vcmp.gt.s32.totalorder %v3692_v44, 0  ;;  %v3566_v49 = vsel %vm3560_vm5, %v8135_v26, %v3565_v34  ;;  %v3609_v12 = vshrl.u32 %v3604_v11, 16  ;;  %v3618_v52 = vadd.s32 %v3617_v16, %v3607_v1 }
 0x3ae   : > { %v3694_v5 = vsel %vm3693_vm14, %v3692_v44, 0  ;;  %v3494_v30 = vxor.u32 2147483648, %v3493_v13  ;;  %v8174_v61 = vadd.s32 %v3612_v56, %v3608_v39  ;;  %v371_v35 = vadd.f32 %v8065_v36, %v370_v18 }
 0x3af   : > { %v3696_v40 = vand.u32 31, %v3694_v5  ;;  %v3516_v53 = vadd.s32 3, %v3499_v43  ;;  %v3619_v45 = vadd.s32 %v3618_v52, %v3609_v12  ;;  %v3689_v48 = vand.u32 8388607, %v3682_v62 }
 0x3b0   : > { %v3495_v63 = vsel %vm3374_vm7, %v3494_v30, %v3493_v13  ;;  %v3620_v42 = vmul.u32 %v8121_v50, %v3566_v49  ;;  %vm3622_vm15 = vc.u32 %v8169_v37, %v8174_v61  ;;  %v8187_v55 = vshrl.u32 %v3694_v5, 5 }
 0x3b1   : > { %v3697_v26 = vsub.s32 32, %v3696_v40  ;;  %v3498_v34 = vsel %vm8162_vm13, %v7884_v41, %v3495_v63  ;;  %v3623_v10 = vadd.s32 1, %v3619_v45  ;;  %v3699_v11 = vshll.u32 %v5774_v4, %v3696_v40 }
 0x3b2   : > { %v3500_v6 = vmul.f32 %v3498_v34, %v3498_v34  ;;  %v3702_v19 = vshll.u32 %v5775_v7, %v3696_v40  ;;  %v3708_v28 = vshll.u32 %v5777_v14, %v3696_v40  ;;  %v3705_v2 = vshll.u32 %v5776_v9, %v3696_v40 }
 0x3b3   : > { %v3700_v31 = vshrl.u32 %v5775_v7, %v3697_v26  ;;  %v3703_v50 = vshrl.u32 %v5776_v9, %v3697_v26  ;;  %v3624_v59 = vsel %vm3622_vm15, %v3623_v10, %v3619_v45  ;;  %v3706_v60 = vshrl.u32 %v5777_v14, %v3697_v26 }
 0x3b4   : > { %v3709_v47 = vshrl.u32 %v5778_v17, %v3697_v26  ;;  %v3501_v58 = vmul.f32 -0.001358992, %v3500_v6  ;;  %v3508_v38 = vmul.f32 -0.00019511016, %v3500_v6  ;;  %v3625_v22 = vadd.s32 %v3624_v59, %v3620_v42 }
 0x3b5   : > { %v3701_v20 = vor.u32 %v3700_v31, %v3699_v11  ;;  %v3711_v56 = vshll.u32 %v5778_v17, %v3696_v40  ;;  %v3712_v57 = vshrl.u32 %v5779_v21, %v3697_v26  ;;  %v8199_v54 = vor.u32 %v3703_v50, %v3702_v19 }
 0x3b6   : > { %v3710_v39 = vor.u32 %v3709_v47, %v3708_v28  ;;  %v3502_v32 = vadd.f32 0.041655596, %v3501_v58  ;;  %v3509_v33 = vadd.f32 0.008332121, %v3508_v38  ;;  %v3626_v51 = vadd.s32 536870912, %v3625_v22 }
 0x3b7   : > { %v3517_v46 = vand.u32 3, %v3516_v53  ;;  %v3690_v15 = vor.u32 8388608, %v3689_v48  ;;  %v3707_v24 = vor.u32 %v3706_v60, %v3705_v2  ;;  %v3713_v23 = vor.u32 %v3712_v57, %v3711_v56 }
 0x3b8   : > { %v3503_v27 = vmul.f32 %v3502_v32, %v3500_v6  ;;  %v3510_v44 = vmul.f32 %v3509_v33, %v3500_v6  ;;  %v8201_v29 = vshrl.u32 %v3626_v51, 30  ;;  %vm3717_vm0 = vcmp.lt.s32.totalorder %v8187_v55, 4 }
 0x3b9   : > { %v8204_v1 = vmul.f32 30.0, %v371_v35  ;;  %vm3714_vm1 = vcmp.lt.s32.totalorder %v8187_v55, 1  ;;  %vm3716_vm2 = vcmp.lt.s32.totalorder %v8187_v55, 3  ;;  %v3723_v16 = vsel %vm3717_vm0, %v3710_v39, 920167782 }
 0x3ba   : > { %v3504_v18 = vadd.f32 -0.4999988, %v3503_v27  ;;  %v3511_v13 = vadd.f32 -0.16666654, %v3510_v44  ;;  %v3628_v43 = vshll.u32 %v8201_v29, 30  ;;  %v3722_v49 = vsel %vm3714_vm1, %v3701_v20, %v8199_v54 }
 0x3bb   : > { %vm3715_vm3 = vcmp.lt.s32.totalorder %v8187_v55, 2  ;;  %v3724_v12 = vsel %vm3716_vm2, %v3707_v24, %v3723_v16  ;;  %v3727_v52 = vsel %vm3717_vm0, %v3713_v23, 1326507024  ;;  %v8219_v5 = vshll.u32 %v3690_v15, 8 }
 0x3bc   : > { %v3505_v30 = vmul.f32 %v3504_v18, %v3500_v6  ;;  %v3512_v40 = vmul.f32 %v3511_v13, %v3500_v6  ;;  %vm3518_vm4 = vcmp.lt.s32.totalorder %v3517_v46, 2  ;;  %v3629_v35 = vsub.s32 %v3625_v22, %v3628_v43 }
 0x3bd   : > { %v3726_v53 = vsel %vm3714_vm1, %v8199_v54, %v3707_v24  ;;  %vm3515_vm5 = vweird.f32 %v7884_v41  ;;  %vm3519_vm6 = vcmp.eq.s32.totalorder %v3517_v46, 0  ;;  %vm3522_vm7 = vcmp.eq.s32.totalorder %v3517_v46, 2 }
 0x3be   : > { %v3725_v45 = vsel %vm3715_vm3, %v3722_v49, %v3724_v12  ;;  %v3728_v48 = vsel %vm3716_vm2, %v3710_v39, %v3727_v52  ;;  %v3506_v63 = vadd.f32 1.0, %v3505_v30  ;;  %v3513_v42 = vadd.f32 1.0, %v3512_v40 }
 0x3bf   : > { %vm3630_vm8 = vcmp.lt.s32.totalorder %v3629_v35, 0  ;;  %v3631_v10 = vsub.s32 0, %v3629_v35  ;;  %v3698_v11 = vshrl.u32 %v5774_v4, %v3697_v26  ;;  %v3729_v6 = vsel %vm3715_vm3, %v3726_v53, %v3728_v48 }
 0x3c0   : > { %v3732_v31 = vshrl.u32 %v8219_v5, 16  ;;  %v3840_v19 = vand.u32 2139095040, %v8204_v1  ;;  %v3514_v50 = vmul.f32 %v3513_v42, %v3498_v34  ;;  %v3523_v59 = vxor.u32 2147483648, %v3506_v63 }
 0x3c1   : > { %v3632_v60 = vsel %vm3630_vm8, %v3631_v10, %v3629_v35  ;;  %v3733_v28 = vand.u32 65535, %v3729_v6  ;;  %v3734_v58 = vshrl.u32 %v3729_v6, 16  ;;  %v3755_v38 = vand.u32 65535, %v3725_v45 }
 0x3c2   : > { %v3633_v47 = vclz %v3632_v60  ;;  %v3756_v22 = vshrl.u32 %v3725_v45, 16  ;;  %v3520_v2 = vxor.u32 2147483648, %v3514_v50  ;;  %v3621_v39 = vadd.s32 %v8174_v61, %v8169_v37 }
 0x3c3   : > { %v8238_v26 = vsel %vm3714_vm1, %v3698_v11, %v3701_v20  ;;  %v3731_v56 = vand.u32 65535, %v8219_v5  ;;  %v3651_v34 = vsub.s32 4, %v8201_v29  ;;  %v3719_v32 = vsel %vm3717_vm0, %v3707_v24, 2102212464 }
 0x3c4   : > { %v5597_v57 = vadd.s32 4294967294, %v3633_v47  ;;  %v3737_v33 = vmul.u32 %v3733_v28, %v3732_v31  ;;  %v3521_v51 = vsel %vm3519_vm6, %v3506_v63, %v3520_v2  ;;  %v3524_v15 = vsel %vm3522_vm7, %v3523_v59, %v3514_v50 }
 0x3c5   : > { %v3736_v23 = vmul.u32 %v3734_v58, %v3731_v56  ;;  %v3841_v37 = vshrl.u32 %v3840_v19, 23  ;;  %v3525_v61 = vsel %vm3518_vm4, %v3521_v51, %v3524_v15  ;;  %vm3529_vm9 = vcmp.lt.s32.totalorder %v7989_v25, 0 }
 0x3c6   : > { %vm5598_vm10 = vcmp.lt.s32.totalorder %v5597_v57, 0  ;;  %v3757_v20 = vmul.u32 %v3755_v38, %v3731_v56  ;;  %v3758_v27 = vmul.u32 %v3756_v22, %v3731_v56  ;;  %v3526_v44 = vsel %vm3515_vm5, nan, %v3525_v61 }
 0x3c7   : > { %v3636_v16 = vsel %vm5598_vm10, 0, %v5597_v57  ;;  %v3735_v24 = vmul.u32 %v3733_v28, %v3731_v56  ;;  %v3739_v18 = vshll.u32 %v3736_v23, 16  ;;  %v3738_v49 = vmul.u32 %v3734_v58, %v3732_v31  ;;  %5406 = vst [vmem:[%s6179_s20 + $0x98] sm:$0xff] %v3526_v44 }
 0x3c8   : > { %v3637_v13 = vsub.s32 32, %v3636_v16  ;;  %v3641_v43 = vsub.s32 4294967266, %v3636_v16  ;;  %v3741_v12 = vshll.u32 %v3737_v33, 16  ;;  %v3759_v46 = vmul.u32 %v3755_v38, %v3732_v31 }
 0x3c9   : > { %vm3743_vm11 = vc.u32 %v3735_v24, %v3739_v18  ;;  %v3745_v52 = vadd.s32 %v3739_v18, %v3735_v24  ;;  %v3761_v30 = vshll.u32 %v3758_v27, 16  ;;  %v3638_v40 = vshll.u32 %v3629_v35, %v3636_v16 }
 0x3ca   : > { %v3639_v53 = vshrl.u32 %v3621_v39, %v3637_v13  ;;  %v3642_v45 = vadd.s32 127, %v3641_v43  ;;  %v3744_v48 = vsel %vm3743_vm11, 1, %v5780_v0  ;;  %v3740_v63 = vshrl.u32 %v3736_v23, 16  ;;  %v372_v23 = vpop.f32.mrf.mxu2 }
 0x3cb   : > { %v3746_v41 = vadd.s32 %v3744_v48, %v3738_v49  ;;  %vm3747_vm12 = vc.u32 %v3745_v52, %v3741_v12  ;;  %v3760_v42 = vmul.u32 %v3756_v22, %v3732_v31  ;;  %vm3765_vm13 = vc.u32 %v3757_v20, %v3761_v30 }
 0x3cc   : > { %v3640_v10 = vor.u32 %v3639_v53, %v3638_v40  ;;  %v3643_v11 = vshll.u32 %v3642_v45, 23  ;;  %v3748_v6 = vsel %vm3747_vm12, 1, %v5780_v0  ;;  %v3763_v50 = vshll.u32 %v3759_v46, 16 }
 0x3cd   : > { %v3750_v19 = vadd.s32 %v3748_v6, %v3746_v41  ;;  %v3766_v59 = vsel %vm3765_vm13, 1, %v5780_v0  ;;  %v3767_v60 = vadd.s32 %v3761_v30, %v3757_v20  ;;  %v3720_v35 = vsel %vm3716_vm2, %v8199_v54, %v3719_v32 }
 0x3ce   : > { %v3644_v28 = vor.u32 4788187, %v3643_v11  ;;  %v3768_v47 = vadd.s32 %v3766_v59, %v3760_v42  ;;  %v5602_v58 = vadd.s32 4294967169, %v3841_v37  ;;  %v3652_v31 = vsel %vm3529_vm9, %v3651_v34, %v8201_v29 }
 0x3cf   : > { %v3742_v38 = vshrl.u32 %v3737_v33, 16  ;;  %v3751_v22 = vadd.s32 %v3750_v19, %v3740_v63  ;;  %vm3769_vm14 = vc.u32 %v3767_v60, %v3763_v50  ;;  %v3647_v39 = vcvt.s32.f32 %v3640_v10 }
 0x3d0   : > { %v3645_v2 = vand.u32 2147483647, %v3644_v28  ;;  %v3770_v56 = vsel %vm3769_vm14, 1, %v5780_v0  ;;  %v3847_v57 = vadd.s32 1, %v5602_v58  ;;  %vm8263_vm15 = vcmp.le.f32.partialorder %v3527_v3, 0.7853982 }
 0x3d1   : > { %v3762_v54 = vshrl.u32 %v3758_v27, 16  ;;  %v3772_v32 = vadd.s32 %v3770_v56, %v3768_v47  ;;  %v3837_v15 = vand.u32 2147483647, %v8204_v1  ;;  %v3654_v34 = vsel %vm8263_vm15, 0, %v3652_v31 }
 0x3d2   : > { %v3648_v29 = vmul.f32 %v3647_v39, %v3645_v2  ;;  %v8270_v33 = vadd.s32 %v3751_v22, %v3742_v38  ;;  %vm3848_vm0 = vcmp.gt.s32.totalorder %v3847_v57, 0  ;;  %v3721_v37 = vsel %vm3715_vm3, %v8238_v26, %v3720_v35 }
 0x3d3   : > { %v3764_v3 = vshrl.u32 %v3759_v46, 16  ;;  %v3773_v61 = vadd.s32 %v3772_v32, %v3762_v54  ;;  %v3849_v20 = vsel %vm3848_vm0, %v3847_v57, 0  ;;  %v8275_v27 = vadd.s32 %v3767_v60, %v3763_v50 }
 0x3d4   : > { %v3649_v44 = vxor.u32 2147483648, %v3648_v29  ;;  %v3851_v16 = vand.u32 31, %v3849_v20  ;;  %v373_v24 = vadd.f32 %v8065_v36, %v372_v23  ;;  %v3671_v18 = vadd.s32 3, %v3654_v34 }
 0x3d5   : > { %v3774_v13 = vadd.s32 %v3773_v61, %v3764_v3  ;;  %v3775_v49 = vmul.u32 %v8219_v5, %v3721_v37  ;;  %vm3777_vm1 = vc.u32 %v8270_v33, %v8275_v27  ;;  %v3844_v52 = vand.u32 8388607, %v3837_v15 }
 0x3d6   : > { %v3650_v43 = vsel %vm3529_vm9, %v3649_v44, %v3648_v29  ;;  %v3852_v55 = vsub.s32 32, %v3851_v16  ;;  %v8290_v46 = vshrl.u32 %v3849_v20, 5  ;;  %v3854_v5 = vshll.u32 %v5774_v4, %v3851_v16 }
 0x3d7   : > { %v8286_v26 = vsel %vm8263_vm15, %v7989_v25, %v3650_v43  ;;  %v3778_v12 = vadd.s32 1, %v3774_v13  ;;  %v3863_v53 = vshll.u32 %v5777_v14, %v3851_v16  ;;  %v3857_v6 = vshll.u32 %v5775_v7, %v3851_v16 }
 0x3d8   : > { %v3655_v30 = vmul.f32 %v8286_v26, %v8286_v26  ;;  %v3855_v40 = vshrl.u32 %v5775_v7, %v3852_v55  ;;  %v3858_v48 = vshrl.u32 %v5776_v9, %v3852_v55  ;;  %v3861_v63 = vshrl.u32 %v5777_v14, %v3852_v55 }
 0x3d9   : > { %v3779_v45 = vsel %vm3777_vm1, %v3778_v12, %v3774_v13  ;;  %v3864_v41 = vshrl.u32 %v5778_v17, %v3852_v55  ;;  %v3860_v19 = vshll.u32 %v5776_v9, %v3851_v16  ;;  %v3866_v59 = vshll.u32 %v5778_v17, %v3851_v16 }
 0x3da   : > { %v3656_v42 = vmul.f32 -0.001358992, %v3655_v30  ;;  %v3663_v10 = vmul.f32 -0.00019511016, %v3655_v30  ;;  %v3780_v11 = vadd.s32 %v3779_v45, %v3775_v49  ;;  %v3867_v60 = vshrl.u32 %v5779_v21, %v3852_v55 }
 0x3db   : > { %v3865_v50 = vor.u32 %v3864_v41, %v3863_v53  ;;  %v8304_v47 = vand.u32 3, %v3671_v18  ;;  %v3856_v31 = vor.u32 %v3855_v40, %v3854_v5  ;;  %v3859_v38 = vor.u32 %v3858_v48, %v3857_v6 }
 0x3dc   : > { %v3657_v28 = vadd.f32 0.041655596, %v3656_v42  ;;  %v3664_v35 = vadd.f32 0.008332121, %v3663_v10  ;;  %v3781_v58 = vadd.s32 536870912, %v3780_v11  ;;  %v3862_v22 = vor.u32 %v3861_v63, %v3860_v19 }
 0x3dd   : > { %v3868_v2 = vor.u32 %v3867_v60, %v3866_v59  ;;  %vm3872_vm2 = vcmp.lt.s32.totalorder %v8290_v46, 4  ;;  %v8309_v51 = vmul.f32 30.0, %v373_v24  ;;  %v3845_v54 = vor.u32 8388608, %v3844_v52 }
 0x3de   : > { %v3658_v39 = vmul.f32 %v3657_v28, %v3655_v30  ;;  %v3665_v56 = vmul.f32 %v3664_v35, %v3655_v30  ;;  %v8306_v57 = vshrl.u32 %v3781_v58, 30  ;;  %v3878_v32 = vsel %vm3872_vm2, %v3865_v50, 920167782 }
 0x3df   : > { %vm3869_vm3 = vcmp.lt.s32.totalorder %v8290_v46, 1  ;;  %vm3674_vm4 = vcmp.eq.s32.totalorder %v8304_v47, 0  ;;  %vm3677_vm5 = vcmp.eq.s32.totalorder %v8304_v47, 2  ;;  %vm3871_vm6 = vcmp.lt.s32.totalorder %v8290_v46, 3 }
 0x3e0   : > { %v3659_v23 = vadd.f32 -0.4999988, %v3658_v39  ;;  %v3666_v29 = vadd.f32 -0.16666654, %v3665_v56  ;;  %v3783_v34 = vshll.u32 %v8306_v57, 30  ;;  %v3877_v37 = vsel %vm3869_vm3, %v3856_v31, %v3859_v38 }
 0x3e1   : > { %v3881_v3 = vsel %vm3869_vm3, %v3859_v38, %v3862_v22  ;;  %v3882_v61 = vsel %vm3872_vm2, %v3868_v2, 1326507024  ;;  %vm3673_vm7 = vcmp.lt.s32.totalorder %v8304_v47, 2  ;;  %v3879_v24 = vsel %vm3871_vm6, %v3862_v22, %v3878_v32 }
 0x3e2   : > { %v3660_v20 = vmul.f32 %v3659_v23, %v3655_v30  ;;  %v3667_v44 = vmul.f32 %v3666_v29, %v3655_v30  ;;  %v3784_v16 = vsub.s32 %v3780_v11, %v3783_v34  ;;  %vm3670_vm8 = vweird.f32 %v7989_v25 }
 0x3e3   : > { %vm3870_vm9 = vcmp.lt.s32.totalorder %v8290_v46, 2  ;;  %v3883_v18 = vsel %vm3871_vm6, %v3865_v50, %v3882_v61  ;;  %v8331_v13 = vshll.u32 %v3845_v54, 8  ;;  %v3995_v43 = vand.u32 2139095040, %v8309_v51 }
 0x3e4   : > { %v3661_v49 = vadd.f32 1.0, %v3660_v20  ;;  %v3668_v12 = vadd.f32 1.0, %v3667_v44  ;;  %vm3785_vm10 = vcmp.lt.s32.totalorder %v3784_v16, 0  ;;  %v3786_v52 = vsub.s32 0, %v3784_v16 }
 0x3e5   : > { %v3776_v30 = vadd.s32 %v8275_v27, %v8270_v33  ;;  %v3853_v5 = vshrl.u32 %v5774_v4, %v3852_v55  ;;  %v3880_v40 = vsel %vm3870_vm9, %v3877_v37, %v3879_v24  ;;  %v3884_v53 = vsel %vm3870_vm9, %v3881_v3, %v3883_v18 }
 0x3e6   : > { %v3669_v45 = vmul.f32 %v3668_v12, %v8286_v26  ;;  %v3678_v48 = vxor.u32 2147483648, %v3661_v49  ;;  %v3787_v63 = vsel %vm3785_vm10, %v3786_v52, %v3784_v16  ;;  %v3888_v41 = vand.u32 65535, %v3884_v53 }
 0x3e7   : > { %v3788_v42 = vclz %v3787_v63  ;;  %v3887_v10 = vshrl.u32 %v8331_v13, 16  ;;  %v3889_v11 = vshrl.u32 %v3884_v53, 16  ;;  %v3996_v6 = vshrl.u32 %v3995_v43, 23 }
 0x3e8   : > { %v3675_v19 = vxor.u32 2147483648, %v3669_v45  ;;  %v8345_v33 = vsel %vm3869_vm3, %v3853_v5, %v3856_v31  ;;  %v3874_v27 = vsel %vm3872_vm2, %v3862_v22, 2102212464  ;;  %v3886_v55 = vand.u32 65535, %v8331_v13 }
 0x3e9   : > { %v5600_v50 = vadd.s32 4294967294, %v3788_v42  ;;  %v3806_v26 = vsub.s32 4, %v8306_v57  ;;  %v3892_v59 = vmul.u32 %v3888_v41, %v3887_v10  ;;  %v3911_v60 = vshrl.u32 %v3880_v40, 16 }
 0x3ea   : > { %v3676_v28 = vsel %vm3674_vm4, %v3661_v49, %v3675_v19  ;;  %v3679_v35 = vsel %vm3677_vm5, %v3678_v48, %v3669_v45  ;;  %vm3684_vm11 = vcmp.lt.s32.totalorder %v8099_v8, 0  ;;  %v3891_v58 = vmul.u32 %v3889_v11, %v3886_v55 }
 0x3eb   : > { %v3910_v31 = vand.u32 65535, %v3880_v40  ;;  %v3680_v22 = vsel %vm3673_vm7, %v3676_v28, %v3679_v35  ;;  %vm5601_vm12 = vcmp.lt.s32.totalorder %v5600_v50, 0  ;;  %v3875_v2 = vsel %vm3871_vm6, %v3859_v38, %v3874_v27 }
 0x3ec   : > { %v3890_v39 = vmul.u32 %v3888_v41, %v3886_v55  ;;  %v3681_v56 = vsel %vm3670_vm8, nan, %v3680_v22  ;;  %v3791_v54 = vsel %vm5601_vm12, 0, %v5600_v50  ;;  %v3893_v32 = vmul.u32 %v3889_v11, %v3887_v10 }
 0x3ed   : > { %v3894_v23 = vshll.u32 %v3891_v58, 16  ;;  %v3792_v29 = vsub.s32 32, %v3791_v54  ;;  %v3796_v34 = vsub.s32 4294967266, %v3791_v54  ;;  %v3896_v37 = vshll.u32 %v3892_v59, 16  ;;  %5407 = vst [vmem:[%s6179_s20 + $0xa0] sm:$0xff] %v3681_v56 }
 0x3ee   : > { %v3913_v3 = vmul.u32 %v3911_v60, %v3886_v55  ;;  %v3793_v61 = vshll.u32 %v3784_v16, %v3791_v54  ;;  %v3914_v20 = vmul.u32 %v3910_v31, %v3887_v10  ;;  %v3895_v43 = vshrl.u32 %v3891_v58, 16 }
 0x3ef   : > { %vm3898_vm13 = vc.u32 %v3890_v39, %v3894_v23  ;;  %v3900_v47 = vadd.s32 %v3894_v23, %v3890_v39  ;;  %v3794_v44 = vshrl.u32 %v3776_v30, %v3792_v29  ;;  %v3797_v24 = vadd.s32 127, %v3796_v34 }
 0x3f0   : > { %v3899_v38 = vsel %vm3898_vm13, 1, %v5780_v0  ;;  %v3916_v18 = vshll.u32 %v3913_v3, 16  ;;  %v3912_v49 = vmul.u32 %v3910_v31, %v3886_v55  ;;  %v3915_v40 = vmul.u32 %v3911_v60, %v3887_v10 }
 0x3f1   : > { %v3901_v25 = vadd.s32 %v3899_v38, %v3893_v32  ;;  %vm3902_vm14 = vc.u32 %v3900_v47, %v3896_v37  ;;  %v3795_v12 = vor.u32 %v3794_v44, %v3793_v61  ;;  %v3798_v52 = vshll.u32 %v3797_v24, 23 }
 0x3f2   : > { %v3903_v5 = vsel %vm3902_vm14, 1, %v5780_v0  ;;  %v3918_v45 = vshll.u32 %v3914_v20, 16  ;;  %vm3920_vm15 = vc.u32 %v3912_v49, %v3916_v18  ;;  %v3922_v16 = vadd.s32 %v3916_v18, %v3912_v49 }
 0x3f3   : > { %v3905_v53 = vadd.s32 %v3903_v5, %v3901_v25  ;;  %v3799_v48 = vor.u32 4788187, %v3798_v52  ;;  %v3807_v30 = vsel %vm3684_vm11, %v3806_v26, %v8306_v57  ;;  %v3921_v63 = vsel %vm3920_vm15, 1, %v5780_v0 }
 0x3f4   : > { %v5605_v41 = vadd.s32 4294967169, %v3996_v6  ;;  %v3897_v42 = vshrl.u32 %v3892_v59, 16  ;;  %v3923_v19 = vadd.s32 %v3921_v63, %v3915_v40  ;;  %vm3924_vm0 = vc.u32 %v3922_v16, %v3918_v45  ;;  %v375_v6 = vpop.f32.mrf.mxu3 }
 0x3f5   : > { %v3906_v11 = vadd.s32 %v3905_v53, %v3895_v43  ;;  %v3800_v27 = vand.u32 2147483647, %v3799_v48  ;;  %v3802_v55 = vcvt.s32.f32 %v3795_v12  ;;  %v3925_v10 = vsel %vm3924_vm0, 1, %v5780_v0 }
 0x3f6   : > { %v4002_v50 = vadd.s32 1, %v5605_v41  ;;  %vm8372_vm1 = vcmp.le.f32.partialorder %v3682_v62, 0.7853982  ;;  %v3917_v28 = vshrl.u32 %v3913_v3, 16  ;;  %v3927_v57 = vadd.s32 %v3925_v10, %v3923_v19 }
 0x3f7   : > { %v3992_v26 = vand.u32 2147483647, %v8309_v51  ;;  %v3803_v59 = vmul.f32 %v3802_v55, %v3800_v27  ;;  %v3809_v35 = vsel %vm8372_vm1, 0, %v3807_v30  ;;  %v8379_v58 = vadd.s32 %v3906_v11, %v3897_v42 }
 0x3f8   : > { %vm4003_vm2 = vcmp.gt.s32.totalorder %v4002_v50, 0  ;;  %v3876_v31 = vsel %vm3870_vm9, %v8345_v33, %v3875_v2  ;;  %v3919_v62 = vshrl.u32 %v3914_v20, 16  ;;  %v3928_v22 = vadd.s32 %v3927_v57, %v3917_v28 }
 0x3f9   : > { %v4004_v39 = vsel %vm4003_vm2, %v4002_v50, 0  ;;  %v3804_v56 = vxor.u32 2147483648, %v3803_v59  ;;  %v8384_v54 = vadd.s32 %v3922_v16, %v3918_v45  ;;  %v376_v23 = vadd.f32 %v8065_v36, %v375_v6 }
 0x3fa   : > { %v4006_v32 = vand.u32 31, %v4004_v39  ;;  %v3826_v29 = vadd.s32 3, %v3809_v35  ;;  %v3929_v34 = vadd.s32 %v3928_v22, %v3919_v62  ;;  %v3999_v37 = vand.u32 8388607, %v3992_v26 }
 0x3fb   : > { %v3805_v3 = vsel %vm3684_vm11, %v3804_v56, %v3803_v59  ;;  %v3930_v46 = vmul.u32 %v8331_v13, %v3876_v31  ;;  %vm3932_vm3 = vc.u32 %v8379_v58, %v8384_v54  ;;  %v8397_v36 = vshrl.u32 %v4004_v39, 5 }
 0x3fc   : > { %v4007_v33 = vsub.s32 32, %v4006_v32  ;;  %v3808_v2 = vsel %vm8372_vm1, %v8099_v8, %v3805_v3  ;;  %v3933_v61 = vadd.s32 1, %v3929_v34  ;;  %v4009_v47 = vshll.u32 %v5774_v4, %v4006_v32 }
 0x3fd   : > { %v3810_v20 = vmul.f32 %v3808_v2, %v3808_v2  ;;  %v4012_v24 = vshll.u32 %v5775_v7, %v4006_v32  ;;  %v4018_v43 = vshll.u32 %v5777_v14, %v4006_v32  ;;  %v4015_v5 = vshll.u32 %v5776_v9, %v4006_v32 }
 0x3fe   : > { %v4010_v44 = vshrl.u32 %v5775_v7, %v4007_v33  ;;  %v4013_v13 = vshrl.u32 %v5776_v9, %v4007_v33  ;;  %v3934_v38 = vsel %vm3932_vm3, %v3933_v61, %v3929_v34  ;;  %v4016_v18 = vshrl.u32 %v5777_v14, %v4007_v33 }
 0x3ff   : > { %v4019_v25 = vshrl.u32 %v5778_v17, %v4007_v33  ;;  %v3811_v49 = vmul.f32 -0.001358992, %v3810_v20  ;;  %v3818_v12 = vmul.f32 -0.00019511016, %v3810_v20  ;;  %v3935_v52 = vadd.s32 %v3934_v38, %v3930_v46 }
 0x400   : > { %v4011_v40 = vor.u32 %v4010_v44, %v4009_v47  ;;  %v4021_v45 = vshll.u32 %v5778_v17, %v4006_v32  ;;  %v4022_v16 = vshrl.u32 %v5779_v21, %v4007_v33  ;;  %v8409_v41 = vor.u32 %v4013_v13, %v4012_v24 }
 0x401   : > { %v4020_v53 = vor.u32 %v4019_v25, %v4018_v43  ;;  %v3812_v48 = vadd.f32 0.041655596, %v3811_v49  ;;  %v3819_v30 = vadd.f32 0.008332121, %v3818_v12  ;;  %v3936_v63 = vadd.s32 536870912, %v3935_v52 }
 0x402   : > { %v3827_v42 = vand.u32 3, %v3826_v29  ;;  %v4000_v11 = vor.u32 8388608, %v3999_v37  ;;  %v4017_v19 = vor.u32 %v4016_v18, %v4015_v5  ;;  %v4023_v27 = vor.u32 %v4022_v16, %v4021_v45 }
 0x403   : > { %v3813_v55 = vmul.f32 %v3812_v48, %v3810_v20  ;;  %v3820_v10 = vmul.f32 %v3819_v30, %v3810_v20  ;;  %v8411_v50 = vshrl.u32 %v3936_v63, 30  ;;  %vm4027_vm4 = vcmp.lt.s32.totalorder %v8397_v36, 4 }
 0x404   : > { %v8414_v60 = vmul.f32 30.0, %v376_v23  ;;  %vm4024_vm5 = vcmp.lt.s32.totalorder %v8397_v36, 1  ;;  %vm4026_vm6 = vcmp.lt.s32.totalorder %v8397_v36, 3  ;;  %v4033_v28 = vsel %vm4027_vm4, %v4020_v53, 920167782 }
 0x405   : > { %v3814_v57 = vadd.f32 -0.4999988, %v3813_v55  ;;  %v3821_v6 = vadd.f32 -0.16666654, %v3820_v10  ;;  %v3938_v59 = vshll.u32 %v8411_v50, 30  ;;  %v4032_v35 = vsel %vm4024_vm5, %v4011_v40, %v8409_v41 }
 0x406   : > { %vm4025_vm7 = vcmp.lt.s32.totalorder %v8397_v36, 2  ;;  %v4034_v31 = vsel %vm4026_vm6, %v4017_v19, %v4033_v28  ;;  %v4037_v62 = vsel %vm4027_vm4, %v4023_v27, 1326507024  ;;  %v8429_v22 = vshll.u32 %v4000_v11, 8 }
 0x407   : > { %v3815_v39 = vmul.f32 %v3814_v57, %v3810_v20  ;;  %v3822_v56 = vmul.f32 %v3821_v6, %v3810_v20  ;;  %vm3828_vm8 = vcmp.lt.s32.totalorder %v3827_v42, 2  ;;  %v3939_v32 = vsub.s32 %v3935_v52, %v3938_v59 }
 0x408   : > { %v4036_v23 = vsel %vm4024_vm5, %v8409_v41, %v4017_v19  ;;  %vm3825_vm9 = vweird.f32 %v8099_v8  ;;  %vm3829_vm10 = vcmp.eq.s32.totalorder %v3827_v42, 0  ;;  %vm3832_vm11 = vcmp.eq.s32.totalorder %v3827_v42, 2 }
 0x409   : > { %v4035_v29 = vsel %vm4025_vm7, %v4032_v35, %v4034_v31  ;;  %v4038_v34 = vsel %vm4026_vm6, %v4020_v53, %v4037_v62  ;;  %v3816_v37 = vadd.f32 1.0, %v3815_v39  ;;  %v3823_v3 = vadd.f32 1.0, %v3822_v56 }
 0x40a   : > { %vm3940_vm12 = vcmp.lt.s32.totalorder %v3939_v32, 0  ;;  %v3941_v46 = vsub.s32 0, %v3939_v32  ;;  %v4008_v61 = vshrl.u32 %v5774_v4, %v4007_v33  ;;  %v4039_v47 = vsel %vm4025_vm7, %v4036_v23, %v4038_v34 }
 0x40b   : > { %v4042_v20 = vshrl.u32 %v8429_v22, 16  ;;  %v4150_v44 = vand.u32 2139095040, %v8414_v60  ;;  %v3824_v24 = vmul.f32 %v3823_v3, %v3808_v2  ;;  %v3833_v13 = vxor.u32 2147483648, %v3816_v37 }
 0x40c   : > { %v3942_v38 = vsel %vm3940_vm12, %v3941_v46, %v3939_v32  ;;  %v4043_v18 = vand.u32 65535, %v4039_v47  ;;  %v4044_v25 = vshrl.u32 %v4039_v47, 16  ;;  %v4065_v49 = vand.u32 65535, %v4035_v29 }
 0x40d   : > { %v3943_v43 = vclz %v3942_v38  ;;  %v4066_v12 = vshrl.u32 %v4035_v29, 16  ;;  %v3830_v52 = vxor.u32 2147483648, %v3824_v24  ;;  %v3931_v5 = vadd.s32 %v8384_v54, %v8379_v58 }
 0x40e   : > { %v8448_v33 = vsel %vm4024_vm5, %v4008_v61, %v4011_v40  ;;  %v4041_v53 = vand.u32 65535, %v8429_v22  ;;  %v3961_v2 = vsub.s32 4, %v8411_v50  ;;  %v4029_v16 = vsel %vm4027_vm4, %v4017_v19, 2102212464 }
 0x40f   : > { %v5603_v45 = vadd.s32 4294967294, %v3943_v43  ;;  %v4047_v48 = vmul.u32 %v4043_v18, %v4042_v20  ;;  %v3831_v30 = vsel %vm3829_vm10, %v3816_v37, %v3830_v52  ;;  %v3834_v63 = vsel %vm3832_vm11, %v3833_v13, %v3824_v24 }
 0x410   : > { %v4046_v11 = vmul.u32 %v4044_v25, %v4041_v53  ;;  %v4151_v58 = vshrl.u32 %v4150_v44, 23  ;;  %v3835_v54 = vsel %vm3828_vm8, %v3831_v30, %v3834_v63  ;;  %vm3839_vm13 = vcmp.lt.s32.totalorder %v8204_v1, 0  ;;  %v377_v63 = vpop.f32.mrf.mxu3 }
 0x411   : > { %vm5604_vm14 = vcmp.lt.s32.totalorder %v5603_v45, 0  ;;  %v4067_v40 = vmul.u32 %v4065_v49, %v4041_v53  ;;  %v4068_v27 = vmul.u32 %v4066_v12, %v4041_v53  ;;  %v3836_v55 = vsel %vm3825_vm9, nan, %v3835_v54 }
 0x412   : > { %v3946_v10 = vsel %vm5604_vm14, 0, %v5603_v45  ;;  %v4045_v19 = vmul.u32 %v4043_v18, %v4041_v53  ;;  %v4049_v28 = vshll.u32 %v4046_v11, 16  ;;  %v4048_v59 = vmul.u32 %v4044_v25, %v4042_v20  ;;  %5408 = vst [vmem:[%s6179_s20 + $0xa8] sm:$0xff] %v3836_v55 }
 0x413   : > { %v3947_v57 = vsub.s32 32, %v3946_v10  ;;  %v3951_v6 = vsub.s32 4294967266, %v3946_v10  ;;  %v4051_v35 = vshll.u32 %v4047_v48, 16  ;;  %v4069_v42 = vmul.u32 %v4065_v49, %v4042_v20 }
 0x414   : > { %vm4053_vm15 = vc.u32 %v4045_v19, %v4049_v28  ;;  %v4055_v31 = vadd.s32 %v4049_v28, %v4045_v19  ;;  %v4071_v62 = vshll.u32 %v4068_v27, 16  ;;  %v3948_v39 = vshll.u32 %v3939_v32, %v3946_v10  ;;  %v8490_v10 = vld [vmem:[%s9382_s2] ss:$0 sm:$0xff] }
 0x415   : > { %v3949_v56 = vshrl.u32 %v3931_v5, %v3947_v57  ;;  %v3952_v23 = vadd.s32 127, %v3951_v6  ;;  %v4054_v29 = vsel %vm4053_vm15, 1, %v5780_v0  ;;  %v4050_v34 = vshrl.u32 %v4046_v11, 16 }
 0x416   : > { %v4056_v8 = vadd.s32 %v4054_v29, %v4048_v59  ;;  %vm4057_vm0 = vc.u32 %v4055_v31, %v4051_v35  ;;  %v4070_v37 = vmul.u32 %v4066_v12, %v4042_v20  ;;  %vm4075_vm1 = vc.u32 %v4067_v40, %v4071_v62 }
 0x417   : > { %v3950_v3 = vor.u32 %v3949_v56, %v3948_v39  ;;  %v3953_v46 = vshll.u32 %v3952_v23, 23  ;;  %v4058_v61 = vsel %vm4057_vm0, 1, %v5780_v0  ;;  %v4073_v44 = vshll.u32 %v4069_v42, 16 }
 0x418   : > { %v4060_v47 = vadd.s32 %v4058_v61, %v4056_v8  ;;  %v4076_v24 = vsel %vm4075_vm1, 1, %v5780_v0  ;;  %v4077_v13 = vadd.s32 %v4071_v62, %v4067_v40  ;;  %v4030_v32 = vsel %vm4026_vm6, %v8409_v41, %v4029_v16 }
 0x419   : > { %v3954_v38 = vor.u32 4788187, %v3953_v46  ;;  %v4078_v18 = vadd.s32 %v4076_v24, %v4070_v37  ;;  %v5608_v43 = vadd.s32 4294967169, %v4151_v58  ;;  %v3962_v20 = vsel %vm3839_vm13, %v3961_v2, %v8411_v50 }
 0x41a   : > { %v4052_v25 = vshrl.u32 %v4047_v48, 16  ;;  %v4061_v49 = vadd.s32 %v4060_v47, %v4050_v34  ;;  %vm4079_vm2 = vc.u32 %v4077_v13, %v4073_v44  ;;  %v3957_v52 = vcvt.s32.f32 %v3950_v3 }
 0x41b   : > { %v3955_v12 = vand.u32 2147483647, %v3954_v38  ;;  %v4080_v5 = vsel %vm4079_vm2, 1, %v5780_v0  ;;  %v4157_v53 = vadd.s32 1, %v5608_v43  ;;  %vm8473_vm3 = vcmp.le.f32.partialorder %v3837_v15, 0.7853982 }
 0x41c   : > { %v4072_v41 = vshrl.u32 %v4068_v27, 16  ;;  %v4082_v16 = vadd.s32 %v4080_v5, %v4078_v18  ;;  %v4147_v30 = vand.u32 2147483647, %v8414_v60  ;;  %v3964_v2 = vsel %vm8473_vm3, 0, %v3962_v20 }
 0x41d   : > { %v3958_v50 = vmul.f32 %v3957_v52, %v3955_v12  ;;  %v8480_v48 = vadd.s32 %v4061_v49, %v4052_v25  ;;  %vm4158_vm4 = vcmp.gt.s32.totalorder %v4157_v53, 0  ;;  %v4031_v11 = vsel %vm4025_vm7, %v8448_v33, %v4030_v32 }
 0x41e   : > { %v4074_v15 = vshrl.u32 %v4069_v42, 16  ;;  %v4083_v58 = vadd.s32 %v4082_v16, %v4072_v41  ;;  %v4159_v54 = vsel %vm4158_vm4, %v4157_v53, 0  ;;  %v8485_v27 = vadd.s32 %v4077_v13, %v4073_v44 }
 0x41f   : > { %v3959_v40 = vxor.u32 2147483648, %v3958_v50  ;;  %v4161_v55 = vand.u32 31, %v4159_v54  ;;  %v378_v19 = vadd.f32 %v8490_v10, %v377_v63  ;;  %v3981_v28 = vadd.s32 3, %v3964_v2 }
 0x420   : > { %v4084_v57 = vadd.s32 %v4083_v58, %v4074_v15  ;;  %v4085_v33 = vmul.u32 %v8429_v22, %v4031_v11  ;;  %vm4087_vm5 = vc.u32 %v8480_v48, %v8485_v27  ;;  %v4154_v31 = vand.u32 8388607, %v4147_v30 }
 0x421   : > { %v3960_v36 = vsel %vm3839_vm13, %v3959_v40, %v3958_v50  ;;  %v4162_v6 = vsub.s32 32, %v4161_v55  ;;  %v8505_v42 = vshrl.u32 %v4159_v54, 5  ;;  %v4164_v22 = vshll.u32 %v5774_v4, %v4161_v55 }
 0x422   : > { %v8501_v59 = vsel %vm8473_vm3, %v8204_v1, %v3960_v36  ;;  %v4088_v35 = vadd.s32 1, %v4084_v57  ;;  %v4173_v56 = vshll.u32 %v5777_v14, %v4161_v55  ;;  %v4167_v61 = vshll.u32 %v5775_v7, %v4161_v55 }
 0x423   : > { %v3965_v62 = vmul.f32 %v8501_v59, %v8501_v59  ;;  %v4165_v39 = vshrl.u32 %v5775_v7, %v4162_v6  ;;  %v4168_v29 = vshrl.u32 %v5776_v9, %v4162_v6  ;;  %v4171_v34 = vshrl.u32 %v5777_v14, %v4162_v6 }
 0x424   : > { %v4089_v23 = vsel %vm4087_vm5, %v4088_v35, %v4084_v57  ;;  %v4174_v8 = vshrl.u32 %v5778_v17, %v4162_v6  ;;  %v4170_v47 = vshll.u32 %v5776_v9, %v4161_v55  ;;  %v4176_v24 = vshll.u32 %v5778_v17, %v4161_v55 }
 0x425   : > { %v3966_v37 = vmul.f32 -0.001358992, %v3965_v62  ;;  %v3973_v3 = vmul.f32 -0.00019511016, %v3965_v62  ;;  %v4090_v46 = vadd.s32 %v4089_v23, %v4085_v33  ;;  %v4177_v13 = vshrl.u32 %v5779_v21, %v4162_v6 }
 0x426   : > { %v4175_v44 = vor.u32 %v4174_v8, %v4173_v56  ;;  %v8519_v18 = vand.u32 3, %v3981_v28  ;;  %v4166_v20 = vor.u32 %v4165_v39, %v4164_v22  ;;  %v4169_v25 = vor.u32 %v4168_v29, %v4167_v61 }
 0x427   : > { %v3967_v38 = vadd.f32 0.041655596, %v3966_v37  ;;  %v3974_v32 = vadd.f32 0.008332121, %v3973_v3  ;;  %v4091_v43 = vadd.s32 536870912, %v4090_v46  ;;  %v4172_v49 = vor.u32 %v4171_v34, %v4170_v47 }
 0x428   : > { %v4178_v12 = vor.u32 %v4177_v13, %v4176_v24  ;;  %vm4182_vm6 = vcmp.lt.s32.totalorder %v8505_v42, 4  ;;  %v8524_v45 = vmul.f32 30.0, %v378_v19  ;;  %v4155_v41 = vor.u32 8388608, %v4154_v31 }
 0x429   : > { %v3968_v52 = vmul.f32 %v3967_v38, %v3965_v62  ;;  %v3975_v5 = vmul.f32 %v3974_v32, %v3965_v62  ;;  %v8521_v53 = vshrl.u32 %v4091_v43, 30  ;;  %v4188_v16 = vsel %vm4182_vm6, %v4175_v44, 920167782 }
 0x42a   : > { %vm4179_vm7 = vcmp.lt.s32.totalorder %v8505_v42, 1  ;;  %vm3984_vm8 = vcmp.eq.s32.totalorder %v8519_v18, 0  ;;  %vm3987_vm9 = vcmp.eq.s32.totalorder %v8519_v18, 2  ;;  %vm4181_vm10 = vcmp.lt.s32.totalorder %v8505_v42, 3 }
 0x42b   : > { %v3969_v63 = vadd.f32 -0.4999988, %v3968_v52  ;;  %v3976_v50 = vadd.f32 -0.16666654, %v3975_v5  ;;  %v4093_v2 = vshll.u32 %v8521_v53, 30  ;;  %v4187_v11 = vsel %vm4179_vm7, %v4166_v20, %v4169_v25 }
 0x42c   : > { %v4191_v15 = vsel %vm4179_vm7, %v4169_v25, %v4172_v49  ;;  %v4192_v58 = vsel %vm4182_vm6, %v4178_v12, 1326507024  ;;  %vm3983_vm11 = vcmp.lt.s32.totalorder %v8519_v18, 2  ;;  %v4189_v19 = vsel %vm4181_vm10, %v4172_v49, %v4188_v16 }
 0x42d   : > { %v3970_v54 = vmul.f32 %v3969_v63, %v3965_v62  ;;  %v3977_v40 = vmul.f32 %v3976_v50, %v3965_v62  ;;  %v4094_v55 = vsub.s32 %v4090_v46, %v4093_v2  ;;  %vm3980_vm12 = vweird.f32 %v8204_v1 }
 0x42e   : > { %vm4180_vm13 = vcmp.lt.s32.totalorder %v8505_v42, 2  ;;  %v4193_v28 = vsel %vm4181_vm10, %v4175_v44, %v4192_v58  ;;  %v8546_v57 = vshll.u32 %v4155_v41, 8  ;;  %v4305_v36 = vand.u32 2139095040, %v8524_v45 }
 0x42f   : > { %v3971_v33 = vadd.f32 1.0, %v3970_v54  ;;  %v3978_v35 = vadd.f32 1.0, %v3977_v40  ;;  %vm4095_vm14 = vcmp.lt.s32.totalorder %v4094_v55, 0  ;;  %v4096_v31 = vsub.s32 0, %v4094_v55 }
 0x430   : > { %v4086_v62 = vadd.s32 %v8485_v27, %v8480_v48  ;;  %v4163_v22 = vshrl.u32 %v5774_v4, %v4162_v6  ;;  %v4190_v39 = vsel %vm4180_vm13, %v4187_v11, %v4189_v19  ;;  %v4194_v56 = vsel %vm4180_vm13, %v4191_v15, %v4193_v28 }
 0x431   : > { %v3979_v23 = vmul.f32 %v3978_v35, %v8501_v59  ;;  %v3988_v29 = vxor.u32 2147483648, %v3971_v33  ;;  %v4097_v34 = vsel %vm4095_vm14, %v4096_v31, %v4094_v55  ;;  %v4198_v8 = vand.u32 65535, %v4194_v56 }
 0x432   : > { %v4098_v37 = vclz %v4097_v34  ;;  %v4197_v3 = vshrl.u32 %v8546_v57, 16  ;;  %v4199_v46 = vshrl.u32 %v4194_v56, 16  ;;  %v4306_v61 = vshrl.u32 %v4305_v36, 23 }
 0x433   : > { %v3985_v47 = vxor.u32 2147483648, %v3979_v23  ;;  %v8560_v48 = vsel %vm4179_vm7, %v4163_v22, %v4166_v20  ;;  %v4184_v27 = vsel %vm4182_vm6, %v4172_v49, 2102212464  ;;  %v4196_v6 = vand.u32 65535, %v8546_v57 }
 0x434   : > { %v5606_v44 = vadd.s32 4294967294, %v4098_v37  ;;  %v4116_v59 = vsub.s32 4, %v8521_v53  ;;  %v4202_v24 = vmul.u32 %v4198_v8, %v4197_v3  ;;  %v4221_v13 = vshrl.u32 %v4190_v39, 16 }
 0x435   : > { %v3986_v38 = vsel %vm3984_vm8, %v3971_v33, %v3985_v47  ;;  %v3989_v32 = vsel %vm3987_vm9, %v3988_v29, %v3979_v23  ;;  %vm3994_vm15 = vcmp.lt.s32.totalorder %v8309_v51, 0  ;;  %v4201_v43 = vmul.u32 %v4199_v46, %v4196_v6 }
 0x436   : > { %v4220_v20 = vand.u32 65535, %v4190_v39  ;;  %v3990_v49 = vsel %vm3983_vm11, %v3986_v38, %v3989_v32  ;;  %vm5607_vm0 = vcmp.lt.s32.totalorder %v5606_v44, 0  ;;  %v4185_v12 = vsel %vm4181_vm10, %v4169_v25, %v4184_v27 }
 0x437   : > { %v4200_v52 = vmul.u32 %v4198_v8, %v4196_v6  ;;  %v3991_v5 = vsel %vm3980_vm12, nan, %v3990_v49  ;;  %v4101_v41 = vsel %vm5607_vm0, 0, %v5606_v44  ;;  %v4203_v16 = vmul.u32 %v4199_v46, %v4197_v3 }
 0x438   : > { %v4204_v63 = vshll.u32 %v4201_v43, 16  ;;  %v4102_v50 = vsub.s32 32, %v4101_v41  ;;  %v4106_v2 = vsub.s32 4294967266, %v4101_v41  ;;  %v4206_v11 = vshll.u32 %v4202_v24, 16  ;;  %5409 = vst [vmem:[%s6179_s20 + $0xb0] sm:$0xff] %v3991_v5 }
 0x439   : > { %v4223_v15 = vmul.u32 %v4221_v13, %v4196_v6  ;;  %v4103_v58 = vshll.u32 %v4094_v55, %v4101_v41  ;;  %v4224_v54 = vmul.u32 %v4220_v20, %v4197_v3  ;;  %v4205_v36 = vshrl.u32 %v4201_v43, 16 }
 0x43a   : > { %vm4208_vm1 = vc.u32 %v4200_v52, %v4204_v63  ;;  %v4210_v18 = vadd.s32 %v4204_v63, %v4200_v52  ;;  %v4104_v40 = vshrl.u32 %v4086_v62, %v4102_v50  ;;  %v4107_v19 = vadd.s32 127, %v4106_v2 }
 0x43b   : > { %v4209_v25 = vsel %vm4208_vm1, 1, %v5780_v0  ;;  %v4226_v28 = vshll.u32 %v4223_v15, 16  ;;  %v4222_v33 = vmul.u32 %v4220_v20, %v4196_v6  ;;  %v4225_v39 = vmul.u32 %v4221_v13, %v4197_v3 }
 0x43c   : > { %v4211_v1 = vadd.s32 %v4209_v25, %v4203_v16  ;;  %vm4212_vm2 = vc.u32 %v4210_v18, %v4206_v11  ;;  %v4105_v35 = vor.u32 %v4104_v40, %v4103_v58  ;;  %v4108_v31 = vshll.u32 %v4107_v19, 23 }
 0x43d   : > { %v4213_v22 = vsel %vm4212_vm2, 1, %v5780_v0  ;;  %v4228_v23 = vshll.u32 %v4224_v54, 16  ;;  %vm4230_vm3 = vc.u32 %v4222_v33, %v4226_v28  ;;  %v4232_v55 = vadd.s32 %v4226_v28, %v4222_v33 }
 0x43e   : > { %v4215_v56 = vadd.s32 %v4213_v22, %v4211_v1  ;;  %v4109_v29 = vor.u32 4788187, %v4108_v31  ;;  %v4117_v62 = vsel %vm3994_vm15, %v4116_v59, %v8521_v53  ;;  %v4231_v34 = vsel %vm4230_vm3, 1, %v5780_v0 }
 0x43f   : > { %v5611_v8 = vadd.s32 4294967169, %v4306_v61  ;;  %v4207_v37 = vshrl.u32 %v4202_v24, 16  ;;  %v4233_v47 = vadd.s32 %v4231_v34, %v4225_v39  ;;  %vm4234_vm4 = vc.u32 %v4232_v55, %v4228_v23  ;;  %v380_v61 = vpop.f32.mrf.mxu3 }
 0x440   : > { %v4216_v46 = vadd.s32 %v4215_v56, %v4205_v36  ;;  %v4110_v27 = vand.u32 2147483647, %v4109_v29  ;;  %v4112_v6 = vcvt.s32.f32 %v4105_v35  ;;  %v4235_v3 = vsel %vm4234_vm4, 1, %v5780_v0 }
 0x441   : > { %v4312_v44 = vadd.s32 1, %v5611_v8  ;;  %vm8587_vm5 = vcmp.le.f32.partialorder %v3992_v26, 0.7853982  ;;  %v4227_v38 = vshrl.u32 %v4223_v15, 16  ;;  %v4237_v53 = vadd.s32 %v4235_v3, %v4233_v47 }
 0x442   : > { %v4302_v59 = vand.u32 2147483647, %v8524_v45  ;;  %v4113_v24 = vmul.f32 %v4112_v6, %v4110_v27  ;;  %v4119_v32 = vsel %vm8587_vm5, 0, %v4117_v62  ;;  %v8594_v43 = vadd.s32 %v4216_v46, %v4207_v37 }
 0x443   : > { %vm4313_vm6 = vcmp.gt.s32.totalorder %v4312_v44, 0  ;;  %v4186_v20 = vsel %vm4180_vm13, %v8560_v48, %v4185_v12  ;;  %v4229_v26 = vshrl.u32 %v4224_v54, 16  ;;  %v4238_v49 = vadd.s32 %v4237_v53, %v4227_v38 }
 0x444   : > { %v4314_v52 = vsel %vm4313_vm6, %v4312_v44, 0  ;;  %v4114_v5 = vxor.u32 2147483648, %v4113_v24  ;;  %v8599_v41 = vadd.s32 %v4232_v55, %v4228_v23  ;;  %v381_v63 = vadd.f32 %v8490_v10, %v380_v61 }
 0x445   : > { %v4316_v16 = vand.u32 31, %v4314_v52  ;;  %v4136_v50 = vadd.s32 3, %v4119_v32  ;;  %v4239_v2 = vadd.s32 %v4238_v49, %v4229_v26  ;;  %v4309_v11 = vand.u32 8388607, %v4302_v59 }
 0x446   : > { %v4115_v15 = vsel %vm3994_vm15, %v4114_v5, %v4113_v24  ;;  %v4240_v42 = vmul.u32 %v8546_v57, %v4186_v20  ;;  %vm4242_vm7 = vc.u32 %v8594_v43, %v8599_v41  ;;  %v8612_v18 = vshrl.u32 %v4314_v52, 5 }
 0x447   : > { %v4317_v48 = vsub.s32 32, %v4316_v16  ;;  %v4118_v12 = vsel %vm8587_vm5, %v8309_v51, %v4115_v15  ;;  %v4243_v58 = vadd.s32 1, %v4239_v2  ;;  %v4319_v54 = vshll.u32 %v5774_v4, %v4316_v16 }
 0x448   : > { %v4120_v40 = vmul.f32 %v4118_v12, %v4118_v12  ;;  %v4322_v25 = vshll.u32 %v5775_v7, %v4316_v16  ;;  %v4328_v1 = vshll.u32 %v5777_v14, %v4316_v16  ;;  %v4325_v39 = vshll.u32 %v5776_v9, %v4316_v16 }
 0x449   : > { %v4320_v19 = vshrl.u32 %v5775_v7, %v4317_v48  ;;  %v4323_v57 = vshrl.u32 %v5776_v9, %v4317_v48  ;;  %v4244_v28 = vsel %vm4242_vm7, %v4243_v58, %v4239_v2  ;;  %v4326_v36 = vshrl.u32 %v5777_v14, %v4317_v48 }
 0x44a   : > { %v4329_v33 = vshrl.u32 %v5778_v17, %v4317_v48  ;;  %v4121_v35 = vmul.f32 -0.001358992, %v4120_v40  ;;  %v4128_v31 = vmul.f32 -0.00019511016, %v4120_v40  ;;  %v4245_v22 = vadd.s32 %v4244_v28, %v4240_v42 }
 0x44b   : > { %v4321_v56 = vor.u32 %v4320_v19, %v4319_v54  ;;  %v4331_v55 = vshll.u32 %v5778_v17, %v4316_v16  ;;  %v4332_v29 = vshrl.u32 %v5779_v21, %v4317_v48  ;;  %v8624_v37 = vor.u32 %v4323_v57, %v4322_v25 }
 0x44c   : > { %v4330_v23 = vor.u32 %v4329_v33, %v4328_v1  ;;  %v4122_v62 = vadd.f32 0.041655596, %v4121_v35  ;;  %v4129_v34 = vadd.f32 0.008332121, %v4128_v31  ;;  %v4246_v8 = vadd.s32 536870912, %v4245_v22 }
 0x44d   : > { %v4137_v46 = vand.u32 3, %v4136_v50  ;;  %v4310_v47 = vor.u32 8388608, %v4309_v11  ;;  %v4327_v27 = vor.u32 %v4326_v36, %v4325_v39  ;;  %v4333_v6 = vor.u32 %v4332_v29, %v4331_v55 }
 0x44e   : > { %v4123_v3 = vmul.f32 %v4122_v62, %v4120_v40  ;;  %v4130_v44 = vmul.f32 %v4129_v34, %v4120_v40  ;;  %v8626_v13 = vshrl.u32 %v4246_v8, 30  ;;  %vm4337_vm8 = vcmp.lt.s32.totalorder %v8612_v18, 4 }
 0x44f   : > { %v8629_v38 = vmul.f32 30.0, %v381_v63  ;;  %vm4334_vm9 = vcmp.lt.s32.totalorder %v8612_v18, 1  ;;  %vm4336_vm10 = vcmp.lt.s32.totalorder %v8612_v18, 3  ;;  %v4343_v53 = vsel %vm4337_vm8, %v4330_v23, 920167782 }
 0x450   : > { %v4124_v61 = vadd.f32 -0.4999988, %v4123_v3  ;;  %v4131_v24 = vadd.f32 -0.16666654, %v4130_v44  ;;  %v4248_v32 = vshll.u32 %v8626_v13, 30  ;;  %v4342_v20 = vsel %vm4334_vm9, %v4321_v56, %v8624_v37 }
 0x451   : > { %vm4335_vm11 = vcmp.lt.s32.totalorder %v8612_v18, 2  ;;  %v4344_v26 = vsel %vm4336_vm10, %v4327_v27, %v4343_v53  ;;  %v4347_v49 = vsel %vm4337_vm8, %v4333_v6, 1326507024  ;;  %v8644_v52 = vshll.u32 %v4310_v47, 8 }
 0x452   : > { %v4125_v5 = vmul.f32 %v4124_v61, %v4120_v40  ;;  %v4132_v16 = vmul.f32 %v4131_v24, %v4120_v40  ;;  %vm4138_vm12 = vcmp.lt.s32.totalorder %v4137_v46, 2  ;;  %v4249_v63 = vsub.s32 %v4245_v22, %v4248_v32 }
 0x453   : > { %v4346_v50 = vsel %vm4334_vm9, %v8624_v37, %v4327_v27  ;;  %vm4135_vm13 = vweird.f32 %v8309_v51  ;;  %vm4139_vm14 = vcmp.eq.s32.totalorder %v4137_v46, 0  ;;  %vm4142_vm15 = vcmp.eq.s32.totalorder %v4137_v46, 2 }
 0x454   : > { %v4345_v2 = vsel %vm4335_vm11, %v4342_v20, %v4344_v26  ;;  %v4348_v11 = vsel %vm4336_vm10, %v4330_v23, %v4347_v49  ;;  %v4126_v15 = vadd.f32 1.0, %v4125_v5  ;;  %v4133_v42 = vadd.f32 1.0, %v4132_v16 }
 0x455   : > { %vm4250_vm0 = vcmp.lt.s32.totalorder %v4249_v63, 0  ;;  %v4251_v58 = vsub.s32 0, %v4249_v63  ;;  %v4318_v54 = vshrl.u32 %v5774_v4, %v4317_v48  ;;  %v4349_v40 = vsel %vm4335_vm11, %v4346_v50, %v4348_v11 }
 0x456   : > { %v4352_v19 = vshrl.u32 %v8644_v52, 16  ;;  %v4460_v25 = vand.u32 2139095040, %v8629_v38  ;;  %v4134_v57 = vmul.f32 %v4133_v42, %v4118_v12  ;;  %v4143_v28 = vxor.u32 2147483648, %v4126_v15 }
 0x457   : > { %v4252_v36 = vsel %vm4250_vm0, %v4251_v58, %v4249_v63  ;;  %v4353_v1 = vand.u32 65535, %v4349_v40  ;;  %v4354_v35 = vshrl.u32 %v4349_v40, 16  ;;  %v4375_v31 = vand.u32 65535, %v4345_v2 }
 0x458   : > { %v4253_v33 = vclz %v4252_v36  ;;  %v4376_v22 = vshrl.u32 %v4345_v2, 16  ;;  %v4140_v39 = vxor.u32 2147483648, %v4134_v57  ;;  %v4241_v23 = vadd.s32 %v8599_v41, %v8594_v43 }
 0x459   : > { %v8663_v48 = vsel %vm4334_vm9, %v4318_v54, %v4321_v56  ;;  %v4351_v55 = vand.u32 65535, %v8644_v52  ;;  %v4271_v12 = vsub.s32 4, %v8626_v13  ;;  %v4339_v62 = vsel %vm4337_vm8, %v4327_v27, 2102212464 }
 0x45a   : > { %v5609_v29 = vadd.s32 4294967294, %v4253_v33  ;;  %v4357_v34 = vmul.u32 %v4353_v1, %v4352_v19  ;;  %v4141_v8 = vsel %vm4139_vm14, %v4126_v15, %v4140_v39  ;;  %v4144_v47 = vsel %vm4142_vm15, %v4143_v28, %v4134_v57 }
 0x45b   : > { %v4356_v6 = vmul.u32 %v4354_v35, %v4351_v55  ;;  %v4461_v43 = vshrl.u32 %v4460_v25, 23  ;;  %v4145_v41 = vsel %vm4138_vm12, %v4141_v8, %v4144_v47  ;;  %vm4149_vm1 = vcmp.lt.s32.totalorder %v8414_v60, 0 }
 0x45c   : > { %vm5610_vm2 = vcmp.lt.s32.totalorder %v5609_v29, 0  ;;  %v4377_v56 = vmul.u32 %v4375_v31, %v4351_v55  ;;  %v4378_v3 = vmul.u32 %v4376_v22, %v4351_v55  ;;  %v4146_v44 = vsel %vm4135_vm13, nan, %v4145_v41 }
 0x45d   : > { %v4256_v53 = vsel %vm5610_vm2, 0, %v5609_v29  ;;  %v4355_v27 = vmul.u32 %v4353_v1, %v4351_v55  ;;  %v4359_v61 = vshll.u32 %v4356_v6, 16  ;;  %v4358_v20 = vmul.u32 %v4354_v35, %v4352_v19  ;;  %5410 = vst [vmem:[%s6179_s20 + $0xb8] sm:$0xff] %v4146_v44 }
 0x45e   : > { %v4257_v24 = vsub.s32 32, %v4256_v53  ;;  %v4261_v32 = vsub.s32 4294967266, %v4256_v53  ;;  %v4361_v26 = vshll.u32 %v4357_v34, 16  ;;  %v4379_v46 = vmul.u32 %v4375_v31, %v4352_v19 }
 0x45f   : > { %vm4363_vm3 = vc.u32 %v4355_v27, %v4359_v61  ;;  %v4365_v49 = vadd.s32 %v4359_v61, %v4355_v27  ;;  %v4381_v5 = vshll.u32 %v4378_v3, 16  ;;  %v4258_v16 = vshll.u32 %v4249_v63, %v4256_v53 }
 0x460   : > { %v4259_v50 = vshrl.u32 %v4241_v23, %v4257_v24  ;;  %v4262_v2 = vadd.s32 127, %v4261_v32  ;;  %v4364_v11 = vsel %vm4363_vm3, 1, %v5780_v0  ;;  %v4360_v15 = vshrl.u32 %v4356_v6, 16  ;;  %v382_v6 = vpop.f32.mrf.mxu3 }
 0x461   : > { %v4366_v51 = vadd.s32 %v4364_v11, %v4358_v20  ;;  %vm4367_vm4 = vc.u32 %v4365_v49, %v4361_v26  ;;  %v4380_v42 = vmul.u32 %v4376_v22, %v4352_v19  ;;  %vm4385_vm5 = vc.u32 %v4377_v56, %v4381_v5 }
 0x462   : > { %v4260_v58 = vor.u32 %v4259_v50, %v4258_v16  ;;  %v4263_v54 = vshll.u32 %v4262_v2, 23  ;;  %v4368_v40 = vsel %vm4367_vm4, 1, %v5780_v0  ;;  %v4383_v57 = vshll.u32 %v4379_v46, 16 }
 0x463   : > { %v4370_v25 = vadd.s32 %v4368_v40, %v4366_v51  ;;  %v4386_v28 = vsel %vm4385_vm5, 1, %v5780_v0  ;;  %v4387_v36 = vadd.s32 %v4381_v5, %v4377_v56  ;;  %v4340_v63 = vsel %vm4336_vm10, %v8624_v37, %v4339_v62 }
 0x464   : > { %v4264_v1 = vor.u32 4788187, %v4263_v54  ;;  %v4388_v33 = vadd.s32 %v4386_v28, %v4380_v42  ;;  %v5614_v35 = vadd.s32 4294967169, %v4461_v43  ;;  %v4272_v19 = vsel %vm4149_vm1, %v4271_v12, %v8626_v13 }
 0x465   : > { %v4362_v31 = vshrl.u32 %v4357_v34, 16  ;;  %v4371_v22 = vadd.s32 %v4370_v25, %v4360_v15  ;;  %vm4389_vm6 = vc.u32 %v4387_v36, %v4383_v57  ;;  %v4267_v23 = vcvt.s32.f32 %v4260_v58 }
 0x466   : > { %v4265_v39 = vand.u32 2147483647, %v4264_v1  ;;  %v4390_v55 = vsel %vm4389_vm6, 1, %v5780_v0  ;;  %v4467_v29 = vadd.s32 1, %v5614_v35  ;;  %vm8688_vm7 = vcmp.le.f32.partialorder %v4147_v30, 0.7853982 }
 0x467   : > { %v4382_v37 = vshrl.u32 %v4378_v3, 16  ;;  %v4392_v62 = vadd.s32 %v4390_v55, %v4388_v33  ;;  %v4457_v47 = vand.u32 2147483647, %v8629_v38  ;;  %v4274_v12 = vsel %vm8688_vm7, 0, %v4272_v19 }
 0x468   : > { %v4268_v13 = vmul.f32 %v4267_v23, %v4265_v39  ;;  %v8695_v34 = vadd.s32 %v4371_v22, %v4362_v31  ;;  %vm4468_vm8 = vcmp.gt.s32.totalorder %v4467_v29, 0  ;;  %v4341_v43 = vsel %vm4335_vm11, %v8663_v48, %v4340_v63 }
 0x469   : > { %v4384_v30 = vshrl.u32 %v4379_v46, 16  ;;  %v4393_v41 = vadd.s32 %v4392_v62, %v4382_v37  ;;  %v4469_v56 = vsel %vm4468_vm8, %v4467_v29, 0  ;;  %v8700_v3 = vadd.s32 %v4387_v36, %v4383_v57 }
 0x46a   : > { %v4269_v44 = vxor.u32 2147483648, %v4268_v13  ;;  %v4471_v53 = vand.u32 31, %v4469_v56  ;;  %v383_v27 = vadd.f32 %v8490_v10, %v382_v6  ;;  %v4291_v61 = vadd.s32 3, %v4274_v12 }
 0x46b   : > { %v4394_v24 = vadd.s32 %v4393_v41, %v4384_v30  ;;  %v4395_v20 = vmul.u32 %v8644_v52, %v4341_v43  ;;  %vm4397_vm9 = vc.u32 %v8695_v34, %v8700_v3  ;;  %v4464_v49 = vand.u32 8388607, %v4457_v47 }
 0x46c   : > { %v4270_v32 = vsel %vm4149_vm1, %v4269_v44, %v4268_v13  ;;  %v4472_v18 = vsub.s32 32, %v4471_v53  ;;  %v8715_v46 = vshrl.u32 %v4469_v56, 5  ;;  %v4474_v52 = vshll.u32 %v5774_v4, %v4471_v53 }
 0x46d   : > { %v8711_v48 = vsel %vm8688_vm7, %v8414_v60, %v4270_v32  ;;  %v4398_v26 = vadd.s32 1, %v4394_v24  ;;  %v4483_v50 = vshll.u32 %v5777_v14, %v4471_v53  ;;  %v4477_v40 = vshll.u32 %v5775_v7, %v4471_v53 }
 0x46e   : > { %v4275_v5 = vmul.f32 %v8711_v48, %v8711_v48  ;;  %v4475_v16 = vshrl.u32 %v5775_v7, %v4472_v18  ;;  %v4478_v11 = vshrl.u32 %v5776_v9, %v4472_v18  ;;  %v4481_v15 = vshrl.u32 %v5777_v14, %v4472_v18 }
 0x46f   : > { %v4399_v2 = vsel %vm4397_vm9, %v4398_v26, %v4394_v24  ;;  %v4484_v51 = vshrl.u32 %v5778_v17, %v4472_v18  ;;  %v4480_v25 = vshll.u32 %v5776_v9, %v4471_v53  ;;  %v4486_v28 = vshll.u32 %v5778_v17, %v4471_v53 }
 0x470   : > { %v4276_v42 = vmul.f32 -0.001358992, %v4275_v5  ;;  %v4283_v58 = vmul.f32 -0.00019511016, %v4275_v5  ;;  %v4400_v54 = vadd.s32 %v4399_v2, %v4395_v20  ;;  %v4487_v36 = vshrl.u32 %v5779_v21, %v4472_v18 }
 0x471   : > { %v4485_v57 = vor.u32 %v4484_v51, %v4483_v50  ;;  %v8729_v33 = vand.u32 3, %v4291_v61  ;;  %v4476_v19 = vor.u32 %v4475_v16, %v4474_v52  ;;  %v4479_v31 = vor.u32 %v4478_v11, %v4477_v40 }
 0x472   : > { %v4277_v1 = vadd.f32 0.041655596, %v4276_v42  ;;  %v4284_v63 = vadd.f32 0.008332121, %v4283_v58  ;;  %v4401_v35 = vadd.s32 536870912, %v4400_v54  ;;  %v4482_v22 = vor.u32 %v4481_v15, %v4480_v25 }
 0x473   : > { %v4488_v39 = vor.u32 %v4487_v36, %v4486_v28  ;;  %vm4492_vm10 = vcmp.lt.s32.totalorder %v8715_v46, 4  ;;  %v8734_v8 = vmul.f32 30.0, %v383_v27  ;;  %v4465_v37 = vor.u32 8388608, %v4464_v49 }
 0x474   : > { %v4278_v23 = vmul.f32 %v4277_v1, %v4275_v5  ;;  %v4285_v55 = vmul.f32 %v4284_v63, %v4275_v5  ;;  %v8731_v29 = vshrl.u32 %v4401_v35, 30  ;;  %v4498_v62 = vsel %vm4492_vm10, %v4485_v57, 920167782 }
 0x475   : > { %vm4489_vm11 = vcmp.lt.s32.totalorder %v8715_v46, 1  ;;  %vm4294_vm12 = vcmp.eq.s32.totalorder %v8729_v33, 0  ;;  %vm4297_vm13 = vcmp.eq.s32.totalorder %v8729_v33, 2  ;;  %vm4491_vm14 = vcmp.lt.s32.totalorder %v8715_v46, 3 }
 0x476   : > { %v4279_v6 = vadd.f32 -0.4999988, %v4278_v23  ;;  %v4286_v13 = vadd.f32 -0.16666654, %v4285_v55  ;;  %v4403_v12 = vshll.u32 %v8731_v29, 30  ;;  %v4497_v43 = vsel %vm4489_vm11, %v4476_v19, %v4479_v31 }
 0x477   : > { %v4501_v30 = vsel %vm4489_vm11, %v4479_v31, %v4482_v22  ;;  %v4502_v41 = vsel %vm4492_vm10, %v4488_v39, 1326507024  ;;  %vm4293_vm15 = vcmp.lt.s32.totalorder %v8729_v33, 2  ;;  %v4499_v27 = vsel %vm4491_vm14, %v4482_v22, %v4498_v62 }
 0x478   : > { %v4280_v56 = vmul.f32 %v4279_v6, %v4275_v5  ;;  %v4287_v44 = vmul.f32 %v4286_v13, %v4275_v5  ;;  %v4404_v53 = vsub.s32 %v4400_v54, %v4403_v12  ;;  %vm4290_vm0 = vweird.f32 %v8414_v60 }
 0x479   : > { %vm4490_vm1 = vcmp.lt.s32.totalorder %v8715_v46, 2  ;;  %v4503_v61 = vsel %vm4491_vm14, %v4485_v57, %v4502_v41  ;;  %v8756_v24 = vshll.u32 %v4465_v37, 8  ;;  %v4615_v32 = vand.u32 2139095040, %v8734_v8 }
 0x47a   : > { %v4281_v20 = vadd.f32 1.0, %v4280_v56  ;;  %v4288_v26 = vadd.f32 1.0, %v4287_v44  ;;  %vm4405_vm2 = vcmp.lt.s32.totalorder %v4404_v53, 0  ;;  %v4406_v49 = vsub.s32 0, %v4404_v53 }
 0x47b   : > { %v4396_v5 = vadd.s32 %v8700_v3, %v8695_v34  ;;  %v4473_v52 = vshrl.u32 %v5774_v4, %v4472_v18  ;;  %v4500_v16 = vsel %vm4490_vm1, %v4497_v43, %v4499_v27  ;;  %v4504_v50 = vsel %vm4490_vm1, %v4501_v30, %v4503_v61 }
 0x47c   : > { %v4289_v2 = vmul.f32 %v4288_v26, %v8711_v48  ;;  %v4298_v11 = vxor.u32 2147483648, %v4281_v20  ;;  %v4407_v15 = vsel %vm4405_vm2, %v4406_v49, %v4404_v53  ;;  %v4508_v51 = vand.u32 65535, %v4504_v50 }
 0x47d   : > { %v4408_v42 = vclz %v4407_v15  ;;  %v4507_v58 = vshrl.u32 %v8756_v24, 16  ;;  %v4509_v54 = vshrl.u32 %v4504_v50, 16  ;;  %v4616_v40 = vshrl.u32 %v4615_v32, 23 }
 0x47e   : > { %v4295_v25 = vxor.u32 2147483648, %v4289_v2  ;;  %v8770_v34 = vsel %vm4489_vm11, %v4473_v52, %v4476_v19  ;;  %v4494_v3 = vsel %vm4492_vm10, %v4482_v22, 2102212464  ;;  %v4506_v18 = vand.u32 65535, %v8756_v24 }
 0x47f   : > { %v5612_v57 = vadd.s32 4294967294, %v4408_v42  ;;  %v4426_v48 = vsub.s32 4, %v8731_v29  ;;  %v4512_v28 = vmul.u32 %v4508_v51, %v4507_v58  ;;  %v4531_v36 = vshrl.u32 %v4500_v16, 16 }
 0x480   : > { %v4296_v1 = vsel %vm4294_vm12, %v4281_v20, %v4295_v25  ;;  %v4299_v63 = vsel %vm4297_vm13, %v4298_v11, %v4289_v2  ;;  %vm4304_vm3 = vcmp.lt.s32.totalorder %v8524_v45, 0  ;;  %v4511_v35 = vmul.u32 %v4509_v54, %v4506_v18 }
 0x481   : > { %v4530_v19 = vand.u32 65535, %v4500_v16  ;;  %v4300_v22 = vsel %vm4293_vm15, %v4296_v1, %v4299_v63  ;;  %vm5613_vm4 = vcmp.lt.s32.totalorder %v5612_v57, 0  ;;  %v4495_v39 = vsel %vm4491_vm14, %v4479_v31, %v4494_v3 }
 0x482   : > { %v4510_v23 = vmul.u32 %v4508_v51, %v4506_v18  ;;  %v4301_v55 = vsel %vm4290_vm0, nan, %v4300_v22  ;;  %v4411_v37 = vsel %vm5613_vm4, 0, %v5612_v57  ;;  %v4513_v62 = vmul.u32 %v4509_v54, %v4507_v58 }
 0x483   : > { %v4514_v6 = vshll.u32 %v4511_v35, 16  ;;  %v4412_v13 = vsub.s32 32, %v4411_v37  ;;  %v4416_v12 = vsub.s32 4294967266, %v4411_v37  ;;  %v4516_v43 = vshll.u32 %v4512_v28, 16  ;;  %5411 = vst [vmem:[%s6179_s20 + $0xc0] sm:$0xff] %v4301_v55 }
 0x484   : > { %v4533_v30 = vmul.u32 %v4531_v36, %v4506_v18  ;;  %v4413_v41 = vshll.u32 %v4404_v53, %v4411_v37  ;;  %v4534_v56 = vmul.u32 %v4530_v19, %v4507_v58  ;;  %v4515_v32 = vshrl.u32 %v4511_v35, 16 }
 0x485   : > { %vm4518_vm5 = vc.u32 %v4510_v23, %v4514_v6  ;;  %v4520_v33 = vadd.s32 %v4514_v6, %v4510_v23  ;;  %v4414_v44 = vshrl.u32 %v4396_v5, %v4412_v13  ;;  %v4417_v27 = vadd.s32 127, %v4416_v12 }
 0x486   : > { %v4519_v31 = vsel %vm4518_vm5, 1, %v5780_v0  ;;  %v4536_v61 = vshll.u32 %v4533_v30, 16  ;;  %v4532_v20 = vmul.u32 %v4530_v19, %v4506_v18  ;;  %v4535_v16 = vmul.u32 %v4531_v36, %v4507_v58 }
 0x487   : > { %v4521_v60 = vadd.s32 %v4519_v31, %v4513_v62  ;;  %vm4522_vm6 = vc.u32 %v4520_v33, %v4516_v43  ;;  %v4415_v26 = vor.u32 %v4414_v44, %v4413_v41  ;;  %v4418_v49 = vshll.u32 %v4417_v27, 23 }
 0x488   : > { %v4523_v52 = vsel %vm4522_vm6, 1, %v5780_v0  ;;  %v4538_v2 = vshll.u32 %v4534_v56, 16  ;;  %vm4540_vm7 = vc.u32 %v4532_v20, %v4536_v61  ;;  %v4542_v53 = vadd.s32 %v4536_v61, %v4532_v20 }
 0x489   : > { %v4525_v50 = vadd.s32 %v4523_v52, %v4521_v60  ;;  %v4419_v11 = vor.u32 4788187, %v4418_v49  ;;  %v4427_v5 = vsel %vm4304_vm3, %v4426_v48, %v8731_v29  ;;  %v4541_v15 = vsel %vm4540_vm7, 1, %v5780_v0 }
 0x48a   : > { %v5617_v51 = vadd.s32 4294967169, %v4616_v40  ;;  %v4517_v42 = vshrl.u32 %v4512_v28, 16  ;;  %v4543_v25 = vadd.s32 %v4541_v15, %v4535_v16  ;;  %vm4544_vm8 = vc.u32 %v4542_v53, %v4538_v2  ;;  %v385_v40 = vpop.f32.mrf.mxu3 }
 0x48b   : > { %v4526_v54 = vadd.s32 %v4525_v50, %v4515_v32  ;;  %v4420_v3 = vand.u32 2147483647, %v4419_v11  ;;  %v4422_v18 = vcvt.s32.f32 %v4415_v26  ;;  %v4545_v58 = vsel %vm4544_vm8, 1, %v5780_v0 }
 0x48c   : > { %v4622_v57 = vadd.s32 1, %v5617_v51  ;;  %vm8797_vm9 = vcmp.le.f32.partialorder %v4302_v59, 0.7853982  ;;  %v4537_v1 = vshrl.u32 %v4533_v30, 16  ;;  %v4547_v29 = vadd.s32 %v4545_v58, %v4543_v25 }
 0x48d   : > { %v4612_v48 = vand.u32 2147483647, %v8734_v8  ;;  %v4423_v28 = vmul.f32 %v4422_v18, %v4420_v3  ;;  %v4429_v63 = vsel %vm8797_vm9, 0, %v4427_v5  ;;  %v8804_v35 = vadd.s32 %v4526_v54, %v4517_v42 }
 0x48e   : > { %vm4623_vm10 = vcmp.gt.s32.totalorder %v4622_v57, 0  ;;  %v4496_v19 = vsel %vm4490_vm1, %v8770_v34, %v4495_v39  ;;  %v4539_v59 = vshrl.u32 %v4534_v56, 16  ;;  %v4548_v22 = vadd.s32 %v4547_v29, %v4537_v1 }
 0x48f   : > { %v4624_v23 = vsel %vm4623_vm10, %v4622_v57, 0  ;;  %v4424_v55 = vxor.u32 2147483648, %v4423_v28  ;;  %v8809_v37 = vadd.s32 %v4542_v53, %v4538_v2  ;;  %v386_v6 = vadd.f32 %v8490_v10, %v385_v40 }
 0x490   : > { %v4626_v62 = vand.u32 31, %v4624_v23  ;;  %v4446_v13 = vadd.s32 3, %v4429_v63  ;;  %v4549_v12 = vadd.s32 %v4548_v22, %v4539_v59  ;;  %v4619_v43 = vand.u32 8388607, %v4612_v48 }
 0x491   : > { %v4425_v30 = vsel %vm4304_vm3, %v4424_v55, %v4423_v28  ;;  %v4550_v46 = vmul.u32 %v8756_v24, %v4496_v19  ;;  %vm4552_vm11 = vc.u32 %v8804_v35, %v8809_v37  ;;  %v8822_v10 = vshrl.u32 %v4624_v23, 5 }
 0x492   : > { %v4627_v34 = vsub.s32 32, %v4626_v62  ;;  %v4428_v39 = vsel %vm8797_vm9, %v8524_v45, %v4425_v30  ;;  %v4553_v41 = vadd.s32 1, %v4549_v12  ;;  %v4629_v33 = vshll.u32 %v5774_v4, %v4626_v62 }
 0x493   : > { %v4430_v56 = vmul.f32 %v4428_v39, %v4428_v39  ;;  %v4632_v27 = vshll.u32 %v5775_v7, %v4626_v62  ;;  %v4638_v32 = vshll.u32 %v5777_v14, %v4626_v62  ;;  %v4635_v52 = vshll.u32 %v5776_v9, %v4626_v62 }
 0x494   : > { %v4630_v44 = vshrl.u32 %v5775_v7, %v4627_v34  ;;  %v4633_v24 = vshrl.u32 %v5776_v9, %v4627_v34  ;;  %v4554_v31 = vsel %vm4552_vm11, %v4553_v41, %v4549_v12  ;;  %v4636_v61 = vshrl.u32 %v5777_v14, %v4627_v34 }
 0x495   : > { %v4639_v60 = vshrl.u32 %v5778_v17, %v4627_v34  ;;  %v4431_v20 = vmul.f32 -0.001358992, %v4430_v56  ;;  %v4438_v26 = vmul.f32 -0.00019511016, %v4430_v56  ;;  %v4555_v49 = vadd.s32 %v4554_v31, %v4550_v46 }
 0x496   : > { %v4631_v16 = vor.u32 %v4630_v44, %v4629_v33  ;;  %v4641_v2 = vshll.u32 %v5778_v17, %v4626_v62  ;;  %v4642_v53 = vshrl.u32 %v5779_v21, %v4627_v34  ;;  %v8834_v51 = vor.u32 %v4633_v24, %v4632_v27 }
 0x497   : > { %v4640_v50 = vor.u32 %v4639_v60, %v4638_v32  ;;  %v4432_v11 = vadd.f32 0.041655596, %v4431_v20  ;;  %v4439_v5 = vadd.f32 0.008332121, %v4438_v26  ;;  %v4556_v15 = vadd.s32 536870912, %v4555_v49 }
 0x498   : > { %v4447_v42 = vand.u32 3, %v4446_v13  ;;  %v4620_v54 = vor.u32 8388608, %v4619_v43  ;;  %v4637_v25 = vor.u32 %v4636_v61, %v4635_v52  ;;  %v4643_v3 = vor.u32 %v4642_v53, %v4641_v2 }
 0x499   : > { %v4433_v18 = vmul.f32 %v4432_v11, %v4430_v56  ;;  %v4440_v58 = vmul.f32 %v4439_v5, %v4430_v56  ;;  %v8836_v57 = vshrl.u32 %v4556_v15, 30  ;;  %vm4647_vm12 = vcmp.lt.s32.totalorder %v8822_v10, 4 }
 0x49a   : > { %v8839_v36 = vmul.f32 30.0, %v386_v6  ;;  %vm4644_vm13 = vcmp.lt.s32.totalorder %v8822_v10, 1  ;;  %vm4646_vm14 = vcmp.lt.s32.totalorder %v8822_v10, 3  ;;  %v4653_v1 = vsel %vm4647_vm12, %v4640_v50, 920167782 }
 0x49b   : > { %v4434_v29 = vadd.f32 -0.4999988, %v4433_v18  ;;  %v4441_v40 = vadd.f32 -0.16666654, %v4440_v58  ;;  %v4558_v28 = vshll.u32 %v8836_v57, 30  ;;  %v4652_v63 = vsel %vm4644_vm13, %v4631_v16, %v8834_v51 }
 0x49c   : > { %vm4645_vm15 = vcmp.lt.s32.totalorder %v8822_v10, 2  ;;  %v4654_v19 = vsel %vm4646_vm14, %v4637_v25, %v4653_v1  ;;  %v4657_v59 = vsel %vm4647_vm12, %v4643_v3, 1326507024  ;;  %v8854_v22 = vshll.u32 %v4620_v54, 8 }
 0x49d   : > { %v4435_v23 = vmul.f32 %v4434_v29, %v4430_v56  ;;  %v4442_v55 = vmul.f32 %v4441_v40, %v4430_v56  ;;  %vm4448_vm0 = vcmp.lt.s32.totalorder %v4447_v42, 2  ;;  %v4559_v62 = vsub.s32 %v4555_v49, %v4558_v28 }
 0x49e   : > { %v4656_v6 = vsel %vm4644_vm13, %v8834_v51, %v4637_v25  ;;  %vm4445_vm1 = vweird.f32 %v8524_v45  ;;  %vm4449_vm2 = vcmp.eq.s32.totalorder %v4447_v42, 0  ;;  %vm4452_vm3 = vcmp.eq.s32.totalorder %v4447_v42, 2 }
 0x49f   : > { %v4655_v13 = vsel %vm4645_vm15, %v4652_v63, %v4654_v19  ;;  %v4658_v12 = vsel %vm4646_vm14, %v4640_v50, %v4657_v59  ;;  %v4436_v43 = vadd.f32 1.0, %v4435_v23  ;;  %v4443_v30 = vadd.f32 1.0, %v4442_v55 }
 0x4a0   : > { %vm4560_vm4 = vcmp.lt.s32.totalorder %v4559_v62, 0  ;;  %v4561_v46 = vsub.s32 0, %v4559_v62  ;;  %v4628_v41 = vshrl.u32 %v5774_v4, %v4627_v34  ;;  %v4659_v33 = vsel %vm4645_vm15, %v4656_v6, %v4658_v12 }
 0x4a1   : > { %v4662_v56 = vshrl.u32 %v8854_v22, 16  ;;  %v4770_v44 = vand.u32 2139095040, %v8839_v36  ;;  %v4444_v27 = vmul.f32 %v4443_v30, %v4428_v39  ;;  %v4453_v24 = vxor.u32 2147483648, %v4436_v43 }
 0x4a2   : > { %v4562_v31 = vsel %vm4560_vm4, %v4561_v46, %v4559_v62  ;;  %v4663_v61 = vand.u32 65535, %v4659_v33  ;;  %v4664_v60 = vshrl.u32 %v4659_v33, 16  ;;  %v4685_v20 = vand.u32 65535, %v4655_v13 }
 0x4a3   : > { %v4563_v32 = vclz %v4562_v31  ;;  %v4686_v26 = vshrl.u32 %v4655_v13, 16  ;;  %v4450_v49 = vxor.u32 2147483648, %v4444_v27  ;;  %v4551_v52 = vadd.s32 %v8809_v37, %v8804_v35 }
 0x4a4   : > { %v8873_v34 = vsel %vm4644_vm13, %v4628_v41, %v4631_v16  ;;  %v4661_v50 = vand.u32 65535, %v8854_v22  ;;  %v4581_v39 = vsub.s32 4, %v8836_v57  ;;  %v4649_v53 = vsel %vm4647_vm12, %v4637_v25, 2102212464 }
 0x4a5   : > { %v5615_v2 = vadd.s32 4294967294, %v4563_v32  ;;  %v4667_v11 = vmul.u32 %v4663_v61, %v4662_v56  ;;  %v4451_v5 = vsel %vm4449_vm2, %v4436_v43, %v4450_v49  ;;  %v4454_v15 = vsel %vm4452_vm3, %v4453_v24, %v4444_v27 }
 0x4a6   : > { %v4666_v54 = vmul.u32 %v4664_v60, %v4661_v50  ;;  %v4771_v35 = vshrl.u32 %v4770_v44, 23  ;;  %v4455_v37 = vsel %vm4448_vm0, %v4451_v5, %v4454_v15  ;;  %vm4459_vm5 = vcmp.lt.s32.totalorder %v8629_v38, 0  ;;  %v387_v15 = vpop.f32.mrf.mxu3 }
 0x4a7   : > { %vm5616_vm6 = vcmp.lt.s32.totalorder %v5615_v2, 0  ;;  %v4687_v16 = vmul.u32 %v4685_v20, %v4661_v50  ;;  %v4688_v3 = vmul.u32 %v4686_v26, %v4661_v50  ;;  %v4456_v18 = vsel %vm4445_vm1, nan, %v4455_v37 }
 0x4a8   : > { %v4566_v58 = vsel %vm5616_vm6, 0, %v5615_v2  ;;  %v4665_v25 = vmul.u32 %v4663_v61, %v4661_v50  ;;  %v4669_v1 = vshll.u32 %v4666_v54, 16  ;;  %v4668_v28 = vmul.u32 %v4664_v60, %v4662_v56  ;;  %5412 = vst [vmem:[%s6179_s20 + $0xc8] sm:$0xff] %v4456_v18 }
 0x4a9   : > { %v4567_v29 = vsub.s32 32, %v4566_v58  ;;  %v4571_v40 = vsub.s32 4294967266, %v4566_v58  ;;  %v4671_v63 = vshll.u32 %v4667_v11, 16  ;;  %v4689_v42 = vmul.u32 %v4685_v20, %v4662_v56 }
 0x4aa   : > { %vm4673_vm7 = vc.u32 %v4665_v25, %v4669_v1  ;;  %v4675_v19 = vadd.s32 %v4669_v1, %v4665_v25  ;;  %v4691_v59 = vshll.u32 %v4688_v3, 16  ;;  %v4568_v23 = vshll.u32 %v4559_v62, %v4566_v58  ;;  %v8915_v58 = vld [vmem:[%s9382_s2] ss:$0 sm:$0xff] }
 0x4ab   : > { %v4569_v55 = vshrl.u32 %v4551_v52, %v4567_v29  ;;  %v4572_v6 = vadd.s32 127, %v4571_v40  ;;  %v4674_v13 = vsel %vm4673_vm7, 1, %v5780_v0  ;;  %v4670_v12 = vshrl.u32 %v4666_v54, 16 }
 0x4ac   : > { %v4676_v45 = vadd.s32 %v4674_v13, %v4668_v28  ;;  %vm4677_vm8 = vc.u32 %v4675_v19, %v4671_v63  ;;  %v4690_v43 = vmul.u32 %v4686_v26, %v4662_v56  ;;  %vm4695_vm9 = vc.u32 %v4687_v16, %v4691_v59 }
 0x4ad   : > { %v4570_v30 = vor.u32 %v4569_v55, %v4568_v23  ;;  %v4573_v46 = vshll.u32 %v4572_v6, 23  ;;  %v4678_v41 = vsel %vm4677_vm8, 1, %v5780_v0  ;;  %v4693_v44 = vshll.u32 %v4689_v42, 16 }
 0x4ae   : > { %v4680_v33 = vadd.s32 %v4678_v41, %v4676_v45  ;;  %v4696_v27 = vsel %vm4695_vm9, 1, %v5780_v0  ;;  %v4697_v24 = vadd.s32 %v4691_v59, %v4687_v16  ;;  %v4650_v62 = vsel %vm4646_vm14, %v8834_v51, %v4649_v53 }
 0x4af   : > { %v4574_v31 = vor.u32 4788187, %v4573_v46  ;;  %v4698_v61 = vadd.s32 %v4696_v27, %v4690_v43  ;;  %v5620_v32 = vadd.s32 4294967169, %v4771_v35  ;;  %v4582_v56 = vsel %vm4459_vm5, %v4581_v39, %v8836_v57 }
 0x4b0   : > { %v4672_v60 = vshrl.u32 %v4667_v11, 16  ;;  %v4681_v20 = vadd.s32 %v4680_v33, %v4670_v12  ;;  %vm4699_vm10 = vc.u32 %v4697_v24, %v4693_v44  ;;  %v4577_v49 = vcvt.s32.f32 %v4570_v30 }
 0x4b1   : > { %v4575_v26 = vand.u32 2147483647, %v4574_v31  ;;  %v4700_v52 = vsel %vm4699_vm10, 1, %v5780_v0  ;;  %v4777_v50 = vadd.s32 1, %v5620_v32  ;;  %vm8898_vm11 = vcmp.le.f32.partialorder %v4457_v47, 0.7853982 }
 0x4b2   : > { %v4692_v51 = vshrl.u32 %v4688_v3, 16  ;;  %v4702_v53 = vadd.s32 %v4700_v52, %v4698_v61  ;;  %v4767_v5 = vand.u32 2147483647, %v8839_v36  ;;  %v4584_v39 = vsel %vm8898_vm11, 0, %v4582_v56 }
 0x4b3   : > { %v4578_v57 = vmul.f32 %v4577_v49, %v4575_v26  ;;  %v8905_v11 = vadd.s32 %v4681_v20, %v4672_v60  ;;  %vm4778_vm12 = vcmp.gt.s32.totalorder %v4777_v50, 0  ;;  %v4651_v54 = vsel %vm4645_vm15, %v8873_v34, %v4650_v62 }
 0x4b4   : > { %v4694_v47 = vshrl.u32 %v4689_v42, 16  ;;  %v4703_v35 = vadd.s32 %v4702_v53, %v4692_v51  ;;  %v4779_v37 = vsel %vm4778_vm12, %v4777_v50, 0  ;;  %v8910_v3 = vadd.s32 %v4697_v24, %v4693_v44 }
 0x4b5   : > { %v4579_v16 = vxor.u32 2147483648, %v4578_v57  ;;  %v4781_v18 = vand.u32 31, %v4779_v37  ;;  %v388_v25 = vadd.f32 %v8915_v58, %v387_v15  ;;  %v4601_v1 = vadd.s32 3, %v4584_v39 }
 0x4b6   : > { %v4704_v29 = vadd.s32 %v4703_v35, %v4694_v47  ;;  %v4705_v34 = vmul.u32 %v8854_v22, %v4651_v54  ;;  %vm4707_vm13 = vc.u32 %v8905_v11, %v8910_v3  ;;  %v4774_v19 = vand.u32 8388607, %v4767_v5 }
 0x4b7   : > { %v4580_v10 = vsel %vm4459_vm5, %v4579_v16, %v4578_v57  ;;  %v4782_v40 = vsub.s32 32, %v4781_v18  ;;  %v8930_v42 = vshrl.u32 %v4779_v37, 5  ;;  %v4784_v22 = vshll.u32 %v5774_v4, %v4781_v18 }
 0x4b8   : > { %v8926_v28 = vsel %vm8898_vm11, %v8629_v38, %v4580_v10  ;;  %v4708_v63 = vadd.s32 1, %v4704_v29  ;;  %v4793_v55 = vshll.u32 %v5777_v14, %v4781_v18  ;;  %v4787_v41 = vshll.u32 %v5775_v7, %v4781_v18 }
 0x4b9   : > { %v4585_v59 = vmul.f32 %v8926_v28, %v8926_v28  ;;  %v4785_v23 = vshrl.u32 %v5775_v7, %v4782_v40  ;;  %v4788_v13 = vshrl.u32 %v5776_v9, %v4782_v40  ;;  %v4791_v12 = vshrl.u32 %v5777_v14, %v4782_v40 }
 0x4ba   : > { %v4709_v6 = vsel %vm4707_vm13, %v4708_v63, %v4704_v29  ;;  %v4794_v45 = vshrl.u32 %v5778_v17, %v4782_v40  ;;  %v4790_v33 = vshll.u32 %v5776_v9, %v4781_v18  ;;  %v4796_v27 = vshll.u32 %v5778_v17, %v4781_v18 }
 0x4bb   : > { %v4586_v43 = vmul.f32 -0.001358992, %v4585_v59  ;;  %v4593_v30 = vmul.f32 -0.00019511016, %v4585_v59  ;;  %v4710_v46 = vadd.s32 %v4709_v6, %v4705_v34  ;;  %v4797_v24 = vshrl.u32 %v5779_v21, %v4782_v40 }
 0x4bc   : > { %v4795_v44 = vor.u32 %v4794_v45, %v4793_v55  ;;  %v8944_v61 = vand.u32 3, %v4601_v1  ;;  %v4786_v56 = vor.u32 %v4785_v23, %v4784_v22  ;;  %v4789_v60 = vor.u32 %v4788_v13, %v4787_v41 }
 0x4bd   : > { %v4587_v31 = vadd.f32 0.041655596, %v4586_v43  ;;  %v4594_v62 = vadd.f32 0.008332121, %v4593_v30  ;;  %v4711_v32 = vadd.s32 536870912, %v4710_v46  ;;  %v4792_v20 = vor.u32 %v4791_v12, %v4790_v33 }
 0x4be   : > { %v4798_v26 = vor.u32 %v4797_v24, %v4796_v27  ;;  %vm4802_vm14 = vcmp.lt.s32.totalorder %v8930_v42, 4  ;;  %v8949_v2 = vmul.f32 30.0, %v388_v25  ;;  %v4775_v51 = vor.u32 8388608, %v4774_v19 }
 0x4bf   : > { %v4588_v49 = vmul.f32 %v4587_v31, %v4585_v59  ;;  %v4595_v52 = vmul.f32 %v4594_v62, %v4585_v59  ;;  %v8946_v50 = vshrl.u32 %v4711_v32, 30  ;;  %v4808_v53 = vsel %vm4802_vm14, %v4795_v44, 920167782 }
 0x4c0   : > { %vm4799_vm15 = vcmp.lt.s32.totalorder %v8930_v42, 1  ;;  %vm4604_vm0 = vcmp.eq.s32.totalorder %v8944_v61, 0  ;;  %vm4607_vm1 = vcmp.eq.s32.totalorder %v8944_v61, 2  ;;  %vm4801_vm2 = vcmp.lt.s32.totalorder %v8930_v42, 3 }
 0x4c1   : > { %v4589_v15 = vadd.f32 -0.4999988, %v4588_v49  ;;  %v4596_v57 = vadd.f32 -0.16666654, %v4595_v52  ;;  %v4713_v39 = vshll.u32 %v8946_v50, 30  ;;  %v4807_v54 = vsel %vm4799_vm15, %v4786_v56, %v4789_v60 }
 0x4c2   : > { %v4811_v47 = vsel %vm4799_vm15, %v4789_v60, %v4792_v20  ;;  %v4812_v35 = vsel %vm4802_vm14, %v4798_v26, 1326507024  ;;  %vm4603_vm3 = vcmp.lt.s32.totalorder %v8944_v61, 2  ;;  %v4809_v25 = vsel %vm4801_vm2, %v4792_v20, %v4808_v53 }
 0x4c3   : > { %v4590_v37 = vmul.f32 %v4589_v15, %v4585_v59  ;;  %v4597_v16 = vmul.f32 %v4596_v57, %v4585_v59  ;;  %v4714_v18 = vsub.s32 %v4710_v46, %v4713_v39  ;;  %vm4600_vm4 = vweird.f32 %v8629_v38 }
 0x4c4   : > { %vm4800_vm5 = vcmp.lt.s32.totalorder %v8930_v42, 2  ;;  %v4813_v1 = vsel %vm4801_vm2, %v4795_v44, %v4812_v35  ;;  %v8971_v29 = vshll.u32 %v4775_v51, 8  ;;  %v4925_v10 = vand.u32 2139095040, %v8949_v2 }
 0x4c5   : > { %v4591_v34 = vadd.f32 1.0, %v4590_v37  ;;  %v4598_v63 = vadd.f32 1.0, %v4597_v16  ;;  %vm4715_vm6 = vcmp.lt.s32.totalorder %v4714_v18, 0  ;;  %v4716_v19 = vsub.s32 0, %v4714_v18 }
 0x4c6   : > { %v4706_v59 = vadd.s32 %v8910_v3, %v8905_v11  ;;  %v4783_v22 = vshrl.u32 %v5774_v4, %v4782_v40  ;;  %v4810_v23 = vsel %vm4800_vm5, %v4807_v54, %v4809_v25  ;;  %v4814_v55 = vsel %vm4800_vm5, %v4811_v47, %v4813_v1 }
 0x4c7   : > { %v4599_v6 = vmul.f32 %v4598_v63, %v8926_v28  ;;  %v4608_v13 = vxor.u32 2147483648, %v4591_v34  ;;  %v4717_v12 = vsel %vm4715_vm6, %v4716_v19, %v4714_v18  ;;  %v4818_v45 = vand.u32 65535, %v4814_v55 }
 0x4c8   : > { %v4718_v43 = vclz %v4717_v12  ;;  %v4817_v30 = vshrl.u32 %v8971_v29, 16  ;;  %v4819_v46 = vshrl.u32 %v4814_v55, 16  ;;  %v4926_v41 = vshrl.u32 %v4925_v10, 23 }
 0x4c9   : > { %v4605_v33 = vxor.u32 2147483648, %v4599_v6  ;;  %v8985_v11 = vsel %vm4799_vm15, %v4783_v22, %v4786_v56  ;;  %v4804_v3 = vsel %vm4802_vm14, %v4792_v20, 2102212464  ;;  %v4816_v40 = vand.u32 65535, %v8971_v29 }
 0x4ca   : > { %v5618_v44 = vadd.s32 4294967294, %v4718_v43  ;;  %v4736_v28 = vsub.s32 4, %v8946_v50  ;;  %v4822_v27 = vmul.u32 %v4818_v45, %v4817_v30  ;;  %v4841_v24 = vshrl.u32 %v4810_v23, 16 }
 0x4cb   : > { %v4606_v31 = vsel %vm4604_vm0, %v4591_v34, %v4605_v33  ;;  %v4609_v62 = vsel %vm4607_vm1, %v4608_v13, %v4599_v6  ;;  %vm4614_vm7 = vcmp.lt.s32.totalorder %v8734_v8, 0  ;;  %v4821_v32 = vmul.u32 %v4819_v46, %v4816_v40 }
 0x4cc   : > { %v4840_v56 = vand.u32 65535, %v4810_v23  ;;  %v4610_v20 = vsel %vm4603_vm3, %v4606_v31, %v4609_v62  ;;  %vm5619_vm8 = vcmp.lt.s32.totalorder %v5618_v44, 0  ;;  %v4805_v26 = vsel %vm4801_vm2, %v4789_v60, %v4804_v3 }
 0x4cd   : > { %v4820_v49 = vmul.u32 %v4818_v45, %v4816_v40  ;;  %v4611_v52 = vsel %vm4600_vm4, nan, %v4610_v20  ;;  %v4721_v51 = vsel %vm5619_vm8, 0, %v5618_v44  ;;  %v4823_v53 = vmul.u32 %v4819_v46, %v4817_v30 }
 0x4ce   : > { %v4824_v15 = vshll.u32 %v4821_v32, 16  ;;  %v4722_v57 = vsub.s32 32, %v4721_v51  ;;  %v4726_v39 = vsub.s32 4294967266, %v4721_v51  ;;  %v4826_v54 = vshll.u32 %v4822_v27, 16  ;;  %5413 = vst [vmem:[%s6179_s20 + $0xd0] sm:$0xff] %v4611_v52 }
 0x4cf   : > { %v4843_v47 = vmul.u32 %v4841_v24, %v4816_v40  ;;  %v4723_v35 = vshll.u32 %v4714_v18, %v4721_v51  ;;  %v4844_v37 = vmul.u32 %v4840_v56, %v4817_v30  ;;  %v4825_v10 = vshrl.u32 %v4821_v32, 16 }
 0x4d0   : > { %vm4828_vm9 = vc.u32 %v4820_v49, %v4824_v15  ;;  %v4830_v61 = vadd.s32 %v4824_v15, %v4820_v49  ;;  %v4724_v16 = vshrl.u32 %v4706_v59, %v4722_v57  ;;  %v4727_v25 = vadd.s32 127, %v4726_v39 }
 0x4d1   : > { %v4829_v60 = vsel %vm4828_vm9, 1, %v5780_v0  ;;  %v4846_v1 = vshll.u32 %v4843_v47, 16  ;;  %v4842_v34 = vmul.u32 %v4840_v56, %v4816_v40  ;;  %v4845_v23 = vmul.u32 %v4841_v24, %v4817_v30 }
 0x4d2   : > { %v4831_v38 = vadd.s32 %v4829_v60, %v4823_v53  ;;  %vm4832_vm10 = vc.u32 %v4830_v61, %v4826_v54  ;;  %v4725_v63 = vor.u32 %v4724_v16, %v4723_v35  ;;  %v4728_v19 = vshll.u32 %v4727_v25, 23 }
 0x4d3   : > { %v4833_v22 = vsel %vm4832_vm10, 1, %v5780_v0  ;;  %v4848_v6 = vshll.u32 %v4844_v37, 16  ;;  %vm4850_vm11 = vc.u32 %v4842_v34, %v4846_v1  ;;  %v4852_v18 = vadd.s32 %v4846_v1, %v4842_v34 }
 0x4d4   : > { %v4835_v55 = vadd.s32 %v4833_v22, %v4831_v38  ;;  %v4729_v13 = vor.u32 4788187, %v4728_v19  ;;  %v4737_v59 = vsel %vm4614_vm7, %v4736_v28, %v8946_v50  ;;  %v4851_v12 = vsel %vm4850_vm11, 1, %v5780_v0 }
 0x4d5   : > { %v5623_v45 = vadd.s32 4294967169, %v4926_v41  ;;  %v4827_v43 = vshrl.u32 %v4822_v27, 16  ;;  %v4853_v33 = vadd.s32 %v4851_v12, %v4845_v23  ;;  %vm4854_vm12 = vc.u32 %v4852_v18, %v4848_v6  ;;  %v390_v41 = vpop.f32.mrf.mxu3 }
 0x4d6   : > { %v4836_v46 = vadd.s32 %v4835_v55, %v4825_v10  ;;  %v4730_v3 = vand.u32 2147483647, %v4729_v13  ;;  %v4732_v40 = vcvt.s32.f32 %v4725_v63  ;;  %v4855_v30 = vsel %vm4854_vm12, 1, %v5780_v0 }
 0x4d7   : > { %v4932_v44 = vadd.s32 1, %v5623_v45  ;;  %vm9012_vm13 = vcmp.le.f32.partialorder %v4612_v48, 0.7853982  ;;  %v4847_v31 = vshrl.u32 %v4843_v47, 16  ;;  %v4857_v50 = vadd.s32 %v4855_v30, %v4853_v33 }
 0x4d8   : > { %v4922_v28 = vand.u32 2147483647, %v8949_v2  ;;  %v4733_v27 = vmul.f32 %v4732_v40, %v4730_v3  ;;  %v4739_v62 = vsel %vm9012_vm13, 0, %v4737_v59  ;;  %v9019_v32 = vadd.s32 %v4836_v46, %v4827_v43 }
 0x4d9   : > { %vm4933_vm14 = vcmp.gt.s32.totalorder %v4932_v44, 0  ;;  %v4806_v56 = vsel %vm4800_vm5, %v8985_v11, %v4805_v26  ;;  %v4849_v48 = vshrl.u32 %v4844_v37, 16  ;;  %v4858_v20 = vadd.s32 %v4857_v50, %v4847_v31 }
 0x4da   : > { %v4934_v49 = vsel %vm4933_vm14, %v4932_v44, 0  ;;  %v4734_v52 = vxor.u32 2147483648, %v4733_v27  ;;  %v9024_v51 = vadd.s32 %v4852_v18, %v4848_v6  ;;  %v391_v15 = vadd.f32 %v8915_v58, %v390_v41 }
 0x4db   : > { %v4936_v53 = vand.u32 31, %v4934_v49  ;;  %v4756_v57 = vadd.s32 3, %v4739_v62  ;;  %v4859_v39 = vadd.s32 %v4858_v20, %v4849_v48  ;;  %v4929_v54 = vand.u32 8388607, %v4922_v28 }
 0x4dc   : > { %v4735_v47 = vsel %vm4614_vm7, %v4734_v52, %v4733_v27  ;;  %v4860_v42 = vmul.u32 %v8971_v29, %v4806_v56  ;;  %vm4862_vm15 = vc.u32 %v9019_v32, %v9024_v51  ;;  %v9037_v61 = vshrl.u32 %v4934_v49, 5 }
 0x4dd   : > { %v4937_v11 = vsub.s32 32, %v4936_v53  ;;  %v4738_v26 = vsel %vm9012_vm13, %v8734_v8, %v4735_v47  ;;  %v4863_v35 = vadd.s32 1, %v4859_v39  ;;  %v4939_v37 = vshll.u32 %v5774_v4, %v4936_v53 }
 0x4de   : > { %v4740_v16 = vmul.f32 %v4738_v26, %v4738_v26  ;;  %v4942_v60 = vshll.u32 %v5775_v7, %v4936_v53  ;;  %v4948_v38 = vshll.u32 %v5777_v14, %v4936_v53  ;;  %v4945_v23 = vshll.u32 %v5776_v9, %v4936_v53 }
 0x4df   : > { %v4940_v25 = vshrl.u32 %v5775_v7, %v4937_v11  ;;  %v4943_v29 = vshrl.u32 %v5776_v9, %v4937_v11  ;;  %v4864_v1 = vsel %vm4862_vm15, %v4863_v35, %v4859_v39  ;;  %v4946_v10 = vshrl.u32 %v5777_v14, %v4937_v11 }
 0x4e0   : > { %v4949_v34 = vshrl.u32 %v5778_v17, %v4937_v11  ;;  %v4741_v63 = vmul.f32 -0.001358992, %v4740_v16  ;;  %v4748_v19 = vmul.f32 -0.00019511016, %v4740_v16  ;;  %v4865_v22 = vadd.s32 %v4864_v1, %v4860_v42 }
 0x4e1   : > { %v4941_v55 = vor.u32 %v4940_v25, %v4939_v37  ;;  %v4951_v18 = vshll.u32 %v5778_v17, %v4936_v53  ;;  %v4952_v13 = vshrl.u32 %v5779_v21, %v4937_v11  ;;  %v9049_v43 = vor.u32 %v4943_v29, %v4942_v60 }
 0x4e2   : > { %v4950_v6 = vor.u32 %v4949_v34, %v4948_v38  ;;  %v4742_v59 = vadd.f32 0.041655596, %v4741_v63  ;;  %v4749_v12 = vadd.f32 0.008332121, %v4748_v19  ;;  %v4866_v45 = vadd.s32 536870912, %v4865_v22 }
 0x4e3   : > { %v4757_v46 = vand.u32 3, %v4756_v57  ;;  %v4930_v33 = vor.u32 8388608, %v4929_v54  ;;  %v4947_v3 = vor.u32 %v4946_v10, %v4945_v23  ;;  %v4953_v40 = vor.u32 %v4952_v13, %v4951_v18 }
 0x4e4   : > { %v4743_v30 = vmul.f32 %v4742_v59, %v4740_v16  ;;  %v4750_v44 = vmul.f32 %v4749_v12, %v4740_v16  ;;  %v9051_v24 = vshrl.u32 %v4866_v45, 30  ;;  %vm4957_vm0 = vcmp.lt.s32.totalorder %v9037_v61, 4 }
 0x4e5   : > { %v9054_v31 = vmul.f32 30.0, %v391_v15  ;;  %vm4954_vm1 = vcmp.lt.s32.totalorder %v9037_v61, 1  ;;  %vm4956_vm2 = vcmp.lt.s32.totalorder %v9037_v61, 3  ;;  %v4963_v50 = vsel %vm4957_vm0, %v4950_v6, 920167782 }
 0x4e6   : > { %v4744_v41 = vadd.f32 -0.4999988, %v4743_v30  ;;  %v4751_v27 = vadd.f32 -0.16666654, %v4750_v44  ;;  %v4868_v62 = vshll.u32 %v9051_v24, 30  ;;  %v4962_v56 = vsel %vm4954_vm1, %v4941_v55, %v9049_v43 }
 0x4e7   : > { %vm4955_vm3 = vcmp.lt.s32.totalorder %v9037_v61, 2  ;;  %v4964_v48 = vsel %vm4956_vm2, %v4947_v3, %v4963_v50  ;;  %v4967_v20 = vsel %vm4957_vm0, %v4953_v40, 1326507024  ;;  %v9069_v49 = vshll.u32 %v4930_v33, 8 }
 0x4e8   : > { %v4745_v52 = vmul.f32 %v4744_v41, %v4740_v16  ;;  %v4752_v53 = vmul.f32 %v4751_v27, %v4740_v16  ;;  %vm4758_vm4 = vcmp.lt.s32.totalorder %v4757_v46, 2  ;;  %v4869_v15 = vsub.s32 %v4865_v22, %v4868_v62 }
 0x4e9   : > { %v4966_v57 = vsel %vm4954_vm1, %v9049_v43, %v4947_v3  ;;  %vm4755_vm5 = vweird.f32 %v8734_v8  ;;  %vm4759_vm6 = vcmp.eq.s32.totalorder %v4757_v46, 0  ;;  %vm4762_vm7 = vcmp.eq.s32.totalorder %v4757_v46, 2 }
 0x4ea   : > { %v4965_v39 = vsel %vm4955_vm3, %v4962_v56, %v4964_v48  ;;  %v4968_v54 = vsel %vm4956_vm2, %v4950_v6, %v4967_v20  ;;  %v4746_v47 = vadd.f32 1.0, %v4745_v52  ;;  %v4753_v42 = vadd.f32 1.0, %v4752_v53 }
 0x4eb   : > { %vm4870_vm8 = vcmp.lt.s32.totalorder %v4869_v15, 0  ;;  %v4871_v35 = vsub.s32 0, %v4869_v15  ;;  %v4938_v37 = vshrl.u32 %v5774_v4, %v4937_v11  ;;  %v4969_v16 = vsel %vm4955_vm3, %v4966_v57, %v4968_v54 }
 0x4ec   : > { %v4972_v25 = vshrl.u32 %v9069_v49, 16  ;;  %v5080_v60 = vand.u32 2139095040, %v9054_v31  ;;  %v4754_v29 = vmul.f32 %v4753_v42, %v4738_v26  ;;  %v4763_v1 = vxor.u32 2147483648, %v4746_v47 }
 0x4ed   : > { %v4872_v10 = vsel %vm4870_vm8, %v4871_v35, %v4869_v15  ;;  %v4973_v38 = vand.u32 65535, %v4969_v16  ;;  %v4974_v63 = vshrl.u32 %v4969_v16, 16  ;;  %v4995_v19 = vand.u32 65535, %v4965_v39 }
 0x4ee   : > { %v4873_v34 = vclz %v4872_v10  ;;  %v4996_v22 = vshrl.u32 %v4965_v39, 16  ;;  %v4760_v23 = vxor.u32 2147483648, %v4754_v29  ;;  %v4861_v6 = vadd.s32 %v9024_v51, %v9019_v32 }
 0x4ef   : > { %v9088_v11 = vsel %vm4954_vm1, %v4938_v37, %v4941_v55  ;;  %v4971_v18 = vand.u32 65535, %v9069_v49  ;;  %v4891_v26 = vsub.s32 4, %v9051_v24  ;;  %v4959_v59 = vsel %vm4957_vm0, %v4947_v3, 2102212464 }
 0x4f0   : > { %v5621_v13 = vadd.s32 4294967294, %v4873_v34  ;;  %v4977_v12 = vmul.u32 %v4973_v38, %v4972_v25  ;;  %v4761_v45 = vsel %vm4759_vm6, %v4746_v47, %v4760_v23  ;;  %v4764_v33 = vsel %vm4762_vm7, %v4763_v1, %v4754_v29 }
 0x4f1   : > { %v4976_v40 = vmul.u32 %v4974_v63, %v4971_v18  ;;  %v5081_v32 = vshrl.u32 %v5080_v60, 23  ;;  %v4765_v51 = vsel %vm4758_vm4, %v4761_v45, %v4764_v33  ;;  %vm4769_vm9 = vcmp.lt.s32.totalorder %v8839_v36, 0 }
 0x4f2   : > { %vm5622_vm10 = vcmp.lt.s32.totalorder %v5621_v13, 0  ;;  %v4997_v55 = vmul.u32 %v4995_v19, %v4971_v18  ;;  %v4998_v30 = vmul.u32 %v4996_v22, %v4971_v18  ;;  %v4766_v44 = vsel %vm4755_vm5, nan, %v4765_v51 }
 0x4f3   : > { %v4876_v50 = vsel %vm5622_vm10, 0, %v5621_v13  ;;  %v4975_v3 = vmul.u32 %v4973_v38, %v4971_v18  ;;  %v4979_v41 = vshll.u32 %v4976_v40, 16  ;;  %v4978_v56 = vmul.u32 %v4974_v63, %v4972_v25  ;;  %5414 = vst [vmem:[%s6179_s20 + $0xd8] sm:$0xff] %v4766_v44 }
 0x4f4   : > { %v4877_v27 = vsub.s32 32, %v4876_v50  ;;  %v4881_v62 = vsub.s32 4294967266, %v4876_v50  ;;  %v4981_v48 = vshll.u32 %v4977_v12, 16  ;;  %v4999_v46 = vmul.u32 %v4995_v19, %v4972_v25 }
 0x4f5   : > { %vm4983_vm11 = vc.u32 %v4975_v3, %v4979_v41  ;;  %v4985_v20 = vadd.s32 %v4979_v41, %v4975_v3  ;;  %v5001_v52 = vshll.u32 %v4998_v30, 16  ;;  %v4878_v53 = vshll.u32 %v4869_v15, %v4876_v50 }
 0x4f6   : > { %v4879_v57 = vshrl.u32 %v4861_v6, %v4877_v27  ;;  %v4882_v39 = vadd.s32 127, %v4881_v62  ;;  %v4984_v54 = vsel %vm4983_vm11, 1, %v5780_v0  ;;  %v4980_v47 = vshrl.u32 %v4976_v40, 16  ;;  %v392_v40 = vpop.f32.mrf.mxu3 }
 0x4f7   : > { %v4986_v8 = vadd.s32 %v4984_v54, %v4978_v56  ;;  %vm4987_vm12 = vc.u32 %v4985_v20, %v4981_v48  ;;  %v5000_v42 = vmul.u32 %v4996_v22, %v4972_v25  ;;  %vm5005_vm13 = vc.u32 %v4997_v55, %v5001_v52 }
 0x4f8   : > { %v4880_v35 = vor.u32 %v4879_v57, %v4878_v53  ;;  %v4883_v37 = vshll.u32 %v4882_v39, 23  ;;  %v4988_v16 = vsel %vm4987_vm12, 1, %v5780_v0  ;;  %v5003_v29 = vshll.u32 %v4999_v46, 16 }
 0x4f9   : > { %v4990_v60 = vadd.s32 %v4988_v16, %v4986_v8  ;;  %v5006_v1 = vsel %vm5005_vm13, 1, %v5780_v0  ;;  %v5007_v10 = vadd.s32 %v5001_v52, %v4997_v55  ;;  %v4960_v15 = vsel %vm4956_vm2, %v9049_v43, %v4959_v59 }
 0x4fa   : > { %v4884_v38 = vor.u32 4788187, %v4883_v37  ;;  %v5008_v34 = vadd.s32 %v5006_v1, %v5000_v42  ;;  %v5626_v63 = vadd.s32 4294967169, %v5081_v32  ;;  %v4892_v25 = vsel %vm4769_vm9, %v4891_v26, %v9051_v24 }
 0x4fb   : > { %v4982_v19 = vshrl.u32 %v4977_v12, 16  ;;  %v4991_v22 = vadd.s32 %v4990_v60, %v4980_v47  ;;  %vm5009_vm14 = vc.u32 %v5007_v10, %v5003_v29  ;;  %v4887_v6 = vcvt.s32.f32 %v4880_v35 }
 0x4fc   : > { %v4885_v23 = vand.u32 2147483647, %v4884_v38  ;;  %v5010_v18 = vsel %vm5009_vm14, 1, %v5780_v0  ;;  %v5087_v13 = vadd.s32 1, %v5626_v63  ;;  %vm9113_vm15 = vcmp.le.f32.partialorder %v4767_v5, 0.7853982 }
 0x4fd   : > { %v5002_v43 = vshrl.u32 %v4998_v30, 16  ;;  %v5012_v59 = vadd.s32 %v5010_v18, %v5008_v34  ;;  %v5077_v33 = vand.u32 2147483647, %v9054_v31  ;;  %v4894_v26 = vsel %vm9113_vm15, 0, %v4892_v25 }
 0x4fe   : > { %v4888_v24 = vmul.f32 %v4887_v6, %v4885_v23  ;;  %v9120_v12 = vadd.s32 %v4991_v22, %v4982_v19  ;;  %vm5088_vm0 = vcmp.gt.s32.totalorder %v5087_v13, 0  ;;  %v4961_v32 = vsel %vm4955_vm3, %v9088_v11, %v4960_v15 }
 0x4ff   : > { %v5004_v5 = vshrl.u32 %v4999_v46, 16  ;;  %v5013_v51 = vadd.s32 %v5012_v59, %v5002_v43  ;;  %v5089_v55 = vsel %vm5088_vm0, %v5087_v13, 0  ;;  %v9125_v30 = vadd.s32 %v5007_v10, %v5003_v29 }
 0x500   : > { %v4889_v44 = vxor.u32 2147483648, %v4888_v24  ;;  %v5091_v50 = vand.u32 31, %v5089_v55  ;;  %v393_v3 = vadd.f32 %v8915_v58, %v392_v40  ;;  %v4911_v41 = vadd.s32 3, %v4894_v26 }
 0x501   : > { %v5014_v27 = vadd.s32 %v5013_v51, %v5004_v5  ;;  %v5015_v56 = vmul.u32 %v9069_v49, %v4961_v32  ;;  %vm5017_vm1 = vc.u32 %v9120_v12, %v9125_v30  ;;  %v5084_v58 = vand.u32 8388607, %v5077_v33 }
 0x502   : > { %v4890_v62 = vsel %vm4769_vm9, %v4889_v44, %v4888_v24  ;;  %v5092_v61 = vsub.s32 32, %v5091_v50  ;;  %v9140_v20 = vshrl.u32 %v5089_v55, 5  ;;  %v5094_v49 = vshll.u32 %v5774_v4, %v5091_v50 }
 0x503   : > { %v9136_v11 = vsel %vm9113_vm15, %v8839_v36, %v4890_v62  ;;  %v5018_v48 = vadd.s32 1, %v5014_v27  ;;  %v5103_v53 = vshll.u32 %v5777_v14, %v5091_v50  ;;  %v5097_v37 = vshll.u32 %v5775_v7, %v5091_v50 }
 0x504   : > { %v4895_v46 = vmul.f32 %v9136_v11, %v9136_v11  ;;  %v5095_v52 = vshrl.u32 %v5775_v7, %v5092_v61  ;;  %v5098_v39 = vshrl.u32 %v5776_v9, %v5092_v61  ;;  %v5101_v54 = vshrl.u32 %v5777_v14, %v5092_v61 }
 0x505   : > { %v5019_v57 = vsel %vm5017_vm1, %v5018_v48, %v5014_v27  ;;  %v5104_v47 = vshrl.u32 %v5778_v17, %v5092_v61  ;;  %v5100_v16 = vshll.u32 %v5776_v9, %v5091_v50  ;;  %v5106_v29 = vshll.u32 %v5778_v17, %v5091_v50 }
 0x506   : > { %v4896_v8 = vmul.f32 -0.001358992, %v4895_v46  ;;  %v4903_v42 = vmul.f32 -0.00019511016, %v4895_v46  ;;  %v5020_v35 = vadd.s32 %v5019_v57, %v5015_v56  ;;  %v5107_v1 = vshrl.u32 %v5779_v21, %v5092_v61 }
 0x507   : > { %v5105_v60 = vor.u32 %v5104_v47, %v5103_v53  ;;  %v4912_v15 = vand.u32 3, %v4911_v41  ;;  %v5096_v63 = vor.u32 %v5095_v52, %v5094_v49  ;;  %v9154_v25 = vor.u32 %v5098_v39, %v5097_v37 }
 0x508   : > { %v4897_v10 = vadd.f32 0.041655596, %v4896_v8  ;;  %v4904_v38 = vadd.f32 0.008332121, %v4903_v42  ;;  %v5021_v34 = vadd.s32 536870912, %v5020_v35  ;;  %v5102_v19 = vor.u32 %v5101_v54, %v5100_v16 }
 0x509   : > { %v5108_v22 = vor.u32 %v5107_v1, %v5106_v29  ;;  %vm5112_vm2 = vcmp.lt.s32.totalorder %v9140_v20, 4  ;;  %v9159_v13 = vmul.f32 30.0, %v393_v3  ;;  %v5085_v45 = vor.u32 8388608, %v5084_v58 }
 0x50a   : > { %v4898_v23 = vmul.f32 %v4897_v10, %v4895_v46  ;;  %v4905_v6 = vmul.f32 %v4904_v38, %v4895_v46  ;;  %v9156_v18 = vshrl.u32 %v5021_v34, 30  ;;  %v5118_v43 = vsel %vm5112_vm2, %v5105_v60, 920167782 }
 0x50b   : > { %vm5109_vm3 = vcmp.lt.s32.totalorder %v9140_v20, 1  ;;  %vm4914_vm4 = vcmp.eq.s32.totalorder %v4912_v15, 0  ;;  %vm5111_vm5 = vcmp.lt.s32.totalorder %v9140_v20, 3  ;;  %v5122_v5 = vsel %vm5112_vm2, %v5108_v22, 1326507024 }
 0x50c   : > { %v4899_v59 = vadd.f32 -0.4999988, %v4898_v23  ;;  %v4906_v40 = vadd.f32 -0.16666654, %v4905_v6  ;;  %v5023_v24 = vshll.u32 %v9156_v18, 30  ;;  %v5117_v26 = vsel %vm5109_vm3, %v5096_v63, %v9154_v25 }
 0x50d   : > { %v5121_v32 = vsel %vm5109_vm3, %v9154_v25, %v5102_v19  ;;  %vm4913_vm6 = vcmp.lt.s32.totalorder %v4912_v15, 2  ;;  %v5119_v50 = vsel %vm5111_vm5, %v5102_v19, %v5118_v43  ;;  %vm4910_vm7 = vweird.f32 %v8839_v36 }
 0x50e   : > { %v4900_v51 = vmul.f32 %v4899_v59, %v4895_v46  ;;  %v4907_v55 = vmul.f32 %v4906_v40, %v4895_v46  ;;  %v5024_v44 = vsub.s32 %v5020_v35, %v5023_v24  ;;  %vm5110_vm8 = vcmp.lt.s32.totalorder %v9140_v20, 2 }
 0x50f   : > { %v5123_v3 = vsel %vm5111_vm5, %v5105_v60, %v5122_v5  ;;  %v9180_v41 = vshll.u32 %v5085_v45, 8  ;;  %v5235_v27 = vand.u32 2139095040, %v9159_v13  ;;  %vm4917_vm10 = vcmp.eq.s32.totalorder %v4912_v15, 2 }
 0x510   : > { %v4901_v62 = vadd.f32 1.0, %v4900_v51  ;;  %v4908_v56 = vadd.f32 1.0, %v4907_v55  ;;  %vm5025_vm9 = vcmp.lt.s32.totalorder %v5024_v44, 0  ;;  %v5026_v48 = vsub.s32 0, %v5024_v44 }
 0x511   : > { %v5093_v58 = vshrl.u32 %v5774_v4, %v5092_v61  ;;  %v5120_v46 = vsel %vm5110_vm8, %v5117_v26, %v5119_v50  ;;  %v5124_v49 = vsel %vm5110_vm8, %v5121_v32, %v5123_v3  ;;  %v5016_v54 = vadd.s32 %v9125_v30, %v9120_v12 }
 0x512   : > { %v4909_v52 = vmul.f32 %v4908_v56, %v9136_v11  ;;  %v4918_v53 = vxor.u32 2147483648, %v4901_v62  ;;  %v5027_v57 = vsel %vm5025_vm9, %v5026_v48, %v5024_v44  ;;  %v5128_v39 = vand.u32 65535, %v5124_v49 }
 0x513   : > { %v5028_v47 = vclz %v5027_v57  ;;  %v5127_v8 = vshrl.u32 %v9180_v41, 16  ;;  %v5129_v42 = vshrl.u32 %v5124_v49, 16  ;;  %v9194_v61 = vsel %vm5109_vm3, %v5093_v58, %v5096_v63 }
 0x514   : > { %v4915_v35 = vxor.u32 2147483648, %v4909_v52  ;;  %v5126_v37 = vand.u32 65535, %v9180_v41  ;;  %v5236_v16 = vshrl.u32 %v5235_v27, 23  ;;  %v5114_v11 = vsel %vm5112_vm2, %v5102_v19, 2102212464 }
 0x515   : > { %v5624_v60 = vadd.s32 4294967294, %v5028_v47  ;;  %v5132_v29 = vmul.u32 %v5128_v39, %v5127_v8  ;;  %v5151_v1 = vshrl.u32 %v5120_v46, 16  ;;  %v4919_v30 = vsel %vm4917_vm10, %v4918_v53, %v4909_v52 }
 0x516   : > { %v4916_v12 = vsel %vm4914_vm4, %v4901_v62, %v4915_v35  ;;  %v5131_v10 = vmul.u32 %v5129_v42, %v5126_v37  ;;  %v5150_v38 = vand.u32 65535, %v5120_v46  ;;  %v5046_v63 = vsub.s32 4, %v9156_v18 }
 0x517   : > { %v4920_v34 = vsel %vm4913_vm6, %v4916_v12, %v4919_v30  ;;  %vm5625_vm11 = vcmp.lt.s32.totalorder %v5624_v60, 0  ;;  %v5130_v22 = vmul.u32 %v5128_v39, %v5126_v37  ;;  %v5133_v19 = vmul.u32 %v5129_v42, %v5127_v8 }
 0x518   : > { %v4921_v23 = vsel %vm4910_vm7, nan, %v4920_v34  ;;  %v5031_v6 = vsel %vm5625_vm11, 0, %v5624_v60  ;;  %v5134_v45 = vshll.u32 %v5131_v10, 16  ;;  %v5136_v40 = vshll.u32 %v5132_v29, 16 }
 0x519   : > { %v5032_v43 = vsub.s32 32, %v5031_v6  ;;  %v5036_v59 = vsub.s32 4294967266, %v5031_v6  ;;  %v5153_v24 = vmul.u32 %v5151_v1, %v5126_v37  ;;  %5415 = vst [vmem:[%s6179_s20 + $0xe0] sm:$0xff] %v4921_v23  ;;  %v5033_v26 = vshll.u32 %v5024_v44, %v5031_v6 }
 0x51a   : > { %vm5138_vm12 = vc.u32 %v5130_v22, %v5134_v45  ;;  %v5140_v32 = vadd.s32 %v5134_v45, %v5130_v22  ;;  %v5154_v15 = vmul.u32 %v5150_v38, %v5127_v8  ;;  %v5135_v3 = vshrl.u32 %v5131_v10, 16 }
 0x51b   : > { %v5034_v5 = vshrl.u32 %v5016_v54, %v5032_v43  ;;  %v5037_v51 = vadd.s32 127, %v5036_v59  ;;  %v5139_v55 = vsel %vm5138_vm12, 1, %v5780_v0  ;;  %v5156_v50 = vshll.u32 %v5153_v24, 16 }
 0x51c   : > { %v5141_v36 = vadd.s32 %v5139_v55, %v5133_v19  ;;  %vm5142_vm13 = vc.u32 %v5140_v32, %v5136_v40  ;;  %v5152_v27 = vmul.u32 %v5150_v38, %v5126_v37  ;;  %v5155_v58 = vmul.u32 %v5151_v1, %v5127_v8 }
 0x51d   : > { %v5035_v62 = vor.u32 %v5034_v5, %v5033_v26  ;;  %v5038_v56 = vshll.u32 %v5037_v51, 23  ;;  %v5143_v48 = vsel %vm5142_vm13, 1, %v5780_v0  ;;  %v5158_v49 = vshll.u32 %v5154_v15, 16 }
 0x51e   : > { %v5145_v46 = vadd.s32 %v5143_v48, %v5141_v36  ;;  %vm5160_vm14 = vc.u32 %v5152_v27, %v5156_v50  ;;  %v5162_v44 = vadd.s32 %v5156_v50, %v5152_v27  ;;  %v5115_v53 = vsel %vm5111_vm5, %v9154_v25, %v5114_v11 }
 0x51f   : > { %v5039_v52 = vor.u32 4788187, %v5038_v56  ;;  %v5161_v57 = vsel %vm5160_vm14, 1, %v5780_v0  ;;  %v5629_v39 = vadd.s32 4294967169, %v5236_v16  ;;  %v5137_v54 = vshrl.u32 %v5132_v29, 16 }
 0x520   : > { %v5146_v47 = vadd.s32 %v5145_v46, %v5135_v3  ;;  %v5163_v42 = vadd.s32 %v5161_v57, %v5155_v58  ;;  %vm5164_vm15 = vc.u32 %v5162_v44, %v5158_v49  ;;  %v5042_v37 = vcvt.s32.f32 %v5035_v62 }
 0x521   : > { %v5040_v35 = vand.u32 2147483647, %v5039_v52  ;;  %v5165_v8 = vsel %vm5164_vm15, 1, %v5780_v0  ;;  %v5242_v60 = vadd.s32 1, %v5629_v39  ;;  %vm4924_vm0 = vcmp.lt.s32.totalorder %v8949_v2, 0 }
 0x522   : > { %v5157_v1 = vshrl.u32 %v5153_v24, 16  ;;  %v5167_v12 = vadd.s32 %v5165_v8, %v5163_v42  ;;  %v5232_v30 = vand.u32 2147483647, %v9159_v13  ;;  %v5047_v25 = vsel %vm4924_vm0, %v5046_v63, %v9156_v18 }
 0x523   : > { %v5043_v10 = vmul.f32 %v5042_v37, %v5040_v35  ;;  %v9218_v16 = vadd.s32 %v5146_v47, %v5137_v54  ;;  %vm5243_vm1 = vcmp.gt.s32.totalorder %v5242_v60, 0  ;;  %v5116_v11 = vsel %vm5110_vm8, %v9194_v61, %v5115_v53 }
 0x524   : > { %v5159_v29 = vshrl.u32 %v5154_v15, 16  ;;  %v5168_v38 = vadd.s32 %v5167_v12, %v5157_v1  ;;  %v5244_v34 = vsel %vm5243_vm1, %v5242_v60, 0  ;;  %vm9225_vm2 = vcmp.le.f32.partialorder %v4922_v28, 0.7853982 }
 0x525   : > { %v5044_v23 = vxor.u32 2147483648, %v5043_v10  ;;  %v9229_v6 = vadd.s32 %v5162_v44, %v5158_v49  ;;  %v5246_v18 = vand.u32 31, %v5244_v34  ;;  %v5049_v63 = vsel %vm9225_vm2, 0, %v5047_v25 }
 0x526   : > { %v5169_v19 = vadd.s32 %v5168_v38, %v5159_v29  ;;  %v5239_v20 = vand.u32 8388607, %v5232_v30  ;;  %v5170_v45 = vmul.u32 %v9180_v41, %v5116_v11  ;;  %v9245_v40 = vshrl.u32 %v5244_v34, 5 }
 0x527   : > { %v5045_v61 = vsel %vm4924_vm0, %v5044_v23, %v5043_v10  ;;  %vm5172_vm3 = vc.u32 %v9218_v16, %v9229_v6  ;;  %v9240_v28 = vsub.s32 32, %v5246_v18  ;;  %v5249_v24 = vshll.u32 %v5774_v4, %v5246_v18 }
 0x528   : > { %v5048_v43 = vsel %vm9225_vm2, %v8949_v2, %v5045_v61  ;;  %v5173_v59 = vadd.s32 1, %v5169_v19  ;;  %v5252_v41 = vshll.u32 %v5775_v7, %v5246_v18  ;;  %v5258_v55 = vshll.u32 %v5777_v14, %v5246_v18 }
 0x529   : > { %v5050_v26 = vmul.f32 %v5048_v43, %v5048_v43  ;;  %v5250_v32 = vshrl.u32 %v5775_v7, %v9240_v28  ;;  %v5253_v15 = vshrl.u32 %v5776_v9, %v9240_v28  ;;  %v5256_v51 = vshrl.u32 %v5777_v14, %v9240_v28 }
 0x52a   : > { %v5174_v5 = vsel %vm5172_vm3, %v5173_v59, %v5169_v19  ;;  %v5259_v50 = vshrl.u32 %v5778_v17, %v9240_v28  ;;  %v5255_v62 = vshll.u32 %v5776_v9, %v5246_v18  ;;  %v5261_v48 = vshll.u32 %v5778_v17, %v5246_v18 }
 0x52b   : > { %v5051_v3 = vmul.f32 -0.001358992, %v5050_v26  ;;  %v5058_v36 = vmul.f32 -0.00019511016, %v5050_v26  ;;  %v5175_v27 = vadd.s32 %v5174_v5, %v5170_v45  ;;  %v9259_v56 = vor.u32 %v5250_v32, %v5249_v24 }
 0x52c   : > { %v5260_v7 = vor.u32 %v5259_v50, %v5258_v55  ;;  %v5262_v58 = vshrl.u32 %v5779_v21, %v9240_v28  ;;  %v9264_v14 = vor.u32 %v5253_v15, %v5252_v41  ;;  %v5240_v52 = vor.u32 8388608, %v5239_v20 }
 0x52d   : > { %v5052_v46 = vadd.f32 0.041655596, %v5051_v3  ;;  %v5059_v49 = vadd.f32 0.008332121, %v5058_v36  ;;  %v5176_v44 = vadd.s32 536870912, %v5175_v27  ;;  %v9266_v53 = vor.u32 %v5256_v51, %v5255_v62 }
 0x52e   : > { %v5263_v57 = vor.u32 %v5262_v58, %v5261_v48  ;;  %vm5267_vm4 = vcmp.lt.s32.totalorder %v9245_v40, 4  ;;  %v5066_v47 = vadd.s32 3, %v5049_v63  ;;  %vm5264_vm5 = vcmp.lt.s32.totalorder %v9245_v40, 1 }
 0x52f   : > { %v5053_v39 = vmul.f32 %v5052_v46, %v5050_v26  ;;  %v5060_v54 = vmul.f32 %v5059_v49, %v5050_v26  ;;  %v9268_v9 = vshrl.u32 %v5176_v44, 30  ;;  %vm5266_vm6 = vcmp.lt.s32.totalorder %v9245_v40, 3 }
 0x530   : > { %v5273_v17 = vsel %vm5267_vm4, %v5260_v7, 920167782  ;;  %v5272_v37 = vsel %vm5264_vm5, %v9259_v56, %v9264_v14  ;;  %vm5265_vm7 = vcmp.lt.s32.totalorder %v9245_v40, 2  ;;  %v5277_v60 = vsel %vm5267_vm4, %v5263_v57, 1326507024 }
 0x531   : > { %v5054_v21 = vadd.f32 -0.4999988, %v5053_v39  ;;  %v5061_v42 = vadd.f32 -0.16666654, %v5060_v54  ;;  %v5178_v35 = vshll.u32 %v9268_v9, 30  ;;  %v5274_v8 = vsel %vm5266_vm6, %v9266_v53, %v5273_v17 }
 0x532   : > { %v9286_v1 = vshll.u32 %v5240_v52, 8  ;;  %v5276_v11 = vsel %vm5264_vm5, %v9264_v14, %v9266_v53  ;;  %v5067_v29 = vand.u32 3, %v5066_v47  ;;  %v5275_v38 = vsel %vm5265_vm7, %v5272_v37, %v5274_v8 }
 0x533   : > { %v5055_v12 = vmul.f32 %v5054_v21, %v5050_v26  ;;  %v5062_v10 = vmul.f32 %v5061_v42, %v5050_v26  ;;  %v5179_v25 = vsub.s32 %v5175_v27, %v5178_v35  ;;  %v5278_v34 = vsel %vm5266_vm6, %v5260_v7, %v5277_v60 }
 0x534   : > { %v5279_v63 = vsel %vm5265_vm7, %v5276_v11, %v5278_v34  ;;  %v5282_v19 = vshrl.u32 %v9286_v1, 16  ;;  %v5305_v32 = vand.u32 65535, %v5275_v38  ;;  %v5306_v41 = vshrl.u32 %v5275_v38, 16 }
 0x535   : > { %v5056_v22 = vadd.f32 1.0, %v5055_v12  ;;  %v5063_v23 = vadd.f32 1.0, %v5062_v10  ;;  %vm5180_vm8 = vcmp.lt.s32.totalorder %v5179_v25, 0  ;;  %v5181_v18 = vsub.s32 0, %v5179_v25 }
 0x536   : > { %v5283_v59 = vand.u32 65535, %v5279_v63  ;;  %v5284_v26 = vshrl.u32 %v5279_v63, 16  ;;  %vm5065_vm9 = vweird.f32 %v8949_v2  ;;  %vm5068_vm10 = vcmp.lt.s32.totalorder %v5067_v29, 2 }
 0x537   : > { %v5064_v20 = vmul.f32 %v5063_v23, %v5048_v43  ;;  %v5073_v61 = vxor.u32 2147483648, %v5056_v22  ;;  %v5182_v45 = vsel %vm5180_vm8, %v5181_v18, %v5179_v25  ;;  %v5281_v5 = vand.u32 65535, %v9286_v1 }
 0x538   : > { %v5183_v24 = vclz %v5182_v45  ;;  %vm5069_vm11 = vcmp.eq.s32.totalorder %v5067_v29, 0  ;;  %vm5072_vm12 = vcmp.eq.s32.totalorder %v5067_v29, 2  ;;  %v5287_v55 = vmul.u32 %v5283_v59, %v5282_v19 }
 0x539   : > { %v5070_v15 = vxor.u32 2147483648, %v5064_v20  ;;  %v5074_v43 = vsel %vm5072_vm12, %v5073_v61, %v5064_v20  ;;  %v5171_v3 = vadd.s32 %v9229_v6, %v9218_v16  ;;  %v5286_v36 = vmul.u32 %v5284_v26, %v5281_v5 }
 0x53a   : > { %v5627_v51 = vadd.s32 4294967294, %v5183_v24  ;;  %v5307_v62 = vmul.u32 %v5305_v32, %v5281_v5  ;;  %v5308_v7 = vmul.u32 %v5306_v41, %v5281_v5  ;;  %v5285_v46 = vmul.u32 %v5283_v59, %v5281_v5 }
 0x53b   : > { %v5071_v50 = vsel %vm5069_vm11, %v5056_v22, %v5070_v15  ;;  %v5289_v49 = vshll.u32 %v5286_v36, 16  ;;  %v5288_v57 = vmul.u32 %v5284_v26, %v5282_v19  ;;  %v5291_v39 = vshll.u32 %v5287_v55, 16 }
 0x53c   : > { %v5075_v27 = vsel %vm5068_vm10, %v5071_v50, %v5074_v43  ;;  %vm5628_vm13 = vcmp.lt.s32.totalorder %v5627_v51, 0  ;;  %v5309_v47 = vmul.u32 %v5305_v32, %v5282_v19  ;;  %v5311_v16 = vshll.u32 %v5308_v7, 16 }
 0x53d   : > { %v5076_v48 = vsel %vm5065_vm9, nan, %v5075_v27  ;;  %v5186_v58 = vsel %vm5628_vm13, 0, %v5627_v51  ;;  %vm5293_vm14 = vc.u32 %v5285_v46, %v5289_v49  ;;  %v5295_v54 = vadd.s32 %v5289_v49, %v5285_v46 }
 0x53e   : > { %v5187_v44 = vsub.s32 32, %v5186_v58  ;;  %v5191_v52 = vsub.s32 4294967266, %v5186_v58  ;;  %5416 = vst [vmem:[%s6179_s20 + $0xe8] sm:$0xff] %v5076_v48  ;;  %v5188_v6 = vshll.u32 %v5179_v25, %v5186_v58  ;;  %v5294_v42 = vsel %vm5293_vm14, 1, %v5780_v0 }
 0x53f   : > { %v5290_v35 = vshrl.u32 %v5286_v36, 16  ;;  %v5296_v2 = vadd.s32 %v5294_v42, %v5288_v57  ;;  %vm5297_vm15 = vc.u32 %v5295_v54, %v5291_v39  ;;  %v5310_v37 = vmul.u32 %v5306_v41, %v5282_v19 }
 0x540   : > { %v5189_v17 = vshrl.u32 %v5171_v3, %v5187_v44  ;;  %v5192_v21 = vadd.s32 127, %v5191_v52  ;;  %v5298_v12 = vsel %vm5297_vm15, 1, %v5780_v0  ;;  %vm5315_vm0 = vc.u32 %v5307_v62, %v5311_v16 }
 0x541   : > { %v5300_v10 = vadd.s32 %v5298_v12, %v5296_v2  ;;  %v5313_v11 = vshll.u32 %v5309_v47, 16  ;;  %v5316_v29 = vsel %vm5315_vm0, 1, %v5780_v0  ;;  %v5317_v38 = vadd.s32 %v5311_v16, %v5307_v62 }
 0x542   : > { %v5190_v8 = vor.u32 %v5189_v17, %v5188_v6  ;;  %v5193_v60 = vshll.u32 %v5192_v21, 23  ;;  %v5318_v25 = vadd.s32 %v5316_v29, %v5310_v37  ;;  %v5248_v22 = vshrl.u32 %v5774_v4, %v9240_v28 }
 0x543   : > { %v5269_v23 = vsel %vm5267_vm4, %v9266_v53, 2102212464  ;;  %v5301_v18 = vadd.s32 %v5300_v10, %v5290_v35  ;;  %vm5319_vm1 = vc.u32 %v5317_v38, %v5313_v11  ;;  %v5292_v20 = vshrl.u32 %v5287_v55, 16 }
 0x544   : > { %v5194_v34 = vor.u32 4788187, %v5193_v60  ;;  %v5197_v19 = vcvt.s32.f32 %v5190_v8  ;;  %v5320_v61 = vsel %vm5319_vm1, 1, %v5780_v0  ;;  %v5312_v45 = vshrl.u32 %v5308_v7, 16 }
 0x545   : > { %v5322_v59 = vadd.s32 %v5320_v61, %v5318_v25  ;;  %v5268_v26 = vsel %vm5264_vm5, %v5248_v22, %v9259_v56  ;;  %v5270_v4 = vsel %vm5266_vm6, %v9264_v14, %v5269_v23  ;;  %v5302_v28 = vadd.s32 %v5301_v18, %v5292_v20 }
 0x546   : > { %v5195_v63 = vand.u32 2147483647, %v5194_v34  ;;  %v5314_v53 = vshrl.u32 %v5309_v47, 16  ;;  %v5321_v15 = vadd.s32 %v5317_v38, %v5313_v11  ;;  %vm5079_vm2 = vcmp.lt.s32.totalorder %v9054_v31, 0 }
 0x547   : > { %v5323_v32 = vadd.s32 %v5322_v59, %v5312_v45  ;;  %v5271_v0 = vsel %vm5265_vm7, %v5268_v26, %v5270_v4  ;;  %vm9326_vm3 = vcmp.le.f32.partialorder %v5077_v33, 0.7853982  ;;  %v5201_v14 = vsub.s32 4, %v9268_v9 }
 0x548   : > { %v5198_v24 = vmul.f32 %v5197_v19, %v5195_v63  ;;  %vm5327_vm4 = vc.u32 %v5302_v28, %v5321_v15  ;;  %v5325_v40 = vmul.u32 %v9286_v1, %v5271_v0  ;;  %vm5220_vm9 = vweird.f32 %v9054_v31 }
 0x549   : > { %v5324_v5 = vadd.s32 %v5323_v32, %v5314_v53  ;;  %v5202_v33 = vsel %vm5079_vm2, %v5201_v14, %v9268_v9  ;;  %v5326_v25 = vadd.s32 %v5321_v15, %v5302_v28  ;;  %vm5234_vm11 = vcmp.lt.s32.totalorder %v9159_v13, 0 }
 0x54a   : > { %v5199_v41 = vxor.u32 2147483648, %v5198_v24  ;;  %v5204_v46 = vsel %vm9326_vm3, 0, %v5202_v33  ;;  %vm5233_vm12 = vcmp.le.f32.partialorder %v5232_v30, 0.7853982  ;;  %vm5375_vm0 = vweird.f32 %v9159_v13 }
 0x54b   : > { %v5328_v50 = vadd.s32 1, %v5324_v5  ;;  %v5221_v47 = vadd.s32 3, %v5204_v46 }
 0x54c   : > { %v5200_v56 = vsel %vm5079_vm2, %v5199_v41, %v5198_v24 }
 0x54d   : > { %v5203_v55 = vsel %vm9326_vm3, %v9054_v31, %v5200_v56  ;;  %v5329_v3 = vsel %vm5327_vm4, %v5328_v50, %v5324_v5  ;;  %v5222_v42 = vand.u32 3, %v5221_v47 }
 0x54e   : > { %v5205_v43 = vmul.f32 %v5203_v55, %v5203_v55  ;;  %v5330_v62 = vadd.s32 %v5329_v3, %v5325_v40 }
 0x54f   : > { %vm5224_vm6 = vcmp.eq.s32.totalorder %v5222_v42, 0  ;;  %vm5227_vm7 = vcmp.eq.s32.totalorder %v5222_v42, 2  ;;  %vm5223_vm8 = vcmp.lt.s32.totalorder %v5222_v42, 2 }
 0x550   : > { %v5206_v36 = vmul.f32 -0.001358992, %v5205_v43  ;;  %v5213_v27 = vmul.f32 -0.00019511016, %v5205_v43  ;;  %v5331_v58 = vadd.s32 536870912, %v5330_v62 }
 0x552   : > { %v5207_v7 = vadd.f32 0.041655596, %v5206_v36  ;;  %v5214_v48 = vadd.f32 0.008332121, %v5213_v27  ;;  %v5332_v52 = vshrl.u32 %v5331_v58, 30 }
 0x554   : > { %v5208_v49 = vmul.f32 %v5207_v7, %v5205_v43  ;;  %v5215_v44 = vmul.f32 %v5214_v48, %v5205_v43  ;;  %v5333_v54 = vshll.u32 %v5332_v52, 30  ;;  %v5356_v28 = vsub.s32 4, %v5332_v52 }
 0x556   : > { %v5209_v57 = vadd.f32 -0.4999988, %v5208_v49  ;;  %v5216_v39 = vadd.f32 -0.16666654, %v5215_v44  ;;  %v5334_v6 = vsub.s32 %v5330_v62, %v5333_v54  ;;  %v5357_v0 = vsel %vm5234_vm11, %v5356_v28, %v5332_v52 }
 0x557   : > { %v5359_v56 = vsel %vm5233_vm12, 0, %v5357_v0 }
 0x558   : > { %v5210_v1 = vmul.f32 %v5209_v57, %v5205_v43  ;;  %v5217_v16 = vmul.f32 %v5216_v39, %v5205_v43  ;;  %vm5335_vm5 = vcmp.lt.s32.totalorder %v5334_v6, 0  ;;  %v5336_v9 = vsub.s32 0, %v5334_v6 }
 0x559   : > { %v5376_v40 = vadd.s32 3, %v5359_v56 }
 0x55a   : > { %v5211_v17 = vadd.f32 1.0, %v5210_v1  ;;  %v5218_v21 = vadd.f32 1.0, %v5217_v16  ;;  %v5337_v37 = vsel %vm5335_vm5, %v5336_v9, %v5334_v6 }
 0x55b   : > { %v5338_v8 = vclz %v5337_v37  ;;  %v5377_v62 = vand.u32 3, %v5376_v40 }
 0x55c   : > { %v5219_v35 = vmul.f32 %v5218_v21, %v5203_v55  ;;  %v5228_v2 = vxor.u32 2147483648, %v5211_v17 }
 0x55d   : > { %v5630_v12 = vadd.s32 4294967294, %v5338_v8  ;;  %vm5379_vm13 = vcmp.eq.s32.totalorder %v5377_v62, 0  ;;  %vm5382_vm14 = vcmp.eq.s32.totalorder %v5377_v62, 2  ;;  %vm5378_vm15 = vcmp.lt.s32.totalorder %v5377_v62, 2 }
 0x55e   : > { %v5225_v60 = vxor.u32 2147483648, %v5219_v35  ;;  %v5229_v11 = vsel %vm5227_vm7, %v5228_v2, %v5219_v35 }
 0x55f   : > { %vm5631_vm10 = vcmp.lt.s32.totalorder %v5630_v12, 0 }
 0x560   : > { %v5226_v10 = vsel %vm5224_vm6, %v5211_v17, %v5225_v60  ;;  %v5341_v34 = vsel %vm5631_vm10, 0, %v5630_v12 }
 0x561   : > { %v5230_v29 = vsel %vm5223_vm8, %v5226_v10, %v5229_v11  ;;  %v5342_v22 = vsub.s32 32, %v5341_v34  ;;  %v5346_v23 = vsub.s32 4294967266, %v5341_v34  ;;  %v5343_v18 = vshll.u32 %v5334_v6, %v5341_v34 }
 0x562   : > { %v5231_v38 = vsel %vm5220_vm9, nan, %v5230_v29 }
 0x563   : > { %5417 = vst [vmem:[%s6179_s20 + $0xf0] sm:$0xff] %v5231_v38  ;;  %v5344_v63 = vshrl.u32 %v5326_v25, %v5342_v22  ;;  %v5347_v19 = vadd.s32 127, %v5346_v23 }
 0x565   : > { %v5345_v20 = vor.u32 %v5344_v63, %v5343_v18  ;;  %v5348_v61 = vshll.u32 %v5347_v19, 23 }
 0x567   : > { %v5349_v45 = vor.u32 4788187, %v5348_v61  ;;  %v5352_v24 = vcvt.s32.f32 %v5345_v20 }
 0x569   : > { %v5350_v59 = vand.u32 2147483647, %v5349_v45 }
 0x56b   : > { %v5353_v26 = vmul.f32 %v5352_v24, %v5350_v59 }
 0x56d   : > { %v5354_v4 = vxor.u32 2147483648, %v5353_v26 }
 0x56f   : > { %v5355_v31 = vsel %vm5234_vm11, %v5354_v4, %v5353_v26 }
 0x570   : > { %v5358_v53 = vsel %vm5233_vm12, %v9159_v13, %v5355_v31 }
 0x571   : > { %v5360_v32 = vmul.f32 %v5358_v53, %v5358_v53 }
 0x573   : > { %v5361_v41 = vmul.f32 -0.001358992, %v5360_v32  ;;  %v5368_v15 = vmul.f32 -0.00019511016, %v5360_v32 }
 0x575   : > { %v5362_v5 = vadd.f32 0.041655596, %v5361_v41  ;;  %v5369_v51 = vadd.f32 0.008332121, %v5368_v15 }
 0x577   : > { %v5363_v14 = vmul.f32 %v5362_v5, %v5360_v32  ;;  %v5370_v55 = vmul.f32 %v5369_v51, %v5360_v32 }
 0x579   : > { %v5364_v50 = vadd.f32 -0.4999988, %v5363_v14  ;;  %v5371_v43 = vadd.f32 -0.16666654, %v5370_v55 }
 0x57b   : > { %v5365_v30 = vmul.f32 %v5364_v50, %v5360_v32  ;;  %v5372_v3 = vmul.f32 %v5371_v43, %v5360_v32 }
 0x57d   : > { %v5366_v36 = vadd.f32 1.0, %v5365_v30  ;;  %v5373_v27 = vadd.f32 1.0, %v5372_v3 }
 0x57f   : > { %v5374_v33 = vmul.f32 %v5373_v27, %v5358_v53  ;;  %v5383_v7 = vxor.u32 2147483648, %v5366_v36 }
 0x581   : > { %v5380_v48 = vxor.u32 2147483648, %v5374_v33  ;;  %v5384_v46 = vsel %vm5382_vm14, %v5383_v7, %v5374_v33 }
 0x583   : > { %v5381_v58 = vsel %vm5379_vm13, %v5366_v36, %v5380_v48 }
 0x584   : > { %v5385_v49 = vsel %vm5378_vm15, %v5381_v58, %v5384_v46 }
 0x585   : > { %v5386_v44 = vsel %vm5375_vm0, nan, %v5385_v49 }
 0x586   : > { %5418 = vst [vmem:[%s6179_s20 + $0xf8] sm:$0xff] %v5386_v44 }
 0x587   : > { %5737 = shalt.err (!%p5734_p3)
}
 0x588   : > { %s5781_s17 = smov 128   ;;  %s5782_s20 = smov 8  }
 0x589   : > { %5654 = dma.vmem_to_hbm [thread:$0]  (%p5841_p5), %s5433_s26, 4096, %s5435_s27, %s5420_s16, %s5781_s17, %s5781_s17, %s5782_s20  }
 0x58a PF: > { %p5660_p4 = scmp.ge.s32.totalorder %s5772_s15, 2  ;;  %s5449_s8 = sand.u32 1, %s5760_s12  }
 0x58b   : > { %s5450_s9 = scalar_lea.sflag [#allocation3], %s5449_s8 }
 0x58c   : > { %p5657_p7 = pnand %p5660_p4, %p5845_p6 }
 0x58e   : > { %p5658_p8 = pneg %p5657_p7 }
 0x590   : > { %5755 = dma.done.wait (%p5658_p8), %s5450_s9, 4096  }
 0x591   : > { %5757 = vsyncadd (%p5658_p8), %s5450_s9, 4294963200  ;;  %p13_p9 = scmp.ge.s32.totalorder %s5828_s18, 6   ;;  %s9448_s12 = smov %s5764_s13 }
 0x592   : > { %s9449_s13 = smov %s5768_s14  ;;  %s9450_s14 = smov %s5839_s21 }
 0x593   : > { %s9451_s15 = smov %s5828_s18  ;;  %15 = sbr.rel (!%p13_p9) target bundleno = 3 (0x3), region = 67 }
 0x598   :  { %5456 = vsyncpa [#allocation3], 1 }
 0x599   :  { %5458 = vsyncpa [#allocation3 + $0x1], 1 }

</bundles_post_ra>
